<compile_context>
chip_gen: v7x
topology: tpu7x:2x2x1
jax: 0.10.0
libtpu: 0.0.40
codegen_flags: <defaults>
</compile_context>

<pallas_src>
import jax
import jax.numpy as jnp
from jax import lax
from jax.experimental import pallas as pl
from jax.experimental.pallas import tpu as pltpu

# ----------------- model hyper-parameters (small, consistent with the module) ---------
D_MODEL = 32
NHEAD = 4
DH = D_MODEL // NHEAD
DIM_FF = 64
NUM_ENC = 2
NUM_DEC = 2
LN_EPS = 1e-5
ATT_SCALE = 1.0 / float(DH) ** 0.5
NEG_BIG = -1e30

# Weight ordering for the fused kernel (encoder layer shared by all NUM_ENC layers,
# decoder layer shared by all NUM_DEC layers, plus the final decoder norm).
PARAM_ORDER = (
    # encoder self-attn (packed q|k), value, output proj, LN1, FFN, LN2
    "e_wqk", "e_bqk", "e_wv", "e_bv", "e_wo", "e_bo",
    "e_ln1_g", "e_ln1_b",
    "e_ffn_w1", "e_ffn_b1", "e_ffn_w2", "e_ffn_b2",
    "e_ln2_g", "e_ln2_b",
    # decoder self-attn (packed q|k), value, output proj, LN1
    "d_wqk", "d_bqk", "d_wv", "d_bv", "d_wo", "d_bo",
    "d_ln1_g", "d_ln1_b",
    # decoder cross-attn (q / k / v / o), LN2
    "d_cwq", "d_cbq", "d_cwk", "d_cbk", "d_cwv", "d_cbv", "d_cwo", "d_cbo",
    "d_ln2_g", "d_ln2_b",
    # decoder FFN, LN3
    "d_ffn_w1", "d_ffn_b1", "d_ffn_w2", "d_ffn_b2",
    "d_ln3_g", "d_ln3_b",
    # final decoder norm
    "dn_g", "dn_b",
)


# ================================ in-kernel helpers ====================================

def _layer_norm(x, g, b):
    # x: [rows, D], g/b: [1, D]
    mean = jnp.mean(x, axis=-1, keepdims=True)
    var = jnp.mean((x - mean) ** 2, axis=-1, keepdims=True)
    return (x - mean) * lax.rsqrt(var + LN_EPS) * g + b


def _ffn(x, w1, b1, w2, b2):
    h = jnp.maximum(jnp.dot(x, w1, preferred_element_type=jnp.float32) + b1, 0.0)
    return jnp.dot(h, w2, preferred_element_type=jnp.float32) + b2


def _mha(q, k, v, wo, bo, bias):
    """Multi-head attention on already-projected q/k/v, flattened over batches.

    q:    [Rq, D]   rows are batch-major (b, token)
    k, v: [Rk, D]
    bias: [Rq, Rk]  additive; -1e30 on cross-batch pairs and padded keys, else 0.
    Returns output projection applied: [Rq, D].
    """
    q = q * ATT_SCALE                         # one scale on q, not per-head on scores
    acc = None
    for h in range(NHEAD):                    # tiny loop, unrolled at trace time
        lo, hi = h * DH, (h + 1) * DH
        # scores over ALL batches at once; cross-batch pairs killed by `bias`
        s = lax.dot_general(q[:, lo:hi], k[:, lo:hi],
                            (((1,), (1,)), ((), ())),
                            preferred_element_type=jnp.float32) + bias      # [Rq, Rk]
        m = jnp.max(s, axis=-1, keepdims=True)
        p = jnp.exp(s - m)
        denom = jnp.sum(p, axis=-1, keepdims=True)
        attn = p * pl.reciprocal(denom, approx=True)          # EUP, not VPU divide
        oh = jnp.dot(attn, v[:, lo:hi], preferred_element_type=jnp.float32)  # [Rq, DH]
        # Fold the output projection per head (avoids a lane-dim concat):
        ph = jnp.dot(oh, wo[lo:hi, :], preferred_element_type=jnp.float32)   # [Rq, D]
        acc = ph if acc is None else acc + ph
    return acc + bo


# ================================ fused forward kernel =================================

def _transformer_kernel(src_ref, pos_ref, qry_ref,
                        enc_bias_ref, self_bias_ref, cross_bias_ref, *refs):
    n_w = len(PARAM_ORDER)
    w = {name: r[...] for name, r in zip(PARAM_ORDER, refs[:n_w])}
    hs_ref, mem_ref = refs[n_w], refs[n_w + 1]

    src = src_ref[...]              # [B*HW, D]  rows are (b, hw)
    pos = pos_ref[...]              # [B*HW, D]
    qry = qry_ref[...]              # [B*N,  D]  rows are (b, n)
    enc_bias = enc_bias_ref[...]    # [B*HW, B*HW]
    self_bias = self_bias_ref[...]  # [B*N,  B*N ]
    cross_bias = cross_bias_ref[...]  # [B*N, B*HW]

    nq = qry.shape[0]               # B*N (static)

    # ------------------------------- encoder (shared params) --------------------------
    mem = src
    for _ in range(NUM_ENC):
        qk_in = mem + pos
        qk = jnp.dot(qk_in, w["e_wqk"], preferred_element_type=jnp.float32) + w["e_bqk"]
        v = jnp.dot(mem, w["e_wv"], preferred_element_type=jnp.float32) + w["e_bv"]
        a = _mha(qk[:, :D_MODEL], qk[:, D_MODEL:], v, w["e_wo"], w["e_bo"], enc_bias)
        mem = _layer_norm(mem + a, w["e_ln1_g"], w["e_ln1_b"])
        f = _ffn(mem, w["e_ffn_w1"], w["e_ffn_b1"], w["e_ffn_w2"], w["e_ffn_b2"])
        mem = _layer_norm(mem + f, w["e_ln2_g"], w["e_ln2_b"])
    mem_ref[...] = mem                                        # lane-dense [B*HW, D]

    # ------------------------------- decoder (shared params) --------------------------
    # Cross-attention K/V depend only on memory/pos and the shared weights -> hoist.
    k_c = jnp.dot(mem + pos, w["d_cwk"], preferred_element_type=jnp.float32) + w["d_cbk"]
    v_c = jnp.dot(mem, w["d_cwv"], preferred_element_type=jnp.float32) + w["d_cbv"]

    tgt = jnp.zeros_like(qry)
    for li in range(NUM_DEC):
        # self-attention (no key padding mask; block-diagonal batch bias only)
        qk_in = tgt + qry
        qk = jnp.dot(qk_in, w["d_wqk"], preferred_element_type=jnp.float32) + w["d_bqk"]
        v = jnp.dot(tgt, w["d_wv"], preferred_element_type=jnp.float32) + w["d_bv"]
        a = _mha(qk[:, :D_MODEL], qk[:, D_MODEL:], v, w["d_wo"], w["d_bo"], self_bias)
        tgt = _layer_norm(tgt + a, w["d_ln1_g"], w["d_ln1_b"])

        # cross-attention over encoder memory (key padding mask folded into cross_bias)
        q_c = (jnp.dot(tgt + qry, w["d_cwq"], preferred_element_type=jnp.float32)
               + w["d_cbq"])
        a = _mha(q_c, k_c, v_c, w["d_cwo"], w["d_cbo"], cross_bias)
        tgt = _layer_norm(tgt + a, w["d_ln2_g"], w["d_ln2_b"])

        # feed-forward
        f = _ffn(tgt, w["d_ffn_w1"], w["d_ffn_b1"], w["d_ffn_w2"], w["d_ffn_b2"])
        tgt = _layer_norm(tgt + f, w["d_ln3_g"], w["d_ln3_b"])

        # per-layer output norm; contiguous store into the stacked output
        normed = _layer_norm(tgt, w["dn_g"], w["dn_b"])       # [B*N, D]
        hs_ref[li * nq:(li + 1) * nq, :] = normed


# ================================ wrapper ==============================================

def transformer_forward(params, src, query_embed, pos_embed, padding_mask=None):
    HW, B, D = src.shape
    N = query_embed.shape[0]
    assert D == D_MODEL

    # Batch-major 2-D layout for the kernel (one tiny XLA transpose at the boundary).
    src_bf = src.transpose(1, 0, 2).reshape(B * HW, D)
    pos_bf = pos_embed.transpose(1, 0, 2).reshape(B * HW, D)
    qry_bf = query_embed.transpose(1, 0, 2).reshape(B * N, D)

    # Additive attention biases: block-diagonal across batches; -1e30 on padded keys.
    if padding_mask is None:
        pad_flat = jnp.zeros((B * HW,), jnp.bool_)
    else:
        pad_flat = padding_mask.reshape(B * HW)               # rows are (b, hw)
    batch_hw = jnp.repeat(jnp.arange(B, dtype=jnp.int32), HW)  # [B*HW]
    batch_n = jnp.repeat(jnp.arange(B, dtype=jnp.int32), N)    # [B*N]

    neg = jnp.float32(NEG_BIG)
    zero = jnp.float32(0.0)
    enc_ok = (batch_hw[:, None] == batch_hw[None, :]) & (~pad_flat)[None, :]
    self_ok = batch_n[:, None] == batch_n[None, :]
    cross_ok = (batch_n[:, None] == batch_hw[None, :]) & (~pad_flat)[None, :]
    enc_bias = jnp.where(enc_ok, zero, neg)                    # [B*HW, B*HW]
    self_bias = jnp.where(self_ok, zero, neg)                  # [B*N,  B*N ]
    cross_bias = jnp.where(cross_ok, zero, neg)                # [B*N,  B*HW]

    flat_w = [params[name] for name in PARAM_ORDER]
    inputs = [src_bf, pos_bf, qry_bf, enc_bias, self_bias, cross_bias] + flat_w

    def _full2d(shape):
        return pl.BlockSpec(shape, lambda i: (0, 0))

    out_shapes = (jax.ShapeDtypeStruct((NUM_DEC * B * N, D), jnp.float32),
                  jax.ShapeDtypeStruct((B * HW, D), jnp.float32))
    out_specs = (_full2d((NUM_DEC * B * N, D)), _full2d((B * HW, D)))

    hs_flat, mem_bf = pl.pallas_call(
        _transformer_kernel,
        out_shape=out_shapes,
        grid=(1,),
        in_specs=[_full2d(a.shape) for a in inputs],
        out_specs=out_specs,
        compiler_params=pltpu.CompilerParams(dimension_semantics=("arbitrary",)),
    )(*inputs)

    hs = hs_flat.reshape(NUM_DEC, B, N, D)                     # [L_dec, B, N, D]
    memory = mem_bf.reshape(B, HW, D).transpose(1, 0, 2)       # [HW, B, D]
    return hs, memory


# ================================ parameter init =======================================

def init_params(key):
    ks = iter(jax.random.split(key, 64))

    def dense(din, dout):
        return jax.random.normal(next(ks), (din, dout), jnp.float32) * 0.02

    def zeros(n):
        return jnp.zeros((1, n), jnp.float32)

    def ones(n):
        return jnp.ones((1, n), jnp.float32)

    p = {}
    # encoder layer (shared across all encoder layers, like ModuleList([layer]*n))
    p["e_wqk"] = dense(D_MODEL, 2 * D_MODEL); p["e_bqk"] = zeros(2 * D_MODEL)
    p["e_wv"] = dense(D_MODEL, D_MODEL);      p["e_bv"] = zeros(D_MODEL)
    p["e_wo"] = dense(D_MODEL, D_MODEL);      p["e_bo"] = zeros(D_MODEL)
    p["e_ln1_g"] = ones(D_MODEL);             p["e_ln1_b"] = zeros(D_MODEL)
    p["e_ffn_w1"] = dense(D_MODEL, DIM_FF);   p["e_ffn_b1"] = zeros(DIM_FF)
    p["e_ffn_w2"] = dense(DIM_FF, D_MODEL);   p["e_ffn_b2"] = zeros(D_MODEL)
    p["e_ln2_g"] = ones(D_MODEL);             p["e_ln2_b"] = zeros(D_MODEL)
    # decoder layer (shared across all decoder layers)
    p["d_wqk"] = dense(D_MODEL, 2 * D_MODEL); p["d_bqk"] = zeros(2 * D_MODEL)
    p["d_wv"] = dense(D_MODEL, D_MODEL);      p["d_bv"] = zeros(D_MODEL)
    p["d_wo"] = dense(D_MODEL, D_MODEL);      p["d_bo"] = zeros(D_MODEL)
    p["d_ln1_g"] = ones(D_MODEL);             p["d_ln1_b"] = zeros(D_MODEL)
    p["d_cwq"] = dense(D_MODEL, D_MODEL);     p["d_cbq"] = zeros(D_MODEL)
    p["d_cwk"] = dense(D_MODEL, D_MODEL);     p["d_cbk"] = zeros(D_MODEL)
    p["d_cwv"] = dense(D_MODEL, D_MODEL);     p["d_cbv"] = zeros(D_MODEL)
    p["d_cwo"] = dense(D_MODEL, D_MODEL);     p["d_cbo"] = zeros(D_MODEL)
    p["d_ln2_g"] = ones(D_MODEL);             p["d_ln2_b"] = zeros(D_MODEL)
    p["d_ffn_w1"] = dense(D_MODEL, DIM_FF);   p["d_ffn_b1"] = zeros(DIM_FF)
    p["d_ffn_w2"] = dense(DIM_FF, D_MODEL);   p["d_ffn_b2"] = zeros(D_MODEL)
    p["d_ln3_g"] = ones(D_MODEL);             p["d_ln3_b"] = zeros(D_MODEL)
    # final decoder norm
    p["dn_g"] = ones(D_MODEL);                p["dn_b"] = zeros(D_MODEL)
    return p


# ======================================= main ==========================================

if __name__ == "__main__":
    key = jax.random.PRNGKey(0)
    k_p, k_src, k_pos, k_q = jax.random.split(key, 4)

    HW, B, N = 16, 2, 8            # spatial tokens, batch, num object queries
    params = init_params(k_p)

    src = jax.random.normal(k_src, (HW, B, D_MODEL), jnp.float32)
    pos_embed = jax.random.normal(k_pos, (HW, B, D_MODEL), jnp.float32)
    query_embed = jax.random.normal(k_q, (N, B, D_MODEL), jnp.float32)

    # padding_mask [B, HW]: batch 0 has no padding, batch 1 pads the last 3 positions.
    padding_mask = jnp.zeros((B, HW), jnp.bool_).at[1, HW - 3:].set(True)

    fwd = jax.jit(transformer_forward)
    hs, memory = fwd(params, src, query_embed, pos_embed, padding_mask)
    jax.block_until_ready((hs, memory))

    assert hs.shape == (NUM_DEC, B, N, D_MODEL), hs.shape
    assert memory.shape == (HW, B, D_MODEL), memory.shape
    assert bool(jnp.all(jnp.isfinite(hs))) and bool(jnp.all(jnp.isfinite(memory)))
    print("KERNEL_OK")
</pallas_src>

<mosaic_0001>
module attributes {stable_mosaic.version = 11 : i64} {
  func.func @_transformer_kernel(%arg0: i32, %arg1: memref<32x32xf32, #tpu.memory_space<vmem>>, %arg2: memref<32x32xf32, #tpu.memory_space<vmem>>, %arg3: memref<16x32xf32, #tpu.memory_space<vmem>>, %arg4: memref<32x32xf32, #tpu.memory_space<vmem>>, %arg5: memref<16x16xf32, #tpu.memory_space<vmem>>, %arg6: memref<16x32xf32, #tpu.memory_space<vmem>>, %arg7: memref<32x64xf32, #tpu.memory_space<vmem>>, %arg8: memref<1x64xf32, #tpu.memory_space<vmem>>, %arg9: memref<32x32xf32, #tpu.memory_space<vmem>>, %arg10: memref<1x32xf32, #tpu.memory_space<vmem>>, %arg11: memref<32x32xf32, #tpu.memory_space<vmem>>, %arg12: memref<1x32xf32, #tpu.memory_space<vmem>>, %arg13: memref<1x32xf32, #tpu.memory_space<vmem>>, %arg14: memref<1x32xf32, #tpu.memory_space<vmem>>, %arg15: memref<32x64xf32, #tpu.memory_space<vmem>>, %arg16: memref<1x64xf32, #tpu.memory_space<vmem>>, %arg17: memref<64x32xf32, #tpu.memory_space<vmem>>, %arg18: memref<1x32xf32, #tpu.memory_space<vmem>>, %arg19: memref<1x32xf32, #tpu.memory_space<vmem>>, %arg20: memref<1x32xf32, #tpu.memory_space<vmem>>, %arg21: memref<32x64xf32, #tpu.memory_space<vmem>>, %arg22: memref<1x64xf32, #tpu.memory_space<vmem>>, %arg23: memref<32x32xf32, #tpu.memory_space<vmem>>, %arg24: memref<1x32xf32, #tpu.memory_space<vmem>>, %arg25: memref<32x32xf32, #tpu.memory_space<vmem>>, %arg26: memref<1x32xf32, #tpu.memory_space<vmem>>, %arg27: memref<1x32xf32, #tpu.memory_space<vmem>>, %arg28: memref<1x32xf32, #tpu.memory_space<vmem>>, %arg29: memref<32x32xf32, #tpu.memory_space<vmem>>, %arg30: memref<1x32xf32, #tpu.memory_space<vmem>>, %arg31: memref<32x32xf32, #tpu.memory_space<vmem>>, %arg32: memref<1x32xf32, #tpu.memory_space<vmem>>, %arg33: memref<32x32xf32, #tpu.memory_space<vmem>>, %arg34: memref<1x32xf32, #tpu.memory_space<vmem>>, %arg35: memref<32x32xf32, #tpu.memory_space<vmem>>, %arg36: memref<1x32xf32, #tpu.memory_space<vmem>>, %arg37: memref<1x32xf32, #tpu.memory_space<vmem>>, %arg38: memref<1x32xf32, #tpu.memory_space<vmem>>, %arg39: memref<32x64xf32, #tpu.memory_space<vmem>>, %arg40: memref<1x64xf32, #tpu.memory_space<vmem>>, %arg41: memref<64x32xf32, #tpu.memory_space<vmem>>, %arg42: memref<1x32xf32, #tpu.memory_space<vmem>>, %arg43: memref<1x32xf32, #tpu.memory_space<vmem>>, %arg44: memref<1x32xf32, #tpu.memory_space<vmem>>, %arg45: memref<1x32xf32, #tpu.memory_space<vmem>>, %arg46: memref<1x32xf32, #tpu.memory_space<vmem>>, %arg47: memref<32x32xf32, #tpu.memory_space<vmem>>, %arg48: memref<32x32xf32, #tpu.memory_space<vmem>>) attributes {dimension_semantics = [#tpu.dimension_semantics<arbitrary>], iteration_bounds = array<i64: 1>, scalar_prefetch = 0 : i64, scratch_operands = 0 : i64, tpu.core_type = #tpu.core_type<tc>, window_params = [{pipeline_mode = #tpu.pipeline_mode<synchronous>, transform_indices = @transform_0, window_bounds = array<i64: 32, 32>}, {pipeline_mode = #tpu.pipeline_mode<synchronous>, transform_indices = @transform_1, window_bounds = array<i64: 32, 32>}, {pipeline_mode = #tpu.pipeline_mode<synchronous>, transform_indices = @transform_2, window_bounds = array<i64: 16, 32>}, {pipeline_mode = #tpu.pipeline_mode<synchronous>, transform_indices = @transform_3, window_bounds = array<i64: 32, 32>}, {pipeline_mode = #tpu.pipeline_mode<synchronous>, transform_indices = @transform_4, window_bounds = array<i64: 16, 16>}, {pipeline_mode = #tpu.pipeline_mode<synchronous>, transform_indices = @transform_5, window_bounds = array<i64: 16, 32>}, {pipeline_mode = #tpu.pipeline_mode<synchronous>, transform_indices = @transform_6, window_bounds = array<i64: 32, 64>}, {pipeline_mode = #tpu.pipeline_mode<synchronous>, transform_indices = @transform_7, window_bounds = array<i64: 1, 64>}, {pipeline_mode = #tpu.pipeline_mode<synchronous>, transform_indices = @transform_8, window_bounds = array<i64: 32, 32>}, {pipeline_mode = #tpu.pipeline_mode<synchronous>, transform_indices = @transform_9, window_bounds = array<i64: 1, 32>}, {pipeline_mode = #tpu.pipeline_mode<synchronous>, transform_indices = @transform_10, window_bounds = array<i64: 32, 32>}, {pipeline_mode = #tpu.pipeline_mode<synchronous>, transform_indices = @transform_11, window_bounds = array<i64: 1, 32>}, {pipeline_mode = #tpu.pipeline_mode<synchronous>, transform_indices = @transform_12, window_bounds = array<i64: 1, 32>}, {pipeline_mode = #tpu.pipeline_mode<synchronous>, transform_indices = @transform_13, window_bounds = array<i64: 1, 32>}, {pipeline_mode = #tpu.pipeline_mode<synchronous>, transform_indices = @transform_14, window_bounds = array<i64: 32, 64>}, {pipeline_mode = #tpu.pipeline_mode<synchronous>, transform_indices = @transform_15, window_bounds = array<i64: 1, 64>}, {pipeline_mode = #tpu.pipeline_mode<synchronous>, transform_indices = @transform_16, window_bounds = array<i64: 64, 32>}, {pipeline_mode = #tpu.pipeline_mode<synchronous>, transform_indices = @transform_17, window_bounds = array<i64: 1, 32>}, {pipeline_mode = #tpu.pipeline_mode<synchronous>, transform_indices = @transform_18, window_bounds = array<i64: 1, 32>}, {pipeline_mode = #tpu.pipeline_mode<synchronous>, transform_indices = @transform_19, window_bounds = array<i64: 1, 32>}, {pipeline_mode = #tpu.pipeline_mode<synchronous>, transform_indices = @transform_20, window_bounds = array<i64: 32, 64>}, {pipeline_mode = #tpu.pipeline_mode<synchronous>, transform_indices = @transform_21, window_bounds = array<i64: 1, 64>}, {pipeline_mode = #tpu.pipeline_mode<synchronous>, transform_indices = @transform_22, window_bounds = array<i64: 32, 32>}, {pipeline_mode = #tpu.pipeline_mode<synchronous>, transform_indices = @transform_23, window_bounds = array<i64: 1, 32>}, {pipeline_mode = #tpu.pipeline_mode<synchronous>, transform_indices = @transform_24, window_bounds = array<i64: 32, 32>}, {pipeline_mode = #tpu.pipeline_mode<synchronous>, transform_indices = @transform_25, window_bounds = array<i64: 1, 32>}, {pipeline_mode = #tpu.pipeline_mode<synchronous>, transform_indices = @transform_26, window_bounds = array<i64: 1, 32>}, {pipeline_mode = #tpu.pipeline_mode<synchronous>, transform_indices = @transform_27, window_bounds = array<i64: 1, 32>}, {pipeline_mode = #tpu.pipeline_mode<synchronous>, transform_indices = @transform_28, window_bounds = array<i64: 32, 32>}, {pipeline_mode = #tpu.pipeline_mode<synchronous>, transform_indices = @transform_29, window_bounds = array<i64: 1, 32>}, {pipeline_mode = #tpu.pipeline_mode<synchronous>, transform_indices = @transform_30, window_bounds = array<i64: 32, 32>}, {pipeline_mode = #tpu.pipeline_mode<synchronous>, transform_indices = @transform_31, window_bounds = array<i64: 1, 32>}, {pipeline_mode = #tpu.pipeline_mode<synchronous>, transform_indices = @transform_32, window_bounds = array<i64: 32, 32>}, {pipeline_mode = #tpu.pipeline_mode<synchronous>, transform_indices = @transform_33, window_bounds = array<i64: 1, 32>}, {pipeline_mode = #tpu.pipeline_mode<synchronous>, transform_indices = @transform_34, window_bounds = array<i64: 32, 32>}, {pipeline_mode = #tpu.pipeline_mode<synchronous>, transform_indices = @transform_35, window_bounds = array<i64: 1, 32>}, {pipeline_mode = #tpu.pipeline_mode<synchronous>, transform_indices = @transform_36, window_bounds = array<i64: 1, 32>}, {pipeline_mode = #tpu.pipeline_mode<synchronous>, transform_indices = @transform_37, window_bounds = array<i64: 1, 32>}, {pipeline_mode = #tpu.pipeline_mode<synchronous>, transform_indices = @transform_38, window_bounds = array<i64: 32, 64>}, {pipeline_mode = #tpu.pipeline_mode<synchronous>, transform_indices = @transform_39, window_bounds = array<i64: 1, 64>}, {pipeline_mode = #tpu.pipeline_mode<synchronous>, transform_indices = @transform_40, window_bounds = array<i64: 64, 32>}, {pipeline_mode = #tpu.pipeline_mode<synchronous>, transform_indices = @transform_41, window_bounds = array<i64: 1, 32>}, {pipeline_mode = #tpu.pipeline_mode<synchronous>, transform_indices = @transform_42, window_bounds = array<i64: 1, 32>}, {pipeline_mode = #tpu.pipeline_mode<synchronous>, transform_indices = @transform_43, window_bounds = array<i64: 1, 32>}, {pipeline_mode = #tpu.pipeline_mode<synchronous>, transform_indices = @transform_44, window_bounds = array<i64: 1, 32>}, {pipeline_mode = #tpu.pipeline_mode<synchronous>, transform_indices = @transform_45, window_bounds = array<i64: 1, 32>}, {pipeline_mode = #tpu.pipeline_mode<synchronous>, transform_indices = @transform_46, window_bounds = array<i64: 32, 32>}, {pipeline_mode = #tpu.pipeline_mode<synchronous>, transform_indices = @transform_47, window_bounds = array<i64: 32, 32>}]} {
    %c0 = arith.constant 0 : index
    %c0_0 = arith.constant 0 : index
    %0 = vector.load %arg7[%c0, %c0_0] : memref<32x64xf32, #tpu.memory_space<vmem>>, vector<32x64xf32>
    %c0_1 = arith.constant 0 : index
    %c0_2 = arith.constant 0 : index
    %1 = vector.load %arg8[%c0_1, %c0_2] : memref<1x64xf32, #tpu.memory_space<vmem>>, vector<1x64xf32>
    %c0_3 = arith.constant 0 : index
    %c0_4 = arith.constant 0 : index
    %2 = vector.load %arg9[%c0_3, %c0_4] : memref<32x32xf32, #tpu.memory_space<vmem>>, vector<32x32xf32>
    %c0_5 = arith.constant 0 : index
    %c0_6 = arith.constant 0 : index
    %3 = vector.load %arg10[%c0_5, %c0_6] : memref<1x32xf32, #tpu.memory_space<vmem>>, vector<1x32xf32>
    %c0_7 = arith.constant 0 : index
    %c0_8 = arith.constant 0 : index
    %4 = vector.load %arg11[%c0_7, %c0_8] : memref<32x32xf32, #tpu.memory_space<vmem>>, vector<32x32xf32>
    %c0_9 = arith.constant 0 : index
    %c0_10 = arith.constant 0 : index
    %5 = vector.load %arg12[%c0_9, %c0_10] : memref<1x32xf32, #tpu.memory_space<vmem>>, vector<1x32xf32>
    %c0_11 = arith.constant 0 : index
    %c0_12 = arith.constant 0 : index
    %6 = vector.load %arg13[%c0_11, %c0_12] : memref<1x32xf32, #tpu.memory_space<vmem>>, vector<1x32xf32>
    %c0_13 = arith.constant 0 : index
    %c0_14 = arith.constant 0 : index
    %7 = vector.load %arg14[%c0_13, %c0_14] : memref<1x32xf32, #tpu.memory_space<vmem>>, vector<1x32xf32>
    %c0_15 = arith.constant 0 : index
    %c0_16 = arith.constant 0 : index
    %8 = vector.load %arg15[%c0_15, %c0_16] : memref<32x64xf32, #tpu.memory_space<vmem>>, vector<32x64xf32>
    %c0_17 = arith.constant 0 : index
    %c0_18 = arith.constant 0 : index
    %9 = vector.load %arg16[%c0_17, %c0_18] : memref<1x64xf32, #tpu.memory_space<vmem>>, vector<1x64xf32>
    %c0_19 = arith.constant 0 : index
    %c0_20 = arith.constant 0 : index
    %10 = vector.load %arg17[%c0_19, %c0_20] : memref<64x32xf32, #tpu.memory_space<vmem>>, vector<64x32xf32>
    %c0_21 = arith.constant 0 : index
    %c0_22 = arith.constant 0 : index
    %11 = vector.load %arg18[%c0_21, %c0_22] : memref<1x32xf32, #tpu.memory_space<vmem>>, vector<1x32xf32>
    %c0_23 = arith.constant 0 : index
    %c0_24 = arith.constant 0 : index
    %12 = vector.load %arg19[%c0_23, %c0_24] : memref<1x32xf32, #tpu.memory_space<vmem>>, vector<1x32xf32>
    %c0_25 = arith.constant 0 : index
    %c0_26 = arith.constant 0 : index
    %13 = vector.load %arg20[%c0_25, %c0_26] : memref<1x32xf32, #tpu.memory_space<vmem>>, vector<1x32xf32>
    %c0_27 = arith.constant 0 : index
    %c0_28 = arith.constant 0 : index
    %14 = vector.load %arg21[%c0_27, %c0_28] : memref<32x64xf32, #tpu.memory_space<vmem>>, vector<32x64xf32>
    %c0_29 = arith.constant 0 : index
    %c0_30 = arith.constant 0 : index
    %15 = vector.load %arg22[%c0_29, %c0_30] : memref<1x64xf32, #tpu.memory_space<vmem>>, vector<1x64xf32>
    %c0_31 = arith.constant 0 : index
    %c0_32 = arith.constant 0 : index
    %16 = vector.load %arg23[%c0_31, %c0_32] : memref<32x32xf32, #tpu.memory_space<vmem>>, vector<32x32xf32>
    %c0_33 = arith.constant 0 : index
    %c0_34 = arith.constant 0 : index
    %17 = vector.load %arg24[%c0_33, %c0_34] : memref<1x32xf32, #tpu.memory_space<vmem>>, vector<1x32xf32>
    %c0_35 = arith.constant 0 : index
    %c0_36 = arith.constant 0 : index
    %18 = vector.load %arg25[%c0_35, %c0_36] : memref<32x32xf32, #tpu.memory_space<vmem>>, vector<32x32xf32>
    %c0_37 = arith.constant 0 : index
    %c0_38 = arith.constant 0 : index
    %19 = vector.load %arg26[%c0_37, %c0_38] : memref<1x32xf32, #tpu.memory_space<vmem>>, vector<1x32xf32>
    %c0_39 = arith.constant 0 : index
    %c0_40 = arith.constant 0 : index
    %20 = vector.load %arg27[%c0_39, %c0_40] : memref<1x32xf32, #tpu.memory_space<vmem>>, vector<1x32xf32>
    %c0_41 = arith.constant 0 : index
    %c0_42 = arith.constant 0 : index
    %21 = vector.load %arg28[%c0_41, %c0_42] : memref<1x32xf32, #tpu.memory_space<vmem>>, vector<1x32xf32>
    %c0_43 = arith.constant 0 : index
    %c0_44 = arith.constant 0 : index
    %22 = vector.load %arg29[%c0_43, %c0_44] : memref<32x32xf32, #tpu.memory_space<vmem>>, vector<32x32xf32>
    %c0_45 = arith.constant 0 : index
    %c0_46 = arith.constant 0 : index
    %23 = vector.load %arg30[%c0_45, %c0_46] : memref<1x32xf32, #tpu.memory_space<vmem>>, vector<1x32xf32>
    %c0_47 = arith.constant 0 : index
    %c0_48 = arith.constant 0 : index
    %24 = vector.load %arg31[%c0_47, %c0_48] : memref<32x32xf32, #tpu.memory_space<vmem>>, vector<32x32xf32>
    %c0_49 = arith.constant 0 : index
    %c0_50 = arith.constant 0 : index
    %25 = vector.load %arg32[%c0_49, %c0_50] : memref<1x32xf32, #tpu.memory_space<vmem>>, vector<1x32xf32>
    %c0_51 = arith.constant 0 : index
    %c0_52 = arith.constant 0 : index
    %26 = vector.load %arg33[%c0_51, %c0_52] : memref<32x32xf32, #tpu.memory_space<vmem>>, vector<32x32xf32>
    %c0_53 = arith.constant 0 : index
    %c0_54 = arith.constant 0 : index
    %27 = vector.load %arg34[%c0_53, %c0_54] : memref<1x32xf32, #tpu.memory_space<vmem>>, vector<1x32xf32>
    %c0_55 = arith.constant 0 : index
    %c0_56 = arith.constant 0 : index
    %28 = vector.load %arg35[%c0_55, %c0_56] : memref<32x32xf32, #tpu.memory_space<vmem>>, vector<32x32xf32>
    %c0_57 = arith.constant 0 : index
    %c0_58 = arith.constant 0 : index
    %29 = vector.load %arg36[%c0_57, %c0_58] : memref<1x32xf32, #tpu.memory_space<vmem>>, vector<1x32xf32>
    %c0_59 = arith.constant 0 : index
    %c0_60 = arith.constant 0 : index
    %30 = vector.load %arg37[%c0_59, %c0_60] : memref<1x32xf32, #tpu.memory_space<vmem>>, vector<1x32xf32>
    %c0_61 = arith.constant 0 : index
    %c0_62 = arith.constant 0 : index
    %31 = vector.load %arg38[%c0_61, %c0_62] : memref<1x32xf32, #tpu.memory_space<vmem>>, vector<1x32xf32>
    %c0_63 = arith.constant 0 : index
    %c0_64 = arith.constant 0 : index
    %32 = vector.load %arg39[%c0_63, %c0_64] : memref<32x64xf32, #tpu.memory_space<vmem>>, vector<32x64xf32>
    %c0_65 = arith.constant 0 : index
    %c0_66 = arith.constant 0 : index
    %33 = vector.load %arg40[%c0_65, %c0_66] : memref<1x64xf32, #tpu.memory_space<vmem>>, vector<1x64xf32>
    %c0_67 = arith.constant 0 : index
    %c0_68 = arith.constant 0 : index
    %34 = vector.load %arg41[%c0_67, %c0_68] : memref<64x32xf32, #tpu.memory_space<vmem>>, vector<64x32xf32>
    %c0_69 = arith.constant 0 : index
    %c0_70 = arith.constant 0 : index
    %35 = vector.load %arg42[%c0_69, %c0_70] : memref<1x32xf32, #tpu.memory_space<vmem>>, vector<1x32xf32>
    %c0_71 = arith.constant 0 : index
    %c0_72 = arith.constant 0 : index
    %36 = vector.load %arg43[%c0_71, %c0_72] : memref<1x32xf32, #tpu.memory_space<vmem>>, vector<1x32xf32>
    %c0_73 = arith.constant 0 : index
    %c0_74 = arith.constant 0 : index
    %37 = vector.load %arg44[%c0_73, %c0_74] : memref<1x32xf32, #tpu.memory_space<vmem>>, vector<1x32xf32>
    %c0_75 = arith.constant 0 : index
    %c0_76 = arith.constant 0 : index
    %38 = vector.load %arg45[%c0_75, %c0_76] : memref<1x32xf32, #tpu.memory_space<vmem>>, vector<1x32xf32>
    %c0_77 = arith.constant 0 : index
    %c0_78 = arith.constant 0 : index
    %39 = vector.load %arg46[%c0_77, %c0_78] : memref<1x32xf32, #tpu.memory_space<vmem>>, vector<1x32xf32>
    %c0_79 = arith.constant 0 : index
    %c0_80 = arith.constant 0 : index
    %40 = vector.load %arg1[%c0_79, %c0_80] : memref<32x32xf32, #tpu.memory_space<vmem>>, vector<32x32xf32>
    %c0_81 = arith.constant 0 : index
    %c0_82 = arith.constant 0 : index
    %41 = vector.load %arg2[%c0_81, %c0_82] : memref<32x32xf32, #tpu.memory_space<vmem>>, vector<32x32xf32>
    %c0_83 = arith.constant 0 : index
    %c0_84 = arith.constant 0 : index
    %42 = vector.load %arg3[%c0_83, %c0_84] : memref<16x32xf32, #tpu.memory_space<vmem>>, vector<16x32xf32>
    %c0_85 = arith.constant 0 : index
    %c0_86 = arith.constant 0 : index
    %43 = vector.load %arg4[%c0_85, %c0_86] : memref<32x32xf32, #tpu.memory_space<vmem>>, vector<32x32xf32>
    %c0_87 = arith.constant 0 : index
    %c0_88 = arith.constant 0 : index
    %44 = vector.load %arg5[%c0_87, %c0_88] : memref<16x16xf32, #tpu.memory_space<vmem>>, vector<16x16xf32>
    %c0_89 = arith.constant 0 : index
    %c0_90 = arith.constant 0 : index
    %45 = vector.load %arg6[%c0_89, %c0_90] : memref<16x32xf32, #tpu.memory_space<vmem>>, vector<16x32xf32>
    %46 = arith.addf %40, %41 : vector<32x32xf32>
    %cst = arith.constant dense<0.000000e+00> : vector<32x64xf32>
    %47 = tpu.matmul %46, %0, %cst {dimension_numbers = #tpu.dot_dimension_numbers<[1], [0], [0], [1], [0, 0, 1, 1], [], []>} : vector<32x32xf32>, vector<32x64xf32>, vector<32x64xf32> -> vector<32x64xf32>
    %48 = vector.broadcast %1 : vector<1x64xf32> to vector<32x64xf32>
    %49 = arith.addf %47, %48 : vector<32x64xf32>
    %cst_91 = arith.constant dense<0.000000e+00> : vector<32x32xf32>
    %50 = tpu.matmul %40, %2, %cst_91 {dimension_numbers = #tpu.dot_dimension_numbers<[1], [0], [0], [1], [0, 0, 1, 1], [], []>} : vector<32x32xf32>, vector<32x32xf32>, vector<32x32xf32> -> vector<32x32xf32>
    %51 = vector.broadcast %3 : vector<1x32xf32> to vector<32x32xf32>
    %52 = arith.addf %50, %51 : vector<32x32xf32>
    %53 = vector.extract_strided_slice %49 {offsets = [0, 0], sizes = [32, 32], strides = [1, 1]} : vector<32x64xf32> to vector<32x32xf32>
    %54 = vector.extract_strided_slice %49 {offsets = [0, 32], sizes = [32, 32], strides = [1, 1]} : vector<32x64xf32> to vector<32x32xf32>
    %cst_92 = arith.constant 0.353553385 : f32
    %55 = vector.broadcast %cst_92 : f32 to vector<32x32xf32>
    %56 = arith.mulf %53, %55 : vector<32x32xf32>
    %57 = vector.extract_strided_slice %56 {offsets = [0, 0], sizes = [32, 8], strides = [1, 1]} : vector<32x32xf32> to vector<32x8xf32>
    %58 = vector.extract_strided_slice %54 {offsets = [0, 0], sizes = [32, 8], strides = [1, 1]} : vector<32x32xf32> to vector<32x8xf32>
    %cst_93 = arith.constant dense<0.000000e+00> : vector<32x32xf32>
    %59 = tpu.matmul %57, %58, %cst_93 {dimension_numbers = #tpu.dot_dimension_numbers<[1], [1], [0], [0], [0, 0, 1, 0], [], []>} : vector<32x8xf32>, vector<32x8xf32>, vector<32x32xf32> -> vector<32x32xf32>
    %60 = arith.addf %59, %43 : vector<32x32xf32>
    %cst_94 = arith.constant dense<0xFF800000> : vector<32xf32>
    %61 = vector.multi_reduction <maximumf>, %60, %cst_94 [1] : vector<32x32xf32> to vector<32xf32>
    %62 = vector.shape_cast %61 : vector<32xf32> to vector<32x1xf32>
    %63 = vector.broadcast %62 : vector<32x1xf32> to vector<32x32xf32>
    %64 = arith.subf %60, %63 : vector<32x32xf32>
    %65 = math.exp %64 : vector<32x32xf32>
    %cst_95 = arith.constant dense<0.000000e+00> : vector<32xf32>
    %66 = vector.multi_reduction <add>, %65, %cst_95 [1] : vector<32x32xf32> to vector<32xf32>
    %67 = vector.shape_cast %66 : vector<32xf32> to vector<32x1xf32>
    %68 = tpu.reciprocal %67 {approx = true} : vector<32x1xf32> -> vector<32x1xf32>
    %69 = vector.broadcast %68 : vector<32x1xf32> to vector<32x32xf32>
    %70 = arith.mulf %65, %69 : vector<32x32xf32>
    %71 = vector.extract_strided_slice %52 {offsets = [0, 0], sizes = [32, 8], strides = [1, 1]} : vector<32x32xf32> to vector<32x8xf32>
    %cst_96 = arith.constant dense<0.000000e+00> : vector<32x8xf32>
    %72 = tpu.matmul %70, %71, %cst_96 {dimension_numbers = #tpu.dot_dimension_numbers<[1], [0], [0], [1], [0, 0, 1, 1], [], []>} : vector<32x32xf32>, vector<32x8xf32>, vector<32x8xf32> -> vector<32x8xf32>
    %73 = vector.extract_strided_slice %4 {offsets = [0, 0], sizes = [8, 32], strides = [1, 1]} : vector<32x32xf32> to vector<8x32xf32>
    %cst_97 = arith.constant dense<0.000000e+00> : vector<32x32xf32>
    %74 = tpu.matmul %72, %73, %cst_97 {dimension_numbers = #tpu.dot_dimension_numbers<[1], [0], [0], [1], [0, 0, 1, 1], [], []>} : vector<32x8xf32>, vector<8x32xf32>, vector<32x32xf32> -> vector<32x32xf32>
    %75 = vector.extract_strided_slice %56 {offsets = [0, 8], sizes = [32, 8], strides = [1, 1]} : vector<32x32xf32> to vector<32x8xf32>
    %76 = vector.extract_strided_slice %54 {offsets = [0, 8], sizes = [32, 8], strides = [1, 1]} : vector<32x32xf32> to vector<32x8xf32>
    %cst_98 = arith.constant dense<0.000000e+00> : vector<32x32xf32>
    %77 = tpu.matmul %75, %76, %cst_98 {dimension_numbers = #tpu.dot_dimension_numbers<[1], [1], [0], [0], [0, 0, 1, 0], [], []>} : vector<32x8xf32>, vector<32x8xf32>, vector<32x32xf32> -> vector<32x32xf32>
    %78 = arith.addf %77, %43 : vector<32x32xf32>
    %cst_99 = arith.constant dense<0xFF800000> : vector<32xf32>
    %79 = vector.multi_reduction <maximumf>, %78, %cst_99 [1] : vector<32x32xf32> to vector<32xf32>
    %80 = vector.shape_cast %79 : vector<32xf32> to vector<32x1xf32>
    %81 = vector.broadcast %80 : vector<32x1xf32> to vector<32x32xf32>
    %82 = arith.subf %78, %81 : vector<32x32xf32>
    %83 = math.exp %82 : vector<32x32xf32>
    %cst_100 = arith.constant dense<0.000000e+00> : vector<32xf32>
    %84 = vector.multi_reduction <add>, %83, %cst_100 [1] : vector<32x32xf32> to vector<32xf32>
    %85 = vector.shape_cast %84 : vector<32xf32> to vector<32x1xf32>
    %86 = tpu.reciprocal %85 {approx = true} : vector<32x1xf32> -> vector<32x1xf32>
    %87 = vector.broadcast %86 : vector<32x1xf32> to vector<32x32xf32>
    %88 = arith.mulf %83, %87 : vector<32x32xf32>
    %89 = vector.extract_strided_slice %52 {offsets = [0, 8], sizes = [32, 8], strides = [1, 1]} : vector<32x32xf32> to vector<32x8xf32>
    %cst_101 = arith.constant dense<0.000000e+00> : vector<32x8xf32>
    %90 = tpu.matmul %88, %89, %cst_101 {dimension_numbers = #tpu.dot_dimension_numbers<[1], [0], [0], [1], [0, 0, 1, 1], [], []>} : vector<32x32xf32>, vector<32x8xf32>, vector<32x8xf32> -> vector<32x8xf32>
    %91 = vector.extract_strided_slice %4 {offsets = [8, 0], sizes = [8, 32], strides = [1, 1]} : vector<32x32xf32> to vector<8x32xf32>
    %cst_102 = arith.constant dense<0.000000e+00> : vector<32x32xf32>
    %92 = tpu.matmul %90, %91, %cst_102 {dimension_numbers = #tpu.dot_dimension_numbers<[1], [0], [0], [1], [0, 0, 1, 1], [], []>} : vector<32x8xf32>, vector<8x32xf32>, vector<32x32xf32> -> vector<32x32xf32>
    %93 = arith.addf %74, %92 : vector<32x32xf32>
    %94 = vector.extract_strided_slice %56 {offsets = [0, 16], sizes = [32, 8], strides = [1, 1]} : vector<32x32xf32> to vector<32x8xf32>
    %95 = vector.extract_strided_slice %54 {offsets = [0, 16], sizes = [32, 8], strides = [1, 1]} : vector<32x32xf32> to vector<32x8xf32>
    %cst_103 = arith.constant dense<0.000000e+00> : vector<32x32xf32>
    %96 = tpu.matmul %94, %95, %cst_103 {dimension_numbers = #tpu.dot_dimension_numbers<[1], [1], [0], [0], [0, 0, 1, 0], [], []>} : vector<32x8xf32>, vector<32x8xf32>, vector<32x32xf32> -> vector<32x32xf32>
    %97 = arith.addf %96, %43 : vector<32x32xf32>
    %cst_104 = arith.constant dense<0xFF800000> : vector<32xf32>
    %98 = vector.multi_reduction <maximumf>, %97, %cst_104 [1] : vector<32x32xf32> to vector<32xf32>
    %99 = vector.shape_cast %98 : vector<32xf32> to vector<32x1xf32>
    %100 = vector.broadcast %99 : vector<32x1xf32> to vector<32x32xf32>
    %101 = arith.subf %97, %100 : vector<32x32xf32>
    %102 = math.exp %101 : vector<32x32xf32>
    %cst_105 = arith.constant dense<0.000000e+00> : vector<32xf32>
    %103 = vector.multi_reduction <add>, %102, %cst_105 [1] : vector<32x32xf32> to vector<32xf32>
    %104 = vector.shape_cast %103 : vector<32xf32> to vector<32x1xf32>
    %105 = tpu.reciprocal %104 {approx = true} : vector<32x1xf32> -> vector<32x1xf32>
    %106 = vector.broadcast %105 : vector<32x1xf32> to vector<32x32xf32>
    %107 = arith.mulf %102, %106 : vector<32x32xf32>
    %108 = vector.extract_strided_slice %52 {offsets = [0, 16], sizes = [32, 8], strides = [1, 1]} : vector<32x32xf32> to vector<32x8xf32>
    %cst_106 = arith.constant dense<0.000000e+00> : vector<32x8xf32>
    %109 = tpu.matmul %107, %108, %cst_106 {dimension_numbers = #tpu.dot_dimension_numbers<[1], [0], [0], [1], [0, 0, 1, 1], [], []>} : vector<32x32xf32>, vector<32x8xf32>, vector<32x8xf32> -> vector<32x8xf32>
    %110 = vector.extract_strided_slice %4 {offsets = [16, 0], sizes = [8, 32], strides = [1, 1]} : vector<32x32xf32> to vector<8x32xf32>
    %cst_107 = arith.constant dense<0.000000e+00> : vector<32x32xf32>
    %111 = tpu.matmul %109, %110, %cst_107 {dimension_numbers = #tpu.dot_dimension_numbers<[1], [0], [0], [1], [0, 0, 1, 1], [], []>} : vector<32x8xf32>, vector<8x32xf32>, vector<32x32xf32> -> vector<32x32xf32>
    %112 = arith.addf %93, %111 : vector<32x32xf32>
    %113 = vector.extract_strided_slice %56 {offsets = [0, 24], sizes = [32, 8], strides = [1, 1]} : vector<32x32xf32> to vector<32x8xf32>
    %114 = vector.extract_strided_slice %54 {offsets = [0, 24], sizes = [32, 8], strides = [1, 1]} : vector<32x32xf32> to vector<32x8xf32>
    %cst_108 = arith.constant dense<0.000000e+00> : vector<32x32xf32>
    %115 = tpu.matmul %113, %114, %cst_108 {dimension_numbers = #tpu.dot_dimension_numbers<[1], [1], [0], [0], [0, 0, 1, 0], [], []>} : vector<32x8xf32>, vector<32x8xf32>, vector<32x32xf32> -> vector<32x32xf32>
    %116 = arith.addf %115, %43 : vector<32x32xf32>
    %cst_109 = arith.constant dense<0xFF800000> : vector<32xf32>
    %117 = vector.multi_reduction <maximumf>, %116, %cst_109 [1] : vector<32x32xf32> to vector<32xf32>
    %118 = vector.shape_cast %117 : vector<32xf32> to vector<32x1xf32>
    %119 = vector.broadcast %118 : vector<32x1xf32> to vector<32x32xf32>
    %120 = arith.subf %116, %119 : vector<32x32xf32>
    %121 = math.exp %120 : vector<32x32xf32>
    %cst_110 = arith.constant dense<0.000000e+00> : vector<32xf32>
    %122 = vector.multi_reduction <add>, %121, %cst_110 [1] : vector<32x32xf32> to vector<32xf32>
    %123 = vector.shape_cast %122 : vector<32xf32> to vector<32x1xf32>
    %124 = tpu.reciprocal %123 {approx = true} : vector<32x1xf32> -> vector<32x1xf32>
    %125 = vector.broadcast %124 : vector<32x1xf32> to vector<32x32xf32>
    %126 = arith.mulf %121, %125 : vector<32x32xf32>
    %127 = vector.extract_strided_slice %52 {offsets = [0, 24], sizes = [32, 8], strides = [1, 1]} : vector<32x32xf32> to vector<32x8xf32>
    %cst_111 = arith.constant dense<0.000000e+00> : vector<32x8xf32>
    %128 = tpu.matmul %126, %127, %cst_111 {dimension_numbers = #tpu.dot_dimension_numbers<[1], [0], [0], [1], [0, 0, 1, 1], [], []>} : vector<32x32xf32>, vector<32x8xf32>, vector<32x8xf32> -> vector<32x8xf32>
    %129 = vector.extract_strided_slice %4 {offsets = [24, 0], sizes = [8, 32], strides = [1, 1]} : vector<32x32xf32> to vector<8x32xf32>
    %cst_112 = arith.constant dense<0.000000e+00> : vector<32x32xf32>
    %130 = tpu.matmul %128, %129, %cst_112 {dimension_numbers = #tpu.dot_dimension_numbers<[1], [0], [0], [1], [0, 0, 1, 1], [], []>} : vector<32x8xf32>, vector<8x32xf32>, vector<32x32xf32> -> vector<32x32xf32>
    %131 = arith.addf %112, %130 : vector<32x32xf32>
    %132 = vector.broadcast %5 : vector<1x32xf32> to vector<32x32xf32>
    %133 = arith.addf %131, %132 : vector<32x32xf32>
    %134 = arith.addf %40, %133 : vector<32x32xf32>
    %cst_113 = arith.constant dense<0.000000e+00> : vector<32xf32>
    %135 = vector.multi_reduction <add>, %134, %cst_113 [1] : vector<32x32xf32> to vector<32xf32>
    %136 = vector.shape_cast %135 : vector<32xf32> to vector<32x1xf32>
    %cst_114 = arith.constant 3.200000e+01 : f32
    %137 = vector.broadcast %cst_114 : f32 to vector<32x1xf32>
    %138 = arith.divf %136, %137 : vector<32x1xf32>
    %139 = vector.broadcast %138 : vector<32x1xf32> to vector<32x32xf32>
    %140 = arith.subf %134, %139 : vector<32x32xf32>
    %141 = arith.mulf %140, %140 : vector<32x32xf32>
    %cst_115 = arith.constant dense<0.000000e+00> : vector<32xf32>
    %142 = vector.multi_reduction <add>, %141, %cst_115 [1] : vector<32x32xf32> to vector<32xf32>
    %143 = vector.shape_cast %142 : vector<32xf32> to vector<32x1xf32>
    %cst_116 = arith.constant 3.200000e+01 : f32
    %144 = vector.broadcast %cst_116 : f32 to vector<32x1xf32>
    %145 = arith.divf %143, %144 : vector<32x1xf32>
    %146 = vector.broadcast %138 : vector<32x1xf32> to vector<32x32xf32>
    %147 = arith.subf %134, %146 : vector<32x32xf32>
    %cst_117 = arith.constant 9.99999974E-6 : f32
    %148 = vector.broadcast %cst_117 : f32 to vector<32x1xf32>
    %149 = arith.addf %145, %148 : vector<32x1xf32>
    %150 = math.rsqrt %149 : vector<32x1xf32>
    %151 = vector.broadcast %150 : vector<32x1xf32> to vector<32x32xf32>
    %152 = arith.mulf %147, %151 : vector<32x32xf32>
    %153 = vector.broadcast %6 : vector<1x32xf32> to vector<32x32xf32>
    %154 = arith.mulf %152, %153 : vector<32x32xf32>
    %155 = vector.broadcast %7 : vector<1x32xf32> to vector<32x32xf32>
    %156 = arith.addf %154, %155 : vector<32x32xf32>
    %cst_118 = arith.constant dense<0.000000e+00> : vector<32x64xf32>
    %157 = tpu.matmul %156, %8, %cst_118 {dimension_numbers = #tpu.dot_dimension_numbers<[1], [0], [0], [1], [0, 0, 1, 1], [], []>} : vector<32x32xf32>, vector<32x64xf32>, vector<32x64xf32> -> vector<32x64xf32>
    %158 = vector.broadcast %9 : vector<1x64xf32> to vector<32x64xf32>
    %159 = arith.addf %157, %158 : vector<32x64xf32>
    %cst_119 = arith.constant 0.000000e+00 : f32
    %160 = vector.broadcast %cst_119 : f32 to vector<32x64xf32>
    %161 = arith.maximumf %159, %160 : vector<32x64xf32>
    %cst_120 = arith.constant dense<0.000000e+00> : vector<32x32xf32>
    %162 = tpu.matmul %161, %10, %cst_120 {dimension_numbers = #tpu.dot_dimension_numbers<[1], [0], [0], [1], [0, 0, 1, 1], [], []>} : vector<32x64xf32>, vector<64x32xf32>, vector<32x32xf32> -> vector<32x32xf32>
    %163 = vector.broadcast %11 : vector<1x32xf32> to vector<32x32xf32>
    %164 = arith.addf %162, %163 : vector<32x32xf32>
    %165 = arith.addf %156, %164 : vector<32x32xf32>
    %cst_121 = arith.constant dense<0.000000e+00> : vector<32xf32>
    %166 = vector.multi_reduction <add>, %165, %cst_121 [1] : vector<32x32xf32> to vector<32xf32>
    %167 = vector.shape_cast %166 : vector<32xf32> to vector<32x1xf32>
    %cst_122 = arith.constant 3.200000e+01 : f32
    %168 = vector.broadcast %cst_122 : f32 to vector<32x1xf32>
    %169 = arith.divf %167, %168 : vector<32x1xf32>
    %170 = vector.broadcast %169 : vector<32x1xf32> to vector<32x32xf32>
    %171 = arith.subf %165, %170 : vector<32x32xf32>
    %172 = arith.mulf %171, %171 : vector<32x32xf32>
    %cst_123 = arith.constant dense<0.000000e+00> : vector<32xf32>
    %173 = vector.multi_reduction <add>, %172, %cst_123 [1] : vector<32x32xf32> to vector<32xf32>
    %174 = vector.shape_cast %173 : vector<32xf32> to vector<32x1xf32>
    %cst_124 = arith.constant 3.200000e+01 : f32
    %175 = vector.broadcast %cst_124 : f32 to vector<32x1xf32>
    %176 = arith.divf %174, %175 : vector<32x1xf32>
    %177 = vector.broadcast %169 : vector<32x1xf32> to vector<32x32xf32>
    %178 = arith.subf %165, %177 : vector<32x32xf32>
    %cst_125 = arith.constant 9.99999974E-6 : f32
    %179 = vector.broadcast %cst_125 : f32 to vector<32x1xf32>
    %180 = arith.addf %176, %179 : vector<32x1xf32>
    %181 = math.rsqrt %180 : vector<32x1xf32>
    %182 = vector.broadcast %181 : vector<32x1xf32> to vector<32x32xf32>
    %183 = arith.mulf %178, %182 : vector<32x32xf32>
    %184 = vector.broadcast %12 : vector<1x32xf32> to vector<32x32xf32>
    %185 = arith.mulf %183, %184 : vector<32x32xf32>
    %186 = vector.broadcast %13 : vector<1x32xf32> to vector<32x32xf32>
    %187 = arith.addf %185, %186 : vector<32x32xf32>
    %188 = arith.addf %187, %41 : vector<32x32xf32>
    %cst_126 = arith.constant dense<0.000000e+00> : vector<32x64xf32>
    %189 = tpu.matmul %188, %0, %cst_126 {dimension_numbers = #tpu.dot_dimension_numbers<[1], [0], [0], [1], [0, 0, 1, 1], [], []>} : vector<32x32xf32>, vector<32x64xf32>, vector<32x64xf32> -> vector<32x64xf32>
    %190 = vector.broadcast %1 : vector<1x64xf32> to vector<32x64xf32>
    %191 = arith.addf %189, %190 : vector<32x64xf32>
    %cst_127 = arith.constant dense<0.000000e+00> : vector<32x32xf32>
    %192 = tpu.matmul %187, %2, %cst_127 {dimension_numbers = #tpu.dot_dimension_numbers<[1], [0], [0], [1], [0, 0, 1, 1], [], []>} : vector<32x32xf32>, vector<32x32xf32>, vector<32x32xf32> -> vector<32x32xf32>
    %193 = vector.broadcast %3 : vector<1x32xf32> to vector<32x32xf32>
    %194 = arith.addf %192, %193 : vector<32x32xf32>
    %195 = vector.extract_strided_slice %191 {offsets = [0, 0], sizes = [32, 32], strides = [1, 1]} : vector<32x64xf32> to vector<32x32xf32>
    %196 = vector.extract_strided_slice %191 {offsets = [0, 32], sizes = [32, 32], strides = [1, 1]} : vector<32x64xf32> to vector<32x32xf32>
    %cst_128 = arith.constant 0.353553385 : f32
    %197 = vector.broadcast %cst_128 : f32 to vector<32x32xf32>
    %198 = arith.mulf %195, %197 : vector<32x32xf32>
    %199 = vector.extract_strided_slice %198 {offsets = [0, 0], sizes = [32, 8], strides = [1, 1]} : vector<32x32xf32> to vector<32x8xf32>
    %200 = vector.extract_strided_slice %196 {offsets = [0, 0], sizes = [32, 8], strides = [1, 1]} : vector<32x32xf32> to vector<32x8xf32>
    %cst_129 = arith.constant dense<0.000000e+00> : vector<32x32xf32>
    %201 = tpu.matmul %199, %200, %cst_129 {dimension_numbers = #tpu.dot_dimension_numbers<[1], [1], [0], [0], [0, 0, 1, 0], [], []>} : vector<32x8xf32>, vector<32x8xf32>, vector<32x32xf32> -> vector<32x32xf32>
    %202 = arith.addf %201, %43 : vector<32x32xf32>
    %cst_130 = arith.constant dense<0xFF800000> : vector<32xf32>
    %203 = vector.multi_reduction <maximumf>, %202, %cst_130 [1] : vector<32x32xf32> to vector<32xf32>
    %204 = vector.shape_cast %203 : vector<32xf32> to vector<32x1xf32>
    %205 = vector.broadcast %204 : vector<32x1xf32> to vector<32x32xf32>
    %206 = arith.subf %202, %205 : vector<32x32xf32>
    %207 = math.exp %206 : vector<32x32xf32>
    %cst_131 = arith.constant dense<0.000000e+00> : vector<32xf32>
    %208 = vector.multi_reduction <add>, %207, %cst_131 [1] : vector<32x32xf32> to vector<32xf32>
    %209 = vector.shape_cast %208 : vector<32xf32> to vector<32x1xf32>
    %210 = tpu.reciprocal %209 {approx = true} : vector<32x1xf32> -> vector<32x1xf32>
    %211 = vector.broadcast %210 : vector<32x1xf32> to vector<32x32xf32>
    %212 = arith.mulf %207, %211 : vector<32x32xf32>
    %213 = vector.extract_strided_slice %194 {offsets = [0, 0], sizes = [32, 8], strides = [1, 1]} : vector<32x32xf32> to vector<32x8xf32>
    %cst_132 = arith.constant dense<0.000000e+00> : vector<32x8xf32>
    %214 = tpu.matmul %212, %213, %cst_132 {dimension_numbers = #tpu.dot_dimension_numbers<[1], [0], [0], [1], [0, 0, 1, 1], [], []>} : vector<32x32xf32>, vector<32x8xf32>, vector<32x8xf32> -> vector<32x8xf32>
    %215 = vector.extract_strided_slice %4 {offsets = [0, 0], sizes = [8, 32], strides = [1, 1]} : vector<32x32xf32> to vector<8x32xf32>
    %cst_133 = arith.constant dense<0.000000e+00> : vector<32x32xf32>
    %216 = tpu.matmul %214, %215, %cst_133 {dimension_numbers = #tpu.dot_dimension_numbers<[1], [0], [0], [1], [0, 0, 1, 1], [], []>} : vector<32x8xf32>, vector<8x32xf32>, vector<32x32xf32> -> vector<32x32xf32>
    %217 = vector.extract_strided_slice %198 {offsets = [0, 8], sizes = [32, 8], strides = [1, 1]} : vector<32x32xf32> to vector<32x8xf32>
    %218 = vector.extract_strided_slice %196 {offsets = [0, 8], sizes = [32, 8], strides = [1, 1]} : vector<32x32xf32> to vector<32x8xf32>
    %cst_134 = arith.constant dense<0.000000e+00> : vector<32x32xf32>
    %219 = tpu.matmul %217, %218, %cst_134 {dimension_numbers = #tpu.dot_dimension_numbers<[1], [1], [0], [0], [0, 0, 1, 0], [], []>} : vector<32x8xf32>, vector<32x8xf32>, vector<32x32xf32> -> vector<32x32xf32>
    %220 = arith.addf %219, %43 : vector<32x32xf32>
    %cst_135 = arith.constant dense<0xFF800000> : vector<32xf32>
    %221 = vector.multi_reduction <maximumf>, %220, %cst_135 [1] : vector<32x32xf32> to vector<32xf32>
    %222 = vector.shape_cast %221 : vector<32xf32> to vector<32x1xf32>
    %223 = vector.broadcast %222 : vector<32x1xf32> to vector<32x32xf32>
    %224 = arith.subf %220, %223 : vector<32x32xf32>
    %225 = math.exp %224 : vector<32x32xf32>
    %cst_136 = arith.constant dense<0.000000e+00> : vector<32xf32>
    %226 = vector.multi_reduction <add>, %225, %cst_136 [1] : vector<32x32xf32> to vector<32xf32>
    %227 = vector.shape_cast %226 : vector<32xf32> to vector<32x1xf32>
    %228 = tpu.reciprocal %227 {approx = true} : vector<32x1xf32> -> vector<32x1xf32>
    %229 = vector.broadcast %228 : vector<32x1xf32> to vector<32x32xf32>
    %230 = arith.mulf %225, %229 : vector<32x32xf32>
    %231 = vector.extract_strided_slice %194 {offsets = [0, 8], sizes = [32, 8], strides = [1, 1]} : vector<32x32xf32> to vector<32x8xf32>
    %cst_137 = arith.constant dense<0.000000e+00> : vector<32x8xf32>
    %232 = tpu.matmul %230, %231, %cst_137 {dimension_numbers = #tpu.dot_dimension_numbers<[1], [0], [0], [1], [0, 0, 1, 1], [], []>} : vector<32x32xf32>, vector<32x8xf32>, vector<32x8xf32> -> vector<32x8xf32>
    %233 = vector.extract_strided_slice %4 {offsets = [8, 0], sizes = [8, 32], strides = [1, 1]} : vector<32x32xf32> to vector<8x32xf32>
    %cst_138 = arith.constant dense<0.000000e+00> : vector<32x32xf32>
    %234 = tpu.matmul %232, %233, %cst_138 {dimension_numbers = #tpu.dot_dimension_numbers<[1], [0], [0], [1], [0, 0, 1, 1], [], []>} : vector<32x8xf32>, vector<8x32xf32>, vector<32x32xf32> -> vector<32x32xf32>
    %235 = arith.addf %216, %234 : vector<32x32xf32>
    %236 = vector.extract_strided_slice %198 {offsets = [0, 16], sizes = [32, 8], strides = [1, 1]} : vector<32x32xf32> to vector<32x8xf32>
    %237 = vector.extract_strided_slice %196 {offsets = [0, 16], sizes = [32, 8], strides = [1, 1]} : vector<32x32xf32> to vector<32x8xf32>
    %cst_139 = arith.constant dense<0.000000e+00> : vector<32x32xf32>
    %238 = tpu.matmul %236, %237, %cst_139 {dimension_numbers = #tpu.dot_dimension_numbers<[1], [1], [0], [0], [0, 0, 1, 0], [], []>} : vector<32x8xf32>, vector<32x8xf32>, vector<32x32xf32> -> vector<32x32xf32>
    %239 = arith.addf %238, %43 : vector<32x32xf32>
    %cst_140 = arith.constant dense<0xFF800000> : vector<32xf32>
    %240 = vector.multi_reduction <maximumf>, %239, %cst_140 [1] : vector<32x32xf32> to vector<32xf32>
    %241 = vector.shape_cast %240 : vector<32xf32> to vector<32x1xf32>
    %242 = vector.broadcast %241 : vector<32x1xf32> to vector<32x32xf32>
    %243 = arith.subf %239, %242 : vector<32x32xf32>
    %244 = math.exp %243 : vector<32x32xf32>
    %cst_141 = arith.constant dense<0.000000e+00> : vector<32xf32>
    %245 = vector.multi_reduction <add>, %244, %cst_141 [1] : vector<32x32xf32> to vector<32xf32>
    %246 = vector.shape_cast %245 : vector<32xf32> to vector<32x1xf32>
    %247 = tpu.reciprocal %246 {approx = true} : vector<32x1xf32> -> vector<32x1xf32>
    %248 = vector.broadcast %247 : vector<32x1xf32> to vector<32x32xf32>
    %249 = arith.mulf %244, %248 : vector<32x32xf32>
    %250 = vector.extract_strided_slice %194 {offsets = [0, 16], sizes = [32, 8], strides = [1, 1]} : vector<32x32xf32> to vector<32x8xf32>
    %cst_142 = arith.constant dense<0.000000e+00> : vector<32x8xf32>
    %251 = tpu.matmul %249, %250, %cst_142 {dimension_numbers = #tpu.dot_dimension_numbers<[1], [0], [0], [1], [0, 0, 1, 1], [], []>} : vector<32x32xf32>, vector<32x8xf32>, vector<32x8xf32> -> vector<32x8xf32>
    %252 = vector.extract_strided_slice %4 {offsets = [16, 0], sizes = [8, 32], strides = [1, 1]} : vector<32x32xf32> to vector<8x32xf32>
    %cst_143 = arith.constant dense<0.000000e+00> : vector<32x32xf32>
    %253 = tpu.matmul %251, %252, %cst_143 {dimension_numbers = #tpu.dot_dimension_numbers<[1], [0], [0], [1], [0, 0, 1, 1], [], []>} : vector<32x8xf32>, vector<8x32xf32>, vector<32x32xf32> -> vector<32x32xf32>
    %254 = arith.addf %235, %253 : vector<32x32xf32>
    %255 = vector.extract_strided_slice %198 {offsets = [0, 24], sizes = [32, 8], strides = [1, 1]} : vector<32x32xf32> to vector<32x8xf32>
    %256 = vector.extract_strided_slice %196 {offsets = [0, 24], sizes = [32, 8], strides = [1, 1]} : vector<32x32xf32> to vector<32x8xf32>
    %cst_144 = arith.constant dense<0.000000e+00> : vector<32x32xf32>
    %257 = tpu.matmul %255, %256, %cst_144 {dimension_numbers = #tpu.dot_dimension_numbers<[1], [1], [0], [0], [0, 0, 1, 0], [], []>} : vector<32x8xf32>, vector<32x8xf32>, vector<32x32xf32> -> vector<32x32xf32>
    %258 = arith.addf %257, %43 : vector<32x32xf32>
    %cst_145 = arith.constant dense<0xFF800000> : vector<32xf32>
    %259 = vector.multi_reduction <maximumf>, %258, %cst_145 [1] : vector<32x32xf32> to vector<32xf32>
    %260 = vector.shape_cast %259 : vector<32xf32> to vector<32x1xf32>
    %261 = vector.broadcast %260 : vector<32x1xf32> to vector<32x32xf32>
    %262 = arith.subf %258, %261 : vector<32x32xf32>
    %263 = math.exp %262 : vector<32x32xf32>
    %cst_146 = arith.constant dense<0.000000e+00> : vector<32xf32>
    %264 = vector.multi_reduction <add>, %263, %cst_146 [1] : vector<32x32xf32> to vector<32xf32>
    %265 = vector.shape_cast %264 : vector<32xf32> to vector<32x1xf32>
    %266 = tpu.reciprocal %265 {approx = true} : vector<32x1xf32> -> vector<32x1xf32>
    %267 = vector.broadcast %266 : vector<32x1xf32> to vector<32x32xf32>
    %268 = arith.mulf %263, %267 : vector<32x32xf32>
    %269 = vector.extract_strided_slice %194 {offsets = [0, 24], sizes = [32, 8], strides = [1, 1]} : vector<32x32xf32> to vector<32x8xf32>
    %cst_147 = arith.constant dense<0.000000e+00> : vector<32x8xf32>
    %270 = tpu.matmul %268, %269, %cst_147 {dimension_numbers = #tpu.dot_dimension_numbers<[1], [0], [0], [1], [0, 0, 1, 1], [], []>} : vector<32x32xf32>, vector<32x8xf32>, vector<32x8xf32> -> vector<32x8xf32>
    %271 = vector.extract_strided_slice %4 {offsets = [24, 0], sizes = [8, 32], strides = [1, 1]} : vector<32x32xf32> to vector<8x32xf32>
    %cst_148 = arith.constant dense<0.000000e+00> : vector<32x32xf32>
    %272 = tpu.matmul %270, %271, %cst_148 {dimension_numbers = #tpu.dot_dimension_numbers<[1], [0], [0], [1], [0, 0, 1, 1], [], []>} : vector<32x8xf32>, vector<8x32xf32>, vector<32x32xf32> -> vector<32x32xf32>
    %273 = arith.addf %254, %272 : vector<32x32xf32>
    %274 = vector.broadcast %5 : vector<1x32xf32> to vector<32x32xf32>
    %275 = arith.addf %273, %274 : vector<32x32xf32>
    %276 = arith.addf %187, %275 : vector<32x32xf32>
    %cst_149 = arith.constant dense<0.000000e+00> : vector<32xf32>
    %277 = vector.multi_reduction <add>, %276, %cst_149 [1] : vector<32x32xf32> to vector<32xf32>
    %278 = vector.shape_cast %277 : vector<32xf32> to vector<32x1xf32>
    %cst_150 = arith.constant 3.200000e+01 : f32
    %279 = vector.broadcast %cst_150 : f32 to vector<32x1xf32>
    %280 = arith.divf %278, %279 : vector<32x1xf32>
    %281 = vector.broadcast %280 : vector<32x1xf32> to vector<32x32xf32>
    %282 = arith.subf %276, %281 : vector<32x32xf32>
    %283 = arith.mulf %282, %282 : vector<32x32xf32>
    %cst_151 = arith.constant dense<0.000000e+00> : vector<32xf32>
    %284 = vector.multi_reduction <add>, %283, %cst_151 [1] : vector<32x32xf32> to vector<32xf32>
    %285 = vector.shape_cast %284 : vector<32xf32> to vector<32x1xf32>
    %cst_152 = arith.constant 3.200000e+01 : f32
    %286 = vector.broadcast %cst_152 : f32 to vector<32x1xf32>
    %287 = arith.divf %285, %286 : vector<32x1xf32>
    %288 = vector.broadcast %280 : vector<32x1xf32> to vector<32x32xf32>
    %289 = arith.subf %276, %288 : vector<32x32xf32>
    %cst_153 = arith.constant 9.99999974E-6 : f32
    %290 = vector.broadcast %cst_153 : f32 to vector<32x1xf32>
    %291 = arith.addf %287, %290 : vector<32x1xf32>
    %292 = math.rsqrt %291 : vector<32x1xf32>
    %293 = vector.broadcast %292 : vector<32x1xf32> to vector<32x32xf32>
    %294 = arith.mulf %289, %293 : vector<32x32xf32>
    %295 = vector.broadcast %6 : vector<1x32xf32> to vector<32x32xf32>
    %296 = arith.mulf %294, %295 : vector<32x32xf32>
    %297 = vector.broadcast %7 : vector<1x32xf32> to vector<32x32xf32>
    %298 = arith.addf %296, %297 : vector<32x32xf32>
    %cst_154 = arith.constant dense<0.000000e+00> : vector<32x64xf32>
    %299 = tpu.matmul %298, %8, %cst_154 {dimension_numbers = #tpu.dot_dimension_numbers<[1], [0], [0], [1], [0, 0, 1, 1], [], []>} : vector<32x32xf32>, vector<32x64xf32>, vector<32x64xf32> -> vector<32x64xf32>
    %300 = vector.broadcast %9 : vector<1x64xf32> to vector<32x64xf32>
    %301 = arith.addf %299, %300 : vector<32x64xf32>
    %cst_155 = arith.constant 0.000000e+00 : f32
    %302 = vector.broadcast %cst_155 : f32 to vector<32x64xf32>
    %303 = arith.maximumf %301, %302 : vector<32x64xf32>
    %cst_156 = arith.constant dense<0.000000e+00> : vector<32x32xf32>
    %304 = tpu.matmul %303, %10, %cst_156 {dimension_numbers = #tpu.dot_dimension_numbers<[1], [0], [0], [1], [0, 0, 1, 1], [], []>} : vector<32x64xf32>, vector<64x32xf32>, vector<32x32xf32> -> vector<32x32xf32>
    %305 = vector.broadcast %11 : vector<1x32xf32> to vector<32x32xf32>
    %306 = arith.addf %304, %305 : vector<32x32xf32>
    %307 = arith.addf %298, %306 : vector<32x32xf32>
    %cst_157 = arith.constant dense<0.000000e+00> : vector<32xf32>
    %308 = vector.multi_reduction <add>, %307, %cst_157 [1] : vector<32x32xf32> to vector<32xf32>
    %309 = vector.shape_cast %308 : vector<32xf32> to vector<32x1xf32>
    %cst_158 = arith.constant 3.200000e+01 : f32
    %310 = vector.broadcast %cst_158 : f32 to vector<32x1xf32>
    %311 = arith.divf %309, %310 : vector<32x1xf32>
    %312 = vector.broadcast %311 : vector<32x1xf32> to vector<32x32xf32>
    %313 = arith.subf %307, %312 : vector<32x32xf32>
    %314 = arith.mulf %313, %313 : vector<32x32xf32>
    %cst_159 = arith.constant dense<0.000000e+00> : vector<32xf32>
    %315 = vector.multi_reduction <add>, %314, %cst_159 [1] : vector<32x32xf32> to vector<32xf32>
    %316 = vector.shape_cast %315 : vector<32xf32> to vector<32x1xf32>
    %cst_160 = arith.constant 3.200000e+01 : f32
    %317 = vector.broadcast %cst_160 : f32 to vector<32x1xf32>
    %318 = arith.divf %316, %317 : vector<32x1xf32>
    %319 = vector.broadcast %311 : vector<32x1xf32> to vector<32x32xf32>
    %320 = arith.subf %307, %319 : vector<32x32xf32>
    %cst_161 = arith.constant 9.99999974E-6 : f32
    %321 = vector.broadcast %cst_161 : f32 to vector<32x1xf32>
    %322 = arith.addf %318, %321 : vector<32x1xf32>
    %323 = math.rsqrt %322 : vector<32x1xf32>
    %324 = vector.broadcast %323 : vector<32x1xf32> to vector<32x32xf32>
    %325 = arith.mulf %320, %324 : vector<32x32xf32>
    %326 = vector.broadcast %12 : vector<1x32xf32> to vector<32x32xf32>
    %327 = arith.mulf %325, %326 : vector<32x32xf32>
    %328 = vector.broadcast %13 : vector<1x32xf32> to vector<32x32xf32>
    %329 = arith.addf %327, %328 : vector<32x32xf32>
    %c0_162 = arith.constant 0 : index
    %c0_163 = arith.constant 0 : index
    %330 = vector.load %arg48[%c0_162, %c0_163] : memref<32x32xf32, #tpu.memory_space<vmem>>, vector<32x32xf32>
    tpu.vector_store %arg48[%c0_162, %c0_163], %329 {strides = array<i32>} : memref<32x32xf32, #tpu.memory_space<vmem>>, vector<32x32xf32>,
    %331 = arith.addf %329, %41 : vector<32x32xf32>
    %cst_164 = arith.constant dense<0.000000e+00> : vector<32x32xf32>
    %332 = tpu.matmul %331, %24, %cst_164 {dimension_numbers = #tpu.dot_dimension_numbers<[1], [0], [0], [1], [0, 0, 1, 1], [], []>} : vector<32x32xf32>, vector<32x32xf32>, vector<32x32xf32> -> vector<32x32xf32>
    %333 = vector.broadcast %25 : vector<1x32xf32> to vector<32x32xf32>
    %334 = arith.addf %332, %333 : vector<32x32xf32>
    %cst_165 = arith.constant dense<0.000000e+00> : vector<32x32xf32>
    %335 = tpu.matmul %329, %26, %cst_165 {dimension_numbers = #tpu.dot_dimension_numbers<[1], [0], [0], [1], [0, 0, 1, 1], [], []>} : vector<32x32xf32>, vector<32x32xf32>, vector<32x32xf32> -> vector<32x32xf32>
    %336 = vector.broadcast %27 : vector<1x32xf32> to vector<32x32xf32>
    %337 = arith.addf %335, %336 : vector<32x32xf32>
    %cst_166 = arith.constant 0.000000e+00 : f32
    %338 = vector.broadcast %cst_166 : f32 to vector<16x32xf32>
    %339 = arith.addf %338, %42 : vector<16x32xf32>
    %cst_167 = arith.constant dense<0.000000e+00> : vector<16x64xf32>
    %340 = tpu.matmul %339, %14, %cst_167 {dimension_numbers = #tpu.dot_dimension_numbers<[1], [0], [0], [1], [0, 0, 1, 1], [], []>} : vector<16x32xf32>, vector<32x64xf32>, vector<16x64xf32> -> vector<16x64xf32>
    %341 = vector.broadcast %15 : vector<1x64xf32> to vector<16x64xf32>
    %342 = arith.addf %340, %341 : vector<16x64xf32>
    %cst_168 = arith.constant dense<0.000000e+00> : vector<16x32xf32>
    %343 = tpu.matmul %338, %16, %cst_168 {dimension_numbers = #tpu.dot_dimension_numbers<[1], [0], [0], [1], [0, 0, 1, 1], [], []>} : vector<16x32xf32>, vector<32x32xf32>, vector<16x32xf32> -> vector<16x32xf32>
    %344 = vector.broadcast %17 : vector<1x32xf32> to vector<16x32xf32>
    %345 = arith.addf %343, %344 : vector<16x32xf32>
    %346 = vector.extract_strided_slice %342 {offsets = [0, 0], sizes = [16, 32], strides = [1, 1]} : vector<16x64xf32> to vector<16x32xf32>
    %347 = vector.extract_strided_slice %342 {offsets = [0, 32], sizes = [16, 32], strides = [1, 1]} : vector<16x64xf32> to vector<16x32xf32>
    %cst_169 = arith.constant 0.353553385 : f32
    %348 = vector.broadcast %cst_169 : f32 to vector<16x32xf32>
    %349 = arith.mulf %346, %348 : vector<16x32xf32>
    %350 = vector.extract_strided_slice %349 {offsets = [0, 0], sizes = [16, 8], strides = [1, 1]} : vector<16x32xf32> to vector<16x8xf32>
    %351 = vector.extract_strided_slice %347 {offsets = [0, 0], sizes = [16, 8], strides = [1, 1]} : vector<16x32xf32> to vector<16x8xf32>
    %cst_170 = arith.constant dense<0.000000e+00> : vector<16x16xf32>
    %352 = tpu.matmul %350, %351, %cst_170 {dimension_numbers = #tpu.dot_dimension_numbers<[1], [1], [0], [0], [0, 0, 1, 0], [], []>} : vector<16x8xf32>, vector<16x8xf32>, vector<16x16xf32> -> vector<16x16xf32>
    %353 = arith.addf %352, %44 : vector<16x16xf32>
    %cst_171 = arith.constant dense<0xFF800000> : vector<16xf32>
    %354 = vector.multi_reduction <maximumf>, %353, %cst_171 [1] : vector<16x16xf32> to vector<16xf32>
    %355 = vector.shape_cast %354 : vector<16xf32> to vector<16x1xf32>
    %356 = vector.broadcast %355 : vector<16x1xf32> to vector<16x16xf32>
    %357 = arith.subf %353, %356 : vector<16x16xf32>
    %358 = math.exp %357 : vector<16x16xf32>
    %cst_172 = arith.constant dense<0.000000e+00> : vector<16xf32>
    %359 = vector.multi_reduction <add>, %358, %cst_172 [1] : vector<16x16xf32> to vector<16xf32>
    %360 = vector.shape_cast %359 : vector<16xf32> to vector<16x1xf32>
    %361 = tpu.reciprocal %360 {approx = true} : vector<16x1xf32> -> vector<16x1xf32>
    %362 = vector.broadcast %361 : vector<16x1xf32> to vector<16x16xf32>
    %363 = arith.mulf %358, %362 : vector<16x16xf32>
    %364 = vector.extract_strided_slice %345 {offsets = [0, 0], sizes = [16, 8], strides = [1, 1]} : vector<16x32xf32> to vector<16x8xf32>
    %cst_173 = arith.constant dense<0.000000e+00> : vector<16x8xf32>
    %365 = tpu.matmul %363, %364, %cst_173 {dimension_numbers = #tpu.dot_dimension_numbers<[1], [0], [0], [1], [0, 0, 1, 1], [], []>} : vector<16x16xf32>, vector<16x8xf32>, vector<16x8xf32> -> vector<16x8xf32>
    %366 = vector.extract_strided_slice %18 {offsets = [0, 0], sizes = [8, 32], strides = [1, 1]} : vector<32x32xf32> to vector<8x32xf32>
    %cst_174 = arith.constant dense<0.000000e+00> : vector<16x32xf32>
    %367 = tpu.matmul %365, %366, %cst_174 {dimension_numbers = #tpu.dot_dimension_numbers<[1], [0], [0], [1], [0, 0, 1, 1], [], []>} : vector<16x8xf32>, vector<8x32xf32>, vector<16x32xf32> -> vector<16x32xf32>
    %368 = vector.extract_strided_slice %349 {offsets = [0, 8], sizes = [16, 8], strides = [1, 1]} : vector<16x32xf32> to vector<16x8xf32>
    %369 = vector.extract_strided_slice %347 {offsets = [0, 8], sizes = [16, 8], strides = [1, 1]} : vector<16x32xf32> to vector<16x8xf32>
    %cst_175 = arith.constant dense<0.000000e+00> : vector<16x16xf32>
    %370 = tpu.matmul %368, %369, %cst_175 {dimension_numbers = #tpu.dot_dimension_numbers<[1], [1], [0], [0], [0, 0, 1, 0], [], []>} : vector<16x8xf32>, vector<16x8xf32>, vector<16x16xf32> -> vector<16x16xf32>
    %371 = arith.addf %370, %44 : vector<16x16xf32>
    %cst_176 = arith.constant dense<0xFF800000> : vector<16xf32>
    %372 = vector.multi_reduction <maximumf>, %371, %cst_176 [1] : vector<16x16xf32> to vector<16xf32>
    %373 = vector.shape_cast %372 : vector<16xf32> to vector<16x1xf32>
    %374 = vector.broadcast %373 : vector<16x1xf32> to vector<16x16xf32>
    %375 = arith.subf %371, %374 : vector<16x16xf32>
    %376 = math.exp %375 : vector<16x16xf32>
    %cst_177 = arith.constant dense<0.000000e+00> : vector<16xf32>
    %377 = vector.multi_reduction <add>, %376, %cst_177 [1] : vector<16x16xf32> to vector<16xf32>
    %378 = vector.shape_cast %377 : vector<16xf32> to vector<16x1xf32>
    %379 = tpu.reciprocal %378 {approx = true} : vector<16x1xf32> -> vector<16x1xf32>
    %380 = vector.broadcast %379 : vector<16x1xf32> to vector<16x16xf32>
    %381 = arith.mulf %376, %380 : vector<16x16xf32>
    %382 = vector.extract_strided_slice %345 {offsets = [0, 8], sizes = [16, 8], strides = [1, 1]} : vector<16x32xf32> to vector<16x8xf32>
    %cst_178 = arith.constant dense<0.000000e+00> : vector<16x8xf32>
    %383 = tpu.matmul %381, %382, %cst_178 {dimension_numbers = #tpu.dot_dimension_numbers<[1], [0], [0], [1], [0, 0, 1, 1], [], []>} : vector<16x16xf32>, vector<16x8xf32>, vector<16x8xf32> -> vector<16x8xf32>
    %384 = vector.extract_strided_slice %18 {offsets = [8, 0], sizes = [8, 32], strides = [1, 1]} : vector<32x32xf32> to vector<8x32xf32>
    %cst_179 = arith.constant dense<0.000000e+00> : vector<16x32xf32>
    %385 = tpu.matmul %383, %384, %cst_179 {dimension_numbers = #tpu.dot_dimension_numbers<[1], [0], [0], [1], [0, 0, 1, 1], [], []>} : vector<16x8xf32>, vector<8x32xf32>, vector<16x32xf32> -> vector<16x32xf32>
    %386 = arith.addf %367, %385 : vector<16x32xf32>
    %387 = vector.extract_strided_slice %349 {offsets = [0, 16], sizes = [16, 8], strides = [1, 1]} : vector<16x32xf32> to vector<16x8xf32>
    %388 = vector.extract_strided_slice %347 {offsets = [0, 16], sizes = [16, 8], strides = [1, 1]} : vector<16x32xf32> to vector<16x8xf32>
    %cst_180 = arith.constant dense<0.000000e+00> : vector<16x16xf32>
    %389 = tpu.matmul %387, %388, %cst_180 {dimension_numbers = #tpu.dot_dimension_numbers<[1], [1], [0], [0], [0, 0, 1, 0], [], []>} : vector<16x8xf32>, vector<16x8xf32>, vector<16x16xf32> -> vector<16x16xf32>
    %390 = arith.addf %389, %44 : vector<16x16xf32>
    %cst_181 = arith.constant dense<0xFF800000> : vector<16xf32>
    %391 = vector.multi_reduction <maximumf>, %390, %cst_181 [1] : vector<16x16xf32> to vector<16xf32>
    %392 = vector.shape_cast %391 : vector<16xf32> to vector<16x1xf32>
    %393 = vector.broadcast %392 : vector<16x1xf32> to vector<16x16xf32>
    %394 = arith.subf %390, %393 : vector<16x16xf32>
    %395 = math.exp %394 : vector<16x16xf32>
    %cst_182 = arith.constant dense<0.000000e+00> : vector<16xf32>
    %396 = vector.multi_reduction <add>, %395, %cst_182 [1] : vector<16x16xf32> to vector<16xf32>
    %397 = vector.shape_cast %396 : vector<16xf32> to vector<16x1xf32>
    %398 = tpu.reciprocal %397 {approx = true} : vector<16x1xf32> -> vector<16x1xf32>
    %399 = vector.broadcast %398 : vector<16x1xf32> to vector<16x16xf32>
    %400 = arith.mulf %395, %399 : vector<16x16xf32>
    %401 = vector.extract_strided_slice %345 {offsets = [0, 16], sizes = [16, 8], strides = [1, 1]} : vector<16x32xf32> to vector<16x8xf32>
    %cst_183 = arith.constant dense<0.000000e+00> : vector<16x8xf32>
    %402 = tpu.matmul %400, %401, %cst_183 {dimension_numbers = #tpu.dot_dimension_numbers<[1], [0], [0], [1], [0, 0, 1, 1], [], []>} : vector<16x16xf32>, vector<16x8xf32>, vector<16x8xf32> -> vector<16x8xf32>
    %403 = vector.extract_strided_slice %18 {offsets = [16, 0], sizes = [8, 32], strides = [1, 1]} : vector<32x32xf32> to vector<8x32xf32>
    %cst_184 = arith.constant dense<0.000000e+00> : vector<16x32xf32>
    %404 = tpu.matmul %402, %403, %cst_184 {dimension_numbers = #tpu.dot_dimension_numbers<[1], [0], [0], [1], [0, 0, 1, 1], [], []>} : vector<16x8xf32>, vector<8x32xf32>, vector<16x32xf32> -> vector<16x32xf32>
    %405 = arith.addf %386, %404 : vector<16x32xf32>
    %406 = vector.extract_strided_slice %349 {offsets = [0, 24], sizes = [16, 8], strides = [1, 1]} : vector<16x32xf32> to vector<16x8xf32>
    %407 = vector.extract_strided_slice %347 {offsets = [0, 24], sizes = [16, 8], strides = [1, 1]} : vector<16x32xf32> to vector<16x8xf32>
    %cst_185 = arith.constant dense<0.000000e+00> : vector<16x16xf32>
    %408 = tpu.matmul %406, %407, %cst_185 {dimension_numbers = #tpu.dot_dimension_numbers<[1], [1], [0], [0], [0, 0, 1, 0], [], []>} : vector<16x8xf32>, vector<16x8xf32>, vector<16x16xf32> -> vector<16x16xf32>
    %409 = arith.addf %408, %44 : vector<16x16xf32>
    %cst_186 = arith.constant dense<0xFF800000> : vector<16xf32>
    %410 = vector.multi_reduction <maximumf>, %409, %cst_186 [1] : vector<16x16xf32> to vector<16xf32>
    %411 = vector.shape_cast %410 : vector<16xf32> to vector<16x1xf32>
    %412 = vector.broadcast %411 : vector<16x1xf32> to vector<16x16xf32>
    %413 = arith.subf %409, %412 : vector<16x16xf32>
    %414 = math.exp %413 : vector<16x16xf32>
    %cst_187 = arith.constant dense<0.000000e+00> : vector<16xf32>
    %415 = vector.multi_reduction <add>, %414, %cst_187 [1] : vector<16x16xf32> to vector<16xf32>
    %416 = vector.shape_cast %415 : vector<16xf32> to vector<16x1xf32>
    %417 = tpu.reciprocal %416 {approx = true} : vector<16x1xf32> -> vector<16x1xf32>
    %418 = vector.broadcast %417 : vector<16x1xf32> to vector<16x16xf32>
    %419 = arith.mulf %414, %418 : vector<16x16xf32>
    %420 = vector.extract_strided_slice %345 {offsets = [0, 24], sizes = [16, 8], strides = [1, 1]} : vector<16x32xf32> to vector<16x8xf32>
    %cst_188 = arith.constant dense<0.000000e+00> : vector<16x8xf32>
    %421 = tpu.matmul %419, %420, %cst_188 {dimension_numbers = #tpu.dot_dimension_numbers<[1], [0], [0], [1], [0, 0, 1, 1], [], []>} : vector<16x16xf32>, vector<16x8xf32>, vector<16x8xf32> -> vector<16x8xf32>
    %422 = vector.extract_strided_slice %18 {offsets = [24, 0], sizes = [8, 32], strides = [1, 1]} : vector<32x32xf32> to vector<8x32xf32>
    %cst_189 = arith.constant dense<0.000000e+00> : vector<16x32xf32>
    %423 = tpu.matmul %421, %422, %cst_189 {dimension_numbers = #tpu.dot_dimension_numbers<[1], [0], [0], [1], [0, 0, 1, 1], [], []>} : vector<16x8xf32>, vector<8x32xf32>, vector<16x32xf32> -> vector<16x32xf32>
    %424 = arith.addf %405, %423 : vector<16x32xf32>
    %425 = vector.broadcast %19 : vector<1x32xf32> to vector<16x32xf32>
    %426 = arith.addf %424, %425 : vector<16x32xf32>
    %427 = arith.addf %338, %426 : vector<16x32xf32>
    %cst_190 = arith.constant dense<0.000000e+00> : vector<16xf32>
    %428 = vector.multi_reduction <add>, %427, %cst_190 [1] : vector<16x32xf32> to vector<16xf32>
    %429 = vector.shape_cast %428 : vector<16xf32> to vector<16x1xf32>
    %cst_191 = arith.constant 3.200000e+01 : f32
    %430 = vector.broadcast %cst_191 : f32 to vector<16x1xf32>
    %431 = arith.divf %429, %430 : vector<16x1xf32>
    %432 = vector.broadcast %431 : vector<16x1xf32> to vector<16x32xf32>
    %433 = arith.subf %427, %432 : vector<16x32xf32>
    %434 = arith.mulf %433, %433 : vector<16x32xf32>
    %cst_192 = arith.constant dense<0.000000e+00> : vector<16xf32>
    %435 = vector.multi_reduction <add>, %434, %cst_192 [1] : vector<16x32xf32> to vector<16xf32>
    %436 = vector.shape_cast %435 : vector<16xf32> to vector<16x1xf32>
    %cst_193 = arith.constant 3.200000e+01 : f32
    %437 = vector.broadcast %cst_193 : f32 to vector<16x1xf32>
    %438 = arith.divf %436, %437 : vector<16x1xf32>
    %439 = vector.broadcast %431 : vector<16x1xf32> to vector<16x32xf32>
    %440 = arith.subf %427, %439 : vector<16x32xf32>
    %cst_194 = arith.constant 9.99999974E-6 : f32
    %441 = vector.broadcast %cst_194 : f32 to vector<16x1xf32>
    %442 = arith.addf %438, %441 : vector<16x1xf32>
    %443 = math.rsqrt %442 : vector<16x1xf32>
    %444 = vector.broadcast %443 : vector<16x1xf32> to vector<16x32xf32>
    %445 = arith.mulf %440, %444 : vector<16x32xf32>
    %446 = vector.broadcast %20 : vector<1x32xf32> to vector<16x32xf32>
    %447 = arith.mulf %445, %446 : vector<16x32xf32>
    %448 = vector.broadcast %21 : vector<1x32xf32> to vector<16x32xf32>
    %449 = arith.addf %447, %448 : vector<16x32xf32>
    %450 = arith.addf %449, %42 : vector<16x32xf32>
    %cst_195 = arith.constant dense<0.000000e+00> : vector<16x32xf32>
    %451 = tpu.matmul %450, %22, %cst_195 {dimension_numbers = #tpu.dot_dimension_numbers<[1], [0], [0], [1], [0, 0, 1, 1], [], []>} : vector<16x32xf32>, vector<32x32xf32>, vector<16x32xf32> -> vector<16x32xf32>
    %452 = vector.broadcast %23 : vector<1x32xf32> to vector<16x32xf32>
    %453 = arith.addf %451, %452 : vector<16x32xf32>
    %cst_196 = arith.constant 0.353553385 : f32
    %454 = vector.broadcast %cst_196 : f32 to vector<16x32xf32>
    %455 = arith.mulf %453, %454 : vector<16x32xf32>
    %456 = vector.extract_strided_slice %455 {offsets = [0, 0], sizes = [16, 8], strides = [1, 1]} : vector<16x32xf32> to vector<16x8xf32>
    %457 = vector.extract_strided_slice %334 {offsets = [0, 0], sizes = [32, 8], strides = [1, 1]} : vector<32x32xf32> to vector<32x8xf32>
    %cst_197 = arith.constant dense<0.000000e+00> : vector<16x32xf32>
    %458 = tpu.matmul %456, %457, %cst_197 {dimension_numbers = #tpu.dot_dimension_numbers<[1], [1], [0], [0], [0, 0, 1, 0], [], []>} : vector<16x8xf32>, vector<32x8xf32>, vector<16x32xf32> -> vector<16x32xf32>
    %459 = arith.addf %458, %45 : vector<16x32xf32>
    %cst_198 = arith.constant dense<0xFF800000> : vector<16xf32>
    %460 = vector.multi_reduction <maximumf>, %459, %cst_198 [1] : vector<16x32xf32> to vector<16xf32>
    %461 = vector.shape_cast %460 : vector<16xf32> to vector<16x1xf32>
    %462 = vector.broadcast %461 : vector<16x1xf32> to vector<16x32xf32>
    %463 = arith.subf %459, %462 : vector<16x32xf32>
    %464 = math.exp %463 : vector<16x32xf32>
    %cst_199 = arith.constant dense<0.000000e+00> : vector<16xf32>
    %465 = vector.multi_reduction <add>, %464, %cst_199 [1] : vector<16x32xf32> to vector<16xf32>
    %466 = vector.shape_cast %465 : vector<16xf32> to vector<16x1xf32>
    %467 = tpu.reciprocal %466 {approx = true} : vector<16x1xf32> -> vector<16x1xf32>
    %468 = vector.broadcast %467 : vector<16x1xf32> to vector<16x32xf32>
    %469 = arith.mulf %464, %468 : vector<16x32xf32>
    %470 = vector.extract_strided_slice %337 {offsets = [0, 0], sizes = [32, 8], strides = [1, 1]} : vector<32x32xf32> to vector<32x8xf32>
    %cst_200 = arith.constant dense<0.000000e+00> : vector<16x8xf32>
    %471 = tpu.matmul %469, %470, %cst_200 {dimension_numbers = #tpu.dot_dimension_numbers<[1], [0], [0], [1], [0, 0, 1, 1], [], []>} : vector<16x32xf32>, vector<32x8xf32>, vector<16x8xf32> -> vector<16x8xf32>
    %472 = vector.extract_strided_slice %28 {offsets = [0, 0], sizes = [8, 32], strides = [1, 1]} : vector<32x32xf32> to vector<8x32xf32>
    %cst_201 = arith.constant dense<0.000000e+00> : vector<16x32xf32>
    %473 = tpu.matmul %471, %472, %cst_201 {dimension_numbers = #tpu.dot_dimension_numbers<[1], [0], [0], [1], [0, 0, 1, 1], [], []>} : vector<16x8xf32>, vector<8x32xf32>, vector<16x32xf32> -> vector<16x32xf32>
    %474 = vector.extract_strided_slice %455 {offsets = [0, 8], sizes = [16, 8], strides = [1, 1]} : vector<16x32xf32> to vector<16x8xf32>
    %475 = vector.extract_strided_slice %334 {offsets = [0, 8], sizes = [32, 8], strides = [1, 1]} : vector<32x32xf32> to vector<32x8xf32>
    %cst_202 = arith.constant dense<0.000000e+00> : vector<16x32xf32>
    %476 = tpu.matmul %474, %475, %cst_202 {dimension_numbers = #tpu.dot_dimension_numbers<[1], [1], [0], [0], [0, 0, 1, 0], [], []>} : vector<16x8xf32>, vector<32x8xf32>, vector<16x32xf32> -> vector<16x32xf32>
    %477 = arith.addf %476, %45 : vector<16x32xf32>
    %cst_203 = arith.constant dense<0xFF800000> : vector<16xf32>
    %478 = vector.multi_reduction <maximumf>, %477, %cst_203 [1] : vector<16x32xf32> to vector<16xf32>
    %479 = vector.shape_cast %478 : vector<16xf32> to vector<16x1xf32>
    %480 = vector.broadcast %479 : vector<16x1xf32> to vector<16x32xf32>
    %481 = arith.subf %477, %480 : vector<16x32xf32>
    %482 = math.exp %481 : vector<16x32xf32>
    %cst_204 = arith.constant dense<0.000000e+00> : vector<16xf32>
    %483 = vector.multi_reduction <add>, %482, %cst_204 [1] : vector<16x32xf32> to vector<16xf32>
    %484 = vector.shape_cast %483 : vector<16xf32> to vector<16x1xf32>
    %485 = tpu.reciprocal %484 {approx = true} : vector<16x1xf32> -> vector<16x1xf32>
    %486 = vector.broadcast %485 : vector<16x1xf32> to vector<16x32xf32>
    %487 = arith.mulf %482, %486 : vector<16x32xf32>
    %488 = vector.extract_strided_slice %337 {offsets = [0, 8], sizes = [32, 8], strides = [1, 1]} : vector<32x32xf32> to vector<32x8xf32>
    %cst_205 = arith.constant dense<0.000000e+00> : vector<16x8xf32>
    %489 = tpu.matmul %487, %488, %cst_205 {dimension_numbers = #tpu.dot_dimension_numbers<[1], [0], [0], [1], [0, 0, 1, 1], [], []>} : vector<16x32xf32>, vector<32x8xf32>, vector<16x8xf32> -> vector<16x8xf32>
    %490 = vector.extract_strided_slice %28 {offsets = [8, 0], sizes = [8, 32], strides = [1, 1]} : vector<32x32xf32> to vector<8x32xf32>
    %cst_206 = arith.constant dense<0.000000e+00> : vector<16x32xf32>
    %491 = tpu.matmul %489, %490, %cst_206 {dimension_numbers = #tpu.dot_dimension_numbers<[1], [0], [0], [1], [0, 0, 1, 1], [], []>} : vector<16x8xf32>, vector<8x32xf32>, vector<16x32xf32> -> vector<16x32xf32>
    %492 = arith.addf %473, %491 : vector<16x32xf32>
    %493 = vector.extract_strided_slice %455 {offsets = [0, 16], sizes = [16, 8], strides = [1, 1]} : vector<16x32xf32> to vector<16x8xf32>
    %494 = vector.extract_strided_slice %334 {offsets = [0, 16], sizes = [32, 8], strides = [1, 1]} : vector<32x32xf32> to vector<32x8xf32>
    %cst_207 = arith.constant dense<0.000000e+00> : vector<16x32xf32>
    %495 = tpu.matmul %493, %494, %cst_207 {dimension_numbers = #tpu.dot_dimension_numbers<[1], [1], [0], [0], [0, 0, 1, 0], [], []>} : vector<16x8xf32>, vector<32x8xf32>, vector<16x32xf32> -> vector<16x32xf32>
    %496 = arith.addf %495, %45 : vector<16x32xf32>
    %cst_208 = arith.constant dense<0xFF800000> : vector<16xf32>
    %497 = vector.multi_reduction <maximumf>, %496, %cst_208 [1] : vector<16x32xf32> to vector<16xf32>
    %498 = vector.shape_cast %497 : vector<16xf32> to vector<16x1xf32>
    %499 = vector.broadcast %498 : vector<16x1xf32> to vector<16x32xf32>
    %500 = arith.subf %496, %499 : vector<16x32xf32>
    %501 = math.exp %500 : vector<16x32xf32>
    %cst_209 = arith.constant dense<0.000000e+00> : vector<16xf32>
    %502 = vector.multi_reduction <add>, %501, %cst_209 [1] : vector<16x32xf32> to vector<16xf32>
    %503 = vector.shape_cast %502 : vector<16xf32> to vector<16x1xf32>
    %504 = tpu.reciprocal %503 {approx = true} : vector<16x1xf32> -> vector<16x1xf32>
    %505 = vector.broadcast %504 : vector<16x1xf32> to vector<16x32xf32>
    %506 = arith.mulf %501, %505 : vector<16x32xf32>
    %507 = vector.extract_strided_slice %337 {offsets = [0, 16], sizes = [32, 8], strides = [1, 1]} : vector<32x32xf32> to vector<32x8xf32>
    %cst_210 = arith.constant dense<0.000000e+00> : vector<16x8xf32>
    %508 = tpu.matmul %506, %507, %cst_210 {dimension_numbers = #tpu.dot_dimension_numbers<[1], [0], [0], [1], [0, 0, 1, 1], [], []>} : vector<16x32xf32>, vector<32x8xf32>, vector<16x8xf32> -> vector<16x8xf32>
    %509 = vector.extract_strided_slice %28 {offsets = [16, 0], sizes = [8, 32], strides = [1, 1]} : vector<32x32xf32> to vector<8x32xf32>
    %cst_211 = arith.constant dense<0.000000e+00> : vector<16x32xf32>
    %510 = tpu.matmul %508, %509, %cst_211 {dimension_numbers = #tpu.dot_dimension_numbers<[1], [0], [0], [1], [0, 0, 1, 1], [], []>} : vector<16x8xf32>, vector<8x32xf32>, vector<16x32xf32> -> vector<16x32xf32>
    %511 = arith.addf %492, %510 : vector<16x32xf32>
    %512 = vector.extract_strided_slice %455 {offsets = [0, 24], sizes = [16, 8], strides = [1, 1]} : vector<16x32xf32> to vector<16x8xf32>
    %513 = vector.extract_strided_slice %334 {offsets = [0, 24], sizes = [32, 8], strides = [1, 1]} : vector<32x32xf32> to vector<32x8xf32>
    %cst_212 = arith.constant dense<0.000000e+00> : vector<16x32xf32>
    %514 = tpu.matmul %512, %513, %cst_212 {dimension_numbers = #tpu.dot_dimension_numbers<[1], [1], [0], [0], [0, 0, 1, 0], [], []>} : vector<16x8xf32>, vector<32x8xf32>, vector<16x32xf32> -> vector<16x32xf32>
    %515 = arith.addf %514, %45 : vector<16x32xf32>
    %cst_213 = arith.constant dense<0xFF800000> : vector<16xf32>
    %516 = vector.multi_reduction <maximumf>, %515, %cst_213 [1] : vector<16x32xf32> to vector<16xf32>
    %517 = vector.shape_cast %516 : vector<16xf32> to vector<16x1xf32>
    %518 = vector.broadcast %517 : vector<16x1xf32> to vector<16x32xf32>
    %519 = arith.subf %515, %518 : vector<16x32xf32>
    %520 = math.exp %519 : vector<16x32xf32>
    %cst_214 = arith.constant dense<0.000000e+00> : vector<16xf32>
    %521 = vector.multi_reduction <add>, %520, %cst_214 [1] : vector<16x32xf32> to vector<16xf32>
    %522 = vector.shape_cast %521 : vector<16xf32> to vector<16x1xf32>
    %523 = tpu.reciprocal %522 {approx = true} : vector<16x1xf32> -> vector<16x1xf32>
    %524 = vector.broadcast %523 : vector<16x1xf32> to vector<16x32xf32>
    %525 = arith.mulf %520, %524 : vector<16x32xf32>
    %526 = vector.extract_strided_slice %337 {offsets = [0, 24], sizes = [32, 8], strides = [1, 1]} : vector<32x32xf32> to vector<32x8xf32>
    %cst_215 = arith.constant dense<0.000000e+00> : vector<16x8xf32>
    %527 = tpu.matmul %525, %526, %cst_215 {dimension_numbers = #tpu.dot_dimension_numbers<[1], [0], [0], [1], [0, 0, 1, 1], [], []>} : vector<16x32xf32>, vector<32x8xf32>, vector<16x8xf32> -> vector<16x8xf32>
    %528 = vector.extract_strided_slice %28 {offsets = [24, 0], sizes = [8, 32], strides = [1, 1]} : vector<32x32xf32> to vector<8x32xf32>
    %cst_216 = arith.constant dense<0.000000e+00> : vector<16x32xf32>
    %529 = tpu.matmul %527, %528, %cst_216 {dimension_numbers = #tpu.dot_dimension_numbers<[1], [0], [0], [1], [0, 0, 1, 1], [], []>} : vector<16x8xf32>, vector<8x32xf32>, vector<16x32xf32> -> vector<16x32xf32>
    %530 = arith.addf %511, %529 : vector<16x32xf32>
    %531 = vector.broadcast %29 : vector<1x32xf32> to vector<16x32xf32>
    %532 = arith.addf %530, %531 : vector<16x32xf32>
    %533 = arith.addf %449, %532 : vector<16x32xf32>
    %cst_217 = arith.constant dense<0.000000e+00> : vector<16xf32>
    %534 = vector.multi_reduction <add>, %533, %cst_217 [1] : vector<16x32xf32> to vector<16xf32>
    %535 = vector.shape_cast %534 : vector<16xf32> to vector<16x1xf32>
    %cst_218 = arith.constant 3.200000e+01 : f32
    %536 = vector.broadcast %cst_218 : f32 to vector<16x1xf32>
    %537 = arith.divf %535, %536 : vector<16x1xf32>
    %538 = vector.broadcast %537 : vector<16x1xf32> to vector<16x32xf32>
    %539 = arith.subf %533, %538 : vector<16x32xf32>
    %540 = arith.mulf %539, %539 : vector<16x32xf32>
    %cst_219 = arith.constant dense<0.000000e+00> : vector<16xf32>
    %541 = vector.multi_reduction <add>, %540, %cst_219 [1] : vector<16x32xf32> to vector<16xf32>
    %542 = vector.shape_cast %541 : vector<16xf32> to vector<16x1xf32>
    %cst_220 = arith.constant 3.200000e+01 : f32
    %543 = vector.broadcast %cst_220 : f32 to vector<16x1xf32>
    %544 = arith.divf %542, %543 : vector<16x1xf32>
    %545 = vector.broadcast %537 : vector<16x1xf32> to vector<16x32xf32>
    %546 = arith.subf %533, %545 : vector<16x32xf32>
    %cst_221 = arith.constant 9.99999974E-6 : f32
    %547 = vector.broadcast %cst_221 : f32 to vector<16x1xf32>
    %548 = arith.addf %544, %547 : vector<16x1xf32>
    %549 = math.rsqrt %548 : vector<16x1xf32>
    %550 = vector.broadcast %549 : vector<16x1xf32> to vector<16x32xf32>
    %551 = arith.mulf %546, %550 : vector<16x32xf32>
    %552 = vector.broadcast %30 : vector<1x32xf32> to vector<16x32xf32>
    %553 = arith.mulf %551, %552 : vector<16x32xf32>
    %554 = vector.broadcast %31 : vector<1x32xf32> to vector<16x32xf32>
    %555 = arith.addf %553, %554 : vector<16x32xf32>
    %cst_222 = arith.constant dense<0.000000e+00> : vector<16x64xf32>
    %556 = tpu.matmul %555, %32, %cst_222 {dimension_numbers = #tpu.dot_dimension_numbers<[1], [0], [0], [1], [0, 0, 1, 1], [], []>} : vector<16x32xf32>, vector<32x64xf32>, vector<16x64xf32> -> vector<16x64xf32>
    %557 = vector.broadcast %33 : vector<1x64xf32> to vector<16x64xf32>
    %558 = arith.addf %556, %557 : vector<16x64xf32>
    %cst_223 = arith.constant 0.000000e+00 : f32
    %559 = vector.broadcast %cst_223 : f32 to vector<16x64xf32>
    %560 = arith.maximumf %558, %559 : vector<16x64xf32>
    %cst_224 = arith.constant dense<0.000000e+00> : vector<16x32xf32>
    %561 = tpu.matmul %560, %34, %cst_224 {dimension_numbers = #tpu.dot_dimension_numbers<[1], [0], [0], [1], [0, 0, 1, 1], [], []>} : vector<16x64xf32>, vector<64x32xf32>, vector<16x32xf32> -> vector<16x32xf32>
    %562 = vector.broadcast %35 : vector<1x32xf32> to vector<16x32xf32>
    %563 = arith.addf %561, %562 : vector<16x32xf32>
    %564 = arith.addf %555, %563 : vector<16x32xf32>
    %cst_225 = arith.constant dense<0.000000e+00> : vector<16xf32>
    %565 = vector.multi_reduction <add>, %564, %cst_225 [1] : vector<16x32xf32> to vector<16xf32>
    %566 = vector.shape_cast %565 : vector<16xf32> to vector<16x1xf32>
    %cst_226 = arith.constant 3.200000e+01 : f32
    %567 = vector.broadcast %cst_226 : f32 to vector<16x1xf32>
    %568 = arith.divf %566, %567 : vector<16x1xf32>
    %569 = vector.broadcast %568 : vector<16x1xf32> to vector<16x32xf32>
    %570 = arith.subf %564, %569 : vector<16x32xf32>
    %571 = arith.mulf %570, %570 : vector<16x32xf32>
    %cst_227 = arith.constant dense<0.000000e+00> : vector<16xf32>
    %572 = vector.multi_reduction <add>, %571, %cst_227 [1] : vector<16x32xf32> to vector<16xf32>
    %573 = vector.shape_cast %572 : vector<16xf32> to vector<16x1xf32>
    %cst_228 = arith.constant 3.200000e+01 : f32
    %574 = vector.broadcast %cst_228 : f32 to vector<16x1xf32>
    %575 = arith.divf %573, %574 : vector<16x1xf32>
    %576 = vector.broadcast %568 : vector<16x1xf32> to vector<16x32xf32>
    %577 = arith.subf %564, %576 : vector<16x32xf32>
    %cst_229 = arith.constant 9.99999974E-6 : f32
    %578 = vector.broadcast %cst_229 : f32 to vector<16x1xf32>
    %579 = arith.addf %575, %578 : vector<16x1xf32>
    %580 = math.rsqrt %579 : vector<16x1xf32>
    %581 = vector.broadcast %580 : vector<16x1xf32> to vector<16x32xf32>
    %582 = arith.mulf %577, %581 : vector<16x32xf32>
    %583 = vector.broadcast %36 : vector<1x32xf32> to vector<16x32xf32>
    %584 = arith.mulf %582, %583 : vector<16x32xf32>
    %585 = vector.broadcast %37 : vector<1x32xf32> to vector<16x32xf32>
    %586 = arith.addf %584, %585 : vector<16x32xf32>
    %cst_230 = arith.constant dense<0.000000e+00> : vector<16xf32>
    %587 = vector.multi_reduction <add>, %586, %cst_230 [1] : vector<16x32xf32> to vector<16xf32>
    %588 = vector.shape_cast %587 : vector<16xf32> to vector<16x1xf32>
    %cst_231 = arith.constant 3.200000e+01 : f32
    %589 = vector.broadcast %cst_231 : f32 to vector<16x1xf32>
    %590 = arith.divf %588, %589 : vector<16x1xf32>
    %591 = vector.broadcast %590 : vector<16x1xf32> to vector<16x32xf32>
    %592 = arith.subf %586, %591 : vector<16x32xf32>
    %593 = arith.mulf %592, %592 : vector<16x32xf32>
    %cst_232 = arith.constant dense<0.000000e+00> : vector<16xf32>
    %594 = vector.multi_reduction <add>, %593, %cst_232 [1] : vector<16x32xf32> to vector<16xf32>
    %595 = vector.shape_cast %594 : vector<16xf32> to vector<16x1xf32>
    %cst_233 = arith.constant 3.200000e+01 : f32
    %596 = vector.broadcast %cst_233 : f32 to vector<16x1xf32>
    %597 = arith.divf %595, %596 : vector<16x1xf32>
    %598 = vector.broadcast %590 : vector<16x1xf32> to vector<16x32xf32>
    %599 = arith.subf %586, %598 : vector<16x32xf32>
    %cst_234 = arith.constant 9.99999974E-6 : f32
    %600 = vector.broadcast %cst_234 : f32 to vector<16x1xf32>
    %601 = arith.addf %597, %600 : vector<16x1xf32>
    %602 = math.rsqrt %601 : vector<16x1xf32>
    %603 = vector.broadcast %602 : vector<16x1xf32> to vector<16x32xf32>
    %604 = arith.mulf %599, %603 : vector<16x32xf32>
    %605 = vector.broadcast %38 : vector<1x32xf32> to vector<16x32xf32>
    %606 = arith.mulf %604, %605 : vector<16x32xf32>
    %607 = vector.broadcast %39 : vector<1x32xf32> to vector<16x32xf32>
    %608 = arith.addf %606, %607 : vector<16x32xf32>
    %c0_235 = arith.constant 0 : index
    %c0_236 = arith.constant 0 : index
    %609 = vector.load %arg47[%c0_235, %c0_236] : memref<32x32xf32, #tpu.memory_space<vmem>>, vector<16x32xf32>
    tpu.vector_store %arg47[%c0_235, %c0_236], %608 {strides = array<i32>} : memref<32x32xf32, #tpu.memory_space<vmem>>, vector<16x32xf32>,
    %610 = arith.addf %586, %42 : vector<16x32xf32>
    %cst_237 = arith.constant dense<0.000000e+00> : vector<16x64xf32>
    %611 = tpu.matmul %610, %14, %cst_237 {dimension_numbers = #tpu.dot_dimension_numbers<[1], [0], [0], [1], [0, 0, 1, 1], [], []>} : vector<16x32xf32>, vector<32x64xf32>, vector<16x64xf32> -> vector<16x64xf32>
    %612 = vector.broadcast %15 : vector<1x64xf32> to vector<16x64xf32>
    %613 = arith.addf %611, %612 : vector<16x64xf32>
    %cst_238 = arith.constant dense<0.000000e+00> : vector<16x32xf32>
    %614 = tpu.matmul %586, %16, %cst_238 {dimension_numbers = #tpu.dot_dimension_numbers<[1], [0], [0], [1], [0, 0, 1, 1], [], []>} : vector<16x32xf32>, vector<32x32xf32>, vector<16x32xf32> -> vector<16x32xf32>
    %615 = vector.broadcast %17 : vector<1x32xf32> to vector<16x32xf32>
    %616 = arith.addf %614, %615 : vector<16x32xf32>
    %617 = vector.extract_strided_slice %613 {offsets = [0, 0], sizes = [16, 32], strides = [1, 1]} : vector<16x64xf32> to vector<16x32xf32>
    %618 = vector.extract_strided_slice %613 {offsets = [0, 32], sizes = [16, 32], strides = [1, 1]} : vector<16x64xf32> to vector<16x32xf32>
    %cst_239 = arith.constant 0.353553385 : f32
    %619 = vector.broadcast %cst_239 : f32 to vector<16x32xf32>
    %620 = arith.mulf %617, %619 : vector<16x32xf32>
    %621 = vector.extract_strided_slice %620 {offsets = [0, 0], sizes = [16, 8], strides = [1, 1]} : vector<16x32xf32> to vector<16x8xf32>
    %622 = vector.extract_strided_slice %618 {offsets = [0, 0], sizes = [16, 8], strides = [1, 1]} : vector<16x32xf32> to vector<16x8xf32>
    %cst_240 = arith.constant dense<0.000000e+00> : vector<16x16xf32>
    %623 = tpu.matmul %621, %622, %cst_240 {dimension_numbers = #tpu.dot_dimension_numbers<[1], [1], [0], [0], [0, 0, 1, 0], [], []>} : vector<16x8xf32>, vector<16x8xf32>, vector<16x16xf32> -> vector<16x16xf32>
    %624 = arith.addf %623, %44 : vector<16x16xf32>
    %cst_241 = arith.constant dense<0xFF800000> : vector<16xf32>
    %625 = vector.multi_reduction <maximumf>, %624, %cst_241 [1] : vector<16x16xf32> to vector<16xf32>
    %626 = vector.shape_cast %625 : vector<16xf32> to vector<16x1xf32>
    %627 = vector.broadcast %626 : vector<16x1xf32> to vector<16x16xf32>
    %628 = arith.subf %624, %627 : vector<16x16xf32>
    %629 = math.exp %628 : vector<16x16xf32>
    %cst_242 = arith.constant dense<0.000000e+00> : vector<16xf32>
    %630 = vector.multi_reduction <add>, %629, %cst_242 [1] : vector<16x16xf32> to vector<16xf32>
    %631 = vector.shape_cast %630 : vector<16xf32> to vector<16x1xf32>
    %632 = tpu.reciprocal %631 {approx = true} : vector<16x1xf32> -> vector<16x1xf32>
    %633 = vector.broadcast %632 : vector<16x1xf32> to vector<16x16xf32>
    %634 = arith.mulf %629, %633 : vector<16x16xf32>
    %635 = vector.extract_strided_slice %616 {offsets = [0, 0], sizes = [16, 8], strides = [1, 1]} : vector<16x32xf32> to vector<16x8xf32>
    %cst_243 = arith.constant dense<0.000000e+00> : vector<16x8xf32>
    %636 = tpu.matmul %634, %635, %cst_243 {dimension_numbers = #tpu.dot_dimension_numbers<[1], [0], [0], [1], [0, 0, 1, 1], [], []>} : vector<16x16xf32>, vector<16x8xf32>, vector<16x8xf32> -> vector<16x8xf32>
    %637 = vector.extract_strided_slice %18 {offsets = [0, 0], sizes = [8, 32], strides = [1, 1]} : vector<32x32xf32> to vector<8x32xf32>
    %cst_244 = arith.constant dense<0.000000e+00> : vector<16x32xf32>
    %638 = tpu.matmul %636, %637, %cst_244 {dimension_numbers = #tpu.dot_dimension_numbers<[1], [0], [0], [1], [0, 0, 1, 1], [], []>} : vector<16x8xf32>, vector<8x32xf32>, vector<16x32xf32> -> vector<16x32xf32>
    %639 = vector.extract_strided_slice %620 {offsets = [0, 8], sizes = [16, 8], strides = [1, 1]} : vector<16x32xf32> to vector<16x8xf32>
    %640 = vector.extract_strided_slice %618 {offsets = [0, 8], sizes = [16, 8], strides = [1, 1]} : vector<16x32xf32> to vector<16x8xf32>
    %cst_245 = arith.constant dense<0.000000e+00> : vector<16x16xf32>
    %641 = tpu.matmul %639, %640, %cst_245 {dimension_numbers = #tpu.dot_dimension_numbers<[1], [1], [0], [0], [0, 0, 1, 0], [], []>} : vector<16x8xf32>, vector<16x8xf32>, vector<16x16xf32> -> vector<16x16xf32>
    %642 = arith.addf %641, %44 : vector<16x16xf32>
    %cst_246 = arith.constant dense<0xFF800000> : vector<16xf32>
    %643 = vector.multi_reduction <maximumf>, %642, %cst_246 [1] : vector<16x16xf32> to vector<16xf32>
    %644 = vector.shape_cast %643 : vector<16xf32> to vector<16x1xf32>
    %645 = vector.broadcast %644 : vector<16x1xf32> to vector<16x16xf32>
    %646 = arith.subf %642, %645 : vector<16x16xf32>
    %647 = math.exp %646 : vector<16x16xf32>
    %cst_247 = arith.constant dense<0.000000e+00> : vector<16xf32>
    %648 = vector.multi_reduction <add>, %647, %cst_247 [1] : vector<16x16xf32> to vector<16xf32>
    %649 = vector.shape_cast %648 : vector<16xf32> to vector<16x1xf32>
    %650 = tpu.reciprocal %649 {approx = true} : vector<16x1xf32> -> vector<16x1xf32>
    %651 = vector.broadcast %650 : vector<16x1xf32> to vector<16x16xf32>
    %652 = arith.mulf %647, %651 : vector<16x16xf32>
    %653 = vector.extract_strided_slice %616 {offsets = [0, 8], sizes = [16, 8], strides = [1, 1]} : vector<16x32xf32> to vector<16x8xf32>
    %cst_248 = arith.constant dense<0.000000e+00> : vector<16x8xf32>
    %654 = tpu.matmul %652, %653, %cst_248 {dimension_numbers = #tpu.dot_dimension_numbers<[1], [0], [0], [1], [0, 0, 1, 1], [], []>} : vector<16x16xf32>, vector<16x8xf32>, vector<16x8xf32> -> vector<16x8xf32>
    %655 = vector.extract_strided_slice %18 {offsets = [8, 0], sizes = [8, 32], strides = [1, 1]} : vector<32x32xf32> to vector<8x32xf32>
    %cst_249 = arith.constant dense<0.000000e+00> : vector<16x32xf32>
    %656 = tpu.matmul %654, %655, %cst_249 {dimension_numbers = #tpu.dot_dimension_numbers<[1], [0], [0], [1], [0, 0, 1, 1], [], []>} : vector<16x8xf32>, vector<8x32xf32>, vector<16x32xf32> -> vector<16x32xf32>
    %657 = arith.addf %638, %656 : vector<16x32xf32>
    %658 = vector.extract_strided_slice %620 {offsets = [0, 16], sizes = [16, 8], strides = [1, 1]} : vector<16x32xf32> to vector<16x8xf32>
    %659 = vector.extract_strided_slice %618 {offsets = [0, 16], sizes = [16, 8], strides = [1, 1]} : vector<16x32xf32> to vector<16x8xf32>
    %cst_250 = arith.constant dense<0.000000e+00> : vector<16x16xf32>
    %660 = tpu.matmul %658, %659, %cst_250 {dimension_numbers = #tpu.dot_dimension_numbers<[1], [1], [0], [0], [0, 0, 1, 0], [], []>} : vector<16x8xf32>, vector<16x8xf32>, vector<16x16xf32> -> vector<16x16xf32>
    %661 = arith.addf %660, %44 : vector<16x16xf32>
    %cst_251 = arith.constant dense<0xFF800000> : vector<16xf32>
    %662 = vector.multi_reduction <maximumf>, %661, %cst_251 [1] : vector<16x16xf32> to vector<16xf32>
    %663 = vector.shape_cast %662 : vector<16xf32> to vector<16x1xf32>
    %664 = vector.broadcast %663 : vector<16x1xf32> to vector<16x16xf32>
    %665 = arith.subf %661, %664 : vector<16x16xf32>
    %666 = math.exp %665 : vector<16x16xf32>
    %cst_252 = arith.constant dense<0.000000e+00> : vector<16xf32>
    %667 = vector.multi_reduction <add>, %666, %cst_252 [1] : vector<16x16xf32> to vector<16xf32>
    %668 = vector.shape_cast %667 : vector<16xf32> to vector<16x1xf32>
    %669 = tpu.reciprocal %668 {approx = true} : vector<16x1xf32> -> vector<16x1xf32>
    %670 = vector.broadcast %669 : vector<16x1xf32> to vector<16x16xf32>
    %671 = arith.mulf %666, %670 : vector<16x16xf32>
    %672 = vector.extract_strided_slice %616 {offsets = [0, 16], sizes = [16, 8], strides = [1, 1]} : vector<16x32xf32> to vector<16x8xf32>
    %cst_253 = arith.constant dense<0.000000e+00> : vector<16x8xf32>
    %673 = tpu.matmul %671, %672, %cst_253 {dimension_numbers = #tpu.dot_dimension_numbers<[1], [0], [0], [1], [0, 0, 1, 1], [], []>} : vector<16x16xf32>, vector<16x8xf32>, vector<16x8xf32> -> vector<16x8xf32>
    %674 = vector.extract_strided_slice %18 {offsets = [16, 0], sizes = [8, 32], strides = [1, 1]} : vector<32x32xf32> to vector<8x32xf32>
    %cst_254 = arith.constant dense<0.000000e+00> : vector<16x32xf32>
    %675 = tpu.matmul %673, %674, %cst_254 {dimension_numbers = #tpu.dot_dimension_numbers<[1], [0], [0], [1], [0, 0, 1, 1], [], []>} : vector<16x8xf32>, vector<8x32xf32>, vector<16x32xf32> -> vector<16x32xf32>
    %676 = arith.addf %657, %675 : vector<16x32xf32>
    %677 = vector.extract_strided_slice %620 {offsets = [0, 24], sizes = [16, 8], strides = [1, 1]} : vector<16x32xf32> to vector<16x8xf32>
    %678 = vector.extract_strided_slice %618 {offsets = [0, 24], sizes = [16, 8], strides = [1, 1]} : vector<16x32xf32> to vector<16x8xf32>
    %cst_255 = arith.constant dense<0.000000e+00> : vector<16x16xf32>
    %679 = tpu.matmul %677, %678, %cst_255 {dimension_numbers = #tpu.dot_dimension_numbers<[1], [1], [0], [0], [0, 0, 1, 0], [], []>} : vector<16x8xf32>, vector<16x8xf32>, vector<16x16xf32> -> vector<16x16xf32>
    %680 = arith.addf %679, %44 : vector<16x16xf32>
    %cst_256 = arith.constant dense<0xFF800000> : vector<16xf32>
    %681 = vector.multi_reduction <maximumf>, %680, %cst_256 [1] : vector<16x16xf32> to vector<16xf32>
    %682 = vector.shape_cast %681 : vector<16xf32> to vector<16x1xf32>
    %683 = vector.broadcast %682 : vector<16x1xf32> to vector<16x16xf32>
    %684 = arith.subf %680, %683 : vector<16x16xf32>
    %685 = math.exp %684 : vector<16x16xf32>
    %cst_257 = arith.constant dense<0.000000e+00> : vector<16xf32>
    %686 = vector.multi_reduction <add>, %685, %cst_257 [1] : vector<16x16xf32> to vector<16xf32>
    %687 = vector.shape_cast %686 : vector<16xf32> to vector<16x1xf32>
    %688 = tpu.reciprocal %687 {approx = true} : vector<16x1xf32> -> vector<16x1xf32>
    %689 = vector.broadcast %688 : vector<16x1xf32> to vector<16x16xf32>
    %690 = arith.mulf %685, %689 : vector<16x16xf32>
    %691 = vector.extract_strided_slice %616 {offsets = [0, 24], sizes = [16, 8], strides = [1, 1]} : vector<16x32xf32> to vector<16x8xf32>
    %cst_258 = arith.constant dense<0.000000e+00> : vector<16x8xf32>
    %692 = tpu.matmul %690, %691, %cst_258 {dimension_numbers = #tpu.dot_dimension_numbers<[1], [0], [0], [1], [0, 0, 1, 1], [], []>} : vector<16x16xf32>, vector<16x8xf32>, vector<16x8xf32> -> vector<16x8xf32>
    %693 = vector.extract_strided_slice %18 {offsets = [24, 0], sizes = [8, 32], strides = [1, 1]} : vector<32x32xf32> to vector<8x32xf32>
    %cst_259 = arith.constant dense<0.000000e+00> : vector<16x32xf32>
    %694 = tpu.matmul %692, %693, %cst_259 {dimension_numbers = #tpu.dot_dimension_numbers<[1], [0], [0], [1], [0, 0, 1, 1], [], []>} : vector<16x8xf32>, vector<8x32xf32>, vector<16x32xf32> -> vector<16x32xf32>
    %695 = arith.addf %676, %694 : vector<16x32xf32>
    %696 = vector.broadcast %19 : vector<1x32xf32> to vector<16x32xf32>
    %697 = arith.addf %695, %696 : vector<16x32xf32>
    %698 = arith.addf %586, %697 : vector<16x32xf32>
    %cst_260 = arith.constant dense<0.000000e+00> : vector<16xf32>
    %699 = vector.multi_reduction <add>, %698, %cst_260 [1] : vector<16x32xf32> to vector<16xf32>
    %700 = vector.shape_cast %699 : vector<16xf32> to vector<16x1xf32>
    %cst_261 = arith.constant 3.200000e+01 : f32
    %701 = vector.broadcast %cst_261 : f32 to vector<16x1xf32>
    %702 = arith.divf %700, %701 : vector<16x1xf32>
    %703 = vector.broadcast %702 : vector<16x1xf32> to vector<16x32xf32>
    %704 = arith.subf %698, %703 : vector<16x32xf32>
    %705 = arith.mulf %704, %704 : vector<16x32xf32>
    %cst_262 = arith.constant dense<0.000000e+00> : vector<16xf32>
    %706 = vector.multi_reduction <add>, %705, %cst_262 [1] : vector<16x32xf32> to vector<16xf32>
    %707 = vector.shape_cast %706 : vector<16xf32> to vector<16x1xf32>
    %cst_263 = arith.constant 3.200000e+01 : f32
    %708 = vector.broadcast %cst_263 : f32 to vector<16x1xf32>
    %709 = arith.divf %707, %708 : vector<16x1xf32>
    %710 = vector.broadcast %702 : vector<16x1xf32> to vector<16x32xf32>
    %711 = arith.subf %698, %710 : vector<16x32xf32>
    %cst_264 = arith.constant 9.99999974E-6 : f32
    %712 = vector.broadcast %cst_264 : f32 to vector<16x1xf32>
    %713 = arith.addf %709, %712 : vector<16x1xf32>
    %714 = math.rsqrt %713 : vector<16x1xf32>
    %715 = vector.broadcast %714 : vector<16x1xf32> to vector<16x32xf32>
    %716 = arith.mulf %711, %715 : vector<16x32xf32>
    %717 = vector.broadcast %20 : vector<1x32xf32> to vector<16x32xf32>
    %718 = arith.mulf %716, %717 : vector<16x32xf32>
    %719 = vector.broadcast %21 : vector<1x32xf32> to vector<16x32xf32>
    %720 = arith.addf %718, %719 : vector<16x32xf32>
    %721 = arith.addf %720, %42 : vector<16x32xf32>
    %cst_265 = arith.constant dense<0.000000e+00> : vector<16x32xf32>
    %722 = tpu.matmul %721, %22, %cst_265 {dimension_numbers = #tpu.dot_dimension_numbers<[1], [0], [0], [1], [0, 0, 1, 1], [], []>} : vector<16x32xf32>, vector<32x32xf32>, vector<16x32xf32> -> vector<16x32xf32>
    %723 = vector.broadcast %23 : vector<1x32xf32> to vector<16x32xf32>
    %724 = arith.addf %722, %723 : vector<16x32xf32>
    %cst_266 = arith.constant 0.353553385 : f32
    %725 = vector.broadcast %cst_266 : f32 to vector<16x32xf32>
    %726 = arith.mulf %724, %725 : vector<16x32xf32>
    %727 = vector.extract_strided_slice %726 {offsets = [0, 0], sizes = [16, 8], strides = [1, 1]} : vector<16x32xf32> to vector<16x8xf32>
    %728 = vector.extract_strided_slice %334 {offsets = [0, 0], sizes = [32, 8], strides = [1, 1]} : vector<32x32xf32> to vector<32x8xf32>
    %cst_267 = arith.constant dense<0.000000e+00> : vector<16x32xf32>
    %729 = tpu.matmul %727, %728, %cst_267 {dimension_numbers = #tpu.dot_dimension_numbers<[1], [1], [0], [0], [0, 0, 1, 0], [], []>} : vector<16x8xf32>, vector<32x8xf32>, vector<16x32xf32> -> vector<16x32xf32>
    %730 = arith.addf %729, %45 : vector<16x32xf32>
    %cst_268 = arith.constant dense<0xFF800000> : vector<16xf32>
    %731 = vector.multi_reduction <maximumf>, %730, %cst_268 [1] : vector<16x32xf32> to vector<16xf32>
    %732 = vector.shape_cast %731 : vector<16xf32> to vector<16x1xf32>
    %733 = vector.broadcast %732 : vector<16x1xf32> to vector<16x32xf32>
    %734 = arith.subf %730, %733 : vector<16x32xf32>
    %735 = math.exp %734 : vector<16x32xf32>
    %cst_269 = arith.constant dense<0.000000e+00> : vector<16xf32>
    %736 = vector.multi_reduction <add>, %735, %cst_269 [1] : vector<16x32xf32> to vector<16xf32>
    %737 = vector.shape_cast %736 : vector<16xf32> to vector<16x1xf32>
    %738 = tpu.reciprocal %737 {approx = true} : vector<16x1xf32> -> vector<16x1xf32>
    %739 = vector.broadcast %738 : vector<16x1xf32> to vector<16x32xf32>
    %740 = arith.mulf %735, %739 : vector<16x32xf32>
    %741 = vector.extract_strided_slice %337 {offsets = [0, 0], sizes = [32, 8], strides = [1, 1]} : vector<32x32xf32> to vector<32x8xf32>
    %cst_270 = arith.constant dense<0.000000e+00> : vector<16x8xf32>
    %742 = tpu.matmul %740, %741, %cst_270 {dimension_numbers = #tpu.dot_dimension_numbers<[1], [0], [0], [1], [0, 0, 1, 1], [], []>} : vector<16x32xf32>, vector<32x8xf32>, vector<16x8xf32> -> vector<16x8xf32>
    %743 = vector.extract_strided_slice %28 {offsets = [0, 0], sizes = [8, 32], strides = [1, 1]} : vector<32x32xf32> to vector<8x32xf32>
    %cst_271 = arith.constant dense<0.000000e+00> : vector<16x32xf32>
    %744 = tpu.matmul %742, %743, %cst_271 {dimension_numbers = #tpu.dot_dimension_numbers<[1], [0], [0], [1], [0, 0, 1, 1], [], []>} : vector<16x8xf32>, vector<8x32xf32>, vector<16x32xf32> -> vector<16x32xf32>
    %745 = vector.extract_strided_slice %726 {offsets = [0, 8], sizes = [16, 8], strides = [1, 1]} : vector<16x32xf32> to vector<16x8xf32>
    %746 = vector.extract_strided_slice %334 {offsets = [0, 8], sizes = [32, 8], strides = [1, 1]} : vector<32x32xf32> to vector<32x8xf32>
    %cst_272 = arith.constant dense<0.000000e+00> : vector<16x32xf32>
    %747 = tpu.matmul %745, %746, %cst_272 {dimension_numbers = #tpu.dot_dimension_numbers<[1], [1], [0], [0], [0, 0, 1, 0], [], []>} : vector<16x8xf32>, vector<32x8xf32>, vector<16x32xf32> -> vector<16x32xf32>
    %748 = arith.addf %747, %45 : vector<16x32xf32>
    %cst_273 = arith.constant dense<0xFF800000> : vector<16xf32>
    %749 = vector.multi_reduction <maximumf>, %748, %cst_273 [1] : vector<16x32xf32> to vector<16xf32>
    %750 = vector.shape_cast %749 : vector<16xf32> to vector<16x1xf32>
    %751 = vector.broadcast %750 : vector<16x1xf32> to vector<16x32xf32>
    %752 = arith.subf %748, %751 : vector<16x32xf32>
    %753 = math.exp %752 : vector<16x32xf32>
    %cst_274 = arith.constant dense<0.000000e+00> : vector<16xf32>
    %754 = vector.multi_reduction <add>, %753, %cst_274 [1] : vector<16x32xf32> to vector<16xf32>
    %755 = vector.shape_cast %754 : vector<16xf32> to vector<16x1xf32>
    %756 = tpu.reciprocal %755 {approx = true} : vector<16x1xf32> -> vector<16x1xf32>
    %757 = vector.broadcast %756 : vector<16x1xf32> to vector<16x32xf32>
    %758 = arith.mulf %753, %757 : vector<16x32xf32>
    %759 = vector.extract_strided_slice %337 {offsets = [0, 8], sizes = [32, 8], strides = [1, 1]} : vector<32x32xf32> to vector<32x8xf32>
    %cst_275 = arith.constant dense<0.000000e+00> : vector<16x8xf32>
    %760 = tpu.matmul %758, %759, %cst_275 {dimension_numbers = #tpu.dot_dimension_numbers<[1], [0], [0], [1], [0, 0, 1, 1], [], []>} : vector<16x32xf32>, vector<32x8xf32>, vector<16x8xf32> -> vector<16x8xf32>
    %761 = vector.extract_strided_slice %28 {offsets = [8, 0], sizes = [8, 32], strides = [1, 1]} : vector<32x32xf32> to vector<8x32xf32>
    %cst_276 = arith.constant dense<0.000000e+00> : vector<16x32xf32>
    %762 = tpu.matmul %760, %761, %cst_276 {dimension_numbers = #tpu.dot_dimension_numbers<[1], [0], [0], [1], [0, 0, 1, 1], [], []>} : vector<16x8xf32>, vector<8x32xf32>, vector<16x32xf32> -> vector<16x32xf32>
    %763 = arith.addf %744, %762 : vector<16x32xf32>
    %764 = vector.extract_strided_slice %726 {offsets = [0, 16], sizes = [16, 8], strides = [1, 1]} : vector<16x32xf32> to vector<16x8xf32>
    %765 = vector.extract_strided_slice %334 {offsets = [0, 16], sizes = [32, 8], strides = [1, 1]} : vector<32x32xf32> to vector<32x8xf32>
    %cst_277 = arith.constant dense<0.000000e+00> : vector<16x32xf32>
    %766 = tpu.matmul %764, %765, %cst_277 {dimension_numbers = #tpu.dot_dimension_numbers<[1], [1], [0], [0], [0, 0, 1, 0], [], []>} : vector<16x8xf32>, vector<32x8xf32>, vector<16x32xf32> -> vector<16x32xf32>
    %767 = arith.addf %766, %45 : vector<16x32xf32>
    %cst_278 = arith.constant dense<0xFF800000> : vector<16xf32>
    %768 = vector.multi_reduction <maximumf>, %767, %cst_278 [1] : vector<16x32xf32> to vector<16xf32>
    %769 = vector.shape_cast %768 : vector<16xf32> to vector<16x1xf32>
    %770 = vector.broadcast %769 : vector<16x1xf32> to vector<16x32xf32>
    %771 = arith.subf %767, %770 : vector<16x32xf32>
    %772 = math.exp %771 : vector<16x32xf32>
    %cst_279 = arith.constant dense<0.000000e+00> : vector<16xf32>
    %773 = vector.multi_reduction <add>, %772, %cst_279 [1] : vector<16x32xf32> to vector<16xf32>
    %774 = vector.shape_cast %773 : vector<16xf32> to vector<16x1xf32>
    %775 = tpu.reciprocal %774 {approx = true} : vector<16x1xf32> -> vector<16x1xf32>
    %776 = vector.broadcast %775 : vector<16x1xf32> to vector<16x32xf32>
    %777 = arith.mulf %772, %776 : vector<16x32xf32>
    %778 = vector.extract_strided_slice %337 {offsets = [0, 16], sizes = [32, 8], strides = [1, 1]} : vector<32x32xf32> to vector<32x8xf32>
    %cst_280 = arith.constant dense<0.000000e+00> : vector<16x8xf32>
    %779 = tpu.matmul %777, %778, %cst_280 {dimension_numbers = #tpu.dot_dimension_numbers<[1], [0], [0], [1], [0, 0, 1, 1], [], []>} : vector<16x32xf32>, vector<32x8xf32>, vector<16x8xf32> -> vector<16x8xf32>
    %780 = vector.extract_strided_slice %28 {offsets = [16, 0], sizes = [8, 32], strides = [1, 1]} : vector<32x32xf32> to vector<8x32xf32>
    %cst_281 = arith.constant dense<0.000000e+00> : vector<16x32xf32>
    %781 = tpu.matmul %779, %780, %cst_281 {dimension_numbers = #tpu.dot_dimension_numbers<[1], [0], [0], [1], [0, 0, 1, 1], [], []>} : vector<16x8xf32>, vector<8x32xf32>, vector<16x32xf32> -> vector<16x32xf32>
    %782 = arith.addf %763, %781 : vector<16x32xf32>
    %783 = vector.extract_strided_slice %726 {offsets = [0, 24], sizes = [16, 8], strides = [1, 1]} : vector<16x32xf32> to vector<16x8xf32>
    %784 = vector.extract_strided_slice %334 {offsets = [0, 24], sizes = [32, 8], strides = [1, 1]} : vector<32x32xf32> to vector<32x8xf32>
    %cst_282 = arith.constant dense<0.000000e+00> : vector<16x32xf32>
    %785 = tpu.matmul %783, %784, %cst_282 {dimension_numbers = #tpu.dot_dimension_numbers<[1], [1], [0], [0], [0, 0, 1, 0], [], []>} : vector<16x8xf32>, vector<32x8xf32>, vector<16x32xf32> -> vector<16x32xf32>
    %786 = arith.addf %785, %45 : vector<16x32xf32>
    %cst_283 = arith.constant dense<0xFF800000> : vector<16xf32>
    %787 = vector.multi_reduction <maximumf>, %786, %cst_283 [1] : vector<16x32xf32> to vector<16xf32>
    %788 = vector.shape_cast %787 : vector<16xf32> to vector<16x1xf32>
    %789 = vector.broadcast %788 : vector<16x1xf32> to vector<16x32xf32>
    %790 = arith.subf %786, %789 : vector<16x32xf32>
    %791 = math.exp %790 : vector<16x32xf32>
    %cst_284 = arith.constant dense<0.000000e+00> : vector<16xf32>
    %792 = vector.multi_reduction <add>, %791, %cst_284 [1] : vector<16x32xf32> to vector<16xf32>
    %793 = vector.shape_cast %792 : vector<16xf32> to vector<16x1xf32>
    %794 = tpu.reciprocal %793 {approx = true} : vector<16x1xf32> -> vector<16x1xf32>
    %795 = vector.broadcast %794 : vector<16x1xf32> to vector<16x32xf32>
    %796 = arith.mulf %791, %795 : vector<16x32xf32>
    %797 = vector.extract_strided_slice %337 {offsets = [0, 24], sizes = [32, 8], strides = [1, 1]} : vector<32x32xf32> to vector<32x8xf32>
    %cst_285 = arith.constant dense<0.000000e+00> : vector<16x8xf32>
    %798 = tpu.matmul %796, %797, %cst_285 {dimension_numbers = #tpu.dot_dimension_numbers<[1], [0], [0], [1], [0, 0, 1, 1], [], []>} : vector<16x32xf32>, vector<32x8xf32>, vector<16x8xf32> -> vector<16x8xf32>
    %799 = vector.extract_strided_slice %28 {offsets = [24, 0], sizes = [8, 32], strides = [1, 1]} : vector<32x32xf32> to vector<8x32xf32>
    %cst_286 = arith.constant dense<0.000000e+00> : vector<16x32xf32>
    %800 = tpu.matmul %798, %799, %cst_286 {dimension_numbers = #tpu.dot_dimension_numbers<[1], [0], [0], [1], [0, 0, 1, 1], [], []>} : vector<16x8xf32>, vector<8x32xf32>, vector<16x32xf32> -> vector<16x32xf32>
    %801 = arith.addf %782, %800 : vector<16x32xf32>
    %802 = vector.broadcast %29 : vector<1x32xf32> to vector<16x32xf32>
    %803 = arith.addf %801, %802 : vector<16x32xf32>
    %804 = arith.addf %720, %803 : vector<16x32xf32>
    %cst_287 = arith.constant dense<0.000000e+00> : vector<16xf32>
    %805 = vector.multi_reduction <add>, %804, %cst_287 [1] : vector<16x32xf32> to vector<16xf32>
    %806 = vector.shape_cast %805 : vector<16xf32> to vector<16x1xf32>
    %cst_288 = arith.constant 3.200000e+01 : f32
    %807 = vector.broadcast %cst_288 : f32 to vector<16x1xf32>
    %808 = arith.divf %806, %807 : vector<16x1xf32>
    %809 = vector.broadcast %808 : vector<16x1xf32> to vector<16x32xf32>
    %810 = arith.subf %804, %809 : vector<16x32xf32>
    %811 = arith.mulf %810, %810 : vector<16x32xf32>
    %cst_289 = arith.constant dense<0.000000e+00> : vector<16xf32>
    %812 = vector.multi_reduction <add>, %811, %cst_289 [1] : vector<16x32xf32> to vector<16xf32>
    %813 = vector.shape_cast %812 : vector<16xf32> to vector<16x1xf32>
    %cst_290 = arith.constant 3.200000e+01 : f32
    %814 = vector.broadcast %cst_290 : f32 to vector<16x1xf32>
    %815 = arith.divf %813, %814 : vector<16x1xf32>
    %816 = vector.broadcast %808 : vector<16x1xf32> to vector<16x32xf32>
    %817 = arith.subf %804, %816 : vector<16x32xf32>
    %cst_291 = arith.constant 9.99999974E-6 : f32
    %818 = vector.broadcast %cst_291 : f32 to vector<16x1xf32>
    %819 = arith.addf %815, %818 : vector<16x1xf32>
    %820 = math.rsqrt %819 : vector<16x1xf32>
    %821 = vector.broadcast %820 : vector<16x1xf32> to vector<16x32xf32>
    %822 = arith.mulf %817, %821 : vector<16x32xf32>
    %823 = vector.broadcast %30 : vector<1x32xf32> to vector<16x32xf32>
    %824 = arith.mulf %822, %823 : vector<16x32xf32>
    %825 = vector.broadcast %31 : vector<1x32xf32> to vector<16x32xf32>
    %826 = arith.addf %824, %825 : vector<16x32xf32>
    %cst_292 = arith.constant dense<0.000000e+00> : vector<16x64xf32>
    %827 = tpu.matmul %826, %32, %cst_292 {dimension_numbers = #tpu.dot_dimension_numbers<[1], [0], [0], [1], [0, 0, 1, 1], [], []>} : vector<16x32xf32>, vector<32x64xf32>, vector<16x64xf32> -> vector<16x64xf32>
    %828 = vector.broadcast %33 : vector<1x64xf32> to vector<16x64xf32>
    %829 = arith.addf %827, %828 : vector<16x64xf32>
    %cst_293 = arith.constant 0.000000e+00 : f32
    %830 = vector.broadcast %cst_293 : f32 to vector<16x64xf32>
    %831 = arith.maximumf %829, %830 : vector<16x64xf32>
    %cst_294 = arith.constant dense<0.000000e+00> : vector<16x32xf32>
    %832 = tpu.matmul %831, %34, %cst_294 {dimension_numbers = #tpu.dot_dimension_numbers<[1], [0], [0], [1], [0, 0, 1, 1], [], []>} : vector<16x64xf32>, vector<64x32xf32>, vector<16x32xf32> -> vector<16x32xf32>
    %833 = vector.broadcast %35 : vector<1x32xf32> to vector<16x32xf32>
    %834 = arith.addf %832, %833 : vector<16x32xf32>
    %835 = arith.addf %826, %834 : vector<16x32xf32>
    %cst_295 = arith.constant dense<0.000000e+00> : vector<16xf32>
    %836 = vector.multi_reduction <add>, %835, %cst_295 [1] : vector<16x32xf32> to vector<16xf32>
    %837 = vector.shape_cast %836 : vector<16xf32> to vector<16x1xf32>
    %cst_296 = arith.constant 3.200000e+01 : f32
    %838 = vector.broadcast %cst_296 : f32 to vector<16x1xf32>
    %839 = arith.divf %837, %838 : vector<16x1xf32>
    %840 = vector.broadcast %839 : vector<16x1xf32> to vector<16x32xf32>
    %841 = arith.subf %835, %840 : vector<16x32xf32>
    %842 = arith.mulf %841, %841 : vector<16x32xf32>
    %cst_297 = arith.constant dense<0.000000e+00> : vector<16xf32>
    %843 = vector.multi_reduction <add>, %842, %cst_297 [1] : vector<16x32xf32> to vector<16xf32>
    %844 = vector.shape_cast %843 : vector<16xf32> to vector<16x1xf32>
    %cst_298 = arith.constant 3.200000e+01 : f32
    %845 = vector.broadcast %cst_298 : f32 to vector<16x1xf32>
    %846 = arith.divf %844, %845 : vector<16x1xf32>
    %847 = vector.broadcast %839 : vector<16x1xf32> to vector<16x32xf32>
    %848 = arith.subf %835, %847 : vector<16x32xf32>
    %cst_299 = arith.constant 9.99999974E-6 : f32
    %849 = vector.broadcast %cst_299 : f32 to vector<16x1xf32>
    %850 = arith.addf %846, %849 : vector<16x1xf32>
    %851 = math.rsqrt %850 : vector<16x1xf32>
    %852 = vector.broadcast %851 : vector<16x1xf32> to vector<16x32xf32>
    %853 = arith.mulf %848, %852 : vector<16x32xf32>
    %854 = vector.broadcast %36 : vector<1x32xf32> to vector<16x32xf32>
    %855 = arith.mulf %853, %854 : vector<16x32xf32>
    %856 = vector.broadcast %37 : vector<1x32xf32> to vector<16x32xf32>
    %857 = arith.addf %855, %856 : vector<16x32xf32>
    %cst_300 = arith.constant dense<0.000000e+00> : vector<16xf32>
    %858 = vector.multi_reduction <add>, %857, %cst_300 [1] : vector<16x32xf32> to vector<16xf32>
    %859 = vector.shape_cast %858 : vector<16xf32> to vector<16x1xf32>
    %cst_301 = arith.constant 3.200000e+01 : f32
    %860 = vector.broadcast %cst_301 : f32 to vector<16x1xf32>
    %861 = arith.divf %859, %860 : vector<16x1xf32>
    %862 = vector.broadcast %861 : vector<16x1xf32> to vector<16x32xf32>
    %863 = arith.subf %857, %862 : vector<16x32xf32>
    %864 = arith.mulf %863, %863 : vector<16x32xf32>
    %cst_302 = arith.constant dense<0.000000e+00> : vector<16xf32>
    %865 = vector.multi_reduction <add>, %864, %cst_302 [1] : vector<16x32xf32> to vector<16xf32>
    %866 = vector.shape_cast %865 : vector<16xf32> to vector<16x1xf32>
    %cst_303 = arith.constant 3.200000e+01 : f32
    %867 = vector.broadcast %cst_303 : f32 to vector<16x1xf32>
    %868 = arith.divf %866, %867 : vector<16x1xf32>
    %869 = vector.broadcast %861 : vector<16x1xf32> to vector<16x32xf32>
    %870 = arith.subf %857, %869 : vector<16x32xf32>
    %cst_304 = arith.constant 9.99999974E-6 : f32
    %871 = vector.broadcast %cst_304 : f32 to vector<16x1xf32>
    %872 = arith.addf %868, %871 : vector<16x1xf32>
    %873 = math.rsqrt %872 : vector<16x1xf32>
    %874 = vector.broadcast %873 : vector<16x1xf32> to vector<16x32xf32>
    %875 = arith.mulf %870, %874 : vector<16x32xf32>
    %876 = vector.broadcast %38 : vector<1x32xf32> to vector<16x32xf32>
    %877 = arith.mulf %875, %876 : vector<16x32xf32>
    %878 = vector.broadcast %39 : vector<1x32xf32> to vector<16x32xf32>
    %879 = arith.addf %877, %878 : vector<16x32xf32>
    %c16 = arith.constant 16 : index
    %c0_305 = arith.constant 0 : index
    %880 = vector.load %arg47[%c16, %c0_305] : memref<32x32xf32, #tpu.memory_space<vmem>>, vector<16x32xf32>
    tpu.vector_store %arg47[%c16, %c0_305], %879 {strides = array<i32>} : memref<32x32xf32, #tpu.memory_space<vmem>>, vector<16x32xf32>,
    return
  }
  func.func @transform_0(%arg0: i32) -> (i32, i32) {
    %c0_i32 = arith.constant 0 : i32
    %c0_i32_0 = arith.constant 0 : i32
    %c0_i32_1 = arith.constant 0 : i32
    return %c0_i32, %c0_i32_0 : i32, i32
  }
  func.func @transform_1(%arg0: i32) -> (i32, i32) {
    %c0_i32 = arith.constant 0 : i32
    %c0_i32_0 = arith.constant 0 : i32
    %c0_i32_1 = arith.constant 0 : i32
    return %c0_i32, %c0_i32_0 : i32, i32
  }
  func.func @transform_2(%arg0: i32) -> (i32, i32) {
    %c0_i32 = arith.constant 0 : i32
    %c0_i32_0 = arith.constant 0 : i32
    %c0_i32_1 = arith.constant 0 : i32
    return %c0_i32, %c0_i32_0 : i32, i32
  }
  func.func @transform_3(%arg0: i32) -> (i32, i32) {
    %c0_i32 = arith.constant 0 : i32
    %c0_i32_0 = arith.constant 0 : i32
    %c0_i32_1 = arith.constant 0 : i32
    return %c0_i32, %c0_i32_0 : i32, i32
  }
  func.func @transform_4(%arg0: i32) -> (i32, i32) {
    %c0_i32 = arith.constant 0 : i32
    %c0_i32_0 = arith.constant 0 : i32
    %c0_i32_1 = arith.constant 0 : i32
    return %c0_i32, %c0_i32_0 : i32, i32
  }
  func.func @transform_5(%arg0: i32) -> (i32, i32) {
    %c0_i32 = arith.constant 0 : i32
    %c0_i32_0 = arith.constant 0 : i32
    %c0_i32_1 = arith.constant 0 : i32
    return %c0_i32, %c0_i32_0 : i32, i32
  }
  func.func @transform_6(%arg0: i32) -> (i32, i32) {
    %c0_i32 = arith.constant 0 : i32
    %c0_i32_0 = arith.constant 0 : i32
    %c0_i32_1 = arith.constant 0 : i32
    return %c0_i32, %c0_i32_0 : i32, i32
  }
  func.func @transform_7(%arg0: i32) -> (i32, i32) {
    %c0_i32 = arith.constant 0 : i32
    %c0_i32_0 = arith.constant 0 : i32
    %c0_i32_1 = arith.constant 0 : i32
    return %c0_i32, %c0_i32_0 : i32, i32
  }
  func.func @transform_8(%arg0: i32) -> (i32, i32) {
    %c0_i32 = arith.constant 0 : i32
    %c0_i32_0 = arith.constant 0 : i32
    %c0_i32_1 = arith.constant 0 : i32
    return %c0_i32, %c0_i32_0 : i32, i32
  }
  func.func @transform_9(%arg0: i32) -> (i32, i32) {
    %c0_i32 = arith.constant 0 : i32
    %c0_i32_0 = arith.constant 0 : i32
    %c0_i32_1 = arith.constant 0 : i32
    return %c0_i32, %c0_i32_0 : i32, i32
  }
  func.func @transform_10(%arg0: i32) -> (i32, i32) {
    %c0_i32 = arith.constant 0 : i32
    %c0_i32_0 = arith.constant 0 : i32
    %c0_i32_1 = arith.constant 0 : i32
    return %c0_i32, %c0_i32_0 : i32, i32
  }
  func.func @transform_11(%arg0: i32) -> (i32, i32) {
    %c0_i32 = arith.constant 0 : i32
    %c0_i32_0 = arith.constant 0 : i32
    %c0_i32_1 = arith.constant 0 : i32
    return %c0_i32, %c0_i32_0 : i32, i32
  }
  func.func @transform_12(%arg0: i32) -> (i32, i32) {
    %c0_i32 = arith.constant 0 : i32
    %c0_i32_0 = arith.constant 0 : i32
    %c0_i32_1 = arith.constant 0 : i32
    return %c0_i32, %c0_i32_0 : i32, i32
  }
  func.func @transform_13(%arg0: i32) -> (i32, i32) {
    %c0_i32 = arith.constant 0 : i32
    %c0_i32_0 = arith.constant 0 : i32
    %c0_i32_1 = arith.constant 0 : i32
    return %c0_i32, %c0_i32_0 : i32, i32
  }
  func.func @transform_14(%arg0: i32) -> (i32, i32) {
    %c0_i32 = arith.constant 0 : i32
    %c0_i32_0 = arith.constant 0 : i32
    %c0_i32_1 = arith.constant 0 : i32
    return %c0_i32, %c0_i32_0 : i32, i32
  }
  func.func @transform_15(%arg0: i32) -> (i32, i32) {
    %c0_i32 = arith.constant 0 : i32
    %c0_i32_0 = arith.constant 0 : i32
    %c0_i32_1 = arith.constant 0 : i32
    return %c0_i32, %c0_i32_0 : i32, i32
  }
  func.func @transform_16(%arg0: i32) -> (i32, i32) {
    %c0_i32 = arith.constant 0 : i32
    %c0_i32_0 = arith.constant 0 : i32
    %c0_i32_1 = arith.constant 0 : i32
    return %c0_i32, %c0_i32_0 : i32, i32
  }
  func.func @transform_17(%arg0: i32) -> (i32, i32) {
    %c0_i32 = arith.constant 0 : i32
    %c0_i32_0 = arith.constant 0 : i32
    %c0_i32_1 = arith.constant 0 : i32
    return %c0_i32, %c0_i32_0 : i32, i32
  }
  func.func @transform_18(%arg0: i32) -> (i32, i32) {
    %c0_i32 = arith.constant 0 : i32
    %c0_i32_0 = arith.constant 0 : i32
    %c0_i32_1 = arith.constant 0 : i32
    return %c0_i32, %c0_i32_0 : i32, i32
  }
  func.func @transform_19(%arg0: i32) -> (i32, i32) {
    %c0_i32 = arith.constant 0 : i32
    %c0_i32_0 = arith.constant 0 : i32
    %c0_i32_1 = arith.constant 0 : i32
    return %c0_i32, %c0_i32_0 : i32, i32
  }
  func.func @transform_20(%arg0: i32) -> (i32, i32) {
    %c0_i32 = arith.constant 0 : i32
    %c0_i32_0 = arith.constant 0 : i32
    %c0_i32_1 = arith.constant 0 : i32
    return %c0_i32, %c0_i32_0 : i32, i32
  }
  func.func @transform_21(%arg0: i32) -> (i32, i32) {
    %c0_i32 = arith.constant 0 : i32
    %c0_i32_0 = arith.constant 0 : i32
    %c0_i32_1 = arith.constant 0 : i32
    return %c0_i32, %c0_i32_0 : i32, i32
  }
  func.func @transform_22(%arg0: i32) -> (i32, i32) {
    %c0_i32 = arith.constant 0 : i32
    %c0_i32_0 = arith.constant 0 : i32
    %c0_i32_1 = arith.constant 0 : i32
    return %c0_i32, %c0_i32_0 : i32, i32
  }
  func.func @transform_23(%arg0: i32) -> (i32, i32) {
    %c0_i32 = arith.constant 0 : i32
    %c0_i32_0 = arith.constant 0 : i32
    %c0_i32_1 = arith.constant 0 : i32
    return %c0_i32, %c0_i32_0 : i32, i32
  }
  func.func @transform_24(%arg0: i32) -> (i32, i32) {
    %c0_i32 = arith.constant 0 : i32
    %c0_i32_0 = arith.constant 0 : i32
    %c0_i32_1 = arith.constant 0 : i32
    return %c0_i32, %c0_i32_0 : i32, i32
  }
  func.func @transform_25(%arg0: i32) -> (i32, i32) {
    %c0_i32 = arith.constant 0 : i32
    %c0_i32_0 = arith.constant 0 : i32
    %c0_i32_1 = arith.constant 0 : i32
    return %c0_i32, %c0_i32_0 : i32, i32
  }
  func.func @transform_26(%arg0: i32) -> (i32, i32) {
    %c0_i32 = arith.constant 0 : i32
    %c0_i32_0 = arith.constant 0 : i32
    %c0_i32_1 = arith.constant 0 : i32
    return %c0_i32, %c0_i32_0 : i32, i32
  }
  func.func @transform_27(%arg0: i32) -> (i32, i32) {
    %c0_i32 = arith.constant 0 : i32
    %c0_i32_0 = arith.constant 0 : i32
    %c0_i32_1 = arith.constant 0 : i32
    return %c0_i32, %c0_i32_0 : i32, i32
  }
  func.func @transform_28(%arg0: i32) -> (i32, i32) {
    %c0_i32 = arith.constant 0 : i32
    %c0_i32_0 = arith.constant 0 : i32
    %c0_i32_1 = arith.constant 0 : i32
    return %c0_i32, %c0_i32_0 : i32, i32
  }
  func.func @transform_29(%arg0: i32) -> (i32, i32) {
    %c0_i32 = arith.constant 0 : i32
    %c0_i32_0 = arith.constant 0 : i32
    %c0_i32_1 = arith.constant 0 : i32
    return %c0_i32, %c0_i32_0 : i32, i32
  }
  func.func @transform_30(%arg0: i32) -> (i32, i32) {
    %c0_i32 = arith.constant 0 : i32
    %c0_i32_0 = arith.constant 0 : i32
    %c0_i32_1 = arith.constant 0 : i32
    return %c0_i32, %c0_i32_0 : i32, i32
  }
  func.func @transform_31(%arg0: i32) -> (i32, i32) {
    %c0_i32 = arith.constant 0 : i32
    %c0_i32_0 = arith.constant 0 : i32
    %c0_i32_1 = arith.constant 0 : i32
    return %c0_i32, %c0_i32_0 : i32, i32
  }
  func.func @transform_32(%arg0: i32) -> (i32, i32) {
    %c0_i32 = arith.constant 0 : i32
    %c0_i32_0 = arith.constant 0 : i32
    %c0_i32_1 = arith.constant 0 : i32
    return %c0_i32, %c0_i32_0 : i32, i32
  }
  func.func @transform_33(%arg0: i32) -> (i32, i32) {
    %c0_i32 = arith.constant 0 : i32
    %c0_i32_0 = arith.constant 0 : i32
    %c0_i32_1 = arith.constant 0 : i32
    return %c0_i32, %c0_i32_0 : i32, i32
  }
  func.func @transform_34(%arg0: i32) -> (i32, i32) {
    %c0_i32 = arith.constant 0 : i32
    %c0_i32_0 = arith.constant 0 : i32
    %c0_i32_1 = arith.constant 0 : i32
    return %c0_i32, %c0_i32_0 : i32, i32
  }
  func.func @transform_35(%arg0: i32) -> (i32, i32) {
    %c0_i32 = arith.constant 0 : i32
    %c0_i32_0 = arith.constant 0 : i32
    %c0_i32_1 = arith.constant 0 : i32
    return %c0_i32, %c0_i32_0 : i32, i32
  }
  func.func @transform_36(%arg0: i32) -> (i32, i32) {
    %c0_i32 = arith.constant 0 : i32
    %c0_i32_0 = arith.constant 0 : i32
    %c0_i32_1 = arith.constant 0 : i32
    return %c0_i32, %c0_i32_0 : i32, i32
  }
  func.func @transform_37(%arg0: i32) -> (i32, i32) {
    %c0_i32 = arith.constant 0 : i32
    %c0_i32_0 = arith.constant 0 : i32
    %c0_i32_1 = arith.constant 0 : i32
    return %c0_i32, %c0_i32_0 : i32, i32
  }
  func.func @transform_38(%arg0: i32) -> (i32, i32) {
    %c0_i32 = arith.constant 0 : i32
    %c0_i32_0 = arith.constant 0 : i32
    %c0_i32_1 = arith.constant 0 : i32
    return %c0_i32, %c0_i32_0 : i32, i32
  }
  func.func @transform_39(%arg0: i32) -> (i32, i32) {
    %c0_i32 = arith.constant 0 : i32
    %c0_i32_0 = arith.constant 0 : i32
    %c0_i32_1 = arith.constant 0 : i32
    return %c0_i32, %c0_i32_0 : i32, i32
  }
  func.func @transform_40(%arg0: i32) -> (i32, i32) {
    %c0_i32 = arith.constant 0 : i32
    %c0_i32_0 = arith.constant 0 : i32
    %c0_i32_1 = arith.constant 0 : i32
    return %c0_i32, %c0_i32_0 : i32, i32
  }
  func.func @transform_41(%arg0: i32) -> (i32, i32) {
    %c0_i32 = arith.constant 0 : i32
    %c0_i32_0 = arith.constant 0 : i32
    %c0_i32_1 = arith.constant 0 : i32
    return %c0_i32, %c0_i32_0 : i32, i32
  }
  func.func @transform_42(%arg0: i32) -> (i32, i32) {
    %c0_i32 = arith.constant 0 : i32
    %c0_i32_0 = arith.constant 0 : i32
    %c0_i32_1 = arith.constant 0 : i32
    return %c0_i32, %c0_i32_0 : i32, i32
  }
  func.func @transform_43(%arg0: i32) -> (i32, i32) {
    %c0_i32 = arith.constant 0 : i32
    %c0_i32_0 = arith.constant 0 : i32
    %c0_i32_1 = arith.constant 0 : i32
    return %c0_i32, %c0_i32_0 : i32, i32
  }
  func.func @transform_44(%arg0: i32) -> (i32, i32) {
    %c0_i32 = arith.constant 0 : i32
    %c0_i32_0 = arith.constant 0 : i32
    %c0_i32_1 = arith.constant 0 : i32
    return %c0_i32, %c0_i32_0 : i32, i32
  }
  func.func @transform_45(%arg0: i32) -> (i32, i32) {
    %c0_i32 = arith.constant 0 : i32
    %c0_i32_0 = arith.constant 0 : i32
    %c0_i32_1 = arith.constant 0 : i32
    return %c0_i32, %c0_i32_0 : i32, i32
  }
  func.func @transform_46(%arg0: i32) -> (i32, i32) {
    %c0_i32 = arith.constant 0 : i32
    %c0_i32_0 = arith.constant 0 : i32
    %c0_i32_1 = arith.constant 0 : i32
    return %c0_i32, %c0_i32_0 : i32, i32
  }
  func.func @transform_47(%arg0: i32) -> (i32, i32) {
    %c0_i32 = arith.constant 0 : i32
    %c0_i32_0 = arith.constant 0 : i32
    %c0_i32_1 = arith.constant 0 : i32
    return %c0_i32, %c0_i32_0 : i32, i32
  }
}

</mosaic_0001>

<bundles_post_ra>
// kernel: eq.29
= control target key start
LH: loop header
LB: loop body
LE: loop exit
PB: predicated region body
PF: predicated region fallthrough
CT: control target
= control target key end

     0   :  { %vm7_vm0 = vcmask 64512   ;;  %vm13_vm1 = vcmask 130112   ;;  %s39_s0 = inlined_call_operand.vmem [shape: s32[2,8], index: 0, kind: input, shape index: {}]   ;;  %s40_s1 = inlined_call_operand.vmem [shape: s32[16], index: 1, kind: output, shape index: {}]  }
   0x1   :  { %v4_v0 = vld [vmem:[%s39_s0] sm:$0x3]  ;;  %s22_s0 = smov 8  }
   0x2   :  { %5 = vst [vmem:[#allocation1] sm:$0x3] %v4_v0 }
   0x9   :  { %v10_v1 = vld [vmem:[#allocation1 + $0x1] sm:$0x1]   ;;  %v6_v2 = vld [vmem:[#allocation1] sm:$0x1]  }
   0xa   :  { %11 = vrot.lane.b32.xlu0 %v10_v1, %s22_s0  ;;  %8 = vst.msk [vmem:[#allocation0] sm:$0x1] %vm7_vm0, %v6_v2  }
  0x7c   :  { %v12_v3 = vpop.permute.xlu0 %11  }
  0x7d   :  { %14 = vst.msk [vmem:[#allocation0] sm:$0x1] %vm13_vm1, %v12_v3  }
  0x84   :  { %v18_v4 = vld [vmem:[#allocation0] sm:$0x1] }
  0x85   :  { %20 = vst [vmem:[%s40_s1] sm:$0x1] %v18_v4 }

// kernel: eq.22
= control target key start
LH: loop header
LB: loop body
LE: loop exit
PB: predicated region body
PF: predicated region fallthrough
CT: control target
= control target key end

     0   :  { %vm7_vm0 = vcmask 130048   ;;  %vm13_vm1 = vcmask 261248   ;;  %s39_s0 = inlined_call_operand.vmem [shape: s32[2,16], index: 0, kind: input, shape index: {}]   ;;  %s40_s1 = inlined_call_operand.vmem [shape: s32[32], index: 1, kind: output, shape index: {}]  }
   0x1   :  { %v4_v0 = vld [vmem:[%s39_s0] sm:$0x3]  ;;  %s22_s0 = smov 16  }
   0x2   :  { %5 = vst [vmem:[#allocation1] sm:$0x3] %v4_v0 }
   0x9   :  { %v10_v1 = vld [vmem:[#allocation1 + $0x1] sm:$0x1]   ;;  %v6_v2 = vld [vmem:[#allocation1] sm:$0x1]  }
   0xa   :  { %11 = vrot.lane.b32.xlu0 %v10_v1, %s22_s0  ;;  %8 = vst.msk [vmem:[#allocation0] sm:$0x1] %vm7_vm0, %v6_v2  }
  0x7c   :  { %v12_v3 = vpop.permute.xlu0 %11  }
  0x7d   :  { %14 = vst.msk [vmem:[#allocation0] sm:$0x1] %vm13_vm1, %v12_v3  }
  0x84   :  { %v18_v4 = vld [vmem:[#allocation0] sm:$0x1] }
  0x85   :  { %20 = vst [vmem:[%s40_s1] sm:$0x1] %v18_v4 }

// kernel: transformer_forward.1
= control target key start
LH: loop header
LB: loop body
LE: loop exit
PB: predicated region body
PF: predicated region fallthrough
CT: control target
= control target key end

     0   :  { %s14047_s6 = smov 1   ;;  %s14048_s10 = smov 2   ;;  %s16007_s0 = inlined_call_operand.smem [shape: u32[48], index: -1, kind: input, shape index: {}] }
   0x1   :  { %s14128_s5 = sld [smem:[%s16007_s0]]   ;;  %s14049_s14 = smov 3  }
   0x2   :  { %s14133_s9 = sld [smem:[%s16007_s0 + %s14047_s6]]   ;;  %s14050_s18 = smov 4  }
   0x3   :  { %s14138_s13 = sld [smem:[%s16007_s0 + %s14048_s10]]   ;;  %s14051_s22 = smov 5  }
   0x4   :  { %s14143_s17 = sld [smem:[%s16007_s0 + %s14049_s14]]   ;;  %s14052_s26 = smov 6  }
   0x5   :  { %s14148_s21 = sld [smem:[%s16007_s0 + %s14050_s18]]   ;;  %s14053_s30 = smov 7  }
   0x6   :  { %s14153_s25 = sld [smem:[%s16007_s0 + %s14051_s22]]   ;;  %s14054_s4 = smov 8  }
   0x7   :  { %16038 = sst [smem:[#allocation36_spill]] %s14128_s5  ;;  %s14055_s10 = smov 9  }
   0x8   :  { %16039 = sst [smem:[#allocation37_spill]] %s14133_s9  ;;  %s14056_s15 = smov 10  }
   0x9   :  { %16040 = sst [smem:[#allocation38_spill]] %s14138_s13  ;;  %s14057_s20 = smov 11  }
   0xa   :  { %16041 = sst [smem:[#allocation39_spill]] %s14143_s17  ;;  %s14059_s1 = smov 13  }
   0xb   :  { %16042 = sst [smem:[#allocation40_spill]] %s14148_s21  ;;  %s14060_s7 = smov 14  }
   0xc   :  { %16043 = sst [smem:[#allocation41_spill]] %s14153_s25  ;;  %s14062_s22 = smov 16  }
   0xd   :  { %s14158_s29 = sld [smem:[%s16007_s0 + %s14052_s26]]   ;;  %s14058_s26 = smov 12  }
   0xe   :  { %s14163_s3 = sld [smem:[%s16007_s0 + %s14053_s30]]   ;;  %s14063_s28 = smov 17  }
   0xf   :  { %s14168_s8 = sld [smem:[%s16007_s0 + %s14054_s4]]  }
  0x10   :  { %s14173_s14 = sld [smem:[%s16007_s0 + %s14055_s10]]  }
  0x11   :  { %s14178_s19 = sld [smem:[%s16007_s0 + %s14056_s15]]   ;;  %s14061_s15 = smov 15  }
  0x12   :  { %s14183_s24 = sld [smem:[%s16007_s0 + %s14057_s20]]  }
  0x13   :  { %16044 = sst [smem:[#allocation42_spill]] %s14158_s29 }
  0x14   :  { %16045 = sst [smem:[#allocation43_spill]] %s14163_s3 }
  0x15   :  { %16046 = sst [smem:[#allocation44_spill]] %s14168_s8 }
  0x16   :  { %16047 = sst [smem:[#allocation45_spill]] %s14173_s14 }
  0x17   :  { %16048 = sst [smem:[#allocation46_spill]] %s14178_s19 }
  0x18   :  { %16049 = sst [smem:[#allocation47_spill]] %s14183_s24 }
  0x19   :  { %s14188_s30 = sld [smem:[%s16007_s0 + %s14058_s26]]  }
  0x1a   :  { %s14193_s6 = sld [smem:[%s16007_s0 + %s14059_s1]]  }
  0x1b   :  { %s14198_s12 = sld [smem:[%s16007_s0 + %s14060_s7]]   ;;  %s14064_s7 = smov 18  }
  0x1c   :  { %s14203_s20 = sld [smem:[%s16007_s0 + %s14061_s15]]   ;;  %s14065_s15 = smov 19  }
  0x1d   :  { %s14208_s27 = sld [smem:[%s16007_s0 + %s14062_s22]]   ;;  %s14066_s22 = smov 20  }
  0x1e   :  { %s14213_s4 = sld [smem:[%s16007_s0 + %s14063_s28]]   ;;  %s14067_s28 = smov 21  }
  0x1f   :  { %16050 = sst [smem:[#allocation48_spill]] %s14188_s30 }
  0x20   :  { %16051 = sst [smem:[#allocation49_spill]] %s14193_s6 }
  0x21   :  { %16052 = sst [smem:[#allocation50_spill]] %s14198_s12 }
  0x22   :  { %16053 = sst [smem:[#allocation51_spill]] %s14203_s20 }
  0x23   :  { %16054 = sst [smem:[#allocation52_spill]] %s14208_s27 }
  0x24   :  { %16055 = sst [smem:[#allocation53_spill]] %s14213_s4 }
  0x25   :  { %s14218_s25 = sld [smem:[%s16007_s0 + %s14064_s7]]   ;;  %s14068_s7 = smov 22  }
  0x26   :  { %s14223_s21 = sld [smem:[%s16007_s0 + %s14065_s15]]   ;;  %s14069_s15 = smov 23  }
  0x27   :  { %s14228_s13 = sld [smem:[%s16007_s0 + %s14066_s22]]   ;;  %s14070_s22 = smov 24  }
  0x28   :  { %s14233_s4 = sld [smem:[%s16007_s0 + %s14067_s28]]   ;;  %s14071_s28 = smov 25  }
  0x29   :  { %s14253_s20 = sld [smem:[%s16007_s0 + %s14071_s28]]   ;;  %s14075_s28 = smov 29  }
  0x2a   :  { %s14273_s30 = sld [smem:[%s16007_s0 + %s14075_s28]]   ;;  %s14079_s28 = smov 33  }
  0x2b   :  { %16056 = sst [smem:[#allocation54_spill]] %s14218_s25 }
  0x2c   :  { %16057 = sst [smem:[#allocation55_spill]] %s14223_s21 }
  0x2d   :  { %16058 = sst [smem:[#allocation56_spill]] %s14228_s13 }
  0x2e   :  { %s14238_s25 = sld [smem:[%s16007_s0 + %s14068_s7]]   ;;  %s14072_s7 = smov 26  }
  0x2f   :  { %s14243_s21 = sld [smem:[%s16007_s0 + %s14069_s15]]   ;;  %s14073_s15 = smov 27  }
  0x30   :  { %s14248_s13 = sld [smem:[%s16007_s0 + %s14070_s22]]   ;;  %s14074_s22 = smov 28  }
  0x31   :  { %s14263_s6 = sld [smem:[%s16007_s0 + %s14073_s15]]   ;;  %s14077_s15 = smov 31  }
  0x32   :  { %s14283_s12 = sld [smem:[%s16007_s0 + %s14077_s15]]   ;;  %s14081_s15 = smov 35  }
  0x33   :  { %s14293_s24 = sld [smem:[%s16007_s0 + %s14079_s28]]   ;;  %s14083_s28 = smov 37  }
  0x34   :  { %16059 = sst [smem:[#allocation57_spill]] %s14238_s25 }
  0x35   :  { %s14258_s25 = sld [smem:[%s16007_s0 + %s14072_s7]]   ;;  %s14076_s7 = smov 30  }
  0x36   :  { %16060 = sst [smem:[#allocation58_spill]] %s14248_s13 }
  0x37   :  { %s14268_s13 = sld [smem:[%s16007_s0 + %s14074_s22]]   ;;  %s14078_s22 = smov 32  }
  0x38   :  { %s14278_s27 = sld [smem:[%s16007_s0 + %s14076_s7]]   ;;  %s14080_s7 = smov 34  }
  0x39   :  { %s14303_s19 = sld [smem:[%s16007_s0 + %s14081_s15]]   ;;  %s14085_s15 = smov 39  }
  0x3a   :  { %s14313_s14 = sld [smem:[%s16007_s0 + %s14083_s28]]   ;;  %s14087_s28 = smov 41  }
  0x3b   :  { %s14323_s17 = sld [smem:[%s16007_s0 + %s14085_s15]]   ;;  %s14089_s15 = smov 43  }
  0x3c   :  { %s14333_s3 = sld [smem:[%s16007_s0 + %s14087_s28]]   ;;  %s14091_s28 = smov 45  }
  0x3d   :  { %16061 = sst [smem:[#allocation59_spill]] %s14268_s13 }
  0x3e   :  { %16062 = sst [smem:[#allocation60_spill]] %s14278_s27 }
  0x3f   :  { %s14288_s13 = sld [smem:[%s16007_s0 + %s14078_s22]]   ;;  %s14082_s22 = smov 36  }
  0x40   :  { %s14298_s27 = sld [smem:[%s16007_s0 + %s14080_s7]]   ;;  %s14084_s7 = smov 38  }
  0x41   :  { %s14343_s9 = sld [smem:[%s16007_s0 + %s14089_s15]]   ;;  %s14093_s15 = smov 47  }
  0x42   :  { %s14353_s5 = sld [smem:[%s16007_s0 + %s14091_s28]]  }
  0x45   :  { %16063 = sst [smem:[#allocation61_spill]] %s14288_s13 }
  0x46   :  { %16064 = sst [smem:[#allocation62_spill]] %s14298_s27 }
  0x47   :  { %s14308_s13 = sld [smem:[%s16007_s0 + %s14082_s22]]   ;;  %s14086_s22 = smov 40  }
  0x48   :  { %s14318_s27 = sld [smem:[%s16007_s0 + %s14084_s7]]   ;;  %s14088_s7 = smov 42  }
  0x49   :  { %s14328_s8 = sld [smem:[%s16007_s0 + %s14086_s22]]   ;;  %s14090_s22 = smov 44  }
  0x4a   :  { %16067 = sst [smem:[#allocation65_spill]] %s14343_s9 }
  0x4b   :  { %s14363_s9 = sld [smem:[%s16007_s0 + %s14093_s15]]  }
  0x4e   :  { %16065 = sst [smem:[#allocation63_spill]] %s14318_s27 }
  0x4f   :  { %16066 = sst [smem:[#allocation64_spill]] %s14328_s8 }
  0x50   :  { %s14338_s27 = sld [smem:[%s16007_s0 + %s14088_s7]]   ;;  %s14092_s7 = smov 46  }
  0x51   :  { %s14348_s8 = sld [smem:[%s16007_s0 + %s14090_s22]]  }
  0x52   :  { %s14358_s29 = sld [smem:[%s16007_s0 + %s14092_s7]]  }
  0x53   :  { %101 = vsyncpa [#allocation3], 0 }
  0x54   :  { %102 = vsyncpa [#allocation6], 0 }
  0x55   :  { %103 = vsyncpa [#allocation9], 0 }
  0x56   :  { %104 = vsyncpa [#allocation12], 0 }
  0x57   :  { %105 = vsyncpa [#allocation15], 0 }
  0x58   :  { %106 = vsyncpa [#allocation18], 0 }
  0x59   :  { %107 = vsyncpa [#allocation21], 0 }
  0x5a   :  { %108 = vsyncpa [#allocation24], 0 }
  0x5b   :  { %109 = vsyncpa [#allocation4], 0  ;;  %s14094_s22 = smov [#allocation5]   ;;  %s14095_s26 = smov [#allocation8]  }
  0x5c   :  { %s170_s23 = sshll.u32 %s14094_s22, 4  ;;  %s192_s28 = sshll.u32 %s14095_s26, 4  ;;  %s171_s23 = int_to_ptr.vmem [resolvable:$true] %s170_s23  ;;  %s193_s28 = int_to_ptr.vmem [resolvable:$true] %s192_s28 }
  0x5d   :  { %s13677_s0 = scalar_lea.hbm %s14243_s21, 16 }
  0x5e   :  { %p13678_p0 = scmp.ne.s32.totalorder %s14243_s21, %s13677_s0  ;;  %p13681_p1 = scmp.lt.u32.totalorder %s13677_s0, %s14243_s21 }
  0x60   :  { %p13683_p2 = pnand %p13681_p1, %p13678_p0 }
  0x62   :  { %13686 = shalt.err (!%p13683_p2)
}
  0x63   :  { %s13687_s1 = scalar_lea.vmem %s171_s23, 16  ;;  %s13691_s2 = scalar_lea.vmem %s171_s23, 32 }
  0x64   :  { %p13688_p3 = scmp.ne.s32.totalorder %s171_s23, %s13687_s1  ;;  %p13692_p4 = scmp.lt.s32.totalorder %s171_s23, %s171_s23 }
  0x65   :  { %p13693_p5 = scmp.lt.s32.totalorder %s13691_s2, %s13687_s1 }
  0x67   :  { %p13694_p6 = por %p13693_p5, %p13692_p4 }
  0x69   :  { %p13695_p7 = pnand %p13694_p6, %p13688_p3 }
  0x6b   :  { %13698 = shalt.err (!%p13695_p7)
}
  0x6c   :  { %173 = dma.hbm_to_vmem [thread:$0]  %s14243_s21, 16, %s171_s23, [#allocation6]  }
  0x6d   :  { %s13699_s7 = scalar_lea.hbm %s14258_s25, 16 }
  0x6e   :  { %p13700_p8 = scmp.ne.s32.totalorder %s14258_s25, %s13699_s7  ;;  %p13703_p9 = scmp.lt.u32.totalorder %s13699_s7, %s14258_s25 }
  0x70   :  { %p13705_p10 = pnand %p13703_p9, %p13700_p8 }
  0x72   :  { %13708 = shalt.err (!%p13705_p10)
}
  0x73   :  { %s13709_s10 = scalar_lea.vmem %s193_s28, 16  ;;  %s13713_s11 = scalar_lea.vmem %s193_s28, 32 }
  0x74   :  { %p13710_p11 = scmp.ne.s32.totalorder %s193_s28, %s13709_s10  ;;  %p13714_p12 = scmp.lt.s32.totalorder %s193_s28, %s193_s28 }
  0x75   :  { %p13715_p13 = scmp.lt.s32.totalorder %s13713_s11, %s13709_s10 }
  0x77   :  { %p13716_p0 = por %p13715_p13, %p13714_p12 }
  0x79   :  { %p13717_p1 = pnand %p13716_p0, %p13710_p11 }
  0x7b   :  { %13720 = shalt.err (!%p13717_p1)
}
  0x7c   :  { %195 = dma.hbm_to_vmem [thread:$0]  %s14258_s25, 16, %s193_s28, [#allocation9]  }
  0x7d   :  { %s14096_s15 = smov [#allocation11]   ;;  %s14097_s16 = smov [#allocation14]  }
  0x7e   :  { %s214_s21 = sshll.u32 %s14096_s15, 4  ;;  %s238_s18 = sshll.u32 %s14097_s16, 4  ;;  %s215_s21 = int_to_ptr.vmem [resolvable:$true] %s214_s21  ;;  %s239_s18 = int_to_ptr.vmem [resolvable:$true] %s238_s18 }
  0x7f   :  { %s13721_s22 = scalar_lea.hbm %s14273_s30, 16 }
  0x80   :  { %p13722_p2 = scmp.ne.s32.totalorder %s14273_s30, %s13721_s22  ;;  %p13725_p3 = scmp.lt.u32.totalorder %s13721_s22, %s14273_s30 }
  0x82   :  { %p13727_p4 = pnand %p13725_p3, %p13722_p2 }
  0x84   :  { %13730 = shalt.err (!%p13727_p4)
}
  0x85   :  { %s13731_s23 = scalar_lea.vmem %s215_s21, 16  ;;  %s13735_s26 = scalar_lea.vmem %s215_s21, 32 }
  0x86   :  { %p13732_p5 = scmp.ne.s32.totalorder %s215_s21, %s13731_s23  ;;  %p13736_p6 = scmp.lt.s32.totalorder %s215_s21, %s215_s21 }
  0x87   :  { %p13737_p7 = scmp.lt.s32.totalorder %s13735_s26, %s13731_s23 }
  0x89   :  { %p13738_p8 = por %p13737_p7, %p13736_p6 }
  0x8b   :  { %p13739_p9 = pnand %p13738_p8, %p13732_p5 }
  0x8d   :  { %13742 = shalt.err (!%p13739_p9)
}
  0x8e   :  { %217 = dma.hbm_to_vmem [thread:$0]  %s14273_s30, 16, %s215_s21, [#allocation12]  }
  0x8f   :  { %s13743_s25 = scalar_lea.hbm %s14293_s24, 16 }
  0x90   :  { %p13744_p10 = scmp.ne.s32.totalorder %s14293_s24, %s13743_s25  ;;  %p13747_p11 = scmp.lt.u32.totalorder %s13743_s25, %s14293_s24 }
  0x92   :  { %p13749_p12 = pnand %p13747_p11, %p13744_p10 }
  0x94   :  { %13752 = shalt.err (!%p13749_p12)
}
  0x95   :  { %s13753_s28 = scalar_lea.vmem %s239_s18, 16  ;;  %s13757_s0 = scalar_lea.vmem %s239_s18, 32 }
  0x96   :  { %p13754_p13 = scmp.ne.s32.totalorder %s239_s18, %s13753_s28  ;;  %p13758_p0 = scmp.lt.s32.totalorder %s239_s18, %s239_s18 }
  0x97   :  { %p13759_p1 = scmp.lt.s32.totalorder %s13757_s0, %s13753_s28 }
  0x99   :  { %p13760_p2 = por %p13759_p1, %p13758_p0 }
  0x9b   :  { %p13761_p3 = pnand %p13760_p2, %p13754_p13 }
  0x9d   :  { %13764 = shalt.err (!%p13761_p3)
}
  0x9e   :  { %241 = dma.hbm_to_vmem [thread:$0]  %s14293_s24, 16, %s239_s18, [#allocation15]  }
  0x9f   :  { %s14098_s1 = smov [#allocation17]   ;;  %s14099_s2 = smov [#allocation20]  }
  0xa0   :  { %s260_s30 = sshll.u32 %s14098_s1, 4  ;;  %s282_s7 = sshll.u32 %s14099_s2, 4  ;;  %s261_s30 = int_to_ptr.vmem [resolvable:$true] %s260_s30  ;;  %s283_s7 = int_to_ptr.vmem [resolvable:$true] %s282_s7 }
  0xa1   :  { %s13765_s10 = scalar_lea.hbm %s14308_s13, 16 }
  0xa2   :  { %p13766_p4 = scmp.ne.s32.totalorder %s14308_s13, %s13765_s10  ;;  %p13769_p5 = scmp.lt.u32.totalorder %s13765_s10, %s14308_s13 }
  0xa4   :  { %p13771_p6 = pnand %p13769_p5, %p13766_p4 }
  0xa6   :  { %13774 = shalt.err (!%p13771_p6)
}
  0xa7   :  { %s13775_s11 = scalar_lea.vmem %s261_s30, 16  ;;  %s13779_s15 = scalar_lea.vmem %s261_s30, 32 }
  0xa8   :  { %p13776_p7 = scmp.ne.s32.totalorder %s261_s30, %s13775_s11  ;;  %p13780_p8 = scmp.lt.s32.totalorder %s261_s30, %s261_s30 }
  0xa9   :  { %p13781_p9 = scmp.lt.s32.totalorder %s13779_s15, %s13775_s11 }
  0xab   :  { %p13782_p10 = por %p13781_p9, %p13780_p8 }
  0xad   :  { %p13783_p11 = pnand %p13782_p10, %p13776_p7 }
  0xaf   :  { %13786 = shalt.err (!%p13783_p11)
}
  0xb0   :  { %263 = dma.hbm_to_vmem [thread:$0]  %s14308_s13, 16, %s261_s30, [#allocation18]  }
  0xb1   :  { %s13787_s24 = scalar_lea.hbm %s14323_s17, 16 }
  0xb2   :  { %p13788_p12 = scmp.ne.s32.totalorder %s14323_s17, %s13787_s24  ;;  %p13791_p13 = scmp.lt.u32.totalorder %s13787_s24, %s14323_s17 }
  0xb4   :  { %p13793_p0 = pnand %p13791_p13, %p13788_p12 }
  0xb6   :  { %13796 = shalt.err (!%p13793_p0)
}
  0xb7   :  { %s13797_s21 = scalar_lea.vmem %s283_s7, 16  ;;  %s13801_s16 = scalar_lea.vmem %s283_s7, 32 }
  0xb8   :  { %p13798_p1 = scmp.ne.s32.totalorder %s283_s7, %s13797_s21  ;;  %p13802_p2 = scmp.lt.s32.totalorder %s283_s7, %s283_s7 }
  0xb9   :  { %p13803_p3 = scmp.lt.s32.totalorder %s13801_s16, %s13797_s21 }
  0xbb   :  { %p13804_p4 = por %p13803_p3, %p13802_p2 }
  0xbd   :  { %p13805_p5 = pnand %p13804_p4, %p13798_p1 }
  0xbf   :  { %13808 = shalt.err (!%p13805_p5)
}
  0xc0   :  { %285 = dma.hbm_to_vmem [thread:$0]  %s14323_s17, 16, %s283_s7, [#allocation21]  }
  0xc1   :  { %s14100_s18 = smov [#allocation23]   ;;  %s14101_s22 = smov [#allocation2]  }
  0xc2   :  { %s304_s13 = sshll.u32 %s14100_s18, 4  ;;  %s158_s23 = sshll.u32 %s14101_s22, 4  ;;  %s305_s13 = int_to_ptr.vmem [resolvable:$true] %s304_s13  ;;  %s159_s23 = int_to_ptr.vmem [resolvable:$true] %s158_s23 }
  0xc3   :  { %s13809_s26 = scalar_lea.hbm %s14338_s27, 16 }
  0xc4   :  { %p13810_p6 = scmp.ne.s32.totalorder %s14338_s27, %s13809_s26  ;;  %p13813_p7 = scmp.lt.u32.totalorder %s13809_s26, %s14338_s27 }
  0xc6   :  { %p13815_p8 = pnand %p13813_p7, %p13810_p6 }
  0xc8   :  { %13818 = shalt.err (!%p13815_p8)
}
  0xc9   :  { %s13819_s25 = scalar_lea.vmem %s305_s13, 16  ;;  %s13823_s28 = scalar_lea.vmem %s305_s13, 32 }
  0xca   :  { %p13820_p9 = scmp.ne.s32.totalorder %s305_s13, %s13819_s25  ;;  %p13824_p10 = scmp.lt.s32.totalorder %s305_s13, %s305_s13 }
  0xcb   :  { %p13825_p11 = scmp.lt.s32.totalorder %s13823_s28, %s13819_s25 }
  0xcd   :  { %p13826_p12 = por %p13825_p11, %p13824_p10 }
  0xcf   :  { %p13827_p13 = pnand %p13826_p12, %p13820_p9 }
  0xd1   :  { %13830 = shalt.err (!%p13827_p13)
}
  0xd2   :  { %307 = dma.hbm_to_vmem [thread:$0]  %s14338_s27, 16, %s305_s13, [#allocation24]  }
  0xd3   :  { %s13831_s17 = scalar_lea.hbm %s14233_s4, 16 }
  0xd4   :  { %p13832_p0 = scmp.ne.s32.totalorder %s14233_s4, %s13831_s17  ;;  %p13835_p1 = scmp.lt.u32.totalorder %s13831_s17, %s14233_s4 }
  0xd6   :  { %p13837_p2 = pnand %p13835_p1, %p13832_p0 }
  0xd8   :  { %13840 = shalt.err (!%p13837_p2)
}
  0xd9   :  { %s13841_s0 = scalar_lea.vmem %s159_s23, 16  ;;  %s13845_s1 = scalar_lea.vmem %s159_s23, 32 }
  0xda   :  { %p13842_p3 = scmp.ne.s32.totalorder %s159_s23, %s13841_s0  ;;  %p13846_p4 = scmp.lt.s32.totalorder %s159_s23, %s159_s23 }
  0xdb   :  { %p13847_p5 = scmp.lt.s32.totalorder %s13845_s1, %s13841_s0 }
  0xdd   :  { %p13848_p6 = por %p13847_p5, %p13846_p4 }
  0xdf   :  { %p13849_p7 = pnand %p13848_p6, %p13842_p3 }
  0xe1   :  { %13852 = shalt.err (!%p13849_p7)
}
  0xe2   :  { %161 = dma.hbm_to_vmem [thread:$0]  %s14233_s4, 16, %s159_s23, [#allocation3]  }
  0xe3   :  { %s14102_s30 = smov [#allocation7]   ;;  %s14103_s2 = smov [#allocation10]  }
  0xe4   :  { %s182_s27 = sshll.u32 %s14102_s30, 4  ;;  %s202_s7 = sshll.u32 %s14103_s2, 4  ;;  %s183_s27 = int_to_ptr.vmem [resolvable:$true] %s182_s27  ;;  %s203_s7 = int_to_ptr.vmem [resolvable:$true] %s202_s7 }
  0xe5   :  { %s13853_s10 = scalar_lea.hbm %s14253_s20, 16 }
  0xe6   :  { %p13854_p8 = scmp.ne.s32.totalorder %s14253_s20, %s13853_s10  ;;  %p13857_p9 = scmp.lt.u32.totalorder %s13853_s10, %s14253_s20 }
  0xe8   :  { %p13859_p10 = pnand %p13857_p9, %p13854_p8 }
  0xea   :  { %13862 = shalt.err (!%p13859_p10)
}
  0xeb   :  { %s13863_s11 = scalar_lea.vmem %s183_s27, 16  ;;  %s13867_s15 = scalar_lea.vmem %s183_s27, 32 }
  0xec   :  { %p13864_p11 = scmp.ne.s32.totalorder %s183_s27, %s13863_s11  ;;  %p13868_p12 = scmp.lt.s32.totalorder %s183_s27, %s183_s27 }
  0xed   :  { %p13869_p13 = scmp.lt.s32.totalorder %s13867_s15, %s13863_s11 }
  0xef   :  { %p13870_p0 = por %p13869_p13, %p13868_p12 }
  0xf1   :  { %p13871_p1 = pnand %p13870_p0, %p13864_p11 }
  0xf3   :  { %13874 = shalt.err (!%p13871_p1)
}
  0xf4   :  { %185 = dma.hbm_to_vmem [thread:$0]  %s14253_s20, 16, %s183_s27, [#allocation6]  }
  0xf5   :  { %s13875_s4 = scalar_lea.hbm %s14263_s6, 16 }
  0xf6   :  { %p13876_p2 = scmp.ne.s32.totalorder %s14263_s6, %s13875_s4  ;;  %p13879_p3 = scmp.lt.u32.totalorder %s13875_s4, %s14263_s6 }
  0xf8   :  { %p13881_p4 = pnand %p13879_p3, %p13876_p2 }
  0xfa   :  { %13884 = shalt.err (!%p13881_p4)
}
  0xfb   :  { %s13885_s24 = scalar_lea.vmem %s203_s7, 16  ;;  %s13889_s21 = scalar_lea.vmem %s203_s7, 32 }
  0xfc   :  { %p13886_p5 = scmp.ne.s32.totalorder %s203_s7, %s13885_s24  ;;  %p13890_p6 = scmp.lt.s32.totalorder %s203_s7, %s203_s7 }
  0xfd   :  { %p13891_p7 = scmp.lt.s32.totalorder %s13889_s21, %s13885_s24 }
  0xff   :  { %p13892_p8 = por %p13891_p7, %p13890_p6 }
 0x101   :  { %p13893_p9 = pnand %p13892_p8, %p13886_p5 }
 0x103   :  { %13896 = shalt.err (!%p13893_p9)
}
 0x104   :  { %205 = dma.hbm_to_vmem [thread:$0]  %s14263_s6, 16, %s203_s7, [#allocation9]  }
 0x105   :  { %s14104_s16 = smov [#allocation13]   ;;  %s14105_s18 = smov [#allocation16]  }
 0x106   :  { %s226_s20 = sshll.u32 %s14104_s16, 4  ;;  %s250_s13 = sshll.u32 %s14105_s18, 4  ;;  %s227_s20 = int_to_ptr.vmem [resolvable:$true] %s226_s20  ;;  %s251_s13 = int_to_ptr.vmem [resolvable:$true] %s250_s13 }
 0x107   :  { %s13897_s22 = scalar_lea.hbm %s14283_s12, 16 }
 0x108   :  { %p13898_p10 = scmp.ne.s32.totalorder %s14283_s12, %s13897_s22  ;;  %p13901_p11 = scmp.lt.u32.totalorder %s13897_s22, %s14283_s12 }
 0x10a   :  { %p13903_p12 = pnand %p13901_p11, %p13898_p10 }
 0x10c   :  { %13906 = shalt.err (!%p13903_p12)
}
 0x10d   :  { %s13907_s23 = scalar_lea.vmem %s227_s20, 16  ;;  %s13911_s26 = scalar_lea.vmem %s227_s20, 32 }
 0x10e   :  { %p13908_p13 = scmp.ne.s32.totalorder %s227_s20, %s13907_s23  ;;  %p13912_p0 = scmp.lt.s32.totalorder %s227_s20, %s227_s20 }
 0x10f   :  { %p13913_p1 = scmp.lt.s32.totalorder %s13911_s26, %s13907_s23 }
 0x111   :  { %p13914_p2 = por %p13913_p1, %p13912_p0 }
 0x113   :  { %p13915_p3 = pnand %p13914_p2, %p13908_p13 }
 0x115   :  { %13918 = shalt.err (!%p13915_p3)
}
 0x116   :  { %229 = dma.hbm_to_vmem [thread:$0]  %s14283_s12, 16, %s227_s20, [#allocation12]  }
 0x117   :  { %s13919_s6 = scalar_lea.hbm %s14303_s19, 16 }
 0x118   :  { %p13920_p4 = scmp.ne.s32.totalorder %s14303_s19, %s13919_s6  ;;  %p13923_p5 = scmp.lt.u32.totalorder %s13919_s6, %s14303_s19 }
 0x11a   :  { %p13925_p6 = pnand %p13923_p5, %p13920_p4 }
 0x11c   :  { %13928 = shalt.err (!%p13925_p6)
}
 0x11d   :  { %s13929_s25 = scalar_lea.vmem %s251_s13, 16  ;;  %s13933_s28 = scalar_lea.vmem %s251_s13, 32 }
 0x11e   :  { %p13930_p7 = scmp.ne.s32.totalorder %s251_s13, %s13929_s25  ;;  %p13934_p8 = scmp.lt.s32.totalorder %s251_s13, %s251_s13 }
 0x11f   :  { %p13935_p9 = scmp.lt.s32.totalorder %s13933_s28, %s13929_s25 }
 0x121   :  { %p13936_p10 = por %p13935_p9, %p13934_p8 }
 0x123   :  { %p13937_p11 = pnand %p13936_p10, %p13930_p7 }
 0x125   :  { %13940 = shalt.err (!%p13937_p11)
}
 0x126   :  { %253 = dma.hbm_to_vmem [thread:$0]  %s14303_s19, 16, %s251_s13, [#allocation15]  }
 0x127   :  { %s14106_s17 = smov [#allocation19]   ;;  %s14107_s0 = smov [#allocation22]  }
 0x128   :  { %s270_s12 = sshll.u32 %s14106_s17, 4  ;;  %s294_s1 = sshll.u32 %s14107_s0, 4  ;;  %s271_s12 = int_to_ptr.vmem [resolvable:$true] %s270_s12  ;;  %s295_s1 = int_to_ptr.vmem [resolvable:$true] %s294_s1 }
 0x129   :  { %s13941_s30 = scalar_lea.hbm %s14313_s14, 16 }
 0x12a   :  { %p13942_p12 = scmp.ne.s32.totalorder %s14313_s14, %s13941_s30  ;;  %p13945_p13 = scmp.lt.u32.totalorder %s13941_s30, %s14313_s14 }
 0x12c   :  { %p13947_p0 = pnand %p13945_p13, %p13942_p12 }
 0x12e   :  { %13950 = shalt.err (!%p13947_p0)
}
 0x12f   :  { %s13951_s27 = scalar_lea.vmem %s271_s12, 16  ;;  %s13955_s2 = scalar_lea.vmem %s271_s12, 32 }
 0x130   :  { %p13952_p1 = scmp.ne.s32.totalorder %s271_s12, %s13951_s27  ;;  %p13956_p2 = scmp.lt.s32.totalorder %s271_s12, %s271_s12 }
 0x131   :  { %p13957_p3 = scmp.lt.s32.totalorder %s13955_s2, %s13951_s27 }
 0x133   :  { %p13958_p4 = por %p13957_p3, %p13956_p2 }
 0x135   :  { %p13959_p5 = pnand %p13958_p4, %p13952_p1 }
 0x137   :  { %13962 = shalt.err (!%p13959_p5)
}
 0x138   :  { %273 = dma.hbm_to_vmem [thread:$0]  %s14313_s14, 16, %s271_s12, [#allocation18]  }
 0x139   :  { %s13963_s19 = scalar_lea.hbm %s14333_s3, 16 }
 0x13a   :  { %p13964_p6 = scmp.ne.s32.totalorder %s14333_s3, %s13963_s19  ;;  %p13967_p7 = scmp.lt.u32.totalorder %s13963_s19, %s14333_s3 }
 0x13c   :  { %p13969_p8 = pnand %p13967_p7, %p13964_p6 }
 0x13e   :  { %13972 = shalt.err (!%p13969_p8)
}
 0x13f   :  { %s13973_s7 = scalar_lea.vmem %s295_s1, 16  ;;  %s13977_s10 = scalar_lea.vmem %s295_s1, 32 }
 0x140   :  { %p13974_p9 = scmp.ne.s32.totalorder %s295_s1, %s13973_s7  ;;  %p13978_p10 = scmp.lt.s32.totalorder %s295_s1, %s295_s1 }
 0x141   :  { %p13979_p11 = scmp.lt.s32.totalorder %s13977_s10, %s13973_s7 }
 0x143   :  { %p13980_p12 = por %p13979_p11, %p13978_p10 }
 0x145   :  { %p13981_p13 = pnand %p13980_p12, %p13974_p9 }
 0x147   :  { %13984 = shalt.err (!%p13981_p13)
}
 0x148   :  { %s16068_s11 = sld [smem:[#allocation65_spill]]  ;;  %s14108_s15 = smov [#allocation25]  }
 0x149   :  { %297 = dma.hbm_to_vmem [thread:$0]  %s14333_s3, 16, %s295_s1, [#allocation21]  }
 0x14a   :  { %s314_s14 = sshll.u32 %s14108_s15, 4  ;;  %s315_s14 = int_to_ptr.vmem [resolvable:$true] %s314_s14 }
 0x14e   :  { %s13985_s4 = scalar_lea.hbm %s16068_s11, 16 }
 0x14f   :  { %p13986_p0 = scmp.ne.s32.totalorder %s16068_s11, %s13985_s4  ;;  %p13989_p1 = scmp.lt.u32.totalorder %s13985_s4, %s16068_s11 }
 0x151   :  { %p13991_p2 = pnand %p13989_p1, %p13986_p0 }
 0x153   :  { %13994 = shalt.err (!%p13991_p2)
}
 0x154   :  { %s13995_s24 = scalar_lea.vmem %s315_s14, 16  ;;  %s13999_s21 = scalar_lea.vmem %s315_s14, 32 }
 0x155   :  { %p13996_p3 = scmp.ne.s32.totalorder %s315_s14, %s13995_s24  ;;  %p14000_p4 = scmp.lt.s32.totalorder %s315_s14, %s315_s14 }
 0x156   :  { %p14001_p5 = scmp.lt.s32.totalorder %s13999_s21, %s13995_s24 }
 0x158   :  { %p14002_p6 = por %p14001_p5, %p14000_p4 }
 0x15a   :  { %p14003_p7 = pnand %p14002_p6, %p13996_p3 }
 0x15c   :  { %14006 = shalt.err (!%p14003_p7)
}
 0x15d   :  { %317 = dma.hbm_to_vmem [thread:$0]  %s16068_s11, 16, %s315_s14, [#allocation24]  }
 0x15e   :  { %14029 = dma.done.wait [#allocation3], 16  }
 0x15f   :  { %14030 = vsyncadd [#allocation3], 4294967280 }
 0x160   :  { %14031 = dma.done.wait [#allocation6], 32  }
 0x161   :  { %14032 = vsyncadd [#allocation6], 4294967264 }
 0x162   :  { %14033 = dma.done.wait [#allocation9], 32  }
 0x163   :  { %14034 = vsyncadd [#allocation9], 4294967264 }
 0x164   :  { %14035 = dma.done.wait [#allocation12], 32  }
 0x165   :  { %14036 = vsyncadd [#allocation12], 4294967264 }
 0x166   :  { %14037 = dma.done.wait [#allocation15], 32  }
 0x167   :  { %14038 = vsyncadd [#allocation15], 4294967264 }
 0x168   :  { %14039 = dma.done.wait [#allocation18], 32  }
 0x169   :  { %14040 = vsyncadd [#allocation18], 4294967264 }
 0x16a   :  { %14041 = dma.done.wait [#allocation21], 32  }
 0x16b   :  { %14042 = vsyncadd [#allocation21], 4294967264 }
 0x16c   :  { %14043 = dma.done.wait [#allocation24], 32  }
 0x16d   :  { %14044 = vsyncadd [#allocation24], 4294967264  ;;  %s16069_s3 = sld [smem:[#allocation42_spill]]  ;;  %s16070_s16 = sld [smem:[#allocation36_spill]]  ;;  %vm485_vm0 = vcmask 261120   ;;  %vm702_vm1 = vcmask 64512  }
 0x16e   :  { %s16071_s20 = sld [smem:[#allocation37_spill]]  ;;  %s16072_s18 = sld [smem:[#allocation43_spill]]  ;;  %vm14480_vm2 = vmpackc.low %vm702_vm1, %vm702_vm1  ;;  %vm2359_vm3 = vcmask 523264   ;;  %vm5013_vm4 = vcmask 130048  }
 0x16f   :  { %s16073_s13 = sld [smem:[#allocation44_spill]]  ;;  %s14109_s22 = smov 96  }
 0x170   :  { %s16076_s23 = sld [smem:[#allocation39_spill]]  ;;  %s16077_s26 = sld [smem:[#allocation45_spill]] }
 0x171   :  { %s14110_s6 = smov 88   ;;  %s14111_s25 = smov 120  }
 0x172   :  { %s14112_s28 = smov 80   ;;  %s14113_s17 = smov 112  }
 0x173   :  { %v367_v0 = vld [vmem:[%s16069_s3] sm:$0xff]  ;;  %v368_v1 = vld [vmem:[%s16069_s3 + $0x8] sm:$0xff]  ;;  %v369_v2 = vld [vmem:[%s16069_s3 + $0x10] sm:$0xff]  ;;  %s14114_s12 = smov 72   ;;  %s14115_s0 = smov 104  }
 0x174   :  { %v14428_v3 = vpack.c.bf16 %v368_v1, %v367_v0  ;;  %v370_v4 = vld [vmem:[%s16069_s3 + $0x18] sm:$0xff]  ;;  %v457_v5 = vld [vmem:[%s16070_s16] sm:$0xff]  ;;  %v458_v9 = vld [vmem:[%s16070_s16 + $0x8] sm:$0xff]  ;;  %s16078_s1 = sld [smem:[#allocation46_spill]]  ;;  %s16079_s30 = sld [smem:[#allocation47_spill]] }
 0x175   :  { %v461_v6 = vld [vmem:[%s16071_s20] sm:$0xff]  ;;  %v14433_v7 = vpack.c.bf16 %v370_v4, %v369_v2  ;;  %11402 = vmatprep.mubr.msk.f32.mxu1 %vm485_vm0, %v457_v5  ;;  %v462_v10 = vld [vmem:[%s16071_s20 + $0x8] sm:$0xff]  ;;  %v459_v11 = vld [vmem:[%s16070_s16 + $0x10] sm:$0xff]  ;;  %s16080_s27 = sld [smem:[#allocation50_spill]]  ;;  %s16081_s2 = sld [smem:[#allocation52_spill]] }
 0x176   :  { %v475_v8 = vadd.f32 %v461_v6, %v457_v5  ;;  %12319 = vmatprep.subr.bf16.mxu0 %v14428_v3  ;;  %v463_v12 = vld [vmem:[%s16071_s20 + $0x10] sm:$0xff]  ;;  %v476_v13 = vadd.f32 %v462_v10, %v458_v9  ;;  %v460_v15 = vld [vmem:[%s16070_s16 + $0x18] sm:$0xff]  ;;  %v10492_v18 = vld [vmem:[%s16072_s18] ss:$0 sm:$0xff]  ;;  %s16082_s19 = sld [smem:[#allocation48_spill]]  ;;  %s16083_s7 = sld [smem:[#allocation49_spill]] }
 0x177   :  { %12321 = vmatpush3.bf16.msra.mxu0 %v14428_v3  ;;  %v477_v14 = vadd.f32 %v463_v12, %v459_v11  ;;  %v464_v16 = vld [vmem:[%s16071_s20 + $0x18] sm:$0xff]  ;;  %v372_v30 = vld [vmem:[%s16073_s13] sm:$0xff]  ;;  %v373_v31 = vld [vmem:[%s16073_s13 + $0x8] sm:$0xff]  ;;  %s16084_s10 = sld [smem:[#allocation51_spill]]  ;;  %s16085_s11 = sld [smem:[#allocation53_spill]] }
 0x178   :  { %11388 = vmatprep.mubr.msk.f32.mxu0 %vm485_vm0, %v475_v8  ;;  %12323 = vmatprep.subr.bf16.mxu0 %v14433_v7  ;;  %v478_v17 = vadd.f32 %v464_v16, %v460_v15  ;;  %v374_v32 = vld [vmem:[%s16073_s13 + $0x10] sm:$0xff]  ;;  %v14466_v33 = vpack.c.bf16 %v373_v31, %v372_v30  ;;  %v375_v34 = vld [vmem:[%s16073_s13 + $0x18] sm:$0xff]  ;;  %v14505_v48 = vld [vmem:[%s16076_s23 + $0x8] sm:$0xff]  ;;  %s16086_s15 = sld [smem:[#allocation54_spill]]  ;;  %s16087_s14 = sld [smem:[#allocation55_spill]] }
 0x179   :  { %v14469_v35 = vpack.c.bf16 %v375_v34, %v374_v32  ;;  %v14508_v50 = vld [vmem:[%s16076_s23] sm:$0xff]  ;;  %v14514_v55 = vld [vmem:[%s16076_s23 + $0x10] sm:$0xff]  ;;  %v14517_v56 = vld [vmem:[%s16076_s23 + $0x18] sm:$0xff]  ;;  %s16088_s4 = sld [smem:[#allocation56_spill]]  ;;  %s16089_s24 = sld [smem:[#allocation38_spill]] }
 0x17a   :  { %12327 = vmatprep.subr.bf16.mxu1 %v14466_v33  ;;  %v10497_v1 = vld [vmem:[%s16077_s26] ss:$0 sm:$0xff]  ;;  %s16090_s21 = sld [smem:[#allocation60_spill]]  ;;  %s16091_s3 = sld [smem:[#allocation61_spill]] }
 0x17b   :  { %12325 = vmatpush3.bf16.msra.mxu0 %v14433_v7  ;;  %12329 = vmatpush3.bf16.msra.mxu1 %v14466_v33  ;;  %s16096_s13 = sld [smem:[#allocation41_spill]] }
 0x17c   :  { %12331 = vmatprep.subr.bf16.mxu1 %v14469_v35 }
 0x17e   :  { %11389 = vmatmul.mubr.msk.f32.vlgmr.msra.gmra.mrb[0].mxu0 %vm485_vm0, %v476_v13 }
 0x17f   :  { %11391 = vmatprep.mubr.msk.f32.mxu0 %vm485_vm0, %v477_v14  ;;  %12333 = vmatpush3.bf16.msra.mxu1 %v14469_v35 }
 0x182   :  { %11392 = vmatmul.mubr.msk.f32.gmra.mrb[2].mxu0 %vm485_vm0, %v478_v17  ;;  %11403 = vmatmul.mubr.msk.f32.vlgmr.msra.gmra.mrb[0].mxu1 %vm485_vm0, %v458_v9 }
 0x183   :  { %11405 = vmatprep.mubr.msk.f32.mxu1 %vm485_vm0, %v459_v11 }
 0x186   :  { %11406 = vmatmul.mubr.msk.f32.gmra.mrb[2].mxu1 %vm485_vm0, %v460_v15 }
 0x251   :  { %v11390_v19 = vpop.f32.mrb[0].mxu0 }
 0x252   :  { %v570_v20 = vadd.f32 %v11390_v19, %v10492_v18  ;;  %v564_v21 = vpop.f32.mrb[1].mxu0 }
 0x253   :  { %v565_v22 = vadd.f32 %v10492_v18, %v564_v21 }
 0x254   :  { %v14492_v45 = vmul.f32 0.35355338, %v570_v20 }
 0x255   :  { %v14451_v23 = vpack.i.bf16 %v570_v20, %v565_v22  ;;  %v14453_v24 = vmul.f32 0.35355338, %v565_v22  ;;  %v11393_v25 = vpop.f32.mrb[2].mxu0  ;;  %v11404_v0 = vpop.f32.mrb[0].mxu1 }
 0x256   :  { %v580_v26 = vadd.f32 %v11393_v25, %v10492_v18  ;;  %v574_v27 = vpop.f32.mrb[3].mxu0  ;;  %v667_v2 = vpop.f32.mrb[1].mxu1  ;;  %v14525_v4 = vadd.f32 %v11404_v0, %v10497_v1 }
 0x257   :  { %13032 = vrot.lane.b32.xlu0 %v14451_v23, %s14109_s22  ;;  %11416 = vmatprep.mubr.msk.f32.mxu0 %vm702_vm1, %v14453_v24  ;;  %v575_v28 = vadd.f32 %v10492_v18, %v574_v27  ;;  %v14527_v5 = vadd.f32 %v10497_v1, %v667_v2 }
 0x258   :  { %v14500_v47 = vmul.f32 0.35355338, %v580_v26 }
 0x259   :  { %v14459_v29 = vpack.i.bf16 %v580_v26, %v575_v28  ;;  %v14494_v46 = vmul.f32 0.35355338, %v575_v28  ;;  %v11407_v6 = vpop.f32.mrb[2].mxu1  ;;  %v12346_v8 = vpack.c.bf16 %v14525_v4, %v14527_v5 }
 0x25a   :  { %v677_v9 = vpop.f32.mrb[3].mxu1  ;;  %v14531_v10 = vadd.f32 %v11407_v6, %v10497_v1 }
 0x25b   :  { %13037 = vrot.lane.b32.xlu0 %v14459_v29, %s14109_s22  ;;  %v14533_v11 = vadd.f32 %v10497_v1, %v677_v9  ;;  %12347 = vmatprep.subr.bf16.mxu1 %v12346_v8 }
 0x25c   :  { %12349 = vmatpush3.bf16.msra.mxu1 %v12346_v8 }
 0x25d   :  { %v12350_v12 = vpack.c.bf16 %v14531_v10, %v14533_v11 }
 0x25f   :  { %12351 = vmatprep.subr.bf16.mxu1 %v12350_v12 }
 0x260   :  { %12353 = vmatpush3.bf16.msra.mxu1 %v12350_v12 }
 0x2c9   :  { %v13033_v36 = vpop.permute.xlu0 %13032 }
 0x2ca   :  { %v13035_v37 = vunpack.i.h.bf16 %v13033_v36  ;;  %v13034_v38 = vunpack.i.l.bf16 %v13033_v36 }
 0x2cc   :  { %v12334_v40 = vpack.c.bf16 %v13035_v37, %v13034_v38 }
 0x2cd   :  { %v13038_v41 = vpop.permute.xlu0 %13037 }
 0x2ce   :  { %12336 = vmatprep.subr.msk.bf16.mxu0 %vm14480_vm2, %v12334_v40  ;;  %v13040_v42 = vunpack.i.h.bf16 %v13038_v41  ;;  %v13039_v43 = vunpack.i.l.bf16 %v13038_v41 }
 0x2cf   :  { %12339 = vmatpush3.bf16.xpose.msk.msra.mxu0 %vm14480_vm2, %v12334_v40 }
 0x2d0   :  { %v12340_v44 = vpack.c.bf16 %v13040_v42, %v13039_v43 }
 0x2d2   :  { %12342 = vmatprep.subr.msk.bf16.mxu0 %vm14480_vm2, %v12340_v44 }
 0x2d7   :  { %12345 = vmatpush3.bf16.xpose.msk.msra.mxu0 %vm14480_vm2, %v12340_v44 }
 0x2de   :  { %11417 = vmatmul.mubr.msk.f32.vlgmr.msra.gmra.mrb[4].mxu0 %vm702_vm1, %v14492_v45 }
 0x2df   :  { %11419 = vmatprep.mubr.msk.f32.mxu0 %vm702_vm1, %v14494_v46 }
 0x2e2   :  { %11420 = vmatmul.mubr.msk.f32.gmra.mrb[6].mxu0 %vm702_vm1, %v14500_v47 }
 0x3b1   :  { %v11418_v49 = vpop.f32.mrb[4].mxu0 }
 0x3b2   :  { %v795_v51 = vadd.f32 %v11418_v49, %v14505_v48  ;;  %v789_v52 = vpop.f32.mrb[5].mxu0 }
 0x3b3   :  { %v790_v53 = vadd.f32 %v789_v52, %v14508_v50 }
 0x3b4   :  { %v811_v54 = vsel %vm485_vm0, %v795_v51, -inf }
 0x3b5   :  { %812 = vmax.xlane.f32.xlu1 %v811_v54  ;;  %v11421_v57 = vpop.f32.mrb[6].mxu0  ;;  %v808_v61 = vsel %vm485_vm0, %v790_v53, -inf }
 0x3b6   :  { %v799_v58 = vpop.f32.mrb[7].mxu0  ;;  %v805_v60 = vadd.f32 %v11421_v57, %v14517_v56 }
 0x3b7   :  { %v800_v59 = vadd.f32 %v799_v58, %v14514_v55 }
 0x3b8   :  { %v817_v63 = vsel %vm485_vm0, %v805_v60, -inf }
 0x3b9   :  { %809 = vmax.xlane.f32.xlu1 %v808_v61  ;;  %v814_v62 = vsel %vm485_vm0, %v800_v59, -inf }
 0x3ba   :  { %815 = vmax.xlane.f32.xlu0 %v814_v62 }
 0x3bd   :  { %818 = vmax.xlane.f32.xlu1 %v817_v63 }
 0x3ce   :  { %13042 = vrot.lane.b32.xlu1 %v14451_v23, %s14110_s6 }
 0x3d0   :  { %13047 = vrot.lane.b32.xlu0 %v14459_v29, %s14110_s6 }
 0x3d2   :  { %949 = vrot.lane.b32.xlu1 %v14453_v24, %s14111_s25 }
 0x3d4   :  { %13052 = vrot.lane.b32.xlu0 %v14451_v23, %s14112_s28 }
 0x3d6   :  { %951 = vrot.lane.b32.xlu1 %v14492_v45, %s14111_s25 }
 0x3d8   :  { %1417 = vrot.lane.b32.xlu0 %v14453_v24, %s14113_s17 }
 0x3dc   :  { %1421 = vrot.lane.b32.xlu0 %v14494_v46, %s14113_s17 }
 0x442   :  { %v813_v13 = vpop.xlane.xlu1 %812 }
 0x443   :  { %v821_v14 = vsub.f32 %v795_v51, %v813_v13 }
 0x445   :  { %v826_v15 = vmul.f32 1.442695, %v821_v14 }
 0x446   :  { %v810_v16 = vpop.xlane.xlu1 %809 }
 0x447   :  { %13301 = vpow2.f32 %v826_v15  ;;  %v820_v17 = vsub.f32 %v790_v53, %v810_v16  ;;  %v816_v32 = vpop.xlane.xlu0 %815 }
 0x448   :  { %v822_v34 = vsub.f32 %v800_v59, %v816_v32 }
 0x449   :  { %v824_v18 = vmul.f32 1.442695, %v820_v17 }
 0x44a   :  { %v819_v19 = vpop.xlane.xlu1 %818  ;;  %v828_v37 = vmul.f32 1.442695, %v822_v34 }
 0x44b   :  { %13303 = vpow2.f32 %v824_v18  ;;  %v823_v31 = vsub.f32 %v805_v60, %v819_v19  ;;  %v13048_v52 = vpop.permute.xlu0 %13047 }
 0x44c   :  { %v13050_v57 = vunpack.i.h.bf16 %v13048_v52  ;;  %v13049_v58 = vunpack.i.l.bf16 %v13048_v52 }
 0x44d   :  { %v830_v36 = vmul.f32 1.442695, %v823_v31 }
 0x44e   :  { %v13043_v20 = vpop.permute.xlu1 %13042  ;;  %v12360_v61 = vpack.c.bf16 %v13050_v57, %v13049_v58 }
 0x44f   :  { %v13045_v21 = vunpack.i.h.bf16 %v13043_v20  ;;  %v13044_v22 = vunpack.i.l.bf16 %v13043_v20  ;;  %13305 = vpow2.f32 %v830_v36  ;;  %v13053_v62 = vpop.permute.xlu0 %13052 }
 0x450   :  { %13307 = vpow2.f32 %v828_v37  ;;  %v13055_v63 = vunpack.i.h.bf16 %v13053_v62  ;;  %v13054_v0 = vunpack.i.l.bf16 %v13053_v62 }
 0x451   :  { %v13302_v25 = vpop.eup %13301  ;;  %v12354_v26 = vpack.c.bf16 %v13045_v21, %v13044_v22 }
 0x452   :  { %v835_v27 = vsel %vm485_vm0, %v13302_v25, 0.0  ;;  %v950_v43 = vpop.permute.xlu1 %949  ;;  %v12374_v1 = vpack.c.bf16 %v13055_v63, %v13054_v0 }
 0x453   :  { %836 = vadd.xlane.f32.xlu1 %v835_v27  ;;  %12356 = vmatprep.subr.msk.bf16.mxu1 %vm14480_vm2, %v12354_v26  ;;  %v1418_v20 = vpop.permute.xlu0 %1417 }
 0x455   :  { %v13304_v28 = vpop.eup %13303 }
 0x456   :  { %v832_v30 = vsel %vm485_vm0, %v13304_v28, 0.0  ;;  %v952_v44 = vpop.permute.xlu1 %951 }
 0x457   :  { %833 = vadd.xlane.f32.xlu1 %v832_v30  ;;  %v1422_v22 = vpop.permute.xlu0 %1421 }
 0x459   :  { %v13306_v38 = vpop.eup %13305 }
 0x45a   :  { %v841_v40 = vsel %vm485_vm0, %v13306_v38, 0.0  ;;  %v13308_v41 = vpop.eup %13307 }
 0x45b   :  { %v838_v42 = vsel %vm485_vm0, %v13308_v41, 0.0 }
 0x468   :  { %953 = vrot.lane.b32.xlu1 %v14494_v46, %s14111_s25 }
 0x48c   :  { %842 = vadd.xlane.f32.xlu1 %v841_v40 }
 0x490   :  { %839 = vadd.xlane.f32.xlu1 %v838_v42 }
 0x4a1   :  { %955 = vrot.lane.b32.xlu1 %v14500_v47, %s14111_s25 }
 0x4a5   :  { %13057 = vrot.lane.b32.xlu1 %v14459_v29, %s14112_s28 }
 0x4a9   :  { %1419 = vrot.lane.b32.xlu1 %v14492_v45, %s14113_s17 }
 0x4ad   :  { %1423 = vrot.lane.b32.xlu1 %v14500_v47, %s14113_s17 }
 0x4e0   :  { %v837_v49 = vpop.xlane.xlu1 %836 }
 0x4e1   :  { %13309 = vrcp.f32 %v837_v49 }
 0x4e4   :  { %v834_v51 = vpop.xlane.xlu1 %833 }
 0x4e5   :  { %13311 = vrcp.f32 %v834_v51 }
 0x4e8   :  { %v954_v2 = vpop.permute.xlu1 %953 }
 0x4eb   :  { %v13310_v53 = vpop.eup %13309 }
 0x4ec   :  { %v849_v60 = vmul.f32 %v13310_v53, %v13302_v25 }
 0x4ef   :  { %v13312_v54 = vpop.eup %13311 }
 0x4f0   :  { %v848_v59 = vmul.f32 %v13312_v54, %v13304_v28 }
 0x4f2   :  { %11430 = vmatprep.mubr.msk.f32.mxu1 %vm485_vm0, %v848_v59 }
 0x4f3   :  { %11431 = vmatmul.mubr.msk.f32.vlgmr.msra.gmra.mrb[4].mxu1 %vm485_vm0, %v849_v60 }
 0x4f4   :  { %12359 = vmatpush3.bf16.xpose.msk.msra.mxu1 %vm14480_vm2, %v12354_v26 }
 0x4f5   :  { %12362 = vmatprep.subr.msk.bf16.mxu1 %vm14480_vm2, %v12360_v61 }
 0x4fc   :  { %12365 = vmatpush3.bf16.xpose.msk.msra.mxu1 %vm14480_vm2, %v12360_v61 }
 0x4fd   :  { %12376 = vmatprep.subr.msk.bf16.mxu1 %vm14480_vm2, %v12374_v1 }
 0x519   :  { %v843_v6 = vpop.xlane.xlu1 %842 }
 0x51a   :  { %13313 = vrcp.f32 %v843_v6 }
 0x51d   :  { %v840_v8 = vpop.xlane.xlu1 %839 }
 0x51e   :  { %13315 = vrcp.f32 %v840_v8 }
 0x521   :  { %v956_v9 = vpop.permute.xlu1 %955 }
 0x524   :  { %v13314_v12 = vpop.eup %13313 }
 0x525   :  { %v13058_v14 = vpop.permute.xlu1 %13057  ;;  %v851_v16 = vmul.f32 %v13314_v12, %v13306_v38 }
 0x526   :  { %v13060_v17 = vunpack.i.h.bf16 %v13058_v14  ;;  %v13059_v18 = vunpack.i.l.bf16 %v13058_v14 }
 0x528   :  { %v13316_v13 = vpop.eup %13315  ;;  %v12380_v19 = vpack.c.bf16 %v13060_v17, %v13059_v18 }
 0x529   :  { %v850_v15 = vmul.f32 %v13316_v13, %v13308_v41  ;;  %v1420_v21 = vpop.permute.xlu1 %1419 }
 0x52b   :  { %11433 = vmatprep.mubr.msk.f32.mxu1 %vm485_vm0, %v850_v15 }
 0x52c   :  { %11434 = vmatmul.mubr.msk.f32.gmra.mrb[6].mxu1 %vm485_vm0, %v851_v16 }
 0x52d   :  { %11444 = vmatprep.mubr.msk.f32.mxu1 %vm702_vm1, %v950_v43  ;;  %v1424_v25 = vpop.permute.xlu1 %1423 }
 0x530   :  { %11445 = vmatmul.mubr.msk.f32.vlgmr.msra.gmra.mrb[8].mxu1 %vm702_vm1, %v952_v44 }
 0x531   :  { %12379 = vmatpush3.bf16.xpose.msk.msra.mxu1 %vm14480_vm2, %v12374_v1  ;;  %11447 = vmatprep.mubr.msk.f32.mxu1 %vm702_vm1, %v954_v2 }
 0x532   :  { %12382 = vmatprep.subr.msk.bf16.mxu1 %vm14480_vm2, %v12380_v19 }
 0x534   :  { %11448 = vmatmul.mubr.msk.f32.gmra.mrb[10].mxu1 %vm702_vm1, %v956_v9 }
 0x535   :  { %11488 = vmatprep.mubr.msk.f32.mxu1 %vm702_vm1, %v1418_v20  ;;  %v14632_v20 = vpack.i.bf16 %v14531_v10, %v14533_v11 }
 0x539   :  { %12385 = vmatpush3.bf16.xpose.msk.msra.mxu1 %vm14480_vm2, %v12380_v19  ;;  %v14624_v19 = vpack.i.bf16 %v14525_v4, %v14527_v5 }
 0x540   :  { %11489 = vmatmul.mubr.msk.f32.vlgmr.msra.gmra.mrb[12].mxu1 %vm702_vm1, %v1420_v21 }
 0x541   :  { %11491 = vmatprep.mubr.msk.f32.mxu1 %vm702_vm1, %v1422_v22 }
 0x544   :  { %11492 = vmatmul.mubr.msk.f32.gmra.mrb[14].mxu1 %vm702_vm1, %v1424_v25 }
 0x5c6   :  { %v14593_v26 = vpop.f32.mrb[4].mxu1 }
 0x5c7   :  { %v14595_v27 = vpop.f32.mrb[5].mxu1 }
 0x5ff   :  { %v14597_v28 = vpop.f32.mrb[6].mxu1 }
 0x600   :  { %v14599_v30 = vpop.f32.mrb[7].mxu1 }
 0x603   :  { %v11446_v31 = vpop.f32.mrb[8].mxu1 }
 0x604   :  { %v1053_v32 = vadd.f32 %v11446_v31, %v14505_v48  ;;  %v1047_v34 = vpop.f32.mrb[9].mxu1 }
 0x605   :  { %v1048_v36 = vadd.f32 %v1047_v34, %v14508_v50 }
 0x606   :  { %v1069_v37 = vsel %vm485_vm0, %v1053_v32, -inf }
 0x607   :  { %1070 = vmax.xlane.f32.xlu1 %v1069_v37  ;;  %v11449_v38 = vpop.f32.mrb[10].mxu1  ;;  %v1066_v40 = vsel %vm485_vm0, %v1048_v36, -inf }
 0x608   :  { %v1057_v41 = vpop.f32.mrb[11].mxu1  ;;  %1067 = vmax.xlane.f32.xlu0 %v1066_v40  ;;  %v1063_v43 = vadd.f32 %v11449_v38, %v14517_v56 }
 0x609   :  { %v1058_v42 = vadd.f32 %v1057_v41, %v14514_v55 }
 0x60a   :  { %v1075_v49 = vsel %vm485_vm0, %v1063_v43, -inf }
 0x60b   :  { %v1072_v44 = vsel %vm485_vm0, %v1058_v42, -inf }
 0x60c   :  { %1073 = vmax.xlane.f32.xlu0 %v1072_v44 }
 0x610   :  { %1076 = vmax.xlane.f32.xlu0 %v1075_v49 }
 0x613   :  { %v11490_v51 = vpop.f32.mrb[12].mxu1 }
 0x614   :  { %v1515_v52 = vpop.f32.mrb[13].mxu1 }
 0x617   :  { %v11493_v53 = vpop.f32.mrb[14].mxu1 }
 0x618   :  { %v1525_v54 = vpop.f32.mrb[15].mxu1 }
 0x619   :  { %v14653_v4 = vadd.f32 %v1525_v54, %v14514_v55 }
 0x694   :  { %v1071_v57 = vpop.xlane.xlu1 %1070 }
 0x695   :  { %v1079_v58 = vsub.f32 %v1053_v32, %v1071_v57  ;;  %v1068_v59 = vpop.xlane.xlu0 %1067 }
 0x696   :  { %v1078_v60 = vsub.f32 %v1048_v36, %v1068_v59 }
 0x697   :  { %v1084_v61 = vmul.f32 1.442695, %v1079_v58 }
 0x698   :  { %v1082_v62 = vmul.f32 1.442695, %v1078_v60 }
 0x699   :  { %13317 = vpow2.f32 %v1084_v61  ;;  %v1074_v63 = vpop.xlane.xlu0 %1073 }
 0x69a   :  { %13319 = vpow2.f32 %v1082_v62  ;;  %v1080_v0 = vsub.f32 %v1058_v42, %v1074_v63 }
 0x69c   :  { %v1086_v1 = vmul.f32 1.442695, %v1080_v0 }
 0x69d   :  { %v1077_v2 = vpop.xlane.xlu0 %1076 }
 0x69e   :  { %13321 = vpow2.f32 %v1086_v1  ;;  %v1081_v6 = vsub.f32 %v1063_v43, %v1077_v2 }
 0x6a0   :  { %v1088_v8 = vmul.f32 1.442695, %v1081_v6 }
 0x6a2   :  { %13323 = vpow2.f32 %v1088_v8 }
 0x6a3   :  { %v14609_v9 = vpop.eup %13317 }
 0x6a4   :  { %v13320_v12 = vpop.eup %13319  ;;  %v1093_v13 = vsel %vm485_vm0, %v14609_v9, 0.0 }
 0x6a5   :  { %1094 = vadd.xlane.f32.xlu0 %v1093_v13  ;;  %v1090_v14 = vsel %vm485_vm0, %v13320_v12, 0.0 }
 0x6a6   :  { %1091 = vadd.xlane.f32.xlu1 %v1090_v14 }
 0x6a8   :  { %v14614_v15 = vpop.eup %13321 }
 0x6a9   :  { %v1096_v16 = vsel %vm485_vm0, %v14614_v15, 0.0 }
 0x6aa   :  { %1097 = vadd.xlane.f32.xlu1 %v1096_v16 }
 0x6ac   :  { %v14618_v17 = vpop.eup %13323 }
 0x6ad   :  { %v1099_v18 = vsel %vm485_vm0, %v14618_v17, 0.0 }
 0x6ae   :  { %1100 = vadd.xlane.f32.xlu0 %v1099_v18 }
 0x6bb   :  { %13062 = vrot.lane.b32.xlu1 %v14624_v19, %s14111_s25 }
 0x6bf   :  { %13072 = vrot.lane.b32.xlu1 %v14451_v23, %s14114_s12  ;;  %v14647_v23 = vadd.f32 %v1515_v52, %v14508_v50 }
 0x6c3   :  { %13077 = vrot.lane.b32.xlu1 %v14459_v29, %s14114_s12  ;;  %v14650_v29 = vadd.f32 %v11490_v51, %v14505_v48 }
 0x6c4   :  { %13067 = vrot.lane.b32.xlu0 %v14632_v20, %s14111_s25 }
 0x6c7   :  { %1790 = vrot.lane.b32.xlu1 %v14492_v45, %s14115_s0  ;;  %v1534_v45 = vsel %vm485_vm0, %v14647_v23, -inf }
 0x6c8   :  { %1788 = vrot.lane.b32.xlu0 %v14453_v24, %s14115_s0  ;;  %v14658_v24 = vadd.f32 %v11493_v53, %v14517_v56 }
 0x6ca   :  { %v1543_v5 = vsel %vm485_vm0, %v14658_v24, -inf }
 0x6cb   :  { %1794 = vrot.lane.b32.xlu1 %v14500_v47, %s14115_s0  ;;  %v1537_v47 = vsel %vm485_vm0, %v14650_v29, -inf }
 0x6cc   :  { %1792 = vrot.lane.b32.xlu0 %v14494_v46, %s14115_s0  ;;  %v1540_v46 = vsel %vm485_vm0, %v14653_v4, -inf }
 0x6eb   :  { %1535 = vmax.xlane.f32.xlu0 %v1534_v45 }
 0x6ef   :  { %1538 = vmax.xlane.f32.xlu1 %v1537_v47  ;;  %1541 = vmax.xlane.f32.xlu0 %v1540_v46 }
 0x6f3   :  { %1544 = vmax.xlane.f32.xlu0 %v1543_v5 }
 0x732   :  { %v1095_v11 = vpop.xlane.xlu0 %1094 }
 0x733   :  { %v1092_v10 = vpop.xlane.xlu1 %1091 }
 0x734   :  { %13325 = vrcp.f32 %v1092_v10 }
 0x735   :  { %13327 = vrcp.f32 %v1095_v11 }
 0x737   :  { %v1098_v21 = vpop.xlane.xlu1 %1097 }
 0x738   :  { %13329 = vrcp.f32 %v1098_v21 }
 0x73b   :  { %v13063_v22 = vpop.permute.xlu1 %13062  ;;  %v1101_v25 = vpop.xlane.xlu0 %1100 }
 0x73c   :  { %v13065_v31 = vunpack.i.h.bf16 %v13063_v22  ;;  %v13064_v32 = vunpack.i.l.bf16 %v13063_v22  ;;  %13331 = vrcp.f32 %v1101_v25  ;;  %v378_v22 = vld [vmem:[%s16078_s1 + $0x8] sm:$0xff]  ;;  %v377_v25 = vld [vmem:[%s16078_s1] sm:$0xff] }
 0x73e   :  { %v13326_v34 = vpop.eup %13325  ;;  %v12366_v36 = vpack.c.bf16 %v13065_v31, %v13064_v32 }
 0x73f   :  { %v13073_v37 = vpop.permute.xlu1 %13072  ;;  %v13068_v38 = vpop.permute.xlu0 %13067  ;;  %v1106_v40 = vmul.f32 %v13326_v34, %v13320_v12 }
 0x740   :  { %v13075_v41 = vunpack.i.h.bf16 %v13073_v37  ;;  %v13074_v42 = vunpack.i.l.bf16 %v13073_v37  ;;  %v13070_v43 = vunpack.i.h.bf16 %v13068_v38  ;;  %v13069_v44 = vunpack.i.l.bf16 %v13068_v38  ;;  %12367 = vmatprep.subr.bf16.mxu0 %v12366_v36  ;;  %v13328_v52 = vpop.eup %13327 }
 0x741   :  { %12369 = vmatpush3.bf16.msra.mxu0 %v12366_v36  ;;  %11458 = vmatprep.mubr.msk.f32.mxu0 %vm485_vm0, %v1106_v40  ;;  %v1107_v60 = vmul.f32 %v13328_v52, %v14609_v9 }
 0x742   :  { %v12394_v49 = vpack.c.bf16 %v13075_v41, %v13074_v42  ;;  %v12370_v51 = vpack.c.bf16 %v13070_v43, %v13069_v44  ;;  %v13330_v57 = vpop.eup %13329 }
 0x743   :  { %v13078_v53 = vpop.permute.xlu1 %13077  ;;  %v1789_v54 = vpop.permute.xlu0 %1788  ;;  %v1108_v63 = vmul.f32 %v13330_v57, %v14614_v15 }
 0x744   :  { %v13080_v58 = vunpack.i.h.bf16 %v13078_v53  ;;  %v13079_v59 = vunpack.i.l.bf16 %v13078_v53  ;;  %12371 = vmatprep.subr.bf16.mxu0 %v12370_v51  ;;  %12396 = vmatprep.subr.msk.bf16.mxu1 %vm14480_vm2, %v12394_v49 }
 0x745   :  { %11524 = vmatprep.mubr.msk.f32.mxu1 %vm702_vm1, %v1789_v54  ;;  %12373 = vmatpush3.bf16.msra.mxu0 %v12370_v51 }
 0x746   :  { %v12400_v61 = vpack.c.bf16 %v13080_v58, %v13079_v59  ;;  %12399 = vmatpush3.bf16.xpose.msk.msra.mxu1 %vm14480_vm2, %v12394_v49  ;;  %v13332_v62 = vpop.eup %13331  ;;  %11464 = vmatprep.subr.mxu0 %v378_v22 }
 0x747   :  { %v1109_v0 = vmul.f32 %v13332_v62, %v14618_v17  ;;  %v1791_v1 = vpop.permute.xlu1 %1790  ;;  %v1793_v2 = vpop.permute.xlu0 %1792 }
 0x748   :  { %11459 = vmatmul.mubr.msk.f32.vlgmr.msra.gmra.mrb[8].mxu0 %vm485_vm0, %v1107_v60  ;;  %12402 = vmatprep.subr.msk.bf16.mxu1 %vm14480_vm2, %v12400_v61 }
 0x749   :  { %11461 = vmatprep.mubr.msk.f32.mxu0 %vm485_vm0, %v1108_v63  ;;  %11465 = vmatpush3.msra.mxu0 %v378_v22 }
 0x74a   :  { %11472 = vmatprep.subr.mxu0 %v377_v25 }
 0x74b   :  { %v1795_v6 = vpop.permute.xlu1 %1794 }
 0x74c   :  { %11462 = vmatmul.mubr.msk.f32.gmra.mrb[10].mxu0 %vm485_vm0, %v1109_v0 }
 0x74e   :  { %12405 = vmatpush3.bf16.xpose.msk.msra.mxu1 %vm14480_vm2, %v12400_v61 }
 0x755   :  { %11525 = vmatmul.mubr.msk.f32.vlgmr.msra.gmra.mrb[16].mxu1 %vm702_vm1, %v1791_v1 }
 0x756   :  { %11527 = vmatprep.mubr.msk.f32.mxu1 %vm702_vm1, %v1793_v2 }
 0x759   :  { %11528 = vmatmul.mubr.msk.f32.gmra.mrb[18].mxu1 %vm702_vm1, %v1795_v6 }
 0x778   :  { %v1536_v8 = vpop.xlane.xlu0 %1535 }
 0x779   :  { %v1546_v9 = vsub.f32 %v14647_v23, %v1536_v8 }
 0x77b   :  { %v1550_v12 = vmul.f32 1.442695, %v1546_v9 }
 0x77c   :  { %v1539_v13 = vpop.xlane.xlu1 %1538  ;;  %v1542_v14 = vpop.xlane.xlu0 %1541 }
 0x77d   :  { %13333 = vpow2.f32 %v1550_v12  ;;  %v1547_v15 = vsub.f32 %v14650_v29, %v1539_v13  ;;  %v1548_v16 = vsub.f32 %v14653_v4, %v1542_v14 }
 0x77f   :  { %v1552_v17 = vmul.f32 1.442695, %v1547_v15  ;;  %v1554_v18 = vmul.f32 1.442695, %v1548_v16 }
 0x780   :  { %v1545_v45 = vpop.xlane.xlu0 %1544 }
 0x781   :  { %13335 = vpow2.f32 %v1552_v17  ;;  %v1549_v47 = vsub.f32 %v14658_v24, %v1545_v45 }
 0x782   :  { %13337 = vpow2.f32 %v1554_v18 }
 0x783   :  { %v1556_v46 = vmul.f32 1.442695, %v1549_v47 }
 0x785   :  { %13339 = vpow2.f32 %v1556_v46 }
 0x787   :  { %v13334_v5 = vpop.eup %13333 }
 0x788   :  { %v1558_v23 = vsel %vm485_vm0, %v13334_v5, 0.0 }
 0x789   :  { %1559 = vadd.xlane.f32.xlu1 %v1558_v23 }
 0x78b   :  { %v13336_v10 = vpop.eup %13335 }
 0x78c   :  { %v14690_v11 = vpop.eup %13337  ;;  %v1561_v29 = vsel %vm485_vm0, %v13336_v10, 0.0 }
 0x78d   :  { %1562 = vadd.xlane.f32.xlu0 %v1561_v29  ;;  %v1564_v4 = vsel %vm485_vm0, %v14690_v11, 0.0 }
 0x78e   :  { %1565 = vadd.xlane.f32.xlu1 %v1564_v4 }
 0x78f   :  { %v14695_v24 = vpop.eup %13339 }
 0x790   :  { %v1567_v21 = vsel %vm485_vm0, %v14695_v24, 0.0 }
 0x791   :  { %1568 = vadd.xlane.f32.xlu0 %v1567_v21 }
 0x79f   :  { %13082 = vrot.lane.b32.xlu1 %v14624_v19, %s14113_s17 }
 0x7a7   :  { %13087 = vrot.lane.b32.xlu0 %v14632_v20, %s14113_s17 }
 0x816   :  { %v1560_v31 = vpop.xlane.xlu1 %1559 }
 0x817   :  { %13341 = vrcp.f32 %v1560_v31 }
 0x81a   :  { %v1563_v32 = vpop.xlane.xlu0 %1562 }
 0x81b   :  { %v1566_v34 = vpop.xlane.xlu1 %1565  ;;  %v11460_v36 = vpop.f32.mrb[8].mxu0  ;;  %13343 = vrcp.f32 %v1563_v32 }
 0x81c   :  { %v1204_v37 = vpop.f32.mrb[9].mxu0  ;;  %13345 = vrcp.f32 %v1566_v34 }
 0x81d   :  { %11466 = vmatprep.mubr.msk.f32.mxu0 %vm702_vm1, %v1204_v37 }
 0x81e   :  { %v1569_v38 = vpop.xlane.xlu0 %1568  ;;  %11467 = vmatmul.mubr.msk.f32.vlgmr.msra.gmra.mrb[12].mxu0 %vm702_vm1, %v11460_v36 }
 0x81f   :  { %v13083_v40 = vpop.permute.xlu1 %13082  ;;  %v11463_v41 = vpop.f32.mrb[10].mxu0  ;;  %11473 = vmatpush3.msra.mxu0 %v377_v25  ;;  %13347 = vrcp.f32 %v1569_v38 }
 0x820   :  { %v13085_v42 = vunpack.i.h.bf16 %v13083_v40  ;;  %v13084_v43 = vunpack.i.l.bf16 %v13083_v40  ;;  %v1214_v44 = vpop.f32.mrb[11].mxu0 }
 0x821   :  { %11469 = vmatprep.mubr.msk.f32.mxu0 %vm702_vm1, %v1214_v44  ;;  %v13342_v57 = vpop.eup %13341 }
 0x822   :  { %v13088_v49 = vpop.permute.xlu0 %13087  ;;  %11470 = vmatmul.mubr.msk.f32.gmra.mrb[14].mxu0 %vm702_vm1, %v11463_v41  ;;  %v12386_v51 = vpack.c.bf16 %v13085_v42, %v13084_v43  ;;  %v1574_v62 = vmul.f32 %v13342_v57, %v13334_v5 }
 0x823   :  { %v13090_v52 = vunpack.i.h.bf16 %v13088_v49  ;;  %v13089_v53 = vunpack.i.l.bf16 %v13088_v49  ;;  %11474 = vmatprep.mubr.msk.f32.mxu0 %vm702_vm1, %v14595_v27 }
 0x824   :  { %12387 = vmatprep.subr.bf16.mxu0 %v12386_v51 }
 0x825   :  { %v12390_v54 = vpack.c.bf16 %v13090_v52, %v13089_v53  ;;  %v13344_v59 = vpop.eup %13343 }
 0x826   :  { %11475 = vmatmul.mubr.msk.f32.vlgmr.msra.gmra.mrb[12].mxu0 %vm702_vm1, %v14593_v26  ;;  %v13346_v63 = vpop.eup %13345  ;;  %v1575_v0 = vmul.f32 %v13344_v59, %v13336_v10 }
 0x827   :  { %12389 = vmatpush3.bf16.msra.mxu0 %v12386_v51  ;;  %11477 = vmatprep.mubr.msk.f32.mxu0 %vm702_vm1, %v14599_v30 }
 0x828   :  { %12391 = vmatprep.subr.bf16.mxu0 %v12390_v54  ;;  %v11526_v58 = vpop.f32.mrb[16].mxu1 }
 0x829   :  { %v1892_v60 = vadd.f32 %v11526_v58, %v14505_v48  ;;  %v1886_v61 = vpop.f32.mrb[17].mxu1  ;;  %v13348_v48 = vpop.eup %13347  ;;  %v380_v58 = vld [vmem:[%s16078_s1 + $0x18] sm:$0xff] }
 0x82a   :  { %v1887_v27 = vadd.f32 %v1886_v61, %v14508_v50  ;;  %11478 = vmatmul.mubr.msk.f32.gmra.mrb[14].mxu0 %vm702_vm1, %v14597_v28  ;;  %v1576_v50 = vmul.f32 %v13346_v63, %v14690_v11  ;;  %v1577_v12 = vmul.f32 %v13348_v48, %v14695_v24 }
 0x82b   :  { %12393 = vmatpush3.bf16.msra.mxu0 %v12390_v54  ;;  %v1908_v26 = vsel %vm485_vm0, %v1892_v60, -inf  ;;  %11502 = vmatprep.mubr.msk.f32.mxu0 %vm485_vm0, %v1574_v62 }
 0x82c   :  { %v11529_v30 = vpop.f32.mrb[18].mxu1  ;;  %1909 = vmax.xlane.f32.xlu0 %v1908_v26  ;;  %v1905_v1 = vsel %vm485_vm0, %v1887_v27, -inf }
 0x82d   :  { %v1902_v2 = vadd.f32 %v11529_v30, %v14517_v56  ;;  %v1896_v6 = vpop.f32.mrb[19].mxu1  ;;  %1906 = vmax.xlane.f32.xlu1 %v1905_v1  ;;  %v379_v56 = vld [vmem:[%s16078_s1 + $0x10] sm:$0xff]  ;;  %v10566_v1 = vld [vmem:[%s16079_s30] ss:$0 sm:$0xff] }
 0x82e   :  { %v1897_v28 = vadd.f32 %v1896_v6, %v14514_v55  ;;  %11503 = vmatmul.mubr.msk.f32.vlgmr.msra.gmra.mrb[16].mxu0 %vm485_vm0, %v1575_v0  ;;  %11508 = vmatprep.subr.mxu0 %v379_v56 }
 0x82f   :  { %v1914_v8 = vsel %vm485_vm0, %v1902_v2, -inf  ;;  %11505 = vmatprep.mubr.msk.f32.mxu0 %vm485_vm0, %v1576_v50  ;;  %11509 = vmatpush3.msra.mxu0 %v379_v56 }
 0x830   :  { %1915 = vmax.xlane.f32.xlu0 %v1914_v8  ;;  %v1911_v9 = vsel %vm485_vm0, %v1897_v28, -inf }
 0x831   :  { %1912 = vmax.xlane.f32.xlu1 %v1911_v9  ;;  %v13622_v9 = vld [vmem:[%s16070_s16] sm:$0xff] }
 0x832   :  { %11506 = vmatmul.mubr.msk.f32.gmra.mrb[18].mxu0 %vm485_vm0, %v1577_v12 }
 0x8b9   :  { %v1910_v13 = vpop.xlane.xlu0 %1909 }
 0x8ba   :  { %v1918_v14 = vsub.f32 %v1892_v60, %v1910_v13  ;;  %v1907_v55 = vpop.xlane.xlu1 %1906 }
 0x8bb   :  { %v1917_v15 = vsub.f32 %v1887_v27, %v1907_v55 }
 0x8bc   :  { %v1923_v16 = vmul.f32 1.442695, %v1918_v14 }
 0x8bd   :  { %v1921_v17 = vmul.f32 1.442695, %v1917_v15  ;;  %v1916_v18 = vpop.xlane.xlu0 %1915  ;;  %v13623_v15 = vld [vmem:[%s16070_s16 + $0x18] sm:$0xff] }
 0x8be   :  { %13349 = vpow2.f32 %v1923_v16  ;;  %v1920_v45 = vsub.f32 %v1902_v2, %v1916_v18  ;;  %v1913_v47 = vpop.xlane.xlu1 %1912 }
 0x8bf   :  { %13351 = vpow2.f32 %v1921_v17  ;;  %v1919_v46 = vsub.f32 %v1897_v28, %v1913_v47  ;;  %v13621_v28 = vld [vmem:[%s16070_s16 + $0x8] sm:$0xff]  ;;  %v13624_v17 = vld [vmem:[%s16070_s16 + $0x10] sm:$0xff]  ;;  %s16092_s16 = sld [smem:[#allocation57_spill]] }
 0x8c0   :  { %v1927_v5 = vmul.f32 1.442695, %v1920_v45 }
 0x8c1   :  { %v1925_v23 = vmul.f32 1.442695, %v1919_v46 }
 0x8c2   :  { %13353 = vpow2.f32 %v1927_v5 }
 0x8c3   :  { %13355 = vpow2.f32 %v1925_v23 }
 0x8c8   :  { %v13350_v10 = vpop.eup %13349 }
 0x8c9   :  { %v13352_v11 = vpop.eup %13351  ;;  %v1932_v29 = vsel %vm485_vm0, %v13350_v10, 0.0 }
 0x8ca   :  { %1933 = vadd.xlane.f32.xlu0 %v1932_v29  ;;  %v1929_v4 = vsel %vm485_vm0, %v13352_v11, 0.0 }
 0x8cb   :  { %1930 = vadd.xlane.f32.xlu1 %v1929_v4 }
 0x8cc   :  { %v13354_v24 = vpop.eup %13353 }
 0x8cd   :  { %v13356_v21 = vpop.eup %13355  ;;  %v1938_v22 = vsel %vm485_vm0, %v13354_v24, 0.0 }
 0x8ce   :  { %1939 = vadd.xlane.f32.xlu0 %v1938_v22  ;;  %v1935_v25 = vsel %vm485_vm0, %v13356_v21, 0.0 }
 0x8cf   :  { %1936 = vadd.xlane.f32.xlu1 %v1935_v25 }
 0x8e0   :  { %13092 = vrot.lane.b32.xlu1 %v14624_v19, %s14115_s0 }
 0x8e4   :  { %13097 = vrot.lane.b32.xlu0 %v14632_v20, %s14115_s0 }
 0x901   :  { %v11504_v31 = vpop.f32.mrb[16].mxu0 }
 0x902   :  { %v1668_v32 = vpop.f32.mrb[17].mxu0 }
 0x903   :  { %11510 = vmatprep.mubr.msk.f32.mxu0 %vm702_vm1, %v1668_v32 }
 0x904   :  { %11511 = vmatmul.mubr.msk.f32.vlgmr.msra.gmra.mrb[12].mxu0 %vm702_vm1, %v11504_v31 }
 0x905   :  { %v11507_v34 = vpop.f32.mrb[18].mxu0 }
 0x906   :  { %v1678_v36 = vpop.f32.mrb[19].mxu0 }
 0x907   :  { %11513 = vmatprep.mubr.msk.f32.mxu0 %vm702_vm1, %v1678_v36 }
 0x908   :  { %11514 = vmatmul.mubr.msk.f32.gmra.mrb[14].mxu0 %vm702_vm1, %v11507_v34 }
 0x957   :  { %v1934_v37 = vpop.xlane.xlu0 %1933 }
 0x958   :  { %v1931_v38 = vpop.xlane.xlu1 %1930 }
 0x959   :  { %13357 = vrcp.f32 %v1931_v38 }
 0x95a   :  { %13359 = vrcp.f32 %v1934_v37 }
 0x95b   :  { %v1940_v40 = vpop.xlane.xlu0 %1939 }
 0x95c   :  { %v1937_v19 = vpop.xlane.xlu1 %1936 }
 0x95d   :  { %13361 = vrcp.f32 %v1937_v19 }
 0x95e   :  { %13363 = vrcp.f32 %v1940_v40 }
 0x95f   :  { %v13098_v20 = vpop.permute.xlu0 %13097 }
 0x960   :  { %v13093_v41 = vpop.permute.xlu1 %13092  ;;  %v13100_v42 = vunpack.i.h.bf16 %v13098_v20  ;;  %v13099_v43 = vunpack.i.l.bf16 %v13098_v20 }
 0x961   :  { %v13095_v44 = vunpack.i.h.bf16 %v13093_v41  ;;  %v13094_v49 = vunpack.i.l.bf16 %v13093_v41  ;;  %v384_v41 = vld [vmem:[%s16080_s27] sm:$0xff] }
 0x962   :  { %v12410_v54 = vpack.c.bf16 %v13100_v42, %v13099_v43  ;;  %v385_v42 = vld [vmem:[%s16080_s27 + $0x8] sm:$0xff] }
 0x963   :  { %v13358_v51 = vpop.eup %13357  ;;  %v12406_v52 = vpack.c.bf16 %v13095_v44, %v13094_v49  ;;  %v14773_v43 = vpack.c.bf16 %v385_v42, %v384_v41  ;;  %v386_v44 = vld [vmem:[%s16080_s27 + $0x10] sm:$0xff]  ;;  %v387_v49 = vld [vmem:[%s16080_s27 + $0x18] sm:$0xff]  ;;  %v10574_v41 = vld [vmem:[%s16085_s11] ss:$0 sm:$0xff] }
 0x964   :  { %v1945_v53 = vmul.f32 %v13358_v51, %v13352_v11  ;;  %v13360_v57 = vpop.eup %13359  ;;  %v14779_v51 = vpack.c.bf16 %v387_v49, %v386_v44 }
 0x965   :  { %12407 = vmatprep.subr.bf16.mxu0 %v12406_v52  ;;  %v1946_v60 = vmul.f32 %v13360_v57, %v13350_v10  ;;  %12415 = vmatprep.subr.bf16.mxu1 %v14773_v43 }
 0x966   :  { %12409 = vmatpush3.bf16.msra.mxu0 %v12406_v52  ;;  %11538 = vmatprep.mubr.msk.f32.mxu0 %vm485_vm0, %v1945_v53  ;;  %v389_v52 = vld [vmem:[%s16081_s2] sm:$0xff]  ;;  %v390_v53 = vld [vmem:[%s16081_s2 + $0x8] sm:$0xff] }
 0x967   :  { %12411 = vmatprep.subr.bf16.mxu0 %v12410_v54  ;;  %v13362_v59 = vpop.eup %13361  ;;  %12417 = vmatpush3.bf16.msra.mxu1 %v14773_v43 }
 0x968   :  { %v13364_v61 = vpop.eup %13363  ;;  %v1947_v62 = vmul.f32 %v13362_v59, %v13356_v21  ;;  %12419 = vmatprep.subr.bf16.mxu1 %v14779_v51 }
 0x969   :  { %v1948_v63 = vmul.f32 %v13364_v61, %v13354_v24 }
 0x96a   :  { %12413 = vmatpush3.bf16.msra.mxu0 %v12410_v54  ;;  %v14785_v54 = vpack.c.bf16 %v390_v53, %v389_v52 }
 0x96b   :  { %11544 = vmatprep.subr.mxu0 %v380_v58  ;;  %12421 = vmatpush3.bf16.msra.mxu1 %v14779_v51 }
 0x96c   :  { %12423 = vmatprep.subr.bf16.mxu1 %v14785_v54 }
 0x96d   :  { %11539 = vmatmul.mubr.msk.f32.vlgmr.msra.gmra.mrb[20].mxu0 %vm485_vm0, %v1946_v60 }
 0x96e   :  { %11541 = vmatprep.mubr.msk.f32.mxu0 %vm485_vm0, %v1947_v62  ;;  %11545 = vmatpush3.msra.mxu0 %v380_v58 }
 0x96f   :  { %12439 = vmatprep.subr.bf16.mxu0 %v14428_v3 }
 0x971   :  { %11542 = vmatmul.mubr.msk.f32.gmra.mrb[22].mxu0 %vm485_vm0, %v1948_v63 }
 0xa40   :  { %v11540_v27 = vpop.f32.mrb[20].mxu0 }
 0xa41   :  { %v2039_v26 = vpop.f32.mrb[21].mxu0 }
 0xa42   :  { %11546 = vmatprep.mubr.msk.f32.mxu0 %vm702_vm1, %v2039_v26 }
 0xa43   :  { %11547 = vmatmul.mubr.msk.f32.vlgmr.msra.gmra.mrb[12].mxu0 %vm702_vm1, %v11540_v27 }
 0xa44   :  { %v11543_v0 = vpop.f32.mrb[22].mxu0  ;;  %12441 = vmatpush3.bf16.msra.mxu0 %v14428_v3 }
 0xa45   :  { %v2049_v30 = vpop.f32.mrb[23].mxu0  ;;  %12443 = vmatprep.subr.bf16.mxu0 %v14433_v7 }
 0xa46   :  { %11549 = vmatprep.mubr.msk.f32.mxu0 %vm702_vm1, %v2049_v30 }
 0xa47   :  { %11550 = vmatmul.mubr.msk.f32.gmra.mrb[14].mxu0 %vm702_vm1, %v11543_v0 }
 0xa48   :  { %12445 = vmatpush3.bf16.msra.mxu0 %v14433_v7 }
 0xa49   :  { %12447 = vmatprep.subr.bf16.mxu0 %v14466_v33 }
 0xb16   :  { %v11548_v48 = vpop.f32.mrb[12].mxu0 }
 0xb17   :  { %v2166_v2 = vadd.f32 %v11548_v48, %v10566_v1  ;;  %v2136_v6 = vpop.f32.mrb[13].mxu0 }
 0xb18   :  { %v2165_v50 = vadd.f32 %v10566_v1, %v2136_v6 }
 0xb19   :  { %v2170_v3 = vadd.f32 %v13621_v28, %v2166_v2  ;;  %v10567_v2 = vld [vmem:[%s16082_s19] ss:$0 sm:$0xff] }
 0xb1a   :  { %v11551_v8 = vpop.f32.mrb[14].mxu0  ;;  %v2169_v12 = vadd.f32 %v13622_v9, %v2165_v50 }
 0xb1b   :  { %v2168_v56 = vadd.f32 %v11551_v8, %v10566_v1  ;;  %v2146_v13 = vpop.f32.mrb[15].mxu0  ;;  %v2176_v14 = vsel %vm485_vm0, %v2170_v3, 0.0  ;;  %v10568_v8 = vld [vmem:[%s16083_s7] ss:$0 sm:$0xff] }
 0xb1c   :  { %v2167_v55 = vadd.f32 %v10566_v1, %v2146_v13  ;;  %2177 = vadd.xlane.f32.xlu0 %v2176_v14  ;;  %v2173_v7 = vsel %vm485_vm0, %v2169_v12, 0.0  ;;  %v392_v13 = vld [vmem:[%s16081_s2 + $0x18] sm:$0xff] }
 0xb1d   :  { %2174 = vadd.xlane.f32.xlu1 %v2173_v7  ;;  %v2172_v16 = vadd.f32 %v13623_v15, %v2168_v56  ;;  %v391_v56 = vld [vmem:[%s16081_s2 + $0x10] sm:$0xff] }
 0xb1e   :  { %v2171_v18 = vadd.f32 %v13624_v17, %v2167_v55 }
 0xb1f   :  { %v2182_v45 = vsel %vm485_vm0, %v2172_v16, 0.0 }
 0xb20   :  { %2183 = vadd.xlane.f32.xlu0 %v2182_v45  ;;  %v2179_v47 = vsel %vm485_vm0, %v2171_v18, 0.0 }
 0xb21   :  { %2180 = vadd.xlane.f32.xlu1 %v2179_v47  ;;  %v393_v47 = vld [vmem:[%s16081_s2 + $0x20] sm:$0xff] }
 0xba9   :  { %v2178_v46 = vpop.xlane.xlu0 %2177 }
 0xbaa   :  { %v2187_v5 = vmul.f32 0.03125, %v2178_v46  ;;  %v2175_v23 = vpop.xlane.xlu1 %2174  ;;  %v394_v46 = vld [vmem:[%s16081_s2 + $0x28] sm:$0xff] }
 0xbab   :  { %v2186_v10 = vmul.f32 0.03125, %v2175_v23 }
 0xbac   :  { %v2191_v11 = vsub.f32 %v2170_v3, %v2187_v5 }
 0xbad   :  { %v2190_v29 = vsub.f32 %v2169_v12, %v2186_v10  ;;  %v2184_v4 = vpop.xlane.xlu0 %2183  ;;  %v14800_v10 = vpack.c.bf16 %v394_v46, %v393_v47 }
 0xbae   :  { %v2189_v24 = vmul.f32 0.03125, %v2184_v4  ;;  %v2181_v21 = vpop.xlane.xlu1 %2180  ;;  %v2195_v22 = vmul.f32 %v2191_v11, %v2191_v11 }
 0xbaf   :  { %v2188_v25 = vmul.f32 0.03125, %v2181_v21  ;;  %v2194_v31 = vmul.f32 %v2190_v29, %v2190_v29 }
 0xbb0   :  { %v2193_v32 = vsub.f32 %v2172_v16, %v2189_v24  ;;  %v2201_v34 = vsel %vm485_vm0, %v2195_v22, 0.0  ;;  %v10569_v24 = vld [vmem:[%s16084_s10] ss:$0 sm:$0xff] }
 0xbb1   :  { %v2192_v36 = vsub.f32 %v2171_v18, %v2188_v25  ;;  %2202 = vadd.xlane.f32.xlu0 %v2201_v34  ;;  %v2198_v37 = vsel %vm485_vm0, %v2194_v31, 0.0  ;;  %v14792_v18 = vpack.c.bf16 %v392_v13, %v391_v56 }
 0xbb2   :  { %2199 = vadd.xlane.f32.xlu1 %v2198_v37  ;;  %v2197_v38 = vmul.f32 %v2193_v32, %v2193_v32 }
 0xbb3   :  { %v2196_v40 = vmul.f32 %v2192_v36, %v2192_v36 }
 0xbb4   :  { %v2207_v19 = vsel %vm485_vm0, %v2197_v38, 0.0 }
 0xbb5   :  { %2208 = vadd.xlane.f32.xlu0 %v2207_v19  ;;  %v2204_v20 = vsel %vm485_vm0, %v2196_v40, 0.0 }
 0xbb6   :  { %2205 = vadd.xlane.f32.xlu1 %v2204_v20 }
 0xc3e   :  { %v2203_v57 = vpop.xlane.xlu0 %2202 }
 0xc3f   :  { %v2211_v58 = vmul.f32 0.03125, %v2203_v57  ;;  %v2200_v59 = vpop.xlane.xlu1 %2199 }
 0xc40   :  { %v2210_v60 = vmul.f32 0.03125, %v2200_v59 }
 0xc41   :  { %v2215_v61 = vadd.f32 1e-05, %v2211_v58 }
 0xc42   :  { %v2214_v62 = vadd.f32 1e-05, %v2210_v60  ;;  %v2209_v63 = vpop.xlane.xlu0 %2208 }
 0xc43   :  { %13365 = vrsqrt.f32 %v2215_v61  ;;  %v2213_v27 = vmul.f32 0.03125, %v2209_v63  ;;  %v2206_v26 = vpop.xlane.xlu1 %2205 }
 0xc44   :  { %13367 = vrsqrt.f32 %v2214_v62  ;;  %v2212_v0 = vmul.f32 0.03125, %v2206_v26 }
 0xc45   :  { %v2217_v30 = vadd.f32 1e-05, %v2213_v27 }
 0xc46   :  { %v2216_v1 = vadd.f32 1e-05, %v2212_v0 }
 0xc47   :  { %13369 = vrsqrt.f32 %v2217_v30 }
 0xc48   :  { %13371 = vrsqrt.f32 %v2216_v1 }
 0xc4d   :  { %v13366_v48 = vpop.eup %13365 }
 0xc4e   :  { %v13368_v6 = vpop.eup %13367  ;;  %v2223_v50 = vmul.f32 %v13366_v48, %v2191_v11  ;;  %v395_v11 = vld [vmem:[%s16081_s2 + $0x30] sm:$0xff] }
 0xc4f   :  { %v2222_v28 = vmul.f32 %v13368_v6, %v2190_v29  ;;  %v396_v29 = vld [vmem:[%s16081_s2 + $0x38] sm:$0xff] }
 0xc50   :  { %v2233_v3 = vmul.f32 %v10567_v2, %v2223_v50  ;;  %v14809_v4 = vpack.c.bf16 %v396_v29, %v395_v11 }
 0xc51   :  { %v13370_v9 = vpop.eup %13369  ;;  %v2232_v12 = vmul.f32 %v10567_v2, %v2222_v28 }
 0xc52   :  { %v13372_v14 = vpop.eup %13371  ;;  %v2225_v55 = vmul.f32 %v13370_v9, %v2193_v32  ;;  %v2243_v16 = vadd.f32 %v10568_v8, %v2233_v3 }
 0xc53   :  { %v2242_v7 = vadd.f32 %v10568_v8, %v2232_v12  ;;  %v2224_v15 = vmul.f32 %v13372_v14, %v2192_v36 }
 0xc54   :  { %v2235_v17 = vmul.f32 %v10567_v2, %v2225_v55 }
 0xc55   :  { %11560 = vmatprep.mubr.msk.f32.mxu1 %vm485_vm0, %v2242_v7  ;;  %v2234_v45 = vmul.f32 %v10567_v2, %v2224_v15 }
 0xc56   :  { %11561 = vmatmul.mubr.msk.f32.vlgmr.msra.gmra.mrb[20].mxu1 %vm485_vm0, %v2243_v16  ;;  %v2245_v23 = vadd.f32 %v10568_v8, %v2235_v17 }
 0xc57   :  { %v2244_v5 = vadd.f32 %v10568_v8, %v2234_v45  ;;  %12425 = vmatpush3.bf16.msra.mxu1 %v14785_v54 }
 0xc58   :  { %12427 = vmatprep.subr.bf16.mxu1 %v14792_v18 }
 0xc59   :  { %11563 = vmatprep.mubr.msk.f32.mxu1 %vm485_vm0, %v2244_v5 }
 0xc5a   :  { %11564 = vmatmul.mubr.msk.f32.gmra.mrb[22].mxu1 %vm485_vm0, %v2245_v23 }
 0xc5b   :  { %12429 = vmatpush3.bf16.msra.mxu1 %v14792_v18 }
 0xc5c   :  { %12431 = vmatprep.subr.bf16.mxu1 %v14800_v10 }
 0xc5f   :  { %12433 = vmatpush3.bf16.msra.mxu1 %v14800_v10 }
 0xc60   :  { %12435 = vmatprep.subr.bf16.mxu1 %v14809_v4 }
 0xc63   :  { %12437 = vmatpush3.bf16.msra.mxu1 %v14809_v4 }
 0xd29   :  { %v11562_v21 = vpop.f32.mrb[20].mxu1 }
 0xd2a   :  { %v2336_v22 = vadd.f32 %v11562_v21, %v10569_v24  ;;  %v2330_v25 = vpop.f32.mrb[21].mxu1 }
 0xd2b   :  { %v2331_v31 = vadd.f32 %v10569_v24, %v2330_v25 }
 0xd2c   :  { %v2350_v36 = vmax.f32 %v2336_v22, 0.0 }
 0xd2d   :  { %v2349_v32 = vmax.f32 %v2331_v31, 0.0  ;;  %v11565_v34 = vpop.f32.mrb[22].mxu1 }
 0xd2e   :  { %v2346_v37 = vadd.f32 %v11565_v34, %v10569_v24  ;;  %v2340_v38 = vpop.f32.mrb[23].mxu1 }
 0xd2f   :  { %v2341_v40 = vadd.f32 %v10569_v24, %v2340_v38  ;;  %11582 = vmatprep.mubr.msk.f32.mxu1 %vm2359_vm3, %v2349_v32 }
 0xd30   :  { %11583 = vmatmul.mubr.msk.f32.vlgmr.msra.gmra.mrb[24].mxu1 %vm2359_vm3, %v2350_v36  ;;  %v2352_v20 = vmax.f32 %v2346_v37, 0.0  ;;  %v10579_v37 = vld [vmem:[%s16086_s15] ss:$0 sm:$0xff] }
 0xd31   :  { %v2351_v19 = vmax.f32 %v2341_v40, 0.0 }
 0xd33   :  { %11585 = vmatprep.mubr.msk.f32.mxu1 %vm2359_vm3, %v2351_v19  ;;  %v10580_v19 = vld [vmem:[%s16087_s14] ss:$0 sm:$0xff] }
 0xd34   :  { %11586 = vmatmul.mubr.msk.f32.gmra.mrb[26].mxu1 %vm2359_vm3, %v2352_v20 }
 0xe03   :  { %v11584_v42 = vpop.f32.mrb[24].mxu1 }
 0xe04   :  { %v2444_v44 = vadd.f32 %v11584_v42, %v10574_v41  ;;  %v2438_v49 = vpop.f32.mrb[25].mxu1 }
 0xe05   :  { %v2439_v52 = vadd.f32 %v10574_v41, %v2438_v49 }
 0xe06   :  { %v2458_v53 = vadd.f32 %v2444_v44, %v2243_v16 }
 0xe07   :  { %v11587_v57 = vpop.f32.mrb[26].mxu1  ;;  %v2457_v58 = vadd.f32 %v2439_v52, %v2242_v7 }
 0xe08   :  { %v2454_v59 = vadd.f32 %v11587_v57, %v10574_v41  ;;  %v2448_v60 = vpop.f32.mrb[27].mxu1  ;;  %v2464_v61 = vsel %vm485_vm0, %v2458_v53, 0.0 }
 0xe09   :  { %v2449_v62 = vadd.f32 %v10574_v41, %v2448_v60  ;;  %2465 = vadd.xlane.f32.xlu0 %v2464_v61  ;;  %v2461_v63 = vsel %vm485_vm0, %v2457_v58, 0.0  ;;  %v13625_v60 = vld [vmem:[%s16071_s20] sm:$0xff] }
 0xe0a   :  { %2462 = vadd.xlane.f32.xlu1 %v2461_v63  ;;  %v2460_v27 = vadd.f32 %v2454_v59, %v2245_v23  ;;  %v13626_v63 = vld [vmem:[%s16071_s20 + $0x8] sm:$0xff] }
 0xe0b   :  { %v2459_v26 = vadd.f32 %v2449_v62, %v2244_v5 }
 0xe0c   :  { %v2470_v0 = vsel %vm485_vm0, %v2460_v27, 0.0 }
 0xe0d   :  { %2471 = vadd.xlane.f32.xlu0 %v2470_v0  ;;  %v2467_v30 = vsel %vm485_vm0, %v2459_v26, 0.0 }
 0xe0e   :  { %2468 = vadd.xlane.f32.xlu1 %v2467_v30  ;;  %v13627_v30 = vld [vmem:[%s16071_s20 + $0x10] sm:$0xff] }
 0xe96   :  { %v2466_v1 = vpop.xlane.xlu0 %2465 }
 0xe97   :  { %v2474_v48 = vmul.f32 0.03125, %v2466_v1  ;;  %v2463_v2 = vpop.xlane.xlu1 %2462 }
 0xe98   :  { %v2473_v6 = vmul.f32 0.03125, %v2463_v2 }
 0xe99   :  { %v2478_v50 = vsub.f32 %v2458_v53, %v2474_v48  ;;  %v13628_v48 = vld [vmem:[%s16071_s20 + $0x18] sm:$0xff] }
 0xe9a   :  { %v2477_v28 = vsub.f32 %v2457_v58, %v2473_v6  ;;  %v2472_v3 = vpop.xlane.xlu0 %2471  ;;  %v13629_v6 = vld [vmem:[%s16072_s18] ss:$0 sm:$0xff]  ;;  %s16095_s18 = sld [smem:[#allocation58_spill]] }
 0xe9b   :  { %v2476_v8 = vmul.f32 0.03125, %v2472_v3  ;;  %v2469_v9 = vpop.xlane.xlu1 %2468  ;;  %v2482_v12 = vmul.f32 %v2478_v50, %v2478_v50 }
 0xe9c   :  { %v2475_v56 = vmul.f32 0.03125, %v2469_v9  ;;  %v2481_v13 = vmul.f32 %v2477_v28, %v2477_v28 }
 0xe9d   :  { %v2480_v14 = vsub.f32 %v2460_v27, %v2476_v8  ;;  %v2488_v55 = vsel %vm485_vm0, %v2482_v12, 0.0 }
 0xe9e   :  { %v2479_v7 = vsub.f32 %v2459_v26, %v2475_v56  ;;  %2489 = vadd.xlane.f32.xlu0 %v2488_v55  ;;  %v2485_v15 = vsel %vm485_vm0, %v2481_v13, 0.0 }
 0xe9f   :  { %2486 = vadd.xlane.f32.xlu1 %v2485_v15  ;;  %v2484_v16 = vmul.f32 %v2480_v14, %v2480_v14 }
 0xea0   :  { %v2483_v17 = vmul.f32 %v2479_v7, %v2479_v7 }
 0xea1   :  { %v2494_v45 = vsel %vm485_vm0, %v2484_v16, 0.0 }
 0xea2   :  { %2495 = vadd.xlane.f32.xlu0 %v2494_v45  ;;  %v2491_v47 = vsel %vm485_vm0, %v2483_v17, 0.0 }
 0xea3   :  { %2492 = vadd.xlane.f32.xlu1 %v2491_v47 }
 0xf2b   :  { %v2490_v46 = vpop.xlane.xlu0 %2489 }
 0xf2c   :  { %v2498_v5 = vmul.f32 0.03125, %v2490_v46  ;;  %v2487_v23 = vpop.xlane.xlu1 %2486 }
 0xf2d   :  { %v2497_v11 = vmul.f32 0.03125, %v2487_v23 }
 0xf2e   :  { %v2502_v29 = vadd.f32 1e-05, %v2498_v5 }
 0xf2f   :  { %v2501_v24 = vadd.f32 1e-05, %v2497_v11  ;;  %v2496_v21 = vpop.xlane.xlu0 %2495 }
 0xf30   :  { %13373 = vrsqrt.f32 %v2502_v29  ;;  %v2500_v22 = vmul.f32 0.03125, %v2496_v21  ;;  %v2493_v25 = vpop.xlane.xlu1 %2492 }
 0xf31   :  { %13375 = vrsqrt.f32 %v2501_v24  ;;  %v2499_v31 = vmul.f32 0.03125, %v2493_v25 }
 0xf32   :  { %v2504_v32 = vadd.f32 1e-05, %v2500_v22 }
 0xf33   :  { %v2503_v34 = vadd.f32 1e-05, %v2499_v31 }
 0xf34   :  { %13377 = vrsqrt.f32 %v2504_v32 }
 0xf35   :  { %13379 = vrsqrt.f32 %v2503_v34 }
 0xf3a   :  { %v13374_v36 = vpop.eup %13373 }
 0xf3b   :  { %v13376_v38 = vpop.eup %13375  ;;  %v2510_v40 = vmul.f32 %v13374_v36, %v2478_v50 }
 0xf3c   :  { %v2509_v20 = vmul.f32 %v13376_v38, %v2477_v28 }
 0xf3d   :  { %v2520_v41 = vmul.f32 %v10579_v37, %v2510_v40 }
 0xf3e   :  { %v13378_v42 = vpop.eup %13377  ;;  %v2519_v44 = vmul.f32 %v10579_v37, %v2509_v20 }
 0xf3f   :  { %v13380_v49 = vpop.eup %13379  ;;  %v14829_v52 = vadd.f32 %v10580_v19, %v2520_v41  ;;  %v2512_v53 = vmul.f32 %v13378_v42, %v2480_v14  ;;  %v14899_v41 = vld [vmem:[%s16076_s23 + $0x8] sm:$0xff] }
 0xf40   :  { %v2511_v57 = vmul.f32 %v13380_v49, %v2479_v7  ;;  %v14831_v58 = vadd.f32 %v10580_v19, %v2519_v44  ;;  %v13630_v7 = vld [vmem:[%s16077_s26] ss:$0 sm:$0xff]  ;;  %s16098_s26 = sld [smem:[#allocation63_spill]] }
 0xf41   :  { %v2522_v59 = vmul.f32 %v10579_v37, %v2512_v53  ;;  %v2534_v27 = vadd.f32 %v13626_v63, %v14829_v52  ;;  %v14903_v49 = vld [vmem:[%s16076_s23] sm:$0xff] }
 0xf42   :  { %v2533_v61 = vadd.f32 %v13625_v60, %v14831_v58  ;;  %v2521_v62 = vmul.f32 %v10579_v37, %v2511_v57 }
 0xf43   :  { %v14837_v26 = vadd.f32 %v10580_v19, %v2522_v59 }
 0xf44   :  { %11596 = vmatprep.mubr.msk.f32.mxu0 %vm485_vm0, %v2533_v61  ;;  %v14840_v0 = vadd.f32 %v10580_v19, %v2521_v62  ;;  %v14909_v61 = vld [vmem:[%s16076_s23 + $0x18] sm:$0xff] }
 0xf45   :  { %11597 = vmatmul.mubr.msk.f32.vlgmr.msra.gmra.mrb[24].mxu0 %vm485_vm0, %v2534_v27  ;;  %v2536_v2 = vadd.f32 %v13628_v48, %v14837_v26  ;;  %v14913_v27 = vld [vmem:[%s16076_s23 + $0x10] sm:$0xff]  ;;  %s16097_s23 = sld [smem:[#allocation62_spill]] }
 0xf46   :  { %12449 = vmatpush3.bf16.msra.mxu0 %v14466_v33  ;;  %v2535_v1 = vadd.f32 %v13627_v30, %v14840_v0 }
 0xf47   :  { %12451 = vmatprep.subr.bf16.mxu0 %v14469_v35 }
 0xf48   :  { %11599 = vmatprep.mubr.msk.f32.mxu0 %vm485_vm0, %v2535_v1 }
 0xf49   :  { %11600 = vmatmul.mubr.msk.f32.gmra.mrb[26].mxu0 %vm485_vm0, %v2536_v2 }
 0xf4a   :  { %12453 = vmatpush3.bf16.msra.mxu0 %v14469_v35  ;;  %11610 = vmatprep.mubr.msk.f32.mxu0 %vm485_vm0, %v14831_v58 }
 0xf4d   :  { %11611 = vmatmul.mubr.msk.f32.vlgmr.msra.gmra.mrb[28].mxu0 %vm485_vm0, %v14829_v52 }
 0xf4e   :  { %11613 = vmatprep.mubr.msk.f32.mxu0 %vm485_vm0, %v14840_v0 }
 0xf51   :  { %11614 = vmatmul.mubr.msk.f32.gmra.mrb[30].mxu0 %vm485_vm0, %v14837_v26 }
0x1018   :  { %v11598_v33 = vpop.f32.mrb[24].mxu0 }
0x1019   :  { %v2621_v50 = vadd.f32 %v13629_v6, %v11598_v33  ;;  %v2615_v28 = vpop.f32.mrb[25].mxu0 }
0x101a   :  { %v2616_v3 = vadd.f32 %v13629_v6, %v2615_v28 }
0x101b   :  { %v14886_v38 = vmul.f32 0.35355338, %v2621_v50 }
0x101c   :  { %v11601_v8 = vpop.f32.mrb[26].mxu0  ;;  %v14861_v35 = vpack.i.bf16 %v2621_v50, %v2616_v3  ;;  %v14863_v9 = vmul.f32 0.35355338, %v2616_v3 }
0x101d   :  { %v2631_v12 = vadd.f32 %v13629_v6, %v11601_v8  ;;  %v2625_v56 = vpop.f32.mrb[27].mxu0 }
0x101e   :  { %v2626_v13 = vadd.f32 %v13629_v6, %v2625_v56  ;;  %13102 = vrot.lane.b32.xlu1 %v14861_v35, %s14109_s22  ;;  %11624 = vmatprep.mubr.msk.f32.mxu1 %vm702_vm1, %v14863_v9 }
0x101f   :  { %v14894_v19 = vmul.f32 0.35355338, %v2631_v12 }
0x1020   :  { %v11612_v14 = vpop.f32.mrb[28].mxu0  ;;  %v14869_v55 = vpack.i.bf16 %v2631_v12, %v2626_v13  ;;  %v14888_v40 = vmul.f32 0.35355338, %v2626_v13 }
0x1021   :  { %v2718_v15 = vadd.f32 %v13630_v7, %v11612_v14  ;;  %v2712_v16 = vpop.f32.mrb[29].mxu0 }
0x1022   :  { %v2713_v17 = vadd.f32 %v13630_v7, %v2712_v16  ;;  %13107 = vrot.lane.b32.xlu0 %v14869_v55, %s14109_s22 }
0x1024   :  { %v11615_v45 = vpop.f32.mrb[30].mxu0  ;;  %v12466_v47 = vpack.c.bf16 %v2718_v15, %v2713_v17  ;;  %v14874_v46 = vpack.i.bf16 %v2718_v15, %v2713_v17 }
0x1025   :  { %v2728_v5 = vadd.f32 %v13630_v7, %v11615_v45  ;;  %v2722_v23 = vpop.f32.mrb[31].mxu0 }
0x1026   :  { %v2723_v11 = vadd.f32 %v13630_v7, %v2722_v23  ;;  %12467 = vmatprep.subr.bf16.mxu0 %v12466_v47 }
0x1027   :  { %12469 = vmatpush3.bf16.msra.mxu0 %v12466_v47 }
0x1028   :  { %v12470_v29 = vpack.c.bf16 %v2728_v5, %v2723_v11  ;;  %v14876_v24 = vpack.i.bf16 %v2728_v5, %v2723_v11 }
0x102a   :  { %12471 = vmatprep.subr.bf16.mxu0 %v12470_v29 }
0x102b   :  { %12473 = vmatpush3.bf16.msra.mxu0 %v12470_v29 }
0x1090   :  { %v13103_v21 = vpop.permute.xlu1 %13102 }
0x1091   :  { %v13105_v22 = vunpack.i.h.bf16 %v13103_v21  ;;  %v13104_v25 = vunpack.i.l.bf16 %v13103_v21 }
0x1093   :  { %v12454_v31 = vpack.c.bf16 %v13105_v22, %v13104_v25 }
0x1094   :  { %v13108_v32 = vpop.permute.xlu0 %13107 }
0x1095   :  { %v13110_v34 = vunpack.i.h.bf16 %v13108_v32  ;;  %v13109_v36 = vunpack.i.l.bf16 %v13108_v32  ;;  %12456 = vmatprep.subr.msk.bf16.mxu1 %vm14480_vm2, %v12454_v31 }
0x1096   :  { %12459 = vmatpush3.bf16.xpose.msk.msra.mxu1 %vm14480_vm2, %v12454_v31 }
0x1097   :  { %v12460_v37 = vpack.c.bf16 %v13110_v34, %v13109_v36 }
0x1099   :  { %12462 = vmatprep.subr.msk.bf16.mxu1 %vm14480_vm2, %v12460_v37 }
0x109e   :  { %12465 = vmatpush3.bf16.xpose.msk.msra.mxu1 %vm14480_vm2, %v12460_v37 }
0x10a5   :  { %11625 = vmatmul.mubr.msk.f32.vlgmr.msra.gmra.mrb[28].mxu1 %vm702_vm1, %v14886_v38 }
0x10a6   :  { %11627 = vmatprep.mubr.msk.f32.mxu1 %vm702_vm1, %v14888_v40 }
0x10a9   :  { %11628 = vmatmul.mubr.msk.f32.gmra.mrb[30].mxu1 %vm702_vm1, %v14894_v19 }
0x1178   :  { %v11626_v20 = vpop.f32.mrb[28].mxu1 }
0x1179   :  { %v2839_v42 = vadd.f32 %v14899_v41, %v11626_v20  ;;  %v2833_v44 = vpop.f32.mrb[29].mxu1 }
0x117a   :  { %v2834_v53 = vadd.f32 %v14903_v49, %v2833_v44 }
0x117b   :  { %v2855_v57 = vsel %vm485_vm0, %v2839_v42, -inf }
0x117c   :  { %2856 = vmax.xlane.f32.xlu0 %v2855_v57  ;;  %v11629_v59 = vpop.f32.mrb[30].mxu1  ;;  %v2852_v60 = vsel %vm485_vm0, %v2834_v53, -inf }
0x117d   :  { %v2849_v62 = vadd.f32 %v14909_v61, %v11629_v59  ;;  %v2843_v63 = vpop.f32.mrb[31].mxu1  ;;  %2853 = vmax.xlane.f32.xlu1 %v2852_v60 }
0x117e   :  { %v2844_v30 = vadd.f32 %v14913_v27, %v2843_v63 }
0x117f   :  { %v2861_v1 = vsel %vm485_vm0, %v2849_v62, -inf }
0x1180   :  { %2862 = vmax.xlane.f32.xlu0 %v2861_v1  ;;  %v2858_v48 = vsel %vm485_vm0, %v2844_v30, -inf }
0x1181   :  { %2859 = vmax.xlane.f32.xlu1 %v2858_v48 }
0x1192   :  { %13112 = vrot.lane.b32.xlu1 %v14861_v35, %s14110_s6 }
0x1209   :  { %v2857_v2 = vpop.xlane.xlu0 %2856 }
0x120a   :  { %v2865_v33 = vsub.f32 %v2839_v42, %v2857_v2  ;;  %v2854_v6 = vpop.xlane.xlu1 %2853 }
0x120b   :  { %v2864_v50 = vsub.f32 %v2834_v53, %v2854_v6 }
0x120c   :  { %v2870_v28 = vmul.f32 1.442695, %v2865_v33 }
0x120d   :  { %v2868_v3 = vmul.f32 1.442695, %v2864_v50  ;;  %v2863_v8 = vpop.xlane.xlu0 %2862 }
0x120e   :  { %13381 = vpow2.f32 %v2870_v28  ;;  %v2867_v12 = vsub.f32 %v2849_v62, %v2863_v8  ;;  %v2860_v56 = vpop.xlane.xlu1 %2859 }
0x120f   :  { %13383 = vpow2.f32 %v2868_v3  ;;  %v2866_v29 = vsub.f32 %v2844_v30, %v2860_v56 }
0x1210   :  { %v2874_v13 = vmul.f32 1.442695, %v2867_v12 }
0x1211   :  { %v2872_v21 = vmul.f32 1.442695, %v2866_v29 }
0x1212   :  { %13385 = vpow2.f32 %v2874_v13  ;;  %v13113_v14 = vpop.permute.xlu1 %13112 }
0x1213   :  { %v13115_v7 = vunpack.i.h.bf16 %v13113_v14  ;;  %v13114_v15 = vunpack.i.l.bf16 %v13113_v14  ;;  %13387 = vpow2.f32 %v2872_v21 }
0x1215   :  { %v12474_v16 = vpack.c.bf16 %v13115_v7, %v13114_v15 }
0x1217   :  { %12476 = vmatprep.subr.msk.bf16.mxu0 %vm14480_vm2, %v12474_v16 }
0x1218   :  { %v13382_v17 = vpop.eup %13381 }
0x1219   :  { %v13384_v45 = vpop.eup %13383  ;;  %v2879_v47 = vsel %vm485_vm0, %v13382_v17, 0.0 }
0x121a   :  { %2880 = vadd.xlane.f32.xlu0 %v2879_v47  ;;  %v2876_v5 = vsel %vm485_vm0, %v13384_v45, 0.0 }
0x121b   :  { %2877 = vadd.xlane.f32.xlu1 %v2876_v5 }
0x121c   :  { %v13386_v23 = vpop.eup %13385 }
0x121d   :  { %v2885_v11 = vsel %vm485_vm0, %v13386_v23, 0.0  ;;  %v13388_v22 = vpop.eup %13387 }
0x121e   :  { %2886 = vadd.xlane.f32.xlu0 %v2885_v11  ;;  %v2882_v25 = vsel %vm485_vm0, %v13388_v22, 0.0 }
0x122c   :  { %2993 = vrot.lane.b32.xlu1 %v14863_v9, %s14111_s25 }
0x1230   :  { %2995 = vrot.lane.b32.xlu1 %v14886_v38, %s14111_s25 }
0x1234   :  { %13117 = vrot.lane.b32.xlu0 %v14869_v55, %s14110_s6 }
0x1238   :  { %2997 = vrot.lane.b32.xlu0 %v14888_v40, %s14111_s25 }
0x123c   :  { %13122 = vrot.lane.b32.xlu0 %v14861_v35, %s14112_s28 }
0x1240   :  { %3461 = vrot.lane.b32.xlu0 %v14863_v9, %s14113_s17 }
0x1244   :  { %3465 = vrot.lane.b32.xlu0 %v14888_v40, %s14113_s17 }
0x1254   :  { %2883 = vadd.xlane.f32.xlu1 %v2882_v25 }
0x1265   :  { %2999 = vrot.lane.b32.xlu1 %v14894_v19, %s14111_s25 }
0x1269   :  { %13127 = vrot.lane.b32.xlu1 %v14869_v55, %s14112_s28 }
0x126d   :  { %3463 = vrot.lane.b32.xlu1 %v14886_v38, %s14113_s17 }
0x1271   :  { %3467 = vrot.lane.b32.xlu1 %v14894_v19, %s14113_s17 }
0x12a7   :  { %v2881_v31 = vpop.xlane.xlu0 %2880 }
0x12a8   :  { %13389 = vrcp.f32 %v2881_v31  ;;  %v2878_v32 = vpop.xlane.xlu1 %2877 }
0x12a9   :  { %13391 = vrcp.f32 %v2878_v32 }
0x12ab   :  { %v2887_v34 = vpop.xlane.xlu0 %2886 }
0x12ac   :  { %v2994_v48 = vpop.permute.xlu1 %2993  ;;  %13393 = vrcp.f32 %v2887_v34 }
0x12af   :  { %v13118_v36 = vpop.permute.xlu0 %13117 }
0x12b0   :  { %v13120_v42 = vunpack.i.h.bf16 %v13118_v36  ;;  %v13119_v44 = vunpack.i.l.bf16 %v13118_v36  ;;  %v2996_v2 = vpop.permute.xlu1 %2995 }
0x12b2   :  { %v13390_v37 = vpop.eup %13389  ;;  %v12480_v60 = vpack.c.bf16 %v13120_v42, %v13119_v44 }
0x12b3   :  { %v13392_v20 = vpop.eup %13391  ;;  %v2998_v53 = vpop.permute.xlu0 %2997  ;;  %v2893_v59 = vmul.f32 %v13390_v37, %v13382_v17 }
0x12b4   :  { %v2892_v57 = vmul.f32 %v13392_v20, %v13384_v45 }
0x12b6   :  { %11638 = vmatprep.mubr.msk.f32.mxu0 %vm485_vm0, %v2892_v57  ;;  %v13394_v50 = vpop.eup %13393 }
0x12b7   :  { %11639 = vmatmul.mubr.msk.f32.vlgmr.msra.gmra.mrb[32].mxu0 %vm485_vm0, %v2893_v59  ;;  %v13123_v62 = vpop.permute.xlu0 %13122  ;;  %v2895_v12 = vmul.f32 %v13394_v50, %v13386_v23 }
0x12b8   :  { %12479 = vmatpush3.bf16.xpose.msk.msra.mxu0 %vm14480_vm2, %v12474_v16  ;;  %v13125_v63 = vunpack.i.h.bf16 %v13123_v62  ;;  %v13124_v30 = vunpack.i.l.bf16 %v13123_v62 }
0x12b9   :  { %12482 = vmatprep.subr.msk.bf16.mxu0 %vm14480_vm2, %v12480_v60 }
0x12ba   :  { %v12494_v1 = vpack.c.bf16 %v13125_v63, %v13124_v30 }
0x12bb   :  { %v3462_v7 = vpop.permute.xlu0 %3461 }
0x12bf   :  { %v3466_v16 = vpop.permute.xlu0 %3465 }
0x12c0   :  { %12485 = vmatpush3.bf16.xpose.msk.msra.mxu0 %vm14480_vm2, %v12480_v60 }
0x12c1   :  { %12496 = vmatprep.subr.msk.bf16.mxu0 %vm14480_vm2, %v12494_v1 }
0x12e1   :  { %v2884_v33 = vpop.xlane.xlu1 %2883 }
0x12e2   :  { %13395 = vrcp.f32 %v2884_v33 }
0x12e5   :  { %v3000_v6 = vpop.permute.xlu1 %2999 }
0x12e9   :  { %v13128_v3 = vpop.permute.xlu1 %13127 }
0x12ea   :  { %v13130_v56 = vunpack.i.h.bf16 %v13128_v3  ;;  %v13129_v13 = vunpack.i.l.bf16 %v13128_v3 }
0x12ec   :  { %v13396_v28 = vpop.eup %13395  ;;  %v12500_v14 = vpack.c.bf16 %v13130_v56, %v13129_v13 }
0x12ed   :  { %v2894_v8 = vmul.f32 %v13396_v28, %v13388_v22  ;;  %v3464_v15 = vpop.permute.xlu1 %3463 }
0x12ef   :  { %11641 = vmatprep.mubr.msk.f32.mxu0 %vm485_vm0, %v2894_v8 }
0x12f0   :  { %11642 = vmatmul.mubr.msk.f32.gmra.mrb[34].mxu0 %vm485_vm0, %v2895_v12 }
0x12f1   :  { %11652 = vmatprep.mubr.msk.f32.mxu0 %vm702_vm1, %v2994_v48  ;;  %v3468_v17 = vpop.permute.xlu1 %3467 }
0x12f4   :  { %11653 = vmatmul.mubr.msk.f32.vlgmr.msra.gmra.mrb[36].mxu0 %vm702_vm1, %v2996_v2 }
0x12f5   :  { %12499 = vmatpush3.bf16.xpose.msk.msra.mxu0 %vm14480_vm2, %v12494_v1  ;;  %11655 = vmatprep.mubr.msk.f32.mxu0 %vm702_vm1, %v2998_v53 }
0x12f6   :  { %12502 = vmatprep.subr.msk.bf16.mxu0 %vm14480_vm2, %v12500_v14 }
0x12f8   :  { %11656 = vmatmul.mubr.msk.f32.gmra.mrb[38].mxu0 %vm702_vm1, %v3000_v6 }
0x12f9   :  { %11696 = vmatprep.mubr.msk.f32.mxu0 %vm702_vm1, %v3462_v7 }
0x12fd   :  { %12505 = vmatpush3.bf16.xpose.msk.msra.mxu0 %vm14480_vm2, %v12500_v14 }
0x1304   :  { %11697 = vmatmul.mubr.msk.f32.vlgmr.msra.gmra.mrb[40].mxu0 %vm702_vm1, %v3464_v15 }
0x1305   :  { %11699 = vmatprep.mubr.msk.f32.mxu0 %vm702_vm1, %v3466_v16 }
0x1308   :  { %11700 = vmatmul.mubr.msk.f32.gmra.mrb[42].mxu0 %vm702_vm1, %v3468_v17 }
0x138a   :  { %v14974_v45 = vpop.f32.mrb[32].mxu0 }
0x138b   :  { %v14976_v47 = vpop.f32.mrb[33].mxu0 }
0x13c3   :  { %v14978_v5 = vpop.f32.mrb[34].mxu0 }
0x13c4   :  { %v14980_v23 = vpop.f32.mrb[35].mxu0 }
0x13c7   :  { %v11654_v11 = vpop.f32.mrb[36].mxu0 }
0x13c8   :  { %v3097_v29 = vadd.f32 %v14899_v41, %v11654_v11  ;;  %v3091_v21 = vpop.f32.mrb[37].mxu0 }
0x13c9   :  { %v3092_v22 = vadd.f32 %v14903_v49, %v3091_v21 }
0x13ca   :  { %v3113_v25 = vsel %vm485_vm0, %v3097_v29, -inf }
0x13cb   :  { %3114 = vmax.xlane.f32.xlu1 %v3113_v25  ;;  %v11657_v31 = vpop.f32.mrb[38].mxu0  ;;  %v3110_v32 = vsel %vm485_vm0, %v3092_v22, -inf }
0x13cc   :  { %v3101_v34 = vpop.f32.mrb[39].mxu0  ;;  %3111 = vmax.xlane.f32.xlu0 %v3110_v32  ;;  %v3107_v37 = vadd.f32 %v14909_v61, %v11657_v31 }
0x13cd   :  { %v3102_v36 = vadd.f32 %v14913_v27, %v3101_v34 }
0x13ce   :  { %v3119_v42 = vsel %vm485_vm0, %v3107_v37, -inf }
0x13cf   :  { %v3116_v20 = vsel %vm485_vm0, %v3102_v36, -inf }
0x13d0   :  { %3117 = vmax.xlane.f32.xlu0 %v3116_v20 }
0x13d4   :  { %3120 = vmax.xlane.f32.xlu0 %v3119_v42 }
0x13d7   :  { %v11698_v44 = vpop.f32.mrb[40].mxu0 }
0x13d8   :  { %v3559_v53 = vpop.f32.mrb[41].mxu0 }
0x13db   :  { %v11701_v57 = vpop.f32.mrb[42].mxu0 }
0x13dc   :  { %v3569_v59 = vpop.f32.mrb[43].mxu0 }
0x13dd   :  { %v15026_v17 = vadd.f32 %v14913_v27, %v3569_v59 }
0x1458   :  { %v3115_v60 = vpop.xlane.xlu1 %3114 }
0x1459   :  { %v3123_v62 = vsub.f32 %v3097_v29, %v3115_v60  ;;  %v3112_v63 = vpop.xlane.xlu0 %3111 }
0x145a   :  { %v3122_v30 = vsub.f32 %v3092_v22, %v3112_v63 }
0x145b   :  { %v3128_v1 = vmul.f32 1.442695, %v3123_v62 }
0x145c   :  { %v3126_v48 = vmul.f32 1.442695, %v3122_v30 }
0x145d   :  { %13397 = vpow2.f32 %v3128_v1  ;;  %v3118_v2 = vpop.xlane.xlu0 %3117 }
0x145e   :  { %13399 = vpow2.f32 %v3126_v48  ;;  %v3124_v33 = vsub.f32 %v3102_v36, %v3118_v2 }
0x1460   :  { %v3130_v6 = vmul.f32 1.442695, %v3124_v33 }
0x1461   :  { %v3121_v50 = vpop.xlane.xlu0 %3120 }
0x1462   :  { %13401 = vpow2.f32 %v3130_v6  ;;  %v3125_v28 = vsub.f32 %v3107_v37, %v3121_v50 }
0x1464   :  { %v3132_v3 = vmul.f32 1.442695, %v3125_v28 }
0x1466   :  { %13403 = vpow2.f32 %v3132_v3  ;;  %v13635_v3 = vld [vmem:[%s16078_s1 + $0x8] sm:$0xff] }
0x1467   :  { %v14990_v8 = vpop.eup %13397 }
0x1468   :  { %v13400_v12 = vpop.eup %13399  ;;  %v3137_v56 = vsel %vm485_vm0, %v14990_v8, 0.0 }
0x1469   :  { %3138 = vadd.xlane.f32.xlu0 %v3137_v56  ;;  %v3134_v13 = vsel %vm485_vm0, %v13400_v12, 0.0 }
0x146a   :  { %3135 = vadd.xlane.f32.xlu1 %v3134_v13 }
0x146c   :  { %v14995_v14 = vpop.eup %13401 }
0x146d   :  { %v3140_v7 = vsel %vm485_vm0, %v14995_v14, 0.0 }
0x146e   :  { %3141 = vadd.xlane.f32.xlu1 %v3140_v7 }
0x1470   :  { %v14999_v15 = vpop.eup %13403 }
0x1471   :  { %v3143_v16 = vsel %vm485_vm0, %v14999_v15, 0.0 }
0x1472   :  { %3144 = vadd.xlane.f32.xlu0 %v3143_v16 }
0x147f   :  { %13132 = vrot.lane.b32.xlu1 %v14874_v46, %s14111_s25 }
0x1483   :  { %13142 = vrot.lane.b32.xlu1 %v14861_v35, %s14114_s12  ;;  %v15020_v35 = vadd.f32 %v14903_v49, %v3559_v53 }
0x1487   :  { %13147 = vrot.lane.b32.xlu1 %v14869_v55, %s14114_s12  ;;  %v15023_v55 = vadd.f32 %v14899_v41, %v11698_v44 }
0x1488   :  { %13137 = vrot.lane.b32.xlu0 %v14876_v24, %s14111_s25 }
0x148b   :  { %3834 = vrot.lane.b32.xlu1 %v14886_v38, %s14115_s0  ;;  %v3578_v38 = vsel %vm485_vm0, %v15020_v35, -inf }
0x148c   :  { %3832 = vrot.lane.b32.xlu0 %v14863_v9, %s14115_s0  ;;  %v15031_v9 = vadd.f32 %v14909_v61, %v11701_v57 }
0x148e   :  { %v3587_v11 = vsel %vm485_vm0, %v15031_v9, -inf }
0x148f   :  { %3838 = vrot.lane.b32.xlu1 %v14894_v19, %s14115_s0  ;;  %v3581_v19 = vsel %vm485_vm0, %v15023_v55, -inf }
0x1490   :  { %3836 = vrot.lane.b32.xlu0 %v14888_v40, %s14115_s0  ;;  %v3584_v40 = vsel %vm485_vm0, %v15026_v17, -inf }
0x14af   :  { %3579 = vmax.xlane.f32.xlu0 %v3578_v38 }
0x14b3   :  { %3582 = vmax.xlane.f32.xlu1 %v3581_v19  ;;  %3585 = vmax.xlane.f32.xlu0 %v3584_v40 }
0x14b7   :  { %3588 = vmax.xlane.f32.xlu0 %v3587_v11 }
0x14f6   :  { %v3139_v21 = vpop.xlane.xlu0 %3138 }
0x14f7   :  { %v3136_v29 = vpop.xlane.xlu1 %3135 }
0x14f8   :  { %13405 = vrcp.f32 %v3136_v29 }
0x14f9   :  { %13407 = vrcp.f32 %v3139_v21 }
0x14fb   :  { %v3142_v22 = vpop.xlane.xlu1 %3141 }
0x14fc   :  { %13409 = vrcp.f32 %v3142_v22 }
0x14ff   :  { %v13133_v25 = vpop.permute.xlu1 %13132  ;;  %v3145_v31 = vpop.xlane.xlu0 %3144 }
0x1500   :  { %v13135_v32 = vunpack.i.h.bf16 %v13133_v25  ;;  %v13134_v34 = vunpack.i.l.bf16 %v13133_v25  ;;  %13411 = vrcp.f32 %v3145_v31 }
0x1502   :  { %v13406_v36 = vpop.eup %13405  ;;  %v12486_v37 = vpack.c.bf16 %v13135_v32, %v13134_v34 }
0x1503   :  { %v13143_v20 = vpop.permute.xlu1 %13142  ;;  %v13138_v42 = vpop.permute.xlu0 %13137  ;;  %v3150_v44 = vmul.f32 %v13406_v36, %v13400_v12 }
0x1504   :  { %v13145_v53 = vunpack.i.h.bf16 %v13143_v20  ;;  %v13144_v57 = vunpack.i.l.bf16 %v13143_v20  ;;  %v13140_v59 = vunpack.i.h.bf16 %v13138_v42  ;;  %v13139_v60 = vunpack.i.l.bf16 %v13138_v42  ;;  %12487 = vmatprep.subr.bf16.mxu1 %v12486_v37  ;;  %v13408_v30 = vpop.eup %13407 }
0x1505   :  { %12489 = vmatpush3.bf16.msra.mxu1 %v12486_v37  ;;  %11666 = vmatprep.mubr.msk.f32.mxu1 %vm485_vm0, %v3150_v44  ;;  %v3151_v50 = vmul.f32 %v13408_v30, %v14990_v8  ;;  %v13636_v8 = vld [vmem:[%s16078_s1] sm:$0xff] }
0x1506   :  { %v12514_v62 = vpack.c.bf16 %v13145_v53, %v13144_v57  ;;  %v12490_v63 = vpack.c.bf16 %v13140_v59, %v13139_v60  ;;  %v13410_v2 = vpop.eup %13409 }
0x1507   :  { %v13148_v1 = vpop.permute.xlu1 %13147  ;;  %v3833_v48 = vpop.permute.xlu0 %3832  ;;  %v3152_v56 = vmul.f32 %v13410_v2, %v14995_v14 }
0x1508   :  { %v13150_v33 = vunpack.i.h.bf16 %v13148_v1  ;;  %v13149_v6 = vunpack.i.l.bf16 %v13148_v1  ;;  %12491 = vmatprep.subr.bf16.mxu1 %v12490_v63  ;;  %12516 = vmatprep.subr.msk.bf16.mxu0 %vm14480_vm2, %v12514_v62 }
0x1509   :  { %11732 = vmatprep.mubr.msk.f32.mxu0 %vm702_vm1, %v3833_v48  ;;  %12493 = vmatpush3.bf16.msra.mxu1 %v12490_v63 }
0x150a   :  { %v12520_v28 = vpack.c.bf16 %v13150_v33, %v13149_v6  ;;  %12519 = vmatpush3.bf16.xpose.msk.msra.mxu0 %vm14480_vm2, %v12514_v62  ;;  %11672 = vmatprep.subr.mxu1 %v13635_v3  ;;  %v13412_v12 = vpop.eup %13411 }
0x150b   :  { %v3153_v13 = vmul.f32 %v13412_v12, %v14999_v15  ;;  %v3835_v14 = vpop.permute.xlu1 %3834  ;;  %v3837_v7 = vpop.permute.xlu0 %3836 }
0x150c   :  { %11667 = vmatmul.mubr.msk.f32.vlgmr.msra.gmra.mrb[32].mxu1 %vm485_vm0, %v3151_v50  ;;  %12522 = vmatprep.subr.msk.bf16.mxu0 %vm14480_vm2, %v12520_v28 }
0x150d   :  { %11669 = vmatprep.mubr.msk.f32.mxu1 %vm485_vm0, %v3152_v56  ;;  %11673 = vmatpush3.msra.mxu1 %v13635_v3 }
0x150e   :  { %11680 = vmatprep.subr.mxu1 %v13636_v8 }
0x150f   :  { %v3839_v15 = vpop.permute.xlu1 %3838 }
0x1510   :  { %11670 = vmatmul.mubr.msk.f32.gmra.mrb[34].mxu1 %vm485_vm0, %v3153_v13 }
0x1512   :  { %12525 = vmatpush3.bf16.xpose.msk.msra.mxu0 %vm14480_vm2, %v12520_v28 }
0x1513   :  { %12535 = vmatprep.subr.bf16.mxu0 %v14773_v43 }
0x1519   :  { %11733 = vmatmul.mubr.msk.f32.vlgmr.msra.gmra.mrb[44].mxu0 %vm702_vm1, %v3835_v14 }
0x151a   :  { %11735 = vmatprep.mubr.msk.f32.mxu0 %vm702_vm1, %v3837_v7  ;;  %12537 = vmatpush3.bf16.msra.mxu0 %v14773_v43 }
0x151b   :  { %12539 = vmatprep.subr.bf16.mxu0 %v14779_v51 }
0x151d   :  { %11736 = vmatmul.mubr.msk.f32.gmra.mrb[46].mxu0 %vm702_vm1, %v3839_v15 }
0x151e   :  { %12541 = vmatpush3.bf16.msra.mxu0 %v14779_v51 }
0x151f   :  { %12543 = vmatprep.subr.bf16.mxu0 %v14785_v54 }
0x153c   :  { %v3580_v16 = vpop.xlane.xlu0 %3579 }
0x153d   :  { %v3590_v38 = vsub.f32 %v15020_v35, %v3580_v16  ;;  %v13637_v16 = vld [vmem:[%s16078_s1 + $0x10] sm:$0xff] }
0x153f   :  { %v3594_v19 = vmul.f32 1.442695, %v3590_v38 }
0x1540   :  { %v3583_v40 = vpop.xlane.xlu1 %3582  ;;  %v3586_v11 = vpop.xlane.xlu0 %3585 }
0x1541   :  { %13413 = vpow2.f32 %v3594_v19  ;;  %v3591_v29 = vsub.f32 %v15023_v55, %v3583_v40  ;;  %v3592_v43 = vsub.f32 %v15026_v17, %v3586_v11 }
0x1543   :  { %v3596_v21 = vmul.f32 1.442695, %v3591_v29  ;;  %v3598_v22 = vmul.f32 1.442695, %v3592_v43 }
0x1544   :  { %v3589_v25 = vpop.xlane.xlu0 %3588 }
0x1545   :  { %13415 = vpow2.f32 %v3596_v21  ;;  %v3593_v31 = vsub.f32 %v15031_v9, %v3589_v25 }
0x1546   :  { %13417 = vpow2.f32 %v3598_v22 }
0x1547   :  { %v3600_v51 = vmul.f32 1.442695, %v3593_v31 }
0x1549   :  { %13419 = vpow2.f32 %v3600_v51 }
0x154b   :  { %v13414_v32 = vpop.eup %13413 }
0x154c   :  { %v3602_v35 = vsel %vm485_vm0, %v13414_v32, 0.0 }
0x154d   :  { %3603 = vadd.xlane.f32.xlu1 %v3602_v35 }
0x154f   :  { %v13416_v34 = vpop.eup %13415 }
0x1550   :  { %v15070_v36 = vpop.eup %13417  ;;  %v3605_v55 = vsel %vm485_vm0, %v13416_v34, 0.0 }
0x1551   :  { %3606 = vadd.xlane.f32.xlu0 %v3605_v55  ;;  %v3608_v17 = vsel %vm485_vm0, %v15070_v36, 0.0 }
0x1552   :  { %3609 = vadd.xlane.f32.xlu1 %v3608_v17 }
0x1553   :  { %v15075_v37 = vpop.eup %13419 }
0x1554   :  { %v3611_v9 = vsel %vm485_vm0, %v15075_v37, 0.0 }
0x1555   :  { %3612 = vadd.xlane.f32.xlu0 %v3611_v9 }
0x1563   :  { %13152 = vrot.lane.b32.xlu1 %v14874_v46, %s14113_s17 }
0x156b   :  { %13157 = vrot.lane.b32.xlu0 %v14876_v24, %s14113_s17 }
0x15da   :  { %v3604_v20 = vpop.xlane.xlu1 %3603 }
0x15db   :  { %13421 = vrcp.f32 %v3604_v20 }
0x15de   :  { %v3607_v42 = vpop.xlane.xlu0 %3606 }
0x15df   :  { %v3610_v44 = vpop.xlane.xlu1 %3609  ;;  %v11668_v53 = vpop.f32.mrb[32].mxu1  ;;  %13423 = vrcp.f32 %v3607_v42 }
0x15e0   :  { %v3248_v57 = vpop.f32.mrb[33].mxu1  ;;  %13425 = vrcp.f32 %v3610_v44 }
0x15e1   :  { %11674 = vmatprep.mubr.msk.f32.mxu1 %vm702_vm1, %v3248_v57 }
0x15e2   :  { %v3613_v59 = vpop.xlane.xlu0 %3612  ;;  %11675 = vmatmul.mubr.msk.f32.vlgmr.msra.gmra.mrb[36].mxu1 %vm702_vm1, %v11668_v53 }
0x15e3   :  { %v13153_v60 = vpop.permute.xlu1 %13152  ;;  %v11671_v62 = vpop.f32.mrb[34].mxu1  ;;  %11681 = vmatpush3.msra.mxu1 %v13636_v8  ;;  %13427 = vrcp.f32 %v3613_v59 }
0x15e4   :  { %v13155_v63 = vunpack.i.h.bf16 %v13153_v60  ;;  %v13154_v30 = vunpack.i.l.bf16 %v13153_v60  ;;  %v3258_v1 = vpop.f32.mrb[35].mxu1 }
0x15e5   :  { %11677 = vmatprep.mubr.msk.f32.mxu1 %vm702_vm1, %v3258_v1  ;;  %v13422_v28 = vpop.eup %13421 }
0x15e6   :  { %v13158_v48 = vpop.permute.xlu0 %13157  ;;  %11678 = vmatmul.mubr.msk.f32.gmra.mrb[38].mxu1 %vm702_vm1, %v11671_v62  ;;  %v12506_v2 = vpack.c.bf16 %v13155_v63, %v13154_v30  ;;  %v3618_v8 = vmul.f32 %v13422_v28, %v13414_v32 }
0x15e7   :  { %v13160_v33 = vunpack.i.h.bf16 %v13158_v48  ;;  %v13159_v6 = vunpack.i.l.bf16 %v13158_v48  ;;  %11682 = vmatprep.mubr.msk.f32.mxu1 %vm702_vm1, %v14976_v47 }
0x15e8   :  { %12507 = vmatprep.subr.bf16.mxu1 %v12506_v2 }
0x15e9   :  { %v12510_v50 = vpack.c.bf16 %v13160_v33, %v13159_v6  ;;  %v13424_v12 = vpop.eup %13423 }
0x15ea   :  { %11683 = vmatmul.mubr.msk.f32.vlgmr.msra.gmra.mrb[36].mxu1 %vm702_vm1, %v14974_v45  ;;  %v13426_v14 = vpop.eup %13425 }
0x15eb   :  { %12509 = vmatpush3.bf16.msra.mxu1 %v12506_v2  ;;  %11685 = vmatprep.mubr.msk.f32.mxu1 %vm702_vm1, %v14980_v23  ;;  %v3619_v23 = vmul.f32 %v13424_v12, %v13416_v34 }
0x15ec   :  { %12511 = vmatprep.subr.bf16.mxu1 %v12510_v50  ;;  %v11734_v3 = vpop.f32.mrb[44].mxu0 }
0x15ed   :  { %v3936_v56 = vadd.f32 %v14899_v41, %v11734_v3  ;;  %v3930_v13 = vpop.f32.mrb[45].mxu0  ;;  %v13428_v41 = vpop.eup %13427 }
0x15ee   :  { %v3931_v47 = vadd.f32 %v14903_v49, %v3930_v13  ;;  %11686 = vmatmul.mubr.msk.f32.gmra.mrb[38].mxu1 %vm702_vm1, %v14978_v5  ;;  %v3620_v49 = vmul.f32 %v13426_v14, %v15070_v36  ;;  %v3621_v29 = vmul.f32 %v13428_v41, %v15075_v37 }
0x15ef   :  { %12513 = vmatpush3.bf16.msra.mxu1 %v12510_v50  ;;  %v3952_v45 = vsel %vm485_vm0, %v3936_v56, -inf  ;;  %11710 = vmatprep.mubr.msk.f32.mxu1 %vm485_vm0, %v3618_v8 }
0x15f0   :  { %v11737_v7 = vpop.f32.mrb[46].mxu0  ;;  %3953 = vmax.xlane.f32.xlu0 %v3952_v45  ;;  %v3949_v15 = vsel %vm485_vm0, %v3931_v47, -inf  ;;  %11716 = vmatprep.subr.mxu1 %v13637_v16 }
0x15f1   :  { %v3946_v38 = vadd.f32 %v14909_v61, %v11737_v7  ;;  %v3940_v19 = vpop.f32.mrb[47].mxu0  ;;  %3950 = vmax.xlane.f32.xlu1 %v3949_v15 }
0x15f2   :  { %v3941_v5 = vadd.f32 %v14913_v27, %v3940_v19  ;;  %11711 = vmatmul.mubr.msk.f32.vlgmr.msra.gmra.mrb[40].mxu1 %vm485_vm0, %v3619_v23 }
0x15f3   :  { %v3958_v40 = vsel %vm485_vm0, %v3946_v38, -inf  ;;  %11713 = vmatprep.mubr.msk.f32.mxu1 %vm485_vm0, %v3620_v49  ;;  %11717 = vmatpush3.msra.mxu1 %v13637_v16  ;;  %v13639_v49 = vld [vmem:[%s16079_s30] ss:$0 sm:$0xff] }
0x15f4   :  { %3959 = vmax.xlane.f32.xlu0 %v3958_v40  ;;  %v3955_v11 = vsel %vm485_vm0, %v3941_v5, -inf }
0x15f5   :  { %3956 = vmax.xlane.f32.xlu1 %v3955_v11 }
0x15f6   :  { %11714 = vmatmul.mubr.msk.f32.gmra.mrb[42].mxu1 %vm485_vm0, %v3621_v29 }
0x167d   :  { %v3954_v61 = vpop.xlane.xlu0 %3953 }
0x167e   :  { %v3962_v43 = vsub.f32 %v3936_v56, %v3954_v61  ;;  %v3951_v21 = vpop.xlane.xlu1 %3950 }
0x167f   :  { %v3961_v22 = vsub.f32 %v3931_v47, %v3951_v21  ;;  %v13638_v47 = vld [vmem:[%s16078_s1 + $0x18] sm:$0xff]  ;;  %s16099_s1 = sld [smem:[#allocation64_spill]] }
0x1680   :  { %v3967_v27 = vmul.f32 1.442695, %v3962_v43 }
0x1681   :  { %v3965_v25 = vmul.f32 1.442695, %v3961_v22  ;;  %v3960_v31 = vpop.xlane.xlu0 %3959 }
0x1682   :  { %13429 = vpow2.f32 %v3967_v27  ;;  %v3964_v51 = vsub.f32 %v3946_v38, %v3960_v31  ;;  %v3957_v32 = vpop.xlane.xlu1 %3956 }
0x1683   :  { %13431 = vpow2.f32 %v3965_v25  ;;  %v3963_v35 = vsub.f32 %v3941_v5, %v3957_v32 }
0x1684   :  { %v3971_v34 = vmul.f32 1.442695, %v3964_v51 }
0x1685   :  { %v3969_v36 = vmul.f32 1.442695, %v3963_v35 }
0x1686   :  { %13433 = vpow2.f32 %v3971_v34 }
0x1687   :  { %13435 = vpow2.f32 %v3969_v36 }
0x168c   :  { %v13430_v55 = vpop.eup %13429 }
0x168d   :  { %v13432_v17 = vpop.eup %13431  ;;  %v3976_v37 = vsel %vm485_vm0, %v13430_v55, 0.0 }
0x168e   :  { %3977 = vadd.xlane.f32.xlu0 %v3976_v37  ;;  %v3973_v9 = vsel %vm485_vm0, %v13432_v17, 0.0 }
0x168f   :  { %3974 = vadd.xlane.f32.xlu1 %v3973_v9 }
0x1690   :  { %v13434_v20 = vpop.eup %13433 }
0x1691   :  { %v13436_v42 = vpop.eup %13435  ;;  %v3982_v44 = vsel %vm485_vm0, %v13434_v20, 0.0 }
0x1692   :  { %3983 = vadd.xlane.f32.xlu0 %v3982_v44  ;;  %v3979_v53 = vsel %vm485_vm0, %v13436_v42, 0.0 }
0x1693   :  { %3980 = vadd.xlane.f32.xlu1 %v3979_v53 }
0x16a4   :  { %13162 = vrot.lane.b32.xlu1 %v14874_v46, %s14115_s0 }
0x16a8   :  { %13167 = vrot.lane.b32.xlu0 %v14876_v24, %s14115_s0 }
0x16c5   :  { %v11712_v57 = vpop.f32.mrb[40].mxu1 }
0x16c6   :  { %v3712_v59 = vpop.f32.mrb[41].mxu1 }
0x16c7   :  { %11718 = vmatprep.mubr.msk.f32.mxu1 %vm702_vm1, %v3712_v59 }
0x16c8   :  { %11719 = vmatmul.mubr.msk.f32.vlgmr.msra.gmra.mrb[36].mxu1 %vm702_vm1, %v11712_v57 }
0x16c9   :  { %v11715_v60 = vpop.f32.mrb[42].mxu1 }
0x16ca   :  { %v3722_v62 = vpop.f32.mrb[43].mxu1 }
0x16cb   :  { %11721 = vmatprep.mubr.msk.f32.mxu1 %vm702_vm1, %v3722_v62 }
0x16cc   :  { %11722 = vmatmul.mubr.msk.f32.gmra.mrb[38].mxu1 %vm702_vm1, %v11715_v60 }
0x171b   :  { %v3978_v63 = vpop.xlane.xlu0 %3977 }
0x171c   :  { %v3975_v30 = vpop.xlane.xlu1 %3974 }
0x171d   :  { %13437 = vrcp.f32 %v3975_v30 }
0x171e   :  { %13439 = vrcp.f32 %v3978_v63 }
0x171f   :  { %v3984_v1 = vpop.xlane.xlu0 %3983 }
0x1720   :  { %v3981_v46 = vpop.xlane.xlu1 %3980 }
0x1721   :  { %13441 = vrcp.f32 %v3981_v46 }
0x1722   :  { %13443 = vrcp.f32 %v3984_v1 }
0x1723   :  { %v13168_v24 = vpop.permute.xlu0 %13167 }
0x1724   :  { %v13163_v48 = vpop.permute.xlu1 %13162  ;;  %v13170_v2 = vunpack.i.h.bf16 %v13168_v24  ;;  %v13169_v33 = vunpack.i.l.bf16 %v13168_v24 }
0x1725   :  { %v13165_v6 = vunpack.i.h.bf16 %v13163_v48  ;;  %v13164_v50 = vunpack.i.l.bf16 %v13163_v48 }
0x1726   :  { %v12530_v56 = vpack.c.bf16 %v13170_v2, %v13169_v33 }
0x1727   :  { %v13438_v28 = vpop.eup %13437  ;;  %v12526_v3 = vpack.c.bf16 %v13165_v6, %v13164_v50 }
0x1728   :  { %v3989_v12 = vmul.f32 %v13438_v28, %v13432_v17  ;;  %v13440_v13 = vpop.eup %13439 }
0x1729   :  { %12527 = vmatprep.subr.bf16.mxu1 %v12526_v3  ;;  %v3990_v14 = vmul.f32 %v13440_v13, %v13430_v55 }
0x172a   :  { %12529 = vmatpush3.bf16.msra.mxu1 %v12526_v3  ;;  %11746 = vmatprep.mubr.msk.f32.mxu1 %vm485_vm0, %v3989_v12 }
0x172b   :  { %12531 = vmatprep.subr.bf16.mxu1 %v12530_v56  ;;  %v13442_v8 = vpop.eup %13441 }
0x172c   :  { %v13444_v45 = vpop.eup %13443  ;;  %v3991_v23 = vmul.f32 %v13442_v8, %v13436_v42 }
0x172d   :  { %v3992_v7 = vmul.f32 %v13444_v45, %v13434_v20 }
0x172e   :  { %12533 = vmatpush3.bf16.msra.mxu1 %v12530_v56 }
0x172f   :  { %11752 = vmatprep.subr.mxu1 %v13638_v47 }
0x1731   :  { %11747 = vmatmul.mubr.msk.f32.vlgmr.msra.gmra.mrb[44].mxu1 %vm485_vm0, %v3990_v14 }
0x1732   :  { %11749 = vmatprep.mubr.msk.f32.mxu1 %vm485_vm0, %v3991_v23  ;;  %11753 = vmatpush3.msra.mxu1 %v13638_v47  ;;  %v13640_v23 = vld [vmem:[%s16082_s19] ss:$0 sm:$0xff] }
0x1735   :  { %11750 = vmatmul.mubr.msk.f32.gmra.mrb[46].mxu1 %vm485_vm0, %v3992_v7 }
0x1804   :  { %v11748_v15 = vpop.f32.mrb[44].mxu1 }
0x1805   :  { %v4083_v16 = vpop.f32.mrb[45].mxu1 }
0x1806   :  { %11754 = vmatprep.mubr.msk.f32.mxu1 %vm702_vm1, %v4083_v16 }
0x1807   :  { %11755 = vmatmul.mubr.msk.f32.vlgmr.msra.gmra.mrb[36].mxu1 %vm702_vm1, %v11748_v15 }
0x1808   :  { %v11751_v41 = vpop.f32.mrb[46].mxu1 }
0x1809   :  { %v4093_v38 = vpop.f32.mrb[47].mxu1 }
0x180a   :  { %11757 = vmatprep.mubr.msk.f32.mxu1 %vm702_vm1, %v4093_v38 }
0x180b   :  { %11758 = vmatmul.mubr.msk.f32.gmra.mrb[38].mxu1 %vm702_vm1, %v11751_v41 }
0x18da   :  { %v11756_v19 = vpop.f32.mrb[36].mxu1 }
0x18db   :  { %v4204_v5 = vadd.f32 %v13639_v49, %v11756_v19  ;;  %v4180_v40 = vpop.f32.mrb[37].mxu1  ;;  %v13641_v19 = vld [vmem:[%s16083_s7] ss:$0 sm:$0xff] }
0x18dc   :  { %v4203_v11 = vadd.f32 %v13639_v49, %v4180_v40 }
0x18dd   :  { %v4208_v29 = vadd.f32 %v4204_v5, %v14829_v52 }
0x18de   :  { %v4207_v61 = vadd.f32 %v4203_v11, %v14831_v58  ;;  %v11759_v43 = vpop.f32.mrb[38].mxu1 }
0x18df   :  { %v4206_v21 = vadd.f32 %v13639_v49, %v11759_v43  ;;  %v4190_v22 = vpop.f32.mrb[39].mxu1  ;;  %v4214_v27 = vsel %vm485_vm0, %v4208_v29, 0.0 }
0x18e0   :  { %v4205_v25 = vadd.f32 %v13639_v49, %v4190_v22  ;;  %4215 = vadd.xlane.f32.xlu0 %v4214_v27  ;;  %v4211_v31 = vsel %vm485_vm0, %v4207_v61, 0.0 }
0x18e1   :  { %v4210_v51 = vadd.f32 %v4206_v21, %v14837_v26  ;;  %4212 = vadd.xlane.f32.xlu1 %v4211_v31  ;;  %v401_v21 = vld [vmem:[%s16088_s4 + $0x8] sm:$0xff] }
0x18e2   :  { %v4209_v32 = vadd.f32 %v4205_v25, %v14840_v0  ;;  %v13642_v25 = vld [vmem:[%s16084_s10] ss:$0 sm:$0xff] }
0x18e3   :  { %v4220_v35 = vsel %vm485_vm0, %v4210_v51, 0.0 }
0x18e4   :  { %4221 = vadd.xlane.f32.xlu0 %v4220_v35  ;;  %v4217_v52 = vsel %vm485_vm0, %v4209_v32, 0.0  ;;  %v403_v35 = vld [vmem:[%s16088_s4 + $0x18] sm:$0xff] }
0x18e5   :  { %4218 = vadd.xlane.f32.xlu1 %v4217_v52 }
0x196d   :  { %v4216_v58 = vpop.xlane.xlu0 %4215 }
0x196e   :  { %v4224_v34 = vmul.f32 0.03125, %v4216_v58  ;;  %v4213_v36 = vpop.xlane.xlu1 %4212 }
0x196f   :  { %v4223_v55 = vmul.f32 0.03125, %v4213_v36 }
0x1970   :  { %v4228_v17 = vsub.f32 %v4208_v29, %v4224_v34 }
0x1971   :  { %v4227_v37 = vsub.f32 %v4207_v61, %v4223_v55  ;;  %v4222_v9 = vpop.xlane.xlu0 %4221 }
0x1972   :  { %v4226_v20 = vmul.f32 0.03125, %v4222_v9  ;;  %v4219_v42 = vpop.xlane.xlu1 %4218  ;;  %v4232_v44 = vmul.f32 %v4228_v17, %v4228_v17  ;;  %v15172_v9 = vld [vmem:[%s16089_s24] sm:$0xff] }
0x1973   :  { %v4225_v26 = vmul.f32 0.03125, %v4219_v42  ;;  %v4231_v53 = vmul.f32 %v4227_v37, %v4227_v37 }
0x1974   :  { %v4230_v57 = vsub.f32 %v4210_v51, %v4226_v20  ;;  %v4238_v0 = vsel %vm485_vm0, %v4232_v44, 0.0  ;;  %v15180_v20 = vld [vmem:[%s16089_s24 + $0x8] sm:$0xff]  ;;  %v13643_v44 = vld [vmem:[%s16085_s11] ss:$0 sm:$0xff] }
0x1975   :  { %v4229_v59 = vsub.f32 %v4209_v32, %v4225_v26  ;;  %4239 = vadd.xlane.f32.xlu0 %v4238_v0  ;;  %v4235_v60 = vsel %vm485_vm0, %v4231_v53, 0.0 }
0x1976   :  { %4236 = vadd.xlane.f32.xlu1 %v4235_v60  ;;  %v4234_v62 = vmul.f32 %v4230_v57, %v4230_v57 }
0x1977   :  { %v4233_v63 = vmul.f32 %v4229_v59, %v4229_v59 }
0x1978   :  { %v4244_v30 = vsel %vm485_vm0, %v4234_v62, 0.0 }
0x1979   :  { %4245 = vadd.xlane.f32.xlu0 %v4244_v30  ;;  %v4241_v1 = vsel %vm485_vm0, %v4233_v63, 0.0 }
0x197a   :  { %4242 = vadd.xlane.f32.xlu1 %v4241_v1 }
0x1a02   :  { %v4240_v46 = vpop.xlane.xlu0 %4239 }
0x1a03   :  { %v4248_v24 = vmul.f32 0.03125, %v4240_v46  ;;  %v4237_v48 = vpop.xlane.xlu1 %4236 }
0x1a04   :  { %v4247_v2 = vmul.f32 0.03125, %v4237_v48 }
0x1a05   :  { %v4252_v33 = vadd.f32 1e-05, %v4248_v24 }
0x1a06   :  { %v4251_v6 = vadd.f32 1e-05, %v4247_v2  ;;  %v4246_v50 = vpop.xlane.xlu0 %4245 }
0x1a07   :  { %13445 = vrsqrt.f32 %v4252_v33  ;;  %v4250_v28 = vmul.f32 0.03125, %v4246_v50  ;;  %v4243_v3 = vpop.xlane.xlu1 %4242  ;;  %v10671_v50 = vld [vmem:[#allocation2] ss:$0 sm:$0xff] }
0x1a08   :  { %13447 = vrsqrt.f32 %v4251_v6  ;;  %v4249_v12 = vmul.f32 0.03125, %v4243_v3 }
0x1a09   :  { %v4254_v56 = vadd.f32 1e-05, %v4250_v28 }
0x1a0a   :  { %v4253_v13 = vadd.f32 1e-05, %v4249_v12 }
0x1a0b   :  { %13449 = vrsqrt.f32 %v4254_v56 }
0x1a0c   :  { %13451 = vrsqrt.f32 %v4253_v13 }
0x1a11   :  { %v13446_v8 = vpop.eup %13445 }
0x1a12   :  { %v13448_v14 = vpop.eup %13447  ;;  %v4260_v47 = vmul.f32 %v13446_v8, %v4228_v17 }
0x1a13   :  { %v4259_v45 = vmul.f32 %v13448_v14, %v4227_v37 }
0x1a14   :  { %v4264_v7 = vmul.f32 %v13640_v23, %v4260_v47 }
0x1a15   :  { %v13450_v15 = vpop.eup %13449  ;;  %v4263_v16 = vmul.f32 %v13640_v23, %v4259_v45 }
0x1a16   :  { %v13452_v41 = vpop.eup %13451  ;;  %v4262_v38 = vmul.f32 %v13450_v15, %v4230_v57  ;;  %v4268_v40 = vadd.f32 %v13641_v19, %v4264_v7 }
0x1a17   :  { %v4267_v49 = vadd.f32 %v13641_v19, %v4263_v16  ;;  %v4261_v5 = vmul.f32 %v13452_v41, %v4229_v59 }
0x1a18   :  { %v4266_v11 = vmul.f32 %v13640_v23, %v4262_v38 }
0x1a19   :  { %11768 = vmatprep.mubr.msk.f32.mxu0 %vm485_vm0, %v4267_v49  ;;  %v4265_v29 = vmul.f32 %v13640_v23, %v4261_v5 }
0x1a1a   :  { %11769 = vmatmul.mubr.msk.f32.vlgmr.msra.gmra.mrb[48].mxu0 %vm485_vm0, %v4268_v40  ;;  %v4270_v43 = vadd.f32 %v13641_v19, %v4266_v11 }
0x1a1b   :  { %v4269_v61 = vadd.f32 %v13641_v19, %v4265_v29  ;;  %12545 = vmatpush3.bf16.msra.mxu0 %v14785_v54  ;;  %v400_v54 = vld [vmem:[%s16088_s4] sm:$0xff] }
0x1a1c   :  { %12547 = vmatprep.subr.bf16.mxu0 %v14792_v18  ;;  %v15159_v22 = vpack.c.bf16 %v401_v21, %v400_v54 }
0x1a1d   :  { %11771 = vmatprep.mubr.msk.f32.mxu0 %vm485_vm0, %v4269_v61 }
0x1a1e   :  { %11772 = vmatmul.mubr.msk.f32.gmra.mrb[50].mxu0 %vm485_vm0, %v4270_v43 }
0x1a1f   :  { %12549 = vmatpush3.bf16.msra.mxu0 %v14792_v18  ;;  %v402_v18 = vld [vmem:[%s16088_s4 + $0x10] sm:$0xff] }
0x1a20   :  { %12551 = vmatprep.subr.bf16.mxu0 %v14800_v10  ;;  %v15165_v36 = vpack.c.bf16 %v403_v35, %v402_v18  ;;  %v425_v18 = vld [vmem:[%s16090_s21 + $0x18] sm:$0xff] }
0x1a23   :  { %12553 = vmatpush3.bf16.msra.mxu0 %v14800_v10 }
0x1a24   :  { %12555 = vmatprep.subr.bf16.mxu0 %v14809_v4 }
0x1a27   :  { %12557 = vmatpush3.bf16.msra.mxu0 %v14809_v4 }
0x1a28   :  { %12575 = vmatprep.subr.bf16.mxu0 %v15159_v22 }
0x1aed   :  { %v11770_v27 = vpop.f32.mrb[48].mxu0 }
0x1aee   :  { %v4355_v31 = vadd.f32 %v13642_v25, %v11770_v27  ;;  %v4349_v51 = vpop.f32.mrb[49].mxu0 }
0x1aef   :  { %v4350_v32 = vadd.f32 %v13642_v25, %v4349_v51 }
0x1af0   :  { %v4369_v58 = vmax.f32 %v4355_v31, 0.0  ;;  %v423_v31 = vld [vmem:[%s16090_s21 + $0x8] sm:$0xff] }
0x1af1   :  { %v4368_v52 = vmax.f32 %v4350_v32, 0.0  ;;  %v11773_v10 = vpop.f32.mrb[50].mxu0  ;;  %v424_v32 = vld [vmem:[%s16090_s21 + $0x10] sm:$0xff] }
0x1af2   :  { %v4365_v34 = vadd.f32 %v13642_v25, %v11773_v10  ;;  %v4359_v4 = vpop.f32.mrb[51].mxu0  ;;  %v12562_v35 = vpack.c.bf16 %v425_v18, %v424_v32  ;;  %v428_v10 = vld [vmem:[%s16091_s3 + $0x8] sm:$0xff] }
0x1af3   :  { %v4360_v55 = vadd.f32 %v13642_v25, %v4359_v4  ;;  %11790 = vmatprep.mubr.msk.f32.mxu0 %vm2359_vm3, %v4368_v52  ;;  %v422_v25 = vld [vmem:[%s16090_s21] sm:$0xff] }
0x1af4   :  { %11791 = vmatmul.mubr.msk.f32.vlgmr.msra.gmra.mrb[52].mxu0 %vm2359_vm3, %v4369_v58  ;;  %v4371_v37 = vmax.f32 %v4365_v34, 0.0  ;;  %v12558_v51 = vpack.c.bf16 %v423_v31, %v422_v25  ;;  %v427_v52 = vld [vmem:[%s16091_s3] sm:$0xff]  ;;  %v407_v31 = vld [vmem:[%s16092_s16 + $0x10] sm:$0xff] }
0x1af5   :  { %v4370_v17 = vmax.f32 %v4360_v55, 0.0  ;;  %12577 = vmatpush3.bf16.msra.mxu0 %v15159_v22  ;;  %v12566_v58 = vpack.c.bf16 %v428_v10, %v427_v52 }
0x1af6   :  { %12579 = vmatprep.subr.bf16.mxu0 %v15165_v36  ;;  %12559 = vmatprep.subr.bf16.mxu1 %v12558_v51 }
0x1af7   :  { %11793 = vmatprep.mubr.msk.f32.mxu0 %vm2359_vm3, %v4370_v17  ;;  %12561 = vmatpush3.bf16.msra.mxu1 %v12558_v51  ;;  %v408_v51 = vld [vmem:[%s16092_s16 + $0x18] sm:$0xff] }
0x1af8   :  { %11794 = vmatmul.mubr.msk.f32.gmra.mrb[54].mxu0 %vm2359_vm3, %v4371_v37  ;;  %12563 = vmatprep.subr.bf16.mxu1 %v12562_v35  ;;  %v15275_v52 = vpack.c.bf16 %v408_v51, %v407_v31 }
0x1af9   :  { %12581 = vmatpush3.bf16.msra.mxu0 %v15165_v36  ;;  %11832 = vmatprep.mubr.msk.f32.mxu0 %vm485_vm0, %v15172_v9 }
0x1afb   :  { %12565 = vmatpush3.bf16.msra.mxu1 %v12562_v35 }
0x1afc   :  { %11833 = vmatmul.mubr.msk.f32.vlgmr.msra.gmra.mrb[56].mxu0 %vm485_vm0, %v15180_v20  ;;  %12567 = vmatprep.subr.bf16.mxu1 %v12566_v58 }
0x1bc7   :  { %v11792_v42 = vpop.f32.mrb[52].mxu0 }
0x1bc8   :  { %v4456_v26 = vadd.f32 %v13643_v44, %v11792_v42  ;;  %v4450_v53 = vpop.f32.mrb[53].mxu0 }
0x1bc9   :  { %v4451_v57 = vadd.f32 %v13643_v44, %v4450_v53 }
0x1bca   :  { %v4470_v0 = vadd.f32 %v4456_v26, %v4268_v40 }
0x1bcb   :  { %v4469_v59 = vadd.f32 %v4451_v57, %v4267_v49  ;;  %v11795_v60 = vpop.f32.mrb[54].mxu0 }
0x1bcc   :  { %v4466_v62 = vadd.f32 %v13643_v44, %v11795_v60  ;;  %v4460_v63 = vpop.f32.mrb[55].mxu0  ;;  %v4476_v30 = vsel %vm485_vm0, %v4470_v0, 0.0 }
0x1bcd   :  { %v4461_v1 = vadd.f32 %v13643_v44, %v4460_v63  ;;  %4477 = vadd.xlane.f32.xlu0 %v4476_v30  ;;  %v4473_v46 = vsel %vm485_vm0, %v4469_v59, 0.0 }
0x1bce   :  { %v4472_v24 = vadd.f32 %v4466_v62, %v4270_v43  ;;  %4474 = vadd.xlane.f32.xlu1 %v4473_v46 }
0x1bcf   :  { %v4471_v48 = vadd.f32 %v4461_v1, %v4269_v61  ;;  %v11834_v6 = vpop.f32.mrb[56].mxu0 }
0x1bd0   :  { %v4482_v2 = vsel %vm485_vm0, %v4472_v24, 0.0  ;;  %v4833_v28 = vadd.f32 %v11834_v6, %v10671_v50  ;;  %v4827_v3 = vpop.f32.mrb[57].mxu0 }
0x1bd1   :  { %4483 = vadd.xlane.f32.xlu0 %v4482_v2  ;;  %v4479_v33 = vsel %vm485_vm0, %v4471_v48, 0.0  ;;  %v4828_v12 = vadd.f32 %v10671_v50, %v4827_v3  ;;  %v13644_v2 = vld [vmem:[%s16086_s15] ss:$0 sm:$0xff] }
0x1bd2   :  { %4480 = vadd.xlane.f32.xlu1 %v4479_v33  ;;  %v15221_v27 = vmul.f32 0.35355338, %v4833_v28  ;;  %v13645_v3 = vld [vmem:[%s16087_s14] ss:$0 sm:$0xff] }
0x1bd3   :  { %v15189_v56 = vpack.i.bf16 %v4833_v28, %v4828_v12  ;;  %v15191_v13 = vmul.f32 0.35355338, %v4828_v12 }
0x1bd5   :  { %11850 = vmatprep.mubr.msk.f32.mxu0 %vm702_vm1, %v15191_v13 }
0x1c5a   :  { %v4478_v8 = vpop.xlane.xlu0 %4477 }
0x1c5b   :  { %v4486_v14 = vmul.f32 0.03125, %v4478_v8  ;;  %v4475_v47 = vpop.xlane.xlu1 %4474 }
0x1c5c   :  { %v4485_v45 = vmul.f32 0.03125, %v4475_v47 }
0x1c5d   :  { %v15195_v23 = vsub.f32 %v4470_v0, %v4486_v14 }
0x1c5e   :  { %v15197_v7 = vsub.f32 %v4469_v59, %v4485_v45  ;;  %v4484_v15 = vpop.xlane.xlu0 %4483  ;;  %v429_v45 = vld [vmem:[%s16091_s3 + $0x10] sm:$0xff] }
0x1c5f   :  { %v4488_v16 = vmul.f32 0.03125, %v4484_v15  ;;  %v4481_v41 = vpop.xlane.xlu1 %4480  ;;  %v4494_v38 = vmul.f32 %v15195_v23, %v15195_v23  ;;  %v13646_v15 = vld [vmem:[%s16071_s20] sm:$0xff] }
0x1c60   :  { %v4487_v19 = vmul.f32 0.03125, %v4481_v41  ;;  %v4493_v49 = vmul.f32 %v15197_v7, %v15197_v7 }
0x1c61   :  { %v15203_v5 = vsub.f32 %v4472_v24, %v4488_v16  ;;  %v4500_v40 = vsel %vm485_vm0, %v4494_v38, 0.0  ;;  %v13647_v38 = vld [vmem:[%s16071_s20 + $0x8] sm:$0xff] }
0x1c62   :  { %v15206_v11 = vsub.f32 %v4471_v48, %v4487_v19  ;;  %4501 = vadd.xlane.f32.xlu0 %v4500_v40  ;;  %v4497_v29 = vsel %vm485_vm0, %v4493_v49, 0.0 }
0x1c63   :  { %4498 = vadd.xlane.f32.xlu1 %v4497_v29  ;;  %v4496_v61 = vmul.f32 %v15203_v5, %v15203_v5  ;;  %v406_v29 = vld [vmem:[%s16092_s16 + $0x8] sm:$0xff] }
0x1c64   :  { %v4495_v43 = vmul.f32 %v15206_v11, %v15206_v11 }
0x1c65   :  { %v4506_v54 = vsel %vm485_vm0, %v4496_v61, 0.0  ;;  %v13648_v61 = vld [vmem:[%s16071_s20 + $0x10] sm:$0xff] }
0x1c66   :  { %4507 = vadd.xlane.f32.xlu0 %v4506_v54  ;;  %v4503_v21 = vsel %vm485_vm0, %v4495_v43, 0.0  ;;  %v13649_v54 = vld [vmem:[%s16071_s20 + $0x18] sm:$0xff]  ;;  %s16094_s20 = sld [smem:[#allocation59_spill]] }
0x1c67   :  { %4504 = vadd.xlane.f32.xlu1 %v4503_v21 }
0x1c78   :  { %13172 = vrot.lane.b32.xlu1 %v15189_v56, %s14109_s22 }
0x1c7c   :  { %13177 = vrot.lane.b32.xlu0 %v15189_v56, %s14110_s6  ;;  %5117 = vrot.lane.b32.xlu1 %v15191_v13, %s14111_s25 }
0x1c80   :  { %13182 = vrot.lane.b32.xlu0 %v15189_v56, %s14112_s28  ;;  %5119 = vrot.lane.b32.xlu1 %v15221_v27, %s14111_s25 }
0x1c84   :  { %5483 = vrot.lane.b32.xlu0 %v15221_v27, %s14113_s17  ;;  %5481 = vrot.lane.b32.xlu1 %v15191_v13, %s14113_s17 }
0x1cef   :  { %v4502_v34 = vpop.xlane.xlu0 %4501 }
0x1cf0   :  { %v4510_v4 = vmul.f32 0.03125, %v4502_v34  ;;  %v4499_v55 = vpop.xlane.xlu1 %4498 }
0x1cf1   :  { %v4509_v17 = vmul.f32 0.03125, %v4499_v55 }
0x1cf2   :  { %v4514_v37 = vadd.f32 1e-05, %v4510_v4 }
0x1cf3   :  { %v4513_v42 = vadd.f32 1e-05, %v4509_v17  ;;  %v4508_v44 = vpop.xlane.xlu0 %4507 }
0x1cf4   :  { %13453 = vrsqrt.f32 %v4514_v37  ;;  %v4512_v26 = vmul.f32 0.03125, %v4508_v44  ;;  %v4505_v53 = vpop.xlane.xlu1 %4504 }
0x1cf5   :  { %13455 = vrsqrt.f32 %v4513_v42  ;;  %v4511_v57 = vmul.f32 0.03125, %v4505_v53 }
0x1cf6   :  { %v4516_v0 = vadd.f32 1e-05, %v4512_v26 }
0x1cf7   :  { %v4515_v59 = vadd.f32 1e-05, %v4511_v57  ;;  %v13178_v32 = vpop.permute.xlu0 %13177 }
0x1cf8   :  { %13457 = vrsqrt.f32 %v4516_v0  ;;  %v13173_v60 = vpop.permute.xlu1 %13172  ;;  %v13180_v18 = vunpack.i.h.bf16 %v13178_v32  ;;  %v13179_v35 = vunpack.i.l.bf16 %v13178_v32 }
0x1cf9   :  { %13459 = vrsqrt.f32 %v4515_v59  ;;  %v13175_v62 = vunpack.i.h.bf16 %v13173_v60  ;;  %v13174_v63 = vunpack.i.l.bf16 %v13173_v60 }
0x1cfa   :  { %v12600_v10 = vpack.c.bf16 %v13180_v18, %v13179_v35 }
0x1cfb   :  { %v12590_v30 = vpack.c.bf16 %v13175_v62, %v13174_v63  ;;  %v13183_v4 = vpop.permute.xlu0 %13182  ;;  %v10661_v63 = vld [vmem:[#allocation13] ss:$0 sm:$0xff] }
0x1cfc   :  { %v5118_v34 = vpop.permute.xlu1 %5117  ;;  %v13185_v55 = vunpack.i.h.bf16 %v13183_v4  ;;  %v13184_v17 = vunpack.i.l.bf16 %v13183_v4 }
0x1cfd   :  { %12592 = vmatprep.subr.msk.bf16.mxu0 %vm14480_vm2, %v12590_v30 }
0x1cfe   :  { %v13454_v1 = vpop.eup %13453  ;;  %12595 = vmatpush3.bf16.xpose.msk.msra.mxu0 %vm14480_vm2, %v12590_v30  ;;  %v12610_v37 = vpack.c.bf16 %v13185_v55, %v13184_v17 }
0x1cff   :  { %v13456_v46 = vpop.eup %13455  ;;  %v4522_v24 = vmul.f32 %v13454_v1, %v15195_v23  ;;  %v430_v23 = vld [vmem:[%s16091_s3 + $0x18] sm:$0xff]  ;;  %v5484_v26 = vpop.permute.xlu0 %5483 }
0x1d00   :  { %v4521_v48 = vmul.f32 %v13456_v46, %v15197_v7  ;;  %v12570_v49 = vpack.c.bf16 %v430_v23, %v429_v45  ;;  %v5120_v42 = vpop.permute.xlu1 %5119 }
0x1d01   :  { %v4526_v33 = vmul.f32 %v13644_v2, %v4522_v24 }
0x1d02   :  { %v13458_v6 = vpop.eup %13457  ;;  %v4525_v50 = vmul.f32 %v13644_v2, %v4521_v48 }
0x1d03   :  { %v13460_v28 = vpop.eup %13459  ;;  %v4530_v12 = vadd.f32 %v13645_v3, %v4526_v33  ;;  %v4524_v8 = vmul.f32 %v13458_v6, %v15203_v5 }
0x1d04   :  { %v4523_v14 = vmul.f32 %v13460_v28, %v15206_v11  ;;  %v4529_v47 = vadd.f32 %v13645_v3, %v4525_v50  ;;  %v405_v11 = vld [vmem:[%s16092_s16] sm:$0xff]  ;;  %v5482_v44 = vpop.permute.xlu1 %5481 }
0x1d05   :  { %4534 = vst.msk [vmem:[%s14363_s9 + $0x8] sm:$0xff] %vm485_vm0, %v4530_v12  ;;  %11851 = vmatmul.mubr.msk.f32.vlgmr.msra.gmra.mrb[58].mxu0 %vm702_vm1, %v15221_v27  ;;  %v4528_v7 = vmul.f32 %v13644_v2, %v4524_v8  ;;  %v4538_v19 = vadd.f32 %v13647_v38, %v4530_v12  ;;  %v15267_v25 = vpack.c.bf16 %v406_v29, %v405_v11  ;;  %v10666_v8 = vld [vmem:[#allocation14] ss:$0 sm:$0xff] }
0x1d06   :  { %4533 = vst.msk [vmem:[%s14363_s9] sm:$0xff] %vm485_vm0, %v4529_v47  ;;  %v4537_v16 = vadd.f32 %v13646_v15, %v4529_v47  ;;  %v4527_v41 = vmul.f32 %v13644_v2, %v4523_v14 }
0x1d07   :  { %v4532_v5 = vadd.f32 %v13645_v3, %v4528_v7 }
0x1d08   :  { %11804 = vmatprep.mubr.msk.f32.mxu1 %vm485_vm0, %v4537_v16  ;;  %v4531_v40 = vadd.f32 %v13645_v3, %v4527_v41 }
0x1d09   :  { %11805 = vmatmul.mubr.msk.f32.vlgmr.msra.gmra.mrb[48].mxu1 %vm485_vm0, %v4538_v19  ;;  %4536 = vst.msk [vmem:[%s14363_s9 + $0x18] sm:$0xff] %vm485_vm0, %v4532_v5  ;;  %v4540_v21 = vadd.f32 %v13649_v54, %v4532_v5 }
0x1d0a   :  { %12569 = vmatpush3.bf16.msra.mxu1 %v12566_v58  ;;  %4535 = vst.msk [vmem:[%s14363_s9 + $0x10] sm:$0xff] %vm485_vm0, %v4531_v40  ;;  %v4539_v43 = vadd.f32 %v13648_v61, %v4531_v40  ;;  %v14116_v58 = vmov 0.0   ;;  %s16093_s9 = sld [smem:[#allocation40_spill]] }
0x1d0b   :  { %12571 = vmatprep.subr.bf16.mxu1 %v12570_v49 }
0x1d0c   :  { %11807 = vmatprep.mubr.msk.f32.mxu1 %vm485_vm0, %v4539_v43 }
0x1d0d   :  { %11808 = vmatmul.mubr.msk.f32.gmra.mrb[50].mxu1 %vm485_vm0, %v4540_v21 }
0x1d0e   :  { %12573 = vmatpush3.bf16.msra.mxu1 %v12570_v49  ;;  %11818 = vmatprep.mubr.msk.f32.mxu1 %vm485_vm0, %v4529_v47 }
0x1d0f   :  { %12583 = vmatprep.subr.bf16.mxu1 %v15267_v25 }
0x1d10   :  { %v15296_v53 = vld [vmem:[%s16093_s9 + $0x8] sm:$0xff]  ;;  %v15299_v57 = vld [vmem:[%s16093_s9] sm:$0xff] }
0x1d11   :  { %11819 = vmatmul.mubr.msk.f32.vlgmr.msra.gmra.mrb[52].mxu1 %vm485_vm0, %v4530_v12 }
0x1d12   :  { %12585 = vmatpush3.bf16.msra.mxu1 %v15267_v25  ;;  %11821 = vmatprep.mubr.msk.f32.mxu1 %vm485_vm0, %v4531_v40  ;;  %v10674_v40 = vld [vmem:[#allocation5] ss:$0 sm:$0xff] }
0x1d13   :  { %12587 = vmatprep.subr.bf16.mxu1 %v15275_v52 }
0x1d15   :  { %11822 = vmatmul.mubr.msk.f32.gmra.mrb[54].mxu1 %vm485_vm0, %v4532_v5 }
0x1d16   :  { %12589 = vmatpush3.bf16.msra.mxu1 %v15275_v52  ;;  %11843 = vmatprep.mubr.f32.mxu1 %v14116_v58 }
0x1d17   :  { %12602 = vmatprep.subr.msk.bf16.mxu1 %vm14480_vm2, %v12600_v10 }
0x1d19   :  { %11844 = vmatmul.mubr.f32.vlgmr.msra.gmra.mrb[56].mxu1 %v14116_v58 }
0x1d1a   :  { %11864 = vmatprep.mubr.msk.f32.mxu1 %vm702_vm1, %v5118_v34 }
0x1d1f   :  { %12605 = vmatpush3.bf16.xpose.msk.msra.mxu1 %vm14480_vm2, %v12600_v10 }
0x1d20   :  { %12612 = vmatprep.subr.msk.bf16.mxu1 %vm14480_vm2, %v12610_v37 }
0x1d26   :  { %11865 = vmatmul.mubr.msk.f32.vlgmr.msra.gmra.mrb[58].mxu1 %vm702_vm1, %v5120_v42 }
0x1d27   :  { %12615 = vmatpush3.bf16.xpose.msk.msra.mxu1 %vm14480_vm2, %v12610_v37  ;;  %11888 = vmatprep.mubr.msk.f32.mxu1 %vm702_vm1, %v5482_v44 }
0x1d2e   :  { %11889 = vmatmul.mubr.msk.f32.vlgmr.msra.gmra.mrb[60].mxu1 %vm702_vm1, %v5484_v26 }
0x1dd8   :  { %v11852_v0 = vpop.f32.mrb[58].mxu0 }
0x1dd9   :  { %v5010_v59 = vadd.f32 %v11852_v0, %v15296_v53  ;;  %v5004_v60 = vpop.f32.mrb[59].mxu0 }
0x1dda   :  { %v5005_v62 = vadd.f32 %v5004_v60, %v15299_v57 }
0x1ddb   :  { %v5017_v30 = vsel %vm5013_vm4, %v5010_v59, -inf }
0x1ddc   :  { %v11806_v1 = vpop.f32.mrb[48].mxu1  ;;  %5018 = vmax.xlane.f32.xlu0 %v5017_v30  ;;  %v5014_v46 = vsel %vm5013_vm4, %v5005_v62, -inf }
0x1ddd   :  { %v4631_v24 = vadd.f32 %v11806_v1, %v10661_v63  ;;  %v4625_v48 = vpop.f32.mrb[49].mxu1  ;;  %5015 = vmax.xlane.f32.xlu1 %v5014_v46 }
0x1dde   :  { %v4626_v2 = vadd.f32 %v10661_v63, %v4625_v48 }
0x1de0   :  { %v11809_v33 = vpop.f32.mrb[50].mxu1  ;;  %v15305_v6 = vpack.c.bf16 %v4631_v24, %v4626_v2  ;;  %v15307_v50 = vpack.i.bf16 %v4631_v24, %v4626_v2 }
0x1de1   :  { %v4641_v28 = vadd.f32 %v11809_v33, %v10661_v63  ;;  %v4635_v3 = vpop.f32.mrb[51].mxu1 }
0x1de2   :  { %v4636_v12 = vadd.f32 %v10661_v63, %v4635_v3 }
0x1de4   :  { %v11820_v14 = vpop.f32.mrb[52].mxu1  ;;  %v15309_v47 = vpack.c.bf16 %v4641_v28, %v4636_v12  ;;  %v15311_v45 = vpack.i.bf16 %v4641_v28, %v4636_v12 }
0x1de5   :  { %v4734_v23 = vadd.f32 %v11820_v14, %v10666_v8  ;;  %v4728_v7 = vpop.f32.mrb[53].mxu1 }
0x1de6   :  { %v4729_v15 = vadd.f32 %v10666_v8, %v4728_v7 }
0x1de8   :  { %v11823_v16 = vpop.f32.mrb[54].mxu1  ;;  %v15313_v41 = vpack.c.bf16 %v4734_v23, %v4729_v15  ;;  %v15315_v38 = vpack.i.bf16 %v4734_v23, %v4729_v15 }
0x1de9   :  { %v4744_v19 = vadd.f32 %v11823_v16, %v10666_v8  ;;  %v4738_v49 = vpop.f32.mrb[55].mxu1 }
0x1dea   :  { %v4739_v5 = vadd.f32 %v10666_v8, %v4738_v49 }
0x1dec   :  { %v11845_v11 = vpop.f32.mrb[56].mxu1  ;;  %v15317_v29 = vpack.c.bf16 %v4744_v19, %v4739_v5  ;;  %v15319_v61 = vpack.i.bf16 %v4744_v19, %v4739_v5 }
0x1ded   :  { %v4917_v43 = vadd.f32 %v11845_v11, %v10674_v40  ;;  %v4911_v54 = vpop.f32.mrb[57].mxu1  ;;  %v417_v11 = vld [vmem:[%s16094_s20] sm:$0xff] }
0x1dee   :  { %v4912_v21 = vadd.f32 %v10674_v40, %v4911_v54 }
0x1df0   :  { %v12596_v31 = vpack.c.bf16 %v4917_v43, %v4912_v21  ;;  %v15321_v51 = vpack.i.bf16 %v4917_v43, %v4912_v21  ;;  %v418_v43 = vld [vmem:[%s16094_s20 + $0x8] sm:$0xff] }
0x1df2   :  { %12597 = vmatprep.subr.bf16.mxu0 %v12596_v31 }
0x1df3   :  { %12599 = vmatpush3.bf16.msra.mxu0 %v12596_v31 }
0x1df9   :  { %v11866_v32 = vpop.f32.mrb[58].mxu1 }
0x1dfa   :  { %v5205_v18 = vadd.f32 %v11866_v32, %v15296_v53  ;;  %v5199_v35 = vpop.f32.mrb[59].mxu1 }
0x1dfb   :  { %v5200_v10 = vadd.f32 %v5199_v35, %v15299_v57 }
0x1dfc   :  { %v5211_v58 = vsel %vm5013_vm4, %v5205_v18, -inf }
0x1dfd   :  { %5212 = vmax.xlane.f32.xlu1 %v5211_v58  ;;  %v5208_v34 = vsel %vm5013_vm4, %v5200_v10, -inf }
0x1dfe   :  { %5209 = vmax.xlane.f32.xlu0 %v5208_v34 }
0x1e01   :  { %v11890_v4 = vpop.f32.mrb[60].mxu1 }
0x1e02   :  { %v5563_v55 = vpop.f32.mrb[61].mxu1  ;;  %v5569_v14 = vadd.f32 %v11890_v4, %v15296_v53 }
0x1e03   :  { %v5564_v8 = vadd.f32 %v5563_v55, %v15299_v57 }
0x1e04   :  { %v5575_v7 = vsel %vm5013_vm4, %v5569_v14, -inf }
0x1e05   :  { %v5572_v23 = vsel %vm5013_vm4, %v5564_v8, -inf }
0x1e69   :  { %v5019_v17 = vpop.xlane.xlu0 %5018 }
0x1e6a   :  { %v5021_v37 = vsub.f32 %v5010_v59, %v5019_v17  ;;  %v5016_v42 = vpop.xlane.xlu1 %5015  ;;  %v419_v17 = vld [vmem:[%s16094_s20 + $0x10] sm:$0xff] }
0x1e6b   :  { %v5020_v44 = vsub.f32 %v5005_v62, %v5016_v42 }
0x1e6c   :  { %v5024_v26 = vmul.f32 1.442695, %v5021_v37  ;;  %v420_v37 = vld [vmem:[%s16094_s20 + $0x18] sm:$0xff] }
0x1e6d   :  { %v5022_v0 = vmul.f32 1.442695, %v5020_v44 }
0x1e6e   :  { %13461 = vpow2.f32 %v5024_v26  ;;  %v15358_v26 = vpack.c.bf16 %v420_v37, %v419_v17 }
0x1e6f   :  { %13463 = vpow2.f32 %v5022_v0 }
0x1e78   :  { %v13462_v60 = vpop.eup %13461 }
0x1e79   :  { %v13464_v63 = vpop.eup %13463  ;;  %v5029_v30 = vsel %vm5013_vm4, %v13462_v60, 0.0 }
0x1e7a   :  { %5030 = vadd.xlane.f32.xlu1 %v5029_v30  ;;  %v5026_v1 = vsel %vm5013_vm4, %v13464_v63, 0.0 }
0x1e7b   :  { %5027 = vadd.xlane.f32.xlu0 %v5026_v1 }
0x1e8a   :  { %v5213_v46 = vpop.xlane.xlu1 %5212 }
0x1e8b   :  { %v5215_v24 = vsub.f32 %v5205_v18, %v5213_v46  ;;  %v5210_v48 = vpop.xlane.xlu0 %5209 }
0x1e8c   :  { %v5214_v2 = vsub.f32 %v5200_v10, %v5210_v48  ;;  %v15347_v10 = vpack.c.bf16 %v418_v43, %v417_v11 }
0x1e8d   :  { %v5218_v33 = vmul.f32 1.442695, %v5215_v24 }
0x1e8e   :  { %v5216_v59 = vmul.f32 1.442695, %v5214_v2 }
0x1e8f   :  { %13465 = vpow2.f32 %v5218_v33 }
0x1e90   :  { %13467 = vpow2.f32 %v5216_v59 }
0x1e99   :  { %v13466_v62 = vpop.eup %13465 }
0x1e9a   :  { %v13468_v28 = vpop.eup %13467  ;;  %v5223_v3 = vsel %vm5013_vm4, %v13466_v62, 0.0 }
0x1e9b   :  { %5224 = vadd.xlane.f32.xlu1 %v5223_v3  ;;  %v5220_v12 = vsel %vm5013_vm4, %v13468_v28, 0.0 }
0x1e9c   :  { %5221 = vadd.xlane.f32.xlu0 %v5220_v12 }
0x1eac   :  { %13192 = vrot.lane.b32.xlu1 %v15189_v56, %s14114_s12 }
0x1eb0   :  { %5764 = vrot.lane.b32.xlu1 %v15191_v13, %s14115_s0 }
0x1eb2   :  { %13187 = vrot.lane.b32.xlu0 %v15321_v51, %s14111_s25 }
0x1eb6   :  { %5766 = vrot.lane.b32.xlu0 %v15221_v27, %s14115_s0 }
0x1ed4   :  { %5573 = vmax.xlane.f32.xlu1 %v5572_v23 }
0x1ed5   :  { %5576 = vmax.xlane.f32.xlu0 %v5575_v7 }
0x1f07   :  { %v5031_v56 = vpop.xlane.xlu1 %5030 }
0x1f08   :  { %13469 = vrcp.f32 %v5031_v56  ;;  %v5028_v13 = vpop.xlane.xlu0 %5027 }
0x1f09   :  { %13471 = vrcp.f32 %v5028_v13 }
0x1f12   :  { %v13470_v15 = vpop.eup %13469 }
0x1f13   :  { %v13472_v16 = vpop.eup %13471  ;;  %v5035_v27 = vmul.f32 %v13470_v15, %v13462_v60 }
0x1f14   :  { %v5034_v19 = vmul.f32 %v13472_v16, %v13464_v63 }
0x1f16   :  { %11857 = vmatprep.mubr.msk.f32.mxu0 %vm5013_vm4, %v5034_v19 }
0x1f17   :  { %11858 = vmatmul.mubr.msk.f32.vlgmr.msra.gmra.mrb[60].mxu0 %vm5013_vm4, %v5035_v27 }
0x1f28   :  { %v5225_v49 = vpop.xlane.xlu1 %5224 }
0x1f29   :  { %13473 = vrcp.f32 %v5225_v49  ;;  %v5222_v5 = vpop.xlane.xlu0 %5221 }
0x1f2a   :  { %13475 = vrcp.f32 %v5222_v5 }
0x1f2c   :  { %v13193_v40 = vpop.permute.xlu1 %13192 }
0x1f2d   :  { %v13195_v54 = vunpack.i.h.bf16 %v13193_v40  ;;  %v13194_v21 = vunpack.i.l.bf16 %v13193_v40  ;;  %v13188_v31 = vpop.permute.xlu0 %13187 }
0x1f2e   :  { %v13190_v32 = vunpack.i.h.bf16 %v13188_v31  ;;  %v13189_v18 = vunpack.i.l.bf16 %v13188_v31  ;;  %v412_v31 = vld [vmem:[%s16095_s18 + $0x10] sm:$0xff] }
0x1f2f   :  { %v12620_v35 = vpack.c.bf16 %v13195_v54, %v13194_v21 }
0x1f30   :  { %v5765_v58 = vpop.permute.xlu1 %5764  ;;  %v12606_v34 = vpack.c.bf16 %v13190_v32, %v13189_v18 }
0x1f31   :  { %12622 = vmatprep.subr.msk.bf16.mxu1 %vm14480_vm2, %v12620_v35  ;;  %11907 = vmatprep.mubr.msk.f32.mxu1 %vm702_vm1, %v5765_v58  ;;  %v5767_v0 = vpop.permute.xlu0 %5766 }
0x1f32   :  { %12607 = vmatprep.subr.bf16.mxu0 %v12606_v34  ;;  %12625 = vmatpush3.bf16.xpose.msk.msra.mxu1 %vm14480_vm2, %v12620_v35 }
0x1f33   :  { %v13474_v4 = vpop.eup %13473  ;;  %12609 = vmatpush3.bf16.msra.mxu0 %v12606_v34  ;;  %12631 = vmatprep.subr.bf16.mxu1 %v15347_v10 }
0x1f34   :  { %v13476_v55 = vpop.eup %13475  ;;  %v5229_v44 = vmul.f32 %v13474_v4, %v13466_v62  ;;  %v411_v62 = vld [vmem:[%s16095_s18 + $0x8] sm:$0xff] }
0x1f35   :  { %v5228_v42 = vmul.f32 %v13476_v55, %v13468_v28  ;;  %11874 = vmatprep.subr.mxu0 %v411_v62  ;;  %v410_v28 = vld [vmem:[%s16095_s18] sm:$0xff] }
0x1f37   :  { %11871 = vmatprep.mubr.msk.f32.mxu0 %vm5013_vm4, %v5228_v42 }
0x1f38   :  { %11872 = vmatmul.mubr.msk.f32.vlgmr.msra.gmra.mrb[62].mxu0 %vm5013_vm4, %v5229_v44 }
0x1f39   :  { %11908 = vmatmul.mubr.msk.f32.vlgmr.msra.gmra.mrb[62].mxu1 %vm702_vm1, %v5767_v0  ;;  %11875 = vmatpush3.msra.mxu0 %v411_v62 }
0x1f3a   :  { %12633 = vmatpush3.bf16.msra.mxu1 %v15347_v10  ;;  %11879 = vmatprep.subr.mxu0 %v410_v28 }
0x1f3b   :  { %12635 = vmatprep.subr.bf16.mxu1 %v15358_v26 }
0x1f3e   :  { %12637 = vmatpush3.bf16.msra.mxu1 %v15358_v26 }
0x1f3f   :  { %12651 = vmatprep.subr.bf16.mxu1 %v15313_v41 }
0x1f61   :  { %v5574_v60 = vpop.xlane.xlu1 %5573 }
0x1f62   :  { %v5578_v63 = vsub.f32 %v5564_v8, %v5574_v60  ;;  %v5577_v30 = vpop.xlane.xlu0 %5576 }
0x1f63   :  { %v5579_v1 = vsub.f32 %v5569_v14, %v5577_v30 }
0x1f64   :  { %v5580_v46 = vmul.f32 1.442695, %v5578_v63 }
0x1f65   :  { %v5582_v24 = vmul.f32 1.442695, %v5579_v1 }
0x1f66   :  { %13477 = vpow2.f32 %v5580_v46 }
0x1f67   :  { %13479 = vpow2.f32 %v5582_v24  ;;  %v413_v24 = vld [vmem:[%s16095_s18 + $0x18] sm:$0xff] }
0x1f70   :  { %v13478_v48 = vpop.eup %13477 }
0x1f71   :  { %v13480_v2 = vpop.eup %13479  ;;  %v5584_v33 = vsel %vm5013_vm4, %v13478_v48, 0.0 }
0x1f72   :  { %5585 = vadd.xlane.f32.xlu0 %v5584_v33  ;;  %v5587_v59 = vsel %vm5013_vm4, %v13480_v2, 0.0 }
0x1f73   :  { %5588 = vadd.xlane.f32.xlu1 %v5587_v59 }
0x1f88   :  { %13197 = vrot.lane.b32.xlu0 %v15321_v51, %s14113_s17 }
0x1fea   :  { %v11859_v3 = vpop.f32.mrb[60].mxu0 }
0x1feb   :  { %v5108_v12 = vpop.f32.mrb[61].mxu0 }
0x1fff   :  { %v5586_v8 = vpop.xlane.xlu0 %5585 }
0x2000   :  { %13481 = vrcp.f32 %v5586_v8  ;;  %v5589_v23 = vpop.xlane.xlu1 %5588 }
0x2001   :  { %13483 = vrcp.f32 %v5589_v23 }
0x2003   :  { %v13198_v14 = vpop.permute.xlu0 %13197 }
0x2004   :  { %v13200_v7 = vunpack.i.h.bf16 %v13198_v14  ;;  %v13199_v56 = vunpack.i.l.bf16 %v13198_v14 }
0x2006   :  { %v12616_v49 = vpack.c.bf16 %v13200_v7, %v13199_v56 }
0x200a   :  { %v13482_v11 = vpop.eup %13481 }
0x200b   :  { %v11873_v13 = vpop.f32.mrb[62].mxu0  ;;  %v13484_v54 = vpop.eup %13483  ;;  %v5592_v21 = vmul.f32 %v13482_v11, %v13478_v48 }
0x200c   :  { %v5310_v15 = vpop.f32.mrb[63].mxu0  ;;  %v11909_v16 = vpop.f32.mrb[62].mxu1 }
0x200d   :  { %11876 = vmatprep.mubr.msk.f32.mxu0 %vm702_vm1, %v5310_v15  ;;  %v5846_v19 = vpop.f32.mrb[63].mxu1  ;;  %v5852_v5 = vadd.f32 %v11909_v16, %v15296_v53 }
0x200e   :  { %v5847_v27 = vadd.f32 %v5846_v19, %v15299_v57  ;;  %11877 = vmatmul.mubr.msk.f32.vlgmr.msra.gmra.mrb[64].mxu0 %vm702_vm1, %v11873_v13  ;;  %v5593_v57 = vmul.f32 %v13484_v54, %v13480_v2 }
0x200f   :  { %11880 = vmatpush3.msra.mxu0 %v410_v28  ;;  %11881 = vmatprep.mubr.msk.f32.mxu0 %vm702_vm1, %v5108_v12  ;;  %v5858_v43 = vsel %vm5013_vm4, %v5852_v5, -inf  ;;  %v10707_v28 = vld [vmem:[#allocation7] ss:$0 sm:$0xff] }
0x2010   :  { %12617 = vmatprep.subr.bf16.mxu0 %v12616_v49  ;;  %v5855_v40 = vsel %vm5013_vm4, %v5847_v27, -inf }
0x2011   :  { %5856 = vmax.xlane.f32.xlu1 %v5855_v40 }
0x2015   :  { %5859 = vmax.xlane.f32.xlu1 %v5858_v43 }
0x2016   :  { %11882 = vmatmul.mubr.msk.f32.vlgmr.msra.gmra.mrb[64].mxu0 %vm702_vm1, %v11859_v3 }
0x2017   :  { %12619 = vmatpush3.bf16.msra.mxu0 %v12616_v49  ;;  %11895 = vmatprep.mubr.msk.f32.mxu0 %vm5013_vm4, %v5592_v21 }
0x2018   :  { %11898 = vmatprep.subr.mxu0 %v412_v31 }
0x201a   :  { %11896 = vmatmul.mubr.msk.f32.vlgmr.msra.gmra.mrb[66].mxu0 %vm5013_vm4, %v5593_v57 }
0x201b   :  { %11899 = vmatpush3.msra.mxu0 %v412_v31 }
0x209e   :  { %v5857_v53 = vpop.xlane.xlu1 %5856 }
0x209f   :  { %v5861_v32 = vsub.f32 %v5847_v27, %v5857_v53 }
0x20a1   :  { %v5863_v58 = vmul.f32 1.442695, %v5861_v32 }
0x20a2   :  { %v5860_v18 = vpop.xlane.xlu1 %5859 }
0x20a3   :  { %v5862_v35 = vsub.f32 %v5852_v5, %v5860_v18  ;;  %v10708_v18 = vld [vmem:[#allocation8] ss:$0 sm:$0xff] }
0x20a5   :  { %v5865_v34 = vmul.f32 1.442695, %v5862_v35 }
0x20a7   :  { %13485 = vpow2.f32 %v5865_v34 }
0x20a8   :  { %13487 = vpow2.f32 %v5863_v58  ;;  %v10709_v58 = vld [vmem:[#allocation10] ss:$0 sm:$0xff] }
0x20b1   :  { %v13486_v4 = vpop.eup %13485 }
0x20b2   :  { %v5870_v55 = vsel %vm5013_vm4, %v13486_v4, 0.0  ;;  %v13488_v17 = vpop.eup %13487 }
0x20b3   :  { %5871 = vadd.xlane.f32.xlu1 %v5870_v55  ;;  %v5867_v37 = vsel %vm5013_vm4, %v13488_v17, 0.0 }
0x20b7   :  { %5868 = vadd.xlane.f32.xlu1 %v5867_v37 }
0x20c8   :  { %13202 = vrot.lane.b32.xlu1 %v15321_v51, %s14115_s0 }
0x20ed   :  { %v11897_v42 = vpop.f32.mrb[66].mxu0 }
0x20ee   :  { %v5672_v44 = vpop.f32.mrb[67].mxu0 }
0x20ef   :  { %11900 = vmatprep.mubr.msk.f32.mxu0 %vm702_vm1, %v5672_v44 }
0x20f0   :  { %11901 = vmatmul.mubr.msk.f32.vlgmr.msra.gmra.mrb[64].mxu0 %vm702_vm1, %v11897_v42 }
0x2140   :  { %v5872_v0 = vpop.xlane.xlu1 %5871 }
0x2141   :  { %13489 = vrcp.f32 %v5872_v0 }
0x2144   :  { %v5869_v60 = vpop.xlane.xlu1 %5868 }
0x2145   :  { %13491 = vrcp.f32 %v5869_v60  ;;  %v10710_v60 = vld [vmem:[#allocation11] ss:$0 sm:$0xff] }
0x2148   :  { %v13203_v63 = vpop.permute.xlu1 %13202 }
0x2149   :  { %v13205_v30 = vunpack.i.h.bf16 %v13203_v63  ;;  %v13204_v1 = vunpack.i.l.bf16 %v13203_v63 }
0x214b   :  { %v12626_v46 = vpack.c.bf16 %v13205_v30, %v13204_v1  ;;  %v13490_v48 = vpop.eup %13489 }
0x214c   :  { %v5876_v33 = vmul.f32 %v13490_v48, %v13486_v4 }
0x214d   :  { %12627 = vmatprep.subr.bf16.mxu0 %v12626_v46 }
0x214e   :  { %12629 = vmatpush3.bf16.msra.mxu0 %v12626_v46 }
0x214f   :  { %v13492_v2 = vpop.eup %13491  ;;  %11917 = vmatprep.subr.mxu0 %v413_v24 }
0x2150   :  { %v5875_v51 = vmul.f32 %v13492_v2, %v13488_v17  ;;  %v15435_v2 = vld [vmem:[%s16096_s13 + $0x8] sm:$0xff] }
0x2152   :  { %11914 = vmatprep.mubr.msk.f32.mxu0 %vm5013_vm4, %v5875_v51 }
0x2153   :  { %11915 = vmatmul.mubr.msk.f32.vlgmr.msra.gmra.mrb[68].mxu0 %vm5013_vm4, %v5876_v33 }
0x2154   :  { %11918 = vmatpush3.msra.mxu0 %v413_v24 }
0x2155   :  { %12640 = vmatprep.subr.msk.bf16.mxu0 %vm14480_vm2, %v15305_v6 }
0x2226   :  { %v11916_v59 = vpop.f32.mrb[68].mxu0 }
0x2227   :  { %v5955_v62 = vpop.f32.mrb[69].mxu0 }
0x2228   :  { %11919 = vmatprep.mubr.msk.f32.mxu0 %vm702_vm1, %v5955_v62 }
0x2229   :  { %11920 = vmatmul.mubr.msk.f32.vlgmr.msra.gmra.mrb[64].mxu0 %vm702_vm1, %v11916_v59 }
0x222a   :  { %12643 = vmatpush3.bf16.xpose.msk.msra.mxu0 %vm14480_vm2, %v15305_v6 }
0x222b   :  { %12646 = vmatprep.subr.msk.bf16.mxu0 %vm14480_vm2, %v15309_v47 }
0x2232   :  { %12649 = vmatpush3.bf16.xpose.msk.msra.mxu0 %vm14480_vm2, %v15309_v47 }
0x22fc   :  { %v11921_v3 = vpop.f32.mrb[64].mxu0 }
0x22fd   :  { %v6054_v12 = vadd.f32 %v11921_v3, %v10707_v28  ;;  %v6036_v8 = vpop.f32.mrb[65].mxu0 }
0x22fe   :  { %v6053_v14 = vadd.f32 %v10707_v28, %v6036_v8 }
0x22ff   :  { %v6060_v23 = vsel %vm485_vm0, %v6054_v12, 0.0 }
0x2300   :  { %6061 = vadd.xlane.f32.xlu1 %v6060_v23  ;;  %v6057_v7 = vsel %vm485_vm0, %v6053_v14, 0.0 }
0x2301   :  { %6058 = vadd.xlane.f32.xlu0 %v6057_v7 }
0x238d   :  { %v6062_v56 = vpop.xlane.xlu1 %6061 }
0x238e   :  { %v6064_v13 = vmul.f32 0.03125, %v6062_v56  ;;  %v6059_v15 = vpop.xlane.xlu0 %6058 }
0x238f   :  { %v6063_v16 = vmul.f32 0.03125, %v6059_v15 }
0x2390   :  { %v6066_v19 = vsub.f32 %v6054_v12, %v6064_v13 }
0x2391   :  { %v6065_v27 = vsub.f32 %v6053_v14, %v6063_v16 }
0x2392   :  { %v6068_v40 = vmul.f32 %v6066_v19, %v6066_v19 }
0x2393   :  { %v6067_v49 = vmul.f32 %v6065_v27, %v6065_v27 }
0x2394   :  { %v6072_v11 = vsel %vm485_vm0, %v6068_v40, 0.0 }
0x2395   :  { %v6069_v5 = vsel %vm485_vm0, %v6067_v49, 0.0 }
0x2396   :  { %6070 = vadd.xlane.f32.xlu0 %v6069_v5 }
0x239a   :  { %6073 = vadd.xlane.f32.xlu0 %v6072_v11 }
0x2423   :  { %v6071_v43 = vpop.xlane.xlu0 %6070 }
0x2424   :  { %v6075_v54 = vmul.f32 0.03125, %v6071_v43 }
0x2426   :  { %v6077_v21 = vadd.f32 1e-05, %v6075_v54 }
0x2427   :  { %v6074_v57 = vpop.xlane.xlu0 %6073 }
0x2428   :  { %13493 = vrsqrt.f32 %v6077_v21  ;;  %v6076_v31 = vmul.f32 0.03125, %v6074_v57 }
0x242a   :  { %v6078_v53 = vadd.f32 1e-05, %v6076_v31 }
0x242c   :  { %13495 = vrsqrt.f32 %v6078_v53 }
0x2432   :  { %v13494_v32 = vpop.eup %13493 }
0x2433   :  { %v6081_v35 = vmul.f32 %v13494_v32, %v6065_v27 }
0x2435   :  { %v6089_v34 = vmul.f32 %v10708_v18, %v6081_v35 }
0x2436   :  { %v13496_v4 = vpop.eup %13495 }
0x2437   :  { %v6082_v55 = vmul.f32 %v13496_v4, %v6066_v19  ;;  %v15410_v17 = vadd.f32 %v10709_v58, %v6089_v34 }
0x2439   :  { %v6099_v37 = vadd.f32 %v15410_v17, %v15172_v9  ;;  %v6090_v42 = vmul.f32 %v10708_v18, %v6082_v55 }
0x243b   :  { %11930 = vmatprep.mubr.msk.f32.mxu1 %vm485_vm0, %v6099_v37  ;;  %v15415_v44 = vadd.f32 %v10709_v58, %v6090_v42 }
0x243d   :  { %v6100_v0 = vadd.f32 %v15415_v44, %v15180_v20  ;;  %v15432_v20 = vld [vmem:[%s16096_s13] sm:$0xff] }
0x243f   :  { %11931 = vmatmul.mubr.msk.f32.vlgmr.msra.gmra.mrb[64].mxu1 %vm485_vm0, %v6100_v0 }
0x2440   :  { %12653 = vmatpush3.bf16.msra.mxu1 %v15313_v41 }
0x2441   :  { %12655 = vmatprep.subr.bf16.mxu1 %v15317_v29 }
0x2444   :  { %12657 = vmatpush3.bf16.msra.mxu1 %v15317_v29 }
0x2512   :  { %v11932_v9 = vpop.f32.mrb[64].mxu1 }
0x2513   :  { %v6185_v63 = vadd.f32 %v11932_v9, %v10710_v60  ;;  %v6179_v30 = vpop.f32.mrb[65].mxu1 }
0x2514   :  { %v6180_v1 = vadd.f32 %v10710_v60, %v6179_v30 }
0x2515   :  { %v15425_v24 = vmul.f32 0.35355338, %v6185_v63 }
0x2516   :  { %v15423_v46 = vmul.f32 0.35355338, %v6180_v1 }
0x2518   :  { %11941 = vmatprep.mubr.msk.f32.mxu0 %vm702_vm1, %v15423_v46 }
0x2519   :  { %11942 = vmatmul.mubr.msk.f32.vlgmr.msra.gmra.mrb[70].mxu0 %vm702_vm1, %v15425_v24 }
0x25ec   :  { %v11943_v48 = vpop.f32.mrb[70].mxu0 }
0x25ed   :  { %v6274_v51 = vpop.f32.mrb[71].mxu0  ;;  %v6280_v59 = vadd.f32 %v11943_v48, %v15435_v2 }
0x25ee   :  { %v6275_v33 = vadd.f32 %v6274_v51, %v15432_v20 }
0x25ef   :  { %v6286_v28 = vsel %vm485_vm0, %v6280_v59, -inf }
0x25f0   :  { %v6283_v62 = vsel %vm485_vm0, %v6275_v33, -inf }
0x25f1   :  { %6284 = vmax.xlane.f32.xlu0 %v6283_v62 }
0x25f5   :  { %6287 = vmax.xlane.f32.xlu0 %v6286_v28 }
0x267e   :  { %v6285_v3 = vpop.xlane.xlu0 %6284 }
0x267f   :  { %v6289_v12 = vsub.f32 %v6275_v33, %v6285_v3 }
0x2681   :  { %v6291_v8 = vmul.f32 1.442695, %v6289_v12 }
0x2682   :  { %v6288_v14 = vpop.xlane.xlu0 %6287 }
0x2683   :  { %13497 = vpow2.f32 %v6291_v8  ;;  %v6290_v23 = vsub.f32 %v6280_v59, %v6288_v14 }
0x2685   :  { %v6293_v7 = vmul.f32 1.442695, %v6290_v23 }
0x2687   :  { %13499 = vpow2.f32 %v6293_v7 }
0x268d   :  { %v13498_v56 = vpop.eup %13497 }
0x268e   :  { %v6295_v13 = vsel %vm485_vm0, %v13498_v56, 0.0 }
0x268f   :  { %6296 = vadd.xlane.f32.xlu0 %v6295_v13 }
0x2691   :  { %v13500_v15 = vpop.eup %13499 }
0x2692   :  { %v6298_v16 = vsel %vm485_vm0, %v13500_v15, 0.0 }
0x2693   :  { %6299 = vadd.xlane.f32.xlu1 %v6298_v16 }
0x26a4   :  { %13212 = vrot.lane.b32.xlu1 %v15311_v45, %s14111_s25 }
0x26a5   :  { %13207 = vrot.lane.b32.xlu0 %v15307_v50, %s14111_s25 }
0x26a8   :  { %6386 = vrot.lane.b32.xlu1 %v15423_v46, %s14111_s25 }
0x26a9   :  { %6388 = vrot.lane.b32.xlu0 %v15425_v24, %s14111_s25 }
0x26ac   :  { %13217 = vrot.lane.b32.xlu1 %v15307_v50, %s14113_s17 }
0x26ad   :  { %13222 = vrot.lane.b32.xlu0 %v15311_v45, %s14113_s17 }
0x26b0   :  { %6766 = vrot.lane.b32.xlu1 %v15423_v46, %s14113_s17 }
0x26b1   :  { %6768 = vrot.lane.b32.xlu0 %v15425_v24, %s14113_s17 }
0x271c   :  { %v6297_v19 = vpop.xlane.xlu0 %6296 }
0x271d   :  { %13501 = vrcp.f32 %v6297_v19 }
0x2720   :  { %v6300_v27 = vpop.xlane.xlu1 %6299  ;;  %v13208_v49 = vpop.permute.xlu0 %13207 }
0x2721   :  { %13503 = vrcp.f32 %v6300_v27  ;;  %v13210_v5 = vunpack.i.h.bf16 %v13208_v49  ;;  %v13209_v40 = vunpack.i.l.bf16 %v13208_v49 }
0x2723   :  { %v15459_v11 = vpack.c.bf16 %v13210_v5, %v13209_v40 }
0x2724   :  { %v13213_v43 = vpop.permute.xlu1 %13212  ;;  %v6389_v34 = vpop.permute.xlu0 %6388 }
0x2725   :  { %12660 = vmatprep.subr.msk.bf16.mxu1 %vm14480_vm2, %v15459_v11  ;;  %v13215_v31 = vunpack.i.h.bf16 %v13213_v43  ;;  %v13214_v53 = vunpack.i.l.bf16 %v13213_v43 }
0x2727   :  { %v13502_v54 = vpop.eup %13501  ;;  %v15465_v35 = vpack.c.bf16 %v13215_v31, %v13214_v53 }
0x2728   :  { %v6303_v21 = vmul.f32 %v13502_v54, %v13498_v56  ;;  %v6387_v57 = vpop.permute.xlu1 %6386  ;;  %v13223_v42 = vpop.permute.xlu0 %13222 }
0x2729   :  { %v13225_v0 = vunpack.i.h.bf16 %v13223_v42  ;;  %v13224_v60 = vunpack.i.l.bf16 %v13223_v42 }
0x272a   :  { %11952 = vmatprep.mubr.msk.f32.mxu1 %vm485_vm0, %v6303_v21 }
0x272b   :  { %v13504_v32 = vpop.eup %13503  ;;  %v15483_v9 = vpack.c.bf16 %v13225_v0, %v13224_v60 }
0x272c   :  { %v6304_v18 = vmul.f32 %v13504_v32, %v13500_v15  ;;  %v13218_v58 = vpop.permute.xlu1 %13217  ;;  %v6769_v30 = vpop.permute.xlu0 %6768 }
0x272d   :  { %v13220_v4 = vunpack.i.h.bf16 %v13218_v58  ;;  %v13219_v55 = vunpack.i.l.bf16 %v13218_v58 }
0x272e   :  { %11953 = vmatmul.mubr.msk.f32.vlgmr.msra.gmra.mrb[66].mxu1 %vm485_vm0, %v6304_v18 }
0x272f   :  { %12663 = vmatpush3.bf16.xpose.msk.msra.mxu1 %vm14480_vm2, %v15459_v11  ;;  %11963 = vmatprep.mubr.msk.f32.mxu1 %vm702_vm1, %v6387_v57  ;;  %v15475_v37 = vpack.c.bf16 %v13220_v4, %v13219_v55 }
0x2730   :  { %12666 = vmatprep.subr.msk.bf16.mxu1 %vm14480_vm2, %v15465_v35  ;;  %v6767_v63 = vpop.permute.xlu1 %6766 }
0x2737   :  { %12669 = vmatpush3.bf16.xpose.msk.msra.mxu1 %vm14480_vm2, %v15465_v35 }
0x2738   :  { %12680 = vmatprep.subr.msk.bf16.mxu1 %vm14480_vm2, %v15475_v37 }
0x273e   :  { %11964 = vmatmul.mubr.msk.f32.vlgmr.msra.gmra.mrb[68].mxu1 %vm702_vm1, %v6389_v34 }
0x273f   :  { %12683 = vmatpush3.bf16.xpose.msk.msra.mxu1 %vm14480_vm2, %v15475_v37  ;;  %11995 = vmatprep.mubr.msk.f32.mxu1 %vm702_vm1, %v6767_v63 }
0x2740   :  { %12686 = vmatprep.subr.msk.bf16.mxu1 %vm14480_vm2, %v15483_v9 }
0x2747   :  { %12689 = vmatpush3.bf16.xpose.msk.msra.mxu1 %vm14480_vm2, %v15483_v9 }
0x274e   :  { %11996 = vmatmul.mubr.msk.f32.vlgmr.msra.gmra.mrb[70].mxu1 %vm702_vm1, %v6769_v30 }
0x2801   :  { %v15497_v1 = vpop.f32.mrb[66].mxu1 }
0x2802   :  { %v15499_v48 = vpop.f32.mrb[67].mxu1 }
0x2811   :  { %v11965_v51 = vpop.f32.mrb[68].mxu1 }
0x2812   :  { %v6482_v33 = vadd.f32 %v11965_v51, %v15435_v2  ;;  %v6476_v59 = vpop.f32.mrb[69].mxu1 }
0x2813   :  { %v6477_v62 = vadd.f32 %v6476_v59, %v15432_v20 }
0x2814   :  { %v6488_v28 = vsel %vm485_vm0, %v6482_v33, -inf }
0x2815   :  { %6489 = vmax.xlane.f32.xlu0 %v6488_v28  ;;  %v6485_v3 = vsel %vm485_vm0, %v6477_v62, -inf }
0x2816   :  { %6486 = vmax.xlane.f32.xlu1 %v6485_v3 }
0x2821   :  { %v11997_v12 = vpop.f32.mrb[70].mxu1 }
0x2822   :  { %v6856_v8 = vpop.f32.mrb[71].mxu1  ;;  %v6862_v40 = vadd.f32 %v11997_v12, %v15435_v2 }
0x2823   :  { %v6857_v5 = vadd.f32 %v6856_v8, %v15432_v20 }
0x2825   :  { %v6865_v43 = vsel %vm485_vm0, %v6857_v5, -inf }
0x28a2   :  { %v6490_v14 = vpop.xlane.xlu0 %6489 }
0x28a3   :  { %v6492_v23 = vsub.f32 %v6482_v33, %v6490_v14  ;;  %v6487_v7 = vpop.xlane.xlu1 %6486 }
0x28a4   :  { %v6491_v56 = vsub.f32 %v6477_v62, %v6487_v7 }
0x28a5   :  { %v6495_v13 = vmul.f32 1.442695, %v6492_v23 }
0x28a6   :  { %v6493_v15 = vmul.f32 1.442695, %v6491_v56 }
0x28a7   :  { %13505 = vpow2.f32 %v6495_v13 }
0x28a8   :  { %13507 = vpow2.f32 %v6493_v15 }
0x28b1   :  { %v13506_v16 = vpop.eup %13505 }
0x28b2   :  { %v13508_v19 = vpop.eup %13507  ;;  %v6500_v27 = vsel %vm485_vm0, %v13506_v16, 0.0 }
0x28b3   :  { %6501 = vadd.xlane.f32.xlu1 %v6500_v27  ;;  %v6497_v49 = vsel %vm485_vm0, %v13508_v19, 0.0  ;;  %v432_v27 = vld [vmem:[%s16097_s23] sm:$0xff] }
0x28b4   :  { %6498 = vadd.xlane.f32.xlu0 %v6497_v49 }
0x28c4   :  { %13232 = vrot.lane.b32.xlu1 %v15319_v61, %s14111_s25 }
0x28c8   :  { %13237 = vrot.lane.b32.xlu1 %v15307_v50, %s14115_s0  ;;  %v6868_v50 = vsel %vm485_vm0, %v6862_v40, -inf }
0x28ca   :  { %13227 = vrot.lane.b32.xlu0 %v15315_v38, %s14111_s25 }
0x28cc   :  { %7063 = vrot.lane.b32.xlu1 %v15423_v46, %s14115_s0 }
0x28ce   :  { %13242 = vrot.lane.b32.xlu0 %v15311_v45, %s14115_s0 }
0x28d2   :  { %7065 = vrot.lane.b32.xlu0 %v15425_v24, %s14115_s0 }
0x28f0   :  { %6866 = vmax.xlane.f32.xlu1 %v6865_v43 }
0x28f1   :  { %6869 = vmax.xlane.f32.xlu0 %v6868_v50 }
0x2940   :  { %v6502_v54 = vpop.xlane.xlu1 %6501 }
0x2941   :  { %v6499_v21 = vpop.xlane.xlu0 %6498 }
0x2942   :  { %13509 = vrcp.f32 %v6499_v21 }
0x2943   :  { %13511 = vrcp.f32 %v6502_v54 }
0x2944   :  { %v13233_v46 = vpop.permute.xlu1 %13232 }
0x2945   :  { %v13228_v57 = vpop.permute.xlu0 %13227  ;;  %v13235_v45 = vunpack.i.h.bf16 %v13233_v46  ;;  %v13234_v31 = vunpack.i.l.bf16 %v13233_v46 }
0x2946   :  { %v13230_v53 = vunpack.i.h.bf16 %v13228_v57  ;;  %v13229_v24 = vunpack.i.l.bf16 %v13228_v57 }
0x2947   :  { %v15525_v55 = vpack.c.bf16 %v13235_v45, %v13234_v31 }
0x2948   :  { %v15523_v32 = vpack.c.bf16 %v13230_v53, %v13229_v24  ;;  %v13238_v18 = vpop.permute.xlu1 %13237 }
0x2949   :  { %v13240_v58 = vunpack.i.h.bf16 %v13238_v18  ;;  %v13239_v34 = vunpack.i.l.bf16 %v13238_v18  ;;  %v13243_v4 = vpop.permute.xlu0 %13242 }
0x294a   :  { %v13245_v42 = vunpack.i.h.bf16 %v13243_v4  ;;  %v13244_v0 = vunpack.i.l.bf16 %v13243_v4  ;;  %12671 = vmatprep.subr.bf16.mxu0 %v15523_v32 }
0x294b   :  { %v15528_v60 = vpack.c.bf16 %v13240_v58, %v13239_v34  ;;  %12673 = vmatpush3.bf16.msra.mxu0 %v15523_v32 }
0x294c   :  { %v13510_v63 = vpop.eup %13509  ;;  %v15531_v30 = vpack.c.bf16 %v13245_v42, %v13244_v0  ;;  %v7064_v51 = vpop.permute.xlu1 %7063  ;;  %12675 = vmatprep.subr.bf16.mxu0 %v15525_v55 }
0x294d   :  { %v13512_v33 = vpop.eup %13511  ;;  %12700 = vmatprep.subr.msk.bf16.mxu1 %vm14480_vm2, %v15528_v60  ;;  %12022 = vmatprep.mubr.msk.f32.mxu1 %vm702_vm1, %v7064_v51  ;;  %v6505_v59 = vmul.f32 %v13510_v63, %v13508_v19  ;;  %v7066_v28 = vpop.permute.xlu0 %7065  ;;  %v433_v19 = vld [vmem:[%s16097_s23 + $0x8] sm:$0xff] }
0x294e   :  { %12703 = vmatpush3.bf16.xpose.msk.msra.mxu1 %vm14480_vm2, %v15528_v60  ;;  %v6506_v62 = vmul.f32 %v13512_v33, %v13506_v16 }
0x294f   :  { %12677 = vmatpush3.bf16.msra.mxu0 %v15525_v55  ;;  %11974 = vmatprep.mubr.msk.f32.mxu0 %vm485_vm0, %v6505_v59 }
0x2950   :  { %12706 = vmatprep.subr.msk.bf16.mxu1 %vm14480_vm2, %v15531_v30  ;;  %11977 = vmatprep.subr.mxu0 %v433_v19 }
0x2952   :  { %11975 = vmatmul.mubr.msk.f32.vlgmr.msra.gmra.mrb[72].mxu0 %vm485_vm0, %v6506_v62 }
0x2953   :  { %11978 = vmatpush3.msra.mxu0 %v433_v19 }
0x2954   :  { %11982 = vmatprep.subr.mxu0 %v432_v27 }
0x2956   :  { %12709 = vmatpush3.bf16.xpose.msk.msra.mxu1 %vm14480_vm2, %v15531_v30 }
0x295d   :  { %12023 = vmatmul.mubr.msk.f32.vlgmr.msra.gmra.mrb[72].mxu1 %vm702_vm1, %v7066_v28 }
0x297d   :  { %v6867_v3 = vpop.xlane.xlu1 %6866 }
0x297e   :  { %v6871_v12 = vsub.f32 %v6857_v5, %v6867_v3  ;;  %v6870_v8 = vpop.xlane.xlu0 %6869 }
0x297f   :  { %v6872_v14 = vsub.f32 %v6862_v40, %v6870_v8 }
0x2980   :  { %v6873_v23 = vmul.f32 1.442695, %v6871_v12 }
0x2981   :  { %v6875_v7 = vmul.f32 1.442695, %v6872_v14 }
0x2982   :  { %13513 = vpow2.f32 %v6873_v23 }
0x2983   :  { %13515 = vpow2.f32 %v6875_v7 }
0x298c   :  { %v13514_v56 = vpop.eup %13513 }
0x298d   :  { %v13516_v13 = vpop.eup %13515  ;;  %v6877_v15 = vsel %vm485_vm0, %v13514_v56, 0.0 }
0x298e   :  { %6878 = vadd.xlane.f32.xlu0 %v6877_v15  ;;  %v6880_v16 = vsel %vm485_vm0, %v13516_v13, 0.0 }
0x298f   :  { %6881 = vadd.xlane.f32.xlu1 %v6880_v16 }
0x29a0   :  { %13252 = vrot.lane.b32.xlu1 %v15319_v61, %s14113_s17 }
0x29a4   :  { %13247 = vrot.lane.b32.xlu0 %v15315_v38, %s14113_s17 }
0x2a1b   :  { %v6879_v49 = vpop.xlane.xlu0 %6878 }
0x2a1c   :  { %13517 = vrcp.f32 %v6879_v49  ;;  %v6882_v40 = vpop.xlane.xlu1 %6881 }
0x2a1d   :  { %13519 = vrcp.f32 %v6882_v40 }
0x2a1f   :  { %v13248_v5 = vpop.permute.xlu0 %13247 }
0x2a20   :  { %v13250_v43 = vunpack.i.h.bf16 %v13248_v5  ;;  %v13249_v50 = vunpack.i.l.bf16 %v13248_v5  ;;  %v13253_v57 = vpop.permute.xlu1 %13252 }
0x2a21   :  { %v13255_v31 = vunpack.i.h.bf16 %v13253_v57  ;;  %v13254_v53 = vunpack.i.l.bf16 %v13253_v57 }
0x2a22   :  { %v15560_v46 = vpack.c.bf16 %v13250_v43, %v13249_v50 }
0x2a23   :  { %v15566_v18 = vpack.c.bf16 %v13255_v31, %v13254_v53  ;;  %v10753_v31 = vld [vmem:[#allocation16] ss:$0 sm:$0xff] }
0x2a25   :  { %v11976_v54 = vpop.f32.mrb[72].mxu0 }
0x2a26   :  { %v6595_v21 = vpop.f32.mrb[73].mxu0  ;;  %v13518_v45 = vpop.eup %13517 }
0x2a27   :  { %11979 = vmatprep.mubr.msk.f32.mxu0 %vm702_vm1, %v6595_v21  ;;  %v6885_v24 = vmul.f32 %v13518_v45, %v13514_v56  ;;  %v13520_v42 = vpop.eup %13519 }
0x2a28   :  { %11980 = vmatmul.mubr.msk.f32.vlgmr.msra.gmra.mrb[74].mxu0 %vm702_vm1, %v11976_v54  ;;  %v435_v54 = vld [vmem:[%s16097_s23 + $0x18] sm:$0xff] }
0x2a29   :  { %11983 = vmatpush3.msra.mxu0 %v432_v27  ;;  %11984 = vmatprep.mubr.msk.f32.mxu0 %vm702_vm1, %v15499_v48 }
0x2a2a   :  { %12691 = vmatprep.subr.bf16.mxu0 %v15560_v46 }
0x2a30   :  { %11985 = vmatmul.mubr.msk.f32.vlgmr.msra.gmra.mrb[74].mxu0 %vm702_vm1, %v15497_v1  ;;  %v12024_v58 = vpop.f32.mrb[72].mxu1  ;;  %v6886_v1 = vmul.f32 %v13520_v42, %v13516_v13 }
0x2a31   :  { %12693 = vmatpush3.bf16.msra.mxu0 %v15560_v46  ;;  %v7159_v34 = vadd.f32 %v12024_v58, %v15435_v2  ;;  %12006 = vmatprep.mubr.msk.f32.mxu0 %vm485_vm0, %v6885_v24  ;;  %v7153_v48 = vpop.f32.mrb[73].mxu1  ;;  %v434_v2 = vld [vmem:[%s16097_s23 + $0x10] sm:$0xff] }
0x2a32   :  { %12695 = vmatprep.subr.bf16.mxu0 %v15566_v18  ;;  %v7154_v4 = vadd.f32 %v7153_v48, %v15432_v20 }
0x2a33   :  { %v7165_v0 = vsel %vm485_vm0, %v7159_v34, -inf }
0x2a34   :  { %7166 = vmax.xlane.f32.xlu0 %v7165_v0  ;;  %v7162_v63 = vsel %vm485_vm0, %v7154_v4, -inf }
0x2a35   :  { %12697 = vmatpush3.bf16.msra.mxu0 %v15566_v18  ;;  %7163 = vmax.xlane.f32.xlu1 %v7162_v63 }
0x2a36   :  { %12009 = vmatprep.subr.mxu0 %v434_v2 }
0x2a38   :  { %12007 = vmatmul.mubr.msk.f32.vlgmr.msra.gmra.mrb[76].mxu0 %vm485_vm0, %v6886_v1 }
0x2a39   :  { %12010 = vmatpush3.msra.mxu0 %v434_v2 }
0x2ac1   :  { %v7167_v51 = vpop.xlane.xlu0 %7166 }
0x2ac2   :  { %v7169_v33 = vsub.f32 %v7159_v34, %v7167_v51  ;;  %v7164_v59 = vpop.xlane.xlu1 %7163 }
0x2ac3   :  { %v7168_v62 = vsub.f32 %v7154_v4, %v7164_v59 }
0x2ac4   :  { %v7172_v20 = vmul.f32 1.442695, %v7169_v33 }
0x2ac5   :  { %v7170_v28 = vmul.f32 1.442695, %v7168_v62 }
0x2ac6   :  { %13521 = vpow2.f32 %v7172_v20 }
0x2ac7   :  { %13523 = vpow2.f32 %v7170_v28  ;;  %v439_v28 = vld [vmem:[%s16098_s26] sm:$0xff] }
0x2ad0   :  { %v13522_v3 = vpop.eup %13521 }
0x2ad1   :  { %v13524_v12 = vpop.eup %13523  ;;  %v7177_v8 = vsel %vm485_vm0, %v13522_v3, 0.0 }
0x2ad2   :  { %7178 = vadd.xlane.f32.xlu1 %v7177_v8  ;;  %v7174_v14 = vsel %vm485_vm0, %v13524_v12, 0.0  ;;  %v441_v8 = vld [vmem:[%s16098_s26 + $0x10] sm:$0xff] }
0x2ad3   :  { %7175 = vadd.xlane.f32.xlu0 %v7174_v14  ;;  %v442_v14 = vld [vmem:[%s16098_s26 + $0x18] sm:$0xff] }
0x2ae3   :  { %13262 = vrot.lane.b32.xlu1 %v15319_v61, %s14115_s0 }
0x2ae9   :  { %13257 = vrot.lane.b32.xlu0 %v15315_v38, %s14115_s0 }
0x2b0b   :  { %v12008_v23 = vpop.f32.mrb[76].mxu0 }
0x2b0c   :  { %v6971_v7 = vpop.f32.mrb[77].mxu0 }
0x2b0d   :  { %12011 = vmatprep.mubr.msk.f32.mxu0 %vm702_vm1, %v6971_v7  ;;  %v444_v7 = vld [vmem:[%s16099_s1] sm:$0xff] }
0x2b0e   :  { %12012 = vmatmul.mubr.msk.f32.vlgmr.msra.gmra.mrb[74].mxu0 %vm702_vm1, %v12008_v23  ;;  %v15614_v23 = vpack.c.bf16 %v442_v14, %v441_v8 }
0x2b5f   :  { %v7179_v56 = vpop.xlane.xlu1 %7178 }
0x2b60   :  { %v7176_v13 = vpop.xlane.xlu0 %7175 }
0x2b61   :  { %13525 = vrcp.f32 %v7176_v13  ;;  %v446_v13 = vld [vmem:[%s16099_s1 + $0x10] sm:$0xff] }
0x2b62   :  { %13527 = vrcp.f32 %v7179_v56  ;;  %v445_v56 = vld [vmem:[%s16099_s1 + $0x8] sm:$0xff] }
0x2b63   :  { %v13263_v15 = vpop.permute.xlu1 %13262 }
0x2b64   :  { %v13258_v16 = vpop.permute.xlu0 %13257  ;;  %v13265_v19 = vunpack.i.h.bf16 %v13263_v15  ;;  %v13264_v27 = vunpack.i.l.bf16 %v13263_v15  ;;  %v15623_v15 = vpack.c.bf16 %v445_v56, %v444_v7 }
0x2b65   :  { %v13260_v49 = vunpack.i.h.bf16 %v13258_v16  ;;  %v13259_v61 = vunpack.i.l.bf16 %v13258_v16  ;;  %v447_v16 = vld [vmem:[%s16099_s1 + $0x18] sm:$0xff] }
0x2b66   :  { %v15590_v38 = vpack.c.bf16 %v13265_v19, %v13264_v27  ;;  %v15626_v19 = vpack.c.bf16 %v447_v16, %v446_v13  ;;  %v448_v27 = vld [vmem:[%s16099_s1 + $0x20] sm:$0xff]  ;;  %12727 = vmatprep.subr.bf16.mxu1 %v15623_v15 }
0x2b67   :  { %v15588_v5 = vpack.c.bf16 %v13260_v49, %v13259_v61  ;;  %v449_v49 = vld [vmem:[%s16099_s1 + $0x28] sm:$0xff]  ;;  %12729 = vmatpush3.bf16.msra.mxu1 %v15623_v15 }
0x2b68   :  { %12731 = vmatprep.subr.bf16.mxu1 %v15626_v19  ;;  %v15633_v61 = vpack.c.bf16 %v449_v49, %v448_v27 }
0x2b69   :  { %12711 = vmatprep.subr.bf16.mxu0 %v15588_v5 }
0x2b6a   :  { %12713 = vmatpush3.bf16.msra.mxu0 %v15588_v5 }
0x2b6b   :  { %v13526_v40 = vpop.eup %13525  ;;  %12715 = vmatprep.subr.bf16.mxu0 %v15590_v38  ;;  %12733 = vmatpush3.bf16.msra.mxu1 %v15626_v19 }
0x2b6c   :  { %v13528_v43 = vpop.eup %13527  ;;  %v7182_v50 = vmul.f32 %v13526_v40, %v13524_v12  ;;  %12735 = vmatprep.subr.bf16.mxu1 %v15633_v61 }
0x2b6d   :  { %v7183_v21 = vmul.f32 %v13528_v43, %v13522_v3  ;;  %v440_v3 = vld [vmem:[%s16098_s26 + $0x8] sm:$0xff] }
0x2b6e   :  { %12717 = vmatpush3.bf16.msra.mxu0 %v15590_v38  ;;  %12033 = vmatprep.mubr.msk.f32.mxu0 %vm485_vm0, %v7182_v50  ;;  %v15609_v12 = vpack.c.bf16 %v440_v3, %v439_v28 }
0x2b6f   :  { %12036 = vmatprep.subr.mxu0 %v435_v54  ;;  %12737 = vmatpush3.bf16.msra.mxu1 %v15633_v61 }
0x2b71   :  { %12034 = vmatmul.mubr.msk.f32.vlgmr.msra.gmra.mrb[78].mxu0 %vm485_vm0, %v7183_v21 }
0x2b72   :  { %12037 = vmatpush3.msra.mxu0 %v435_v54 }
0x2b73   :  { %12719 = vmatprep.subr.bf16.mxu0 %v15609_v12 }
0x2c44   :  { %v12035_v57 = vpop.f32.mrb[78].mxu0 }
0x2c45   :  { %v7268_v45 = vpop.f32.mrb[79].mxu0 }
0x2c46   :  { %12038 = vmatprep.mubr.msk.f32.mxu0 %vm702_vm1, %v7268_v45 }
0x2c47   :  { %12039 = vmatmul.mubr.msk.f32.vlgmr.msra.gmra.mrb[74].mxu0 %vm702_vm1, %v12035_v57 }
0x2c48   :  { %12721 = vmatpush3.bf16.msra.mxu0 %v15609_v12 }
0x2c49   :  { %12723 = vmatprep.subr.bf16.mxu0 %v15614_v23 }
0x2c4c   :  { %12725 = vmatpush3.bf16.msra.mxu0 %v15614_v23 }
0x2c4d   :  { %12743 = vmatprep.subr.bf16.mxu0 %v15159_v22 }
0x2d1a   :  { %v12040_v53 = vpop.f32.mrb[74].mxu0 }
0x2d1b   :  { %v7367_v24 = vadd.f32 %v12040_v53, %v10753_v31  ;;  %v7349_v58 = vpop.f32.mrb[75].mxu0 }
0x2d1c   :  { %v7366_v34 = vadd.f32 %v10753_v31, %v7349_v58  ;;  %v10754_v31 = vld [vmem:[#allocation17] ss:$0 sm:$0xff] }
0x2d1d   :  { %v7369_v48 = vadd.f32 %v7367_v24, %v15415_v44 }
0x2d1e   :  { %v7368_v4 = vadd.f32 %v7366_v34, %v15410_v17  ;;  %v10755_v34 = vld [vmem:[#allocation19] ss:$0 sm:$0xff] }
0x2d1f   :  { %v7373_v42 = vsel %vm485_vm0, %v7369_v48, 0.0 }
0x2d20   :  { %7374 = vadd.xlane.f32.xlu0 %v7373_v42  ;;  %v7370_v0 = vsel %vm485_vm0, %v7368_v4, 0.0 }
0x2d21   :  { %7371 = vadd.xlane.f32.xlu1 %v7370_v0 }
0x2dad   :  { %v7375_v63 = vpop.xlane.xlu0 %7374 }
0x2dae   :  { %v7377_v1 = vmul.f32 0.03125, %v7375_v63  ;;  %v7372_v2 = vpop.xlane.xlu1 %7371  ;;  %v450_v63 = vld [vmem:[%s16099_s1 + $0x30] sm:$0xff] }
0x2daf   :  { %v7376_v51 = vmul.f32 0.03125, %v7372_v2 }
0x2db0   :  { %v7379_v33 = vsub.f32 %v7369_v48, %v7377_v1  ;;  %v451_v1 = vld [vmem:[%s16099_s1 + $0x38] sm:$0xff] }
0x2db1   :  { %v7378_v59 = vsub.f32 %v7368_v4, %v7376_v51  ;;  %v15646_v2 = vpack.c.bf16 %v451_v1, %v450_v63  ;;  %v10756_v51 = vld [vmem:[#allocation20] ss:$0 sm:$0xff]  ;;  %v10763_v1 = vld [vmem:[#allocation25] ss:$0 sm:$0xff] }
0x2db2   :  { %v7381_v62 = vmul.f32 %v7379_v33, %v7379_v33 }
0x2db3   :  { %v7380_v44 = vmul.f32 %v7378_v59, %v7378_v59  ;;  %12739 = vmatprep.subr.bf16.mxu1 %v15646_v2 }
0x2db4   :  { %v7385_v17 = vsel %vm485_vm0, %v7381_v62, 0.0  ;;  %12741 = vmatpush3.bf16.msra.mxu1 %v15646_v2 }
0x2db5   :  { %7386 = vadd.xlane.f32.xlu1 %v7385_v17  ;;  %v7382_v20 = vsel %vm485_vm0, %v7380_v44, 0.0 }
0x2db6   :  { %7383 = vadd.xlane.f32.xlu0 %v7382_v20 }
0x2e42   :  { %v7387_v40 = vpop.xlane.xlu1 %7386 }
0x2e43   :  { %v7389_v43 = vmul.f32 0.03125, %v7387_v40  ;;  %v7384_v50 = vpop.xlane.xlu0 %7383 }
0x2e44   :  { %v7388_v54 = vmul.f32 0.03125, %v7384_v50 }
0x2e45   :  { %v7391_v21 = vadd.f32 1e-05, %v7389_v43 }
0x2e46   :  { %v7390_v57 = vadd.f32 1e-05, %v7388_v54 }
0x2e47   :  { %13529 = vrsqrt.f32 %v7391_v21 }
0x2e48   :  { %13531 = vrsqrt.f32 %v7390_v57 }
0x2e51   :  { %v13530_v45 = vpop.eup %13529 }
0x2e52   :  { %v13532_v53 = vpop.eup %13531  ;;  %v7395_v24 = vmul.f32 %v13530_v45, %v7379_v33 }
0x2e53   :  { %v7394_v58 = vmul.f32 %v13532_v53, %v7378_v59 }
0x2e54   :  { %v7403_v48 = vmul.f32 %v10754_v31, %v7395_v24 }
0x2e55   :  { %v7402_v4 = vmul.f32 %v10754_v31, %v7394_v58 }
0x2e56   :  { %v7411_v0 = vadd.f32 %v10755_v34, %v7403_v48 }
0x2e57   :  { %v7410_v42 = vadd.f32 %v10755_v34, %v7402_v4 }
0x2e59   :  { %12049 = vmatprep.mubr.msk.f32.mxu0 %vm485_vm0, %v7410_v42 }
0x2e5a   :  { %12050 = vmatmul.mubr.msk.f32.vlgmr.msra.gmra.mrb[80].mxu0 %vm485_vm0, %v7411_v0 }
0x2e5b   :  { %12745 = vmatpush3.bf16.msra.mxu0 %v15159_v22 }
0x2e5c   :  { %12747 = vmatprep.subr.bf16.mxu0 %v15165_v36 }
0x2e5f   :  { %12749 = vmatpush3.bf16.msra.mxu0 %v15165_v36  ;;  %v10759_v36 = vld [vmem:[#allocation22] ss:$0 sm:$0xff] }
0x2e60   :  { %12751 = vmatprep.subr.bf16.mxu0 %v15267_v25 }
0x2f2d   :  { %v12051_v33 = vpop.f32.mrb[80].mxu0 }
0x2f2e   :  { %v7496_v59 = vadd.f32 %v12051_v33, %v10756_v51  ;;  %v7490_v62 = vpop.f32.mrb[81].mxu0 }
0x2f2f   :  { %v7491_v44 = vadd.f32 %v10756_v51, %v7490_v62 }
0x2f30   :  { %v7500_v17 = vmax.f32 %v7496_v59, 0.0 }
0x2f31   :  { %v7499_v22 = vmax.f32 %v7491_v44, 0.0 }
0x2f33   :  { %12068 = vmatprep.mubr.msk.f32.mxu1 %vm2359_vm3, %v7499_v22  ;;  %v15661_v22 = vld [vmem:[%s16089_s24] sm:$0xff] }
0x2f34   :  { %12069 = vmatmul.mubr.msk.f32.vlgmr.msra.gmra.mrb[74].mxu1 %vm2359_vm3, %v7500_v17 }
0x3007   :  { %v12070_v20 = vpop.f32.mrb[74].mxu1 }
0x3008   :  { %v7585_v28 = vadd.f32 %v12070_v20, %v10759_v36  ;;  %v7579_v3 = vpop.f32.mrb[75].mxu1 }
0x3009   :  { %v7580_v8 = vadd.f32 %v10759_v36, %v7579_v3  ;;  %v15666_v36 = vld [vmem:[%s16089_s24 + $0x8] sm:$0xff]  ;;  %v13652_v3 = vld [vmem:[#allocation2] ss:$0 sm:$0xff] }
0x300a   :  { %v7589_v14 = vadd.f32 %v7585_v28, %v7411_v0 }
0x300b   :  { %v7588_v7 = vadd.f32 %v7580_v8, %v7410_v42  ;;  %v10762_v42 = vld [vmem:[#allocation23] ss:$0 sm:$0xff] }
0x300c   :  { %v7593_v56 = vsel %vm485_vm0, %v7589_v14, 0.0 }
0x300d   :  { %7594 = vadd.xlane.f32.xlu1 %v7593_v56  ;;  %v7590_v13 = vsel %vm485_vm0, %v7588_v7, 0.0 }
0x300e   :  { %7591 = vadd.xlane.f32.xlu0 %v7590_v13 }
0x309a   :  { %v7595_v16 = vpop.xlane.xlu1 %7594 }
0x309b   :  { %v7597_v27 = vmul.f32 0.03125, %v7595_v16  ;;  %v7592_v49 = vpop.xlane.xlu0 %7591  ;;  %v13653_v16 = vld [vmem:[#allocation5] ss:$0 sm:$0xff] }
0x309c   :  { %v7596_v40 = vmul.f32 0.03125, %v7592_v49 }
0x309d   :  { %v7599_v43 = vsub.f32 %v7589_v14, %v7597_v27 }
0x309e   :  { %v7598_v50 = vsub.f32 %v7588_v7, %v7596_v40 }
0x309f   :  { %v7601_v54 = vmul.f32 %v7599_v43, %v7599_v43 }
0x30a0   :  { %v7600_v21 = vmul.f32 %v7598_v50, %v7598_v50 }
0x30a1   :  { %v7605_v57 = vsel %vm485_vm0, %v7601_v54, 0.0 }
0x30a2   :  { %7606 = vadd.xlane.f32.xlu1 %v7605_v57  ;;  %v7602_v45 = vsel %vm485_vm0, %v7600_v21, 0.0 }
0x30a3   :  { %7603 = vadd.xlane.f32.xlu0 %v7602_v45 }
0x312f   :  { %v7607_v31 = vpop.xlane.xlu1 %7606 }
0x3130   :  { %v7609_v53 = vmul.f32 0.03125, %v7607_v31  ;;  %v7604_v24 = vpop.xlane.xlu0 %7603 }
0x3131   :  { %v7608_v58 = vmul.f32 0.03125, %v7604_v24 }
0x3132   :  { %v7611_v34 = vadd.f32 1e-05, %v7609_v53 }
0x3133   :  { %v7610_v48 = vadd.f32 1e-05, %v7608_v58 }
0x3134   :  { %13533 = vrsqrt.f32 %v7611_v34 }
0x3135   :  { %13535 = vrsqrt.f32 %v7610_v48 }
0x313e   :  { %v13534_v4 = vpop.eup %13533 }
0x313f   :  { %v13536_v0 = vpop.eup %13535  ;;  %v7615_v63 = vmul.f32 %v13534_v4, %v7599_v43 }
0x3140   :  { %v7614_v51 = vmul.f32 %v13536_v0, %v7598_v50 }
0x3141   :  { %v7623_v33 = vmul.f32 %v10762_v42, %v7615_v63 }
0x3142   :  { %v7622_v59 = vmul.f32 %v10762_v42, %v7614_v51 }
0x3143   :  { %v15656_v62 = vadd.f32 %v10763_v1, %v7623_v33 }
0x3144   :  { %v15658_v44 = vadd.f32 %v10763_v1, %v7622_v59  ;;  %v15722_v59 = vld [vmem:[%s16093_s9 + $0x8] sm:$0xff] }
0x3145   :  { %v7677_v20 = vadd.f32 %v15666_v36, %v15656_v62 }
0x3146   :  { %v7676_v17 = vadd.f32 %v15661_v22, %v15658_v44 }
0x3148   :  { %12079 = vmatprep.mubr.msk.f32.mxu0 %vm485_vm0, %v7676_v17 }
0x3149   :  { %12080 = vmatmul.mubr.msk.f32.vlgmr.msra.gmra.mrb[82].mxu0 %vm485_vm0, %v7677_v20 }
0x314a   :  { %12753 = vmatpush3.bf16.msra.mxu0 %v15267_v25  ;;  %12090 = vmatprep.mubr.msk.f32.mxu0 %vm485_vm0, %v15658_v44 }
0x314b   :  { %12755 = vmatprep.subr.bf16.mxu0 %v15275_v52 }
0x314e   :  { %12757 = vmatpush3.bf16.msra.mxu0 %v15275_v52 }
0x3151   :  { %12091 = vmatmul.mubr.msk.f32.vlgmr.msra.gmra.mrb[84].mxu0 %vm485_vm0, %v15656_v62 }
0x321c   :  { %v12081_v28 = vpop.f32.mrb[82].mxu0 }
0x321d   :  { %v7756_v8 = vadd.f32 %v13652_v3, %v12081_v28  ;;  %v7750_v14 = vpop.f32.mrb[83].mxu0  ;;  %v15726_v28 = vld [vmem:[%s16093_s9] sm:$0xff] }
0x321e   :  { %v7751_v7 = vadd.f32 %v13652_v3, %v7750_v14 }
0x321f   :  { %v15689_v52 = vmul.f32 0.35355338, %v7756_v8 }
0x3220   :  { %v15679_v56 = vpack.i.bf16 %v7756_v8, %v7751_v7  ;;  %v15681_v13 = vmul.f32 0.35355338, %v7751_v7 }
0x3222   :  { %13272 = vrot.lane.b32.xlu1 %v15679_v56, %s14110_s6  ;;  %13267 = vrot.lane.b32.xlu0 %v15679_v56, %s14109_s22 }
0x3223   :  { %12097 = vmatprep.mubr.msk.f32.mxu1 %vm702_vm1, %v15681_v13 }
0x3224   :  { %v12092_v25 = vpop.f32.mrb[84].mxu0 }
0x3225   :  { %v7837_v27 = vadd.f32 %v13653_v16, %v12092_v25  ;;  %v7831_v49 = vpop.f32.mrb[85].mxu0 }
0x3226   :  { %v7832_v40 = vadd.f32 %v13653_v16, %v7831_v49  ;;  %8038 = vrot.lane.b32.xlu0 %v15689_v52, %s14111_s25  ;;  %8036 = vrot.lane.b32.xlu1 %v15681_v13, %s14111_s25 }
0x3228   :  { %v12764_v43 = vpack.c.bf16 %v7837_v27, %v7832_v40  ;;  %v15695_v50 = vpack.i.bf16 %v7837_v27, %v7832_v40 }
0x322a   :  { %12765 = vmatprep.subr.bf16.mxu0 %v12764_v43  ;;  %8400 = vrot.lane.b32.xlu0 %v15681_v13, %s14113_s17 }
0x322b   :  { %12767 = vmatpush3.bf16.msra.mxu0 %v12764_v43  ;;  %13277 = vrot.lane.b32.xlu1 %v15679_v56, %s14112_s28 }
0x322f   :  { %8402 = vrot.lane.b32.xlu1 %v15689_v52, %s14113_s17 }
0x3294   :  { %v13273_v54 = vpop.permute.xlu1 %13272  ;;  %v13268_v21 = vpop.permute.xlu0 %13267 }
0x3295   :  { %v13275_v57 = vunpack.i.h.bf16 %v13273_v54  ;;  %v13274_v45 = vunpack.i.l.bf16 %v13273_v54  ;;  %v13270_v31 = vunpack.i.h.bf16 %v13268_v21  ;;  %v13269_v53 = vunpack.i.l.bf16 %v13268_v21 }
0x3297   :  { %v12758_v24 = vpack.c.bf16 %v13270_v31, %v13269_v53  ;;  %v12768_v34 = vpack.c.bf16 %v13275_v57, %v13274_v45 }
0x3298   :  { %v8037_v58 = vpop.permute.xlu1 %8036  ;;  %v8039_v63 = vpop.permute.xlu0 %8038 }
0x3299   :  { %12760 = vmatprep.subr.msk.bf16.mxu1 %vm14480_vm2, %v12758_v24 }
0x329a   :  { %12763 = vmatpush3.bf16.xpose.msk.msra.mxu1 %vm14480_vm2, %v12758_v24 }
0x329b   :  { %12770 = vmatprep.subr.msk.bf16.mxu1 %vm14480_vm2, %v12768_v34 }
0x329c   :  { %v8401_v1 = vpop.permute.xlu0 %8400 }
0x329d   :  { %v13278_v48 = vpop.permute.xlu1 %13277 }
0x329e   :  { %v13280_v4 = vunpack.i.h.bf16 %v13278_v48  ;;  %v13279_v42 = vunpack.i.l.bf16 %v13278_v48 }
0x32a0   :  { %v12778_v0 = vpack.c.bf16 %v13280_v4, %v13279_v42 }
0x32a1   :  { %12098 = vmatmul.mubr.msk.f32.vlgmr.msra.gmra.mrb[76].mxu1 %vm702_vm1, %v15689_v52  ;;  %v8403_v51 = vpop.permute.xlu1 %8402 }
0x32a2   :  { %12773 = vmatpush3.bf16.xpose.msk.msra.mxu1 %vm14480_vm2, %v12768_v34  ;;  %12111 = vmatprep.mubr.msk.f32.mxu1 %vm702_vm1, %v8037_v58 }
0x32a3   :  { %12780 = vmatprep.subr.msk.bf16.mxu1 %vm14480_vm2, %v12778_v0 }
0x32a9   :  { %12112 = vmatmul.mubr.msk.f32.vlgmr.msra.gmra.mrb[78].mxu1 %vm702_vm1, %v8039_v63 }
0x32aa   :  { %12783 = vmatpush3.bf16.xpose.msk.msra.mxu1 %vm14480_vm2, %v12778_v0  ;;  %12135 = vmatprep.mubr.msk.f32.mxu1 %vm702_vm1, %v8401_v1 }
0x32b1   :  { %12136 = vmatmul.mubr.msk.f32.vlgmr.msra.gmra.mrb[80].mxu1 %vm702_vm1, %v8403_v51 }
0x3374   :  { %v12099_v33 = vpop.f32.mrb[76].mxu1 }
0x3375   :  { %v7930_v17 = vadd.f32 %v15722_v59, %v12099_v33  ;;  %v7924_v20 = vpop.f32.mrb[77].mxu1 }
0x3376   :  { %v7925_v3 = vadd.f32 %v15726_v28, %v7924_v20 }
0x3377   :  { %v7936_v8 = vsel %vm5013_vm4, %v7930_v17, -inf }
0x3378   :  { %7937 = vmax.xlane.f32.xlu1 %v7936_v8  ;;  %v7933_v14 = vsel %vm5013_vm4, %v7925_v3, -inf }
0x3379   :  { %7934 = vmax.xlane.f32.xlu0 %v7933_v14 }
0x337c   :  { %v12113_v7 = vpop.f32.mrb[78].mxu1 }
0x337d   :  { %v8118_v25 = vpop.f32.mrb[79].mxu1  ;;  %v8124_v27 = vadd.f32 %v15722_v59, %v12113_v7 }
0x337e   :  { %v8119_v16 = vadd.f32 %v15726_v28, %v8118_v25 }
0x337f   :  { %v8130_v43 = vsel %vm5013_vm4, %v8124_v27, -inf }
0x3380   :  { %v8127_v49 = vsel %vm5013_vm4, %v8119_v16, -inf }
0x3381   :  { %8128 = vmax.xlane.f32.xlu0 %v8127_v49 }
0x3384   :  { %v12137_v40 = vpop.f32.mrb[80].mxu1 }
0x3385   :  { %v8482_v54 = vpop.f32.mrb[81].mxu1  ;;  %8131 = vmax.xlane.f32.xlu0 %v8130_v43  ;;  %v8488_v7 = vadd.f32 %v15722_v59, %v12137_v40 }
0x3386   :  { %v8483_v14 = vadd.f32 %v15726_v28, %v8482_v54 }
0x3388   :  { %v8491_v25 = vsel %vm5013_vm4, %v8483_v14, -inf }
0x3405   :  { %v7938_v21 = vpop.xlane.xlu1 %7937 }
0x3406   :  { %v7940_v57 = vsub.f32 %v7930_v17, %v7938_v21  ;;  %v7935_v45 = vpop.xlane.xlu0 %7934 }
0x3407   :  { %v7939_v31 = vsub.f32 %v7925_v3, %v7935_v45 }
0x3408   :  { %v7943_v53 = vmul.f32 1.442695, %v7940_v57 }
0x3409   :  { %v7941_v24 = vmul.f32 1.442695, %v7939_v31 }
0x340a   :  { %13537 = vpow2.f32 %v7943_v53 }
0x340b   :  { %13539 = vpow2.f32 %v7941_v24 }
0x340e   :  { %v8129_v58 = vpop.xlane.xlu0 %8128 }
0x340f   :  { %v8133_v34 = vsub.f32 %v8119_v16, %v8129_v58  ;;  %v8494_v16 = vsel %vm5013_vm4, %v8488_v7, -inf }
0x3411   :  { %v8135_v48 = vmul.f32 1.442695, %v8133_v34 }
0x3412   :  { %v8132_v4 = vpop.xlane.xlu0 %8131 }
0x3413   :  { %13541 = vpow2.f32 %v8135_v48  ;;  %v8134_v42 = vsub.f32 %v8124_v27, %v8132_v4  ;;  %v13656_v4 = vld [vmem:[%s16095_s18 + $0x8] sm:$0xff] }
0x3414   :  { %v13538_v0 = vpop.eup %13537 }
0x3415   :  { %v13540_v63 = vpop.eup %13539  ;;  %v8137_v1 = vmul.f32 1.442695, %v8134_v42  ;;  %v7948_v51 = vsel %vm5013_vm4, %v13538_v0, 0.0 }
0x3416   :  { %7949 = vadd.xlane.f32.xlu0 %v7948_v51  ;;  %v7945_v33 = vsel %vm5013_vm4, %v13540_v63, 0.0  ;;  %v13657_v51 = vld [vmem:[%s16095_s18] sm:$0xff] }
0x3417   :  { %13543 = vpow2.f32 %v8137_v1  ;;  %7946 = vadd.xlane.f32.xlu1 %v7945_v33 }
0x341d   :  { %v13542_v17 = vpop.eup %13541 }
0x341e   :  { %v8139_v20 = vsel %vm5013_vm4, %v13542_v17, 0.0 }
0x341f   :  { %8140 = vadd.xlane.f32.xlu1 %v8139_v20 }
0x3421   :  { %v13544_v3 = vpop.eup %13543 }
0x3422   :  { %v8142_v8 = vsel %vm5013_vm4, %v13544_v3, 0.0 }
0x3423   :  { %8143 = vadd.xlane.f32.xlu0 %v8142_v8 }
0x3430   :  { %13282 = vrot.lane.b32.xlu1 %v15695_v50, %s14111_s25 }
0x3434   :  { %8683 = vrot.lane.b32.xlu1 %v15681_v13, %s14115_s0 }
0x3438   :  { %8685 = vrot.lane.b32.xlu1 %v15689_v52, %s14115_s0 }
0x3439   :  { %13287 = vrot.lane.b32.xlu0 %v15679_v56, %s14114_s12 }
0x3458   :  { %8492 = vmax.xlane.f32.xlu0 %v8491_v25 }
0x345c   :  { %8495 = vmax.xlane.f32.xlu1 %v8494_v16 }
0x346d   :  { %13292 = vrot.lane.b32.xlu1 %v15695_v50, %s14113_s17 }
0x3471   :  { %13297 = vrot.lane.b32.xlu1 %v15695_v50, %s14115_s0 }
0x34a3   :  { %v7950_v13 = vpop.xlane.xlu0 %7949 }
0x34a4   :  { %13545 = vrcp.f32 %v7950_v13  ;;  %v7947_v52 = vpop.xlane.xlu1 %7946 }
0x34a5   :  { %13547 = vrcp.f32 %v7947_v52 }
0x34ac   :  { %v8141_v56 = vpop.xlane.xlu1 %8140 }
0x34ad   :  { %13549 = vrcp.f32 %v8141_v56 }
0x34ae   :  { %v13546_v27 = vpop.eup %13545 }
0x34af   :  { %v13548_v49 = vpop.eup %13547  ;;  %v7954_v21 = vmul.f32 %v13546_v27, %v13538_v0 }
0x34b0   :  { %v13283_v40 = vpop.permute.xlu1 %13282  ;;  %v8144_v43 = vpop.xlane.xlu0 %8143  ;;  %v7953_v54 = vmul.f32 %v13548_v49, %v13540_v63 }
0x34b1   :  { %v13285_v57 = vunpack.i.h.bf16 %v13283_v40  ;;  %v13284_v45 = vunpack.i.l.bf16 %v13283_v40  ;;  %13551 = vrcp.f32 %v8144_v43 }
0x34b2   :  { %12104 = vmatprep.mubr.msk.f32.mxu0 %vm5013_vm4, %v7953_v54 }
0x34b3   :  { %v12774_v31 = vpack.c.bf16 %v13285_v57, %v13284_v45  ;;  %12105 = vmatmul.mubr.msk.f32.vlgmr.msra.gmra.mrb[86].mxu0 %vm5013_vm4, %v7954_v21 }
0x34b4   :  { %v8684_v50 = vpop.permute.xlu1 %8683  ;;  %v13288_v53 = vpop.permute.xlu0 %13287 }
0x34b5   :  { %v13290_v24 = vunpack.i.h.bf16 %v13288_v53  ;;  %v13289_v58 = vunpack.i.l.bf16 %v13288_v53  ;;  %12775 = vmatprep.subr.bf16.mxu0 %v12774_v31  ;;  %12154 = vmatprep.mubr.msk.f32.mxu1 %vm702_vm1, %v8684_v50 }
0x34b6   :  { %12777 = vmatpush3.bf16.msra.mxu0 %v12774_v31 }
0x34b7   :  { %v13550_v34 = vpop.eup %13549  ;;  %v12788_v48 = vpack.c.bf16 %v13290_v24, %v13289_v58  ;;  %12121 = vmatprep.subr.mxu0 %v13656_v4 }
0x34b8   :  { %v8147_v42 = vmul.f32 %v13550_v34, %v13542_v17  ;;  %v8686_v1 = vpop.permute.xlu1 %8685 }
0x34b9   :  { %12790 = vmatprep.subr.msk.bf16.mxu1 %vm14480_vm2, %v12788_v48 }
0x34ba   :  { %12118 = vmatprep.mubr.msk.f32.mxu0 %vm5013_vm4, %v8147_v42  ;;  %12793 = vmatpush3.bf16.xpose.msk.msra.mxu1 %vm14480_vm2, %v12788_v48 }
0x34bb   :  { %v13552_v0 = vpop.eup %13551  ;;  %12799 = vmatprep.subr.bf16.mxu1 %v15347_v10 }
0x34bc   :  { %v8148_v63 = vmul.f32 %v13552_v0, %v13544_v3 }
0x34be   :  { %12119 = vmatmul.mubr.msk.f32.vlgmr.msra.gmra.mrb[88].mxu0 %vm5013_vm4, %v8148_v63  ;;  %v13658_v63 = vld [vmem:[%s16095_s18 + $0x10] sm:$0xff] }
0x34bf   :  { %12122 = vmatpush3.msra.mxu0 %v13656_v4 }
0x34c0   :  { %12126 = vmatprep.subr.mxu0 %v13657_v51 }
0x34c1   :  { %12155 = vmatmul.mubr.msk.f32.vlgmr.msra.gmra.mrb[82].mxu1 %vm702_vm1, %v8686_v1 }
0x34c2   :  { %12801 = vmatpush3.bf16.msra.mxu1 %v15347_v10 }
0x34c3   :  { %12803 = vmatprep.subr.bf16.mxu1 %v15358_v26 }
0x34c6   :  { %12805 = vmatpush3.bf16.msra.mxu1 %v15358_v26 }
0x34c7   :  { %12819 = vmatprep.subr.bf16.mxu1 %v15313_v41 }
0x34e5   :  { %v8493_v33 = vpop.xlane.xlu0 %8492 }
0x34e6   :  { %v8497_v17 = vsub.f32 %v8483_v14, %v8493_v33 }
0x34e8   :  { %v8499_v20 = vmul.f32 1.442695, %v8497_v17 }
0x34e9   :  { %v8496_v3 = vpop.xlane.xlu1 %8495 }
0x34ea   :  { %13553 = vpow2.f32 %v8499_v20  ;;  %v8498_v8 = vsub.f32 %v8488_v7, %v8496_v3 }
0x34ec   :  { %v8501_v25 = vmul.f32 1.442695, %v8498_v8 }
0x34ed   :  { %v13293_v49 = vpop.permute.xlu1 %13292 }
0x34ee   :  { %13555 = vpow2.f32 %v8501_v25  ;;  %v13295_v40 = vunpack.i.h.bf16 %v13293_v49  ;;  %v13294_v43 = vunpack.i.l.bf16 %v13293_v49 }
0x34f0   :  { %v12784_v21 = vpack.c.bf16 %v13295_v40, %v13294_v43 }
0x34f1   :  { %v13298_v24 = vpop.permute.xlu1 %13297 }
0x34f2   :  { %v13300_v4 = vunpack.i.h.bf16 %v13298_v24  ;;  %v13299_v42 = vunpack.i.l.bf16 %v13298_v24 }
0x34f4   :  { %v13554_v16 = vpop.eup %13553  ;;  %v12794_v1 = vpack.c.bf16 %v13300_v4, %v13299_v42 }
0x34f5   :  { %v8503_v13 = vsel %vm5013_vm4, %v13554_v16, 0.0 }
0x34f6   :  { %8504 = vadd.xlane.f32.xlu0 %v8503_v13 }
0x34f8   :  { %v13556_v52 = vpop.eup %13555 }
0x34f9   :  { %v8506_v10 = vsel %vm5013_vm4, %v13556_v52, 0.0 }
0x34fa   :  { %8507 = vadd.xlane.f32.xlu0 %v8506_v10 }
0x3583   :  { %v8505_v27 = vpop.xlane.xlu0 %8504 }
0x3584   :  { %13557 = vrcp.f32 %v8505_v27 }
0x3586   :  { %v12106_v56 = vpop.f32.mrb[86].mxu0 }
0x3587   :  { %v8027_v26 = vpop.f32.mrb[87].mxu0  ;;  %v8508_v14 = vpop.xlane.xlu0 %8507 }
0x3588   :  { %13559 = vrcp.f32 %v8508_v14 }
0x358e   :  { %v13558_v50 = vpop.eup %13557 }
0x358f   :  { %v8511_v48 = vmul.f32 %v13558_v50, %v13554_v16 }
0x3591   :  { %v12120_v7 = vpop.f32.mrb[88].mxu0 }
0x3592   :  { %v8229_v54 = vpop.f32.mrb[89].mxu0  ;;  %v13560_v34 = vpop.eup %13559 }
0x3593   :  { %12123 = vmatprep.mubr.msk.f32.mxu0 %vm702_vm1, %v8229_v54 }
0x3594   :  { %12124 = vmatmul.mubr.msk.f32.vlgmr.msra.gmra.mrb[90].mxu0 %vm702_vm1, %v12120_v7  ;;  %v12156_v57 = vpop.f32.mrb[82].mxu1 }
0x3595   :  { %12127 = vmatpush3.msra.mxu0 %v13657_v51  ;;  %12128 = vmatprep.mubr.msk.f32.mxu0 %vm702_vm1, %v8027_v26  ;;  %v8765_v45 = vpop.f32.mrb[83].mxu1  ;;  %v8771_v58 = vadd.f32 %v15722_v59, %v12156_v57  ;;  %v13660_v57 = vld [vmem:[#allocation7] ss:$0 sm:$0xff] }
0x3596   :  { %12785 = vmatprep.subr.bf16.mxu0 %v12784_v21  ;;  %v8766_v31 = vadd.f32 %v15726_v28, %v8765_v45  ;;  %v8512_v28 = vmul.f32 %v13560_v34, %v13556_v52 }
0x3597   :  { %v8777_v0 = vsel %vm5013_vm4, %v8771_v58, -inf }
0x3598   :  { %v8774_v53 = vsel %vm5013_vm4, %v8766_v31, -inf }
0x3599   :  { %8775 = vmax.xlane.f32.xlu0 %v8774_v53 }
0x359c   :  { %12129 = vmatmul.mubr.msk.f32.vlgmr.msra.gmra.mrb[90].mxu0 %vm702_vm1, %v12106_v56  ;;  %v13659_v56 = vld [vmem:[%s16095_s18 + $0x18] sm:$0xff] }
0x359d   :  { %12787 = vmatpush3.bf16.msra.mxu0 %v12784_v21  ;;  %12142 = vmatprep.mubr.msk.f32.mxu0 %vm5013_vm4, %v8511_v48 }
0x359e   :  { %8778 = vmax.xlane.f32.xlu0 %v8777_v0  ;;  %12145 = vmatprep.subr.mxu0 %v13658_v63 }
0x35a0   :  { %12143 = vmatmul.mubr.msk.f32.vlgmr.msra.gmra.mrb[92].mxu0 %vm5013_vm4, %v8512_v28 }
0x35a1   :  { %12146 = vmatpush3.msra.mxu0 %v13658_v63 }
0x35a2   :  { %12795 = vmatprep.subr.bf16.mxu0 %v12794_v1 }
0x3626   :  { %v8776_v59 = vpop.xlane.xlu0 %8775 }
0x3627   :  { %v8780_v51 = vsub.f32 %v8766_v31, %v8776_v59 }
0x3629   :  { %v8782_v33 = vmul.f32 1.442695, %v8780_v51 }
0x362b   :  { %13561 = vpow2.f32 %v8782_v33  ;;  %v8779_v17 = vpop.xlane.xlu0 %8778 }
0x362c   :  { %v8781_v20 = vsub.f32 %v8771_v58, %v8779_v17 }
0x362e   :  { %v8784_v3 = vmul.f32 1.442695, %v8781_v20 }
0x3630   :  { %13563 = vpow2.f32 %v8784_v3 }
0x3635   :  { %v13562_v8 = vpop.eup %13561 }
0x3636   :  { %v8786_v25 = vsel %vm5013_vm4, %v13562_v8, 0.0 }
0x3637   :  { %8787 = vadd.xlane.f32.xlu0 %v8786_v25 }
0x363a   :  { %v13564_v16 = vpop.eup %13563 }
0x363b   :  { %v8789_v13 = vsel %vm5013_vm4, %v13564_v16, 0.0 }
0x363c   :  { %8790 = vadd.xlane.f32.xlu0 %v8789_v13  ;;  %v13661_v13 = vld [vmem:[#allocation8] ss:$0 sm:$0xff] }
0x3673   :  { %v12144_v52 = vpop.f32.mrb[92].mxu0 }
0x3674   :  { %v8591_v10 = vpop.f32.mrb[93].mxu0 }
0x3675   :  { %12147 = vmatprep.mubr.msk.f32.mxu0 %vm702_vm1, %v8591_v10 }
0x3676   :  { %12148 = vmatmul.mubr.msk.f32.vlgmr.msra.gmra.mrb[90].mxu0 %vm702_vm1, %v12144_v52 }
0x3677   :  { %12797 = vmatpush3.bf16.msra.mxu0 %v12794_v1 }
0x3678   :  { %12164 = vmatprep.subr.mxu0 %v13659_v56 }
0x36c4   :  { %v8788_v26 = vpop.xlane.xlu0 %8787 }
0x36c5   :  { %13565 = vrcp.f32 %v8788_v26  ;;  %v13662_v26 = vld [vmem:[#allocation10] ss:$0 sm:$0xff] }
0x36c9   :  { %v8791_v27 = vpop.xlane.xlu0 %8790 }
0x36ca   :  { %13567 = vrcp.f32 %v8791_v27 }
0x36cf   :  { %v13566_v49 = vpop.eup %13565 }
0x36d0   :  { %v8794_v14 = vmul.f32 %v13566_v49, %v13562_v8 }
0x36d2   :  { %12161 = vmatprep.mubr.msk.f32.mxu0 %vm5013_vm4, %v8794_v14 }
0x36d4   :  { %v13568_v40 = vpop.eup %13567 }
0x36d5   :  { %v8795_v43 = vmul.f32 %v13568_v40, %v13564_v16 }
0x36d7   :  { %12162 = vmatmul.mubr.msk.f32.vlgmr.msra.gmra.mrb[94].mxu0 %vm5013_vm4, %v8795_v43 }
0x36d8   :  { %12165 = vmatpush3.msra.mxu0 %v13659_v56 }
0x36d9   :  { %12808 = vmatprep.subr.msk.bf16.mxu0 %vm14480_vm2, %v15305_v6 }
0x37aa   :  { %v12163_v7 = vpop.f32.mrb[94].mxu0 }
0x37ab   :  { %v8874_v54 = vpop.f32.mrb[95].mxu0 }
0x37ac   :  { %12166 = vmatprep.mubr.msk.f32.mxu0 %vm702_vm1, %v8874_v54 }
0x37ad   :  { %12167 = vmatmul.mubr.msk.f32.vlgmr.msra.gmra.mrb[90].mxu0 %vm702_vm1, %v12163_v7  ;;  %v13663_v7 = vld [vmem:[#allocation11] ss:$0 sm:$0xff] }
0x37ae   :  { %12811 = vmatpush3.bf16.xpose.msk.msra.mxu0 %vm14480_vm2, %v15305_v6 }
0x37af   :  { %12814 = vmatprep.subr.msk.bf16.mxu0 %vm14480_vm2, %v15309_v47 }
0x37b6   :  { %12817 = vmatpush3.bf16.xpose.msk.msra.mxu0 %vm14480_vm2, %v15309_v47 }
0x37b7   :  { %12839 = vmatprep.subr.bf16.mxu0 %v15523_v32 }
0x3880   :  { %v12168_v21 = vpop.f32.mrb[90].mxu0 }
0x3881   :  { %v8967_v45 = vadd.f32 %v13660_v57, %v12168_v21  ;;  %v8955_v31 = vpop.f32.mrb[91].mxu0 }
0x3882   :  { %v8966_v50 = vadd.f32 %v13660_v57, %v8955_v31 }
0x3883   :  { %v8969_v53 = vadd.f32 %v8967_v45, %v15656_v62 }
0x3884   :  { %v8968_v24 = vadd.f32 %v8966_v50, %v15658_v44  ;;  %v15847_v50 = vld [vmem:[%s16096_s13] sm:$0xff] }
0x3885   :  { %v8973_v6 = vsel %vm485_vm0, %v8969_v53, 0.0 }
0x3886   :  { %8974 = vadd.xlane.f32.xlu1 %v8973_v6  ;;  %v8970_v58 = vsel %vm485_vm0, %v8968_v24, 0.0 }
0x3887   :  { %8971 = vadd.xlane.f32.xlu0 %v8970_v58 }
0x3913   :  { %v8975_v34 = vpop.xlane.xlu1 %8974 }
0x3914   :  { %v8977_v48 = vmul.f32 0.03125, %v8975_v34  ;;  %v8972_v47 = vpop.xlane.xlu0 %8971 }
0x3915   :  { %v8976_v4 = vmul.f32 0.03125, %v8972_v47 }
0x3916   :  { %v8979_v42 = vsub.f32 %v8969_v53, %v8977_v48 }
0x3917   :  { %v8978_v0 = vsub.f32 %v8968_v24, %v8976_v4  ;;  %v15851_v24 = vld [vmem:[%s16096_s13 + $0x8] sm:$0xff] }
0x3918   :  { %v8981_v1 = vmul.f32 %v8979_v42, %v8979_v42 }
0x3919   :  { %v8980_v28 = vmul.f32 %v8978_v0, %v8978_v0 }
0x391a   :  { %v8985_v59 = vsel %vm485_vm0, %v8981_v1, 0.0 }
0x391b   :  { %v8982_v63 = vsel %vm485_vm0, %v8980_v28, 0.0 }
0x391c   :  { %8983 = vadd.xlane.f32.xlu0 %v8982_v63 }
0x3920   :  { %8986 = vadd.xlane.f32.xlu0 %v8985_v59 }
0x39a9   :  { %v8984_v51 = vpop.xlane.xlu0 %8983 }
0x39aa   :  { %v8988_v33 = vmul.f32 0.03125, %v8984_v51 }
0x39ac   :  { %v8990_v17 = vadd.f32 1e-05, %v8988_v33 }
0x39ad   :  { %v8987_v20 = vpop.xlane.xlu0 %8986 }
0x39ae   :  { %13569 = vrsqrt.f32 %v8990_v17  ;;  %v8989_v3 = vmul.f32 0.03125, %v8987_v20 }
0x39b0   :  { %v8991_v8 = vadd.f32 1e-05, %v8989_v3 }
0x39b2   :  { %13571 = vrsqrt.f32 %v8991_v8 }
0x39b8   :  { %v13570_v25 = vpop.eup %13569 }
0x39b9   :  { %v8994_v16 = vmul.f32 %v13570_v25, %v8978_v0 }
0x39bb   :  { %v8996_v52 = vmul.f32 %v13661_v13, %v8994_v16 }
0x39bc   :  { %v13572_v10 = vpop.eup %13571 }
0x39bd   :  { %v8995_v56 = vmul.f32 %v13572_v10, %v8979_v42  ;;  %v15813_v27 = vadd.f32 %v13662_v26, %v8996_v52 }
0x39bf   :  { %v8997_v49 = vmul.f32 %v13661_v13, %v8995_v56  ;;  %v9000_v14 = vadd.f32 %v15661_v22, %v15813_v27 }
0x39c1   :  { %12177 = vmatprep.mubr.msk.f32.mxu1 %vm485_vm0, %v9000_v14  ;;  %v15818_v40 = vadd.f32 %v13662_v26, %v8997_v49 }
0x39c3   :  { %v9001_v43 = vadd.f32 %v15666_v36, %v15818_v40 }
0x39c5   :  { %12178 = vmatmul.mubr.msk.f32.vlgmr.msra.gmra.mrb[84].mxu1 %vm485_vm0, %v9001_v43 }
0x39c6   :  { %12821 = vmatpush3.bf16.msra.mxu1 %v15313_v41  ;;  %v15843_v41 = vld [vmem:[%s16097_s23 + $0x8] sm:$0xff] }
0x39c7   :  { %12823 = vmatprep.subr.bf16.mxu1 %v15317_v29 }
0x39ca   :  { %12825 = vmatpush3.bf16.msra.mxu1 %v15317_v29 }
0x39cb   :  { %12828 = vmatprep.subr.msk.bf16.mxu1 %vm14480_vm2, %v15459_v11 }
0x3a98   :  { %v12179_v22 = vpop.f32.mrb[84].mxu1 }
0x3a99   :  { %v9080_v54 = vadd.f32 %v13663_v7, %v12179_v22  ;;  %v9074_v21 = vpop.f32.mrb[85].mxu1 }
0x3a9a   :  { %v9075_v36 = vadd.f32 %v13663_v7, %v9074_v21 }
0x3a9b   :  { %v15829_v57 = vmul.f32 0.35355338, %v9080_v54 }
0x3a9c   :  { %v15831_v45 = vmul.f32 0.35355338, %v9075_v36 }
0x3a9d   :  { %9271 = vrot.lane.b32.xlu1 %v15829_v57, %s14111_s25 }
0x3a9e   :  { %12188 = vmatprep.mubr.msk.f32.mxu0 %vm702_vm1, %v15831_v45 }
0x3a9f   :  { %12189 = vmatmul.mubr.msk.f32.vlgmr.msra.gmra.mrb[96].mxu0 %vm702_vm1, %v15829_v57 }
0x3aa0   :  { %12841 = vmatpush3.bf16.msra.mxu0 %v15523_v32 }
0x3aa1   :  { %12843 = vmatprep.subr.bf16.mxu0 %v15525_v55 }
0x3aa4   :  { %12845 = vmatpush3.bf16.msra.mxu0 %v15525_v55 }
0x3aa5   :  { %12224 = vmatprep.subr.mxu0 %v15843_v41 }
0x3b0f   :  { %v9272_v25 = vpop.permute.xlu1 %9271 }
0x3b72   :  { %v12190_v29 = vpop.f32.mrb[96].mxu0 }
0x3b73   :  { %v9157_v31 = vpop.f32.mrb[97].mxu0  ;;  %v9163_v6 = vadd.f32 %v15851_v24, %v12190_v29 }
0x3b74   :  { %v9158_v53 = vadd.f32 %v15847_v50, %v9157_v31 }
0x3b75   :  { %v9169_v58 = vsel %vm485_vm0, %v9163_v6, -inf }
0x3b76   :  { %v9166_v32 = vsel %vm485_vm0, %v9158_v53, -inf }
0x3b77   :  { %9167 = vmax.xlane.f32.xlu0 %v9166_v32 }
0x3b7b   :  { %9170 = vmax.xlane.f32.xlu0 %v9169_v58 }
0x3c04   :  { %v9168_v55 = vpop.xlane.xlu0 %9167 }
0x3c05   :  { %v9172_v34 = vsub.f32 %v9158_v53, %v9168_v55 }
0x3c07   :  { %v9174_v48 = vmul.f32 1.442695, %v9172_v34 }
0x3c08   :  { %v9171_v47 = vpop.xlane.xlu0 %9170 }
0x3c09   :  { %13573 = vpow2.f32 %v9174_v48  ;;  %v9173_v4 = vsub.f32 %v9163_v6, %v9171_v47 }
0x3c0b   :  { %v9176_v42 = vmul.f32 1.442695, %v9173_v4 }
0x3c0d   :  { %13575 = vpow2.f32 %v9176_v42 }
0x3c13   :  { %v13574_v0 = vpop.eup %13573 }
0x3c14   :  { %v9178_v28 = vsel %vm485_vm0, %v13574_v0, 0.0 }
0x3c15   :  { %9179 = vadd.xlane.f32.xlu0 %v9178_v28 }
0x3c17   :  { %v13576_v63 = vpop.eup %13575 }
0x3c18   :  { %v9181_v1 = vsel %vm485_vm0, %v13576_v63, 0.0 }
0x3c19   :  { %9182 = vadd.xlane.f32.xlu0 %v9181_v1 }
0x3c2f   :  { %9269 = vrot.lane.b32.xlu0 %v15831_v45, %s14111_s25 }
0x3c33   :  { %9617 = vrot.lane.b32.xlu0 %v15831_v45, %s14113_s17 }
0x3c37   :  { %9619 = vrot.lane.b32.xlu0 %v15829_v57, %s14113_s17 }
0x3ca2   :  { %v9180_v59 = vpop.xlane.xlu0 %9179 }
0x3ca3   :  { %13577 = vrcp.f32 %v9180_v59 }
0x3ca6   :  { %v9183_v51 = vpop.xlane.xlu0 %9182 }
0x3ca7   :  { %13579 = vrcp.f32 %v9183_v51 }
0x3caa   :  { %v9270_v8 = vpop.permute.xlu0 %9269 }
0x3cad   :  { %v13578_v33 = vpop.eup %13577 }
0x3cae   :  { %v9186_v17 = vmul.f32 %v13578_v33, %v13574_v0  ;;  %v9618_v16 = vpop.permute.xlu0 %9617 }
0x3cb0   :  { %12199 = vmatprep.mubr.msk.f32.mxu1 %vm485_vm0, %v9186_v17 }
0x3cb1   :  { %v13580_v20 = vpop.eup %13579 }
0x3cb2   :  { %v9187_v3 = vmul.f32 %v13580_v20, %v13576_v63 }
0x3cb4   :  { %12200 = vmatmul.mubr.msk.f32.vlgmr.msra.gmra.mrb[86].mxu1 %vm485_vm0, %v9187_v3 }
0x3cb5   :  { %12831 = vmatpush3.bf16.xpose.msk.msra.mxu1 %vm14480_vm2, %v15459_v11  ;;  %12210 = vmatprep.mubr.msk.f32.mxu1 %vm702_vm1, %v9270_v8  ;;  %v9620_v11 = vpop.permute.xlu0 %9619 }
0x3cb6   :  { %12834 = vmatprep.subr.msk.bf16.mxu1 %vm14480_vm2, %v15465_v35 }
0x3cbd   :  { %12837 = vmatpush3.bf16.xpose.msk.msra.mxu1 %vm14480_vm2, %v15465_v35 }
0x3cbe   :  { %12848 = vmatprep.subr.msk.bf16.mxu1 %vm14480_vm2, %v15475_v37 }
0x3cc4   :  { %12211 = vmatmul.mubr.msk.f32.vlgmr.msra.gmra.mrb[88].mxu1 %vm702_vm1, %v9272_v25 }
0x3cc5   :  { %12851 = vmatpush3.bf16.xpose.msk.msra.mxu1 %vm14480_vm2, %v15475_v37  ;;  %12242 = vmatprep.mubr.msk.f32.mxu1 %vm702_vm1, %v9618_v16 }
0x3cc6   :  { %12854 = vmatprep.subr.msk.bf16.mxu1 %vm14480_vm2, %v15483_v9 }
0x3ccd   :  { %12857 = vmatpush3.bf16.xpose.msk.msra.mxu1 %vm14480_vm2, %v15483_v9 }
0x3cce   :  { %12868 = vmatprep.subr.msk.bf16.mxu1 %vm14480_vm2, %v15528_v60 }
0x3cd4   :  { %12243 = vmatmul.mubr.msk.f32.vlgmr.msra.gmra.mrb[90].mxu1 %vm702_vm1, %v9620_v11 }
0x3cd5   :  { %12871 = vmatpush3.bf16.xpose.msk.msra.mxu1 %vm14480_vm2, %v15528_v60 }
0x3cd6   :  { %12874 = vmatprep.subr.msk.bf16.mxu1 %vm14480_vm2, %v15531_v30 }
0x3cdd   :  { %12877 = vmatpush3.bf16.xpose.msk.msra.mxu1 %vm14480_vm2, %v15531_v30 }
0x3cde   :  { %12895 = vmatprep.subr.bf16.mxu1 %v15623_v15 }
0x3d87   :  { %v15904_v35 = vpop.f32.mrb[86].mxu1 }
0x3d88   :  { %v15906_v37 = vpop.f32.mrb[87].mxu1 }
0x3d97   :  { %v12212_v9 = vpop.f32.mrb[88].mxu1 }
0x3d98   :  { %v9349_v13 = vadd.f32 %v15851_v24, %v12212_v9  ;;  %v9343_v52 = vpop.f32.mrb[89].mxu1 }
0x3d99   :  { %v9344_v60 = vadd.f32 %v15847_v50, %v9343_v52 }
0x3d9a   :  { %v9355_v10 = vsel %vm485_vm0, %v9349_v13, -inf }
0x3d9b   :  { %9356 = vmax.xlane.f32.xlu0 %v9355_v10  ;;  %v9352_v56 = vsel %vm485_vm0, %v9344_v60, -inf }
0x3d9c   :  { %9353 = vmax.xlane.f32.xlu1 %v9352_v56 }
0x3da7   :  { %v12244_v39 = vpop.f32.mrb[90].mxu1 }
0x3da8   :  { %v9691_v30 = vpop.f32.mrb[91].mxu1  ;;  %v9697_v53 = vadd.f32 %v15851_v24, %v12244_v39 }
0x3da9   :  { %v9692_v31 = vadd.f32 %v15847_v50, %v9691_v30 }
0x3daa   :  { %v9703_v32 = vsel %vm485_vm0, %v9697_v53, -inf }
0x3dab   :  { %v9700_v6 = vsel %vm485_vm0, %v9692_v31, -inf }
0x3e28   :  { %v9357_v26 = vpop.xlane.xlu0 %9356 }
0x3e29   :  { %v9359_v49 = vsub.f32 %v9349_v13, %v9357_v26  ;;  %v9354_v14 = vpop.xlane.xlu1 %9353 }
0x3e2a   :  { %v9358_v43 = vsub.f32 %v9344_v60, %v9354_v14  ;;  %v13668_v60 = vld [vmem:[%s16097_s23 + $0x10] sm:$0xff] }
0x3e2b   :  { %v9362_v22 = vmul.f32 1.442695, %v9359_v49 }
0x3e2c   :  { %v9360_v7 = vmul.f32 1.442695, %v9358_v43 }
0x3e2d   :  { %13581 = vpow2.f32 %v9362_v22  ;;  %v13669_v22 = vld [vmem:[%s16097_s23 + $0x18] sm:$0xff] }
0x3e2e   :  { %13583 = vpow2.f32 %v9360_v7 }
0x3e37   :  { %v13582_v54 = vpop.eup %13581 }
0x3e38   :  { %v13584_v21 = vpop.eup %13583  ;;  %v9367_v36 = vsel %vm485_vm0, %v13582_v54, 0.0 }
0x3e39   :  { %9368 = vadd.xlane.f32.xlu1 %v9367_v36  ;;  %v9364_v29 = vsel %vm485_vm0, %v13584_v21, 0.0 }
0x3e3a   :  { %9365 = vadd.xlane.f32.xlu0 %v9364_v29 }
0x3e4a   :  { %9888 = vrot.lane.b32.xlu1 %v15829_v57, %s14115_s0 }
0x3e50   :  { %9886 = vrot.lane.b32.xlu0 %v15831_v45, %s14115_s0 }
0x3e6e   :  { %9701 = vmax.xlane.f32.xlu1 %v9700_v6  ;;  %v13670_v6 = vld [vmem:[#allocation16] ss:$0 sm:$0xff] }
0x3e6f   :  { %9704 = vmax.xlane.f32.xlu0 %v9703_v32 }
0x3ec6   :  { %v9369_v58 = vpop.xlane.xlu1 %9368 }
0x3ec7   :  { %13585 = vrcp.f32 %v9369_v58  ;;  %v9366_v55 = vpop.xlane.xlu0 %9365 }
0x3ec8   :  { %13587 = vrcp.f32 %v9366_v55 }
0x3eca   :  { %v9889_v48 = vpop.permute.xlu1 %9888 }
0x3ecb   :  { %v9887_v34 = vpop.permute.xlu0 %9886 }
0x3ecc   :  { %12269 = vmatprep.mubr.msk.f32.mxu1 %vm702_vm1, %v9887_v34 }
0x3ecd   :  { %12270 = vmatmul.mubr.msk.f32.vlgmr.msra.gmra.mrb[92].mxu1 %vm702_vm1, %v9889_v48 }
0x3ece   :  { %12897 = vmatpush3.bf16.msra.mxu1 %v15623_v15  ;;  %v13667_v15 = vld [vmem:[%s16097_s23] sm:$0xff] }
0x3ecf   :  { %12899 = vmatprep.subr.bf16.mxu1 %v15626_v19 }
0x3ed1   :  { %v13586_v57 = vpop.eup %13585 }
0x3ed2   :  { %v13588_v45 = vpop.eup %13587  ;;  %12901 = vmatpush3.bf16.msra.mxu1 %v15626_v19  ;;  %v9373_v4 = vmul.f32 %v13586_v57, %v13582_v54 }
0x3ed3   :  { %v9372_v47 = vmul.f32 %v13588_v45, %v13584_v21  ;;  %12903 = vmatprep.subr.bf16.mxu1 %v15633_v61 }
0x3ed5   :  { %12221 = vmatprep.mubr.msk.f32.mxu0 %vm485_vm0, %v9372_v47 }
0x3ed6   :  { %12222 = vmatmul.mubr.msk.f32.vlgmr.msra.gmra.mrb[98].mxu0 %vm485_vm0, %v9373_v4  ;;  %12905 = vmatpush3.bf16.msra.mxu1 %v15633_v61 }
0x3ed7   :  { %12225 = vmatpush3.msra.mxu0 %v15843_v41  ;;  %12907 = vmatprep.subr.bf16.mxu1 %v15646_v2 }
0x3ed8   :  { %12229 = vmatprep.subr.mxu0 %v13667_v15 }
0x3eda   :  { %12909 = vmatpush3.bf16.msra.mxu1 %v15646_v2 }
0x3efb   :  { %v9702_v42 = vpop.xlane.xlu1 %9701 }
0x3efc   :  { %v9706_v19 = vsub.f32 %v9692_v31, %v9702_v42  ;;  %v9705_v0 = vpop.xlane.xlu0 %9704 }
0x3efd   :  { %v9707_v28 = vsub.f32 %v9697_v53, %v9705_v0 }
0x3efe   :  { %v9708_v63 = vmul.f32 1.442695, %v9706_v19 }
0x3eff   :  { %v9710_v1 = vmul.f32 1.442695, %v9707_v28 }
0x3f00   :  { %13589 = vpow2.f32 %v9708_v63 }
0x3f01   :  { %13591 = vpow2.f32 %v9710_v1 }
0x3f0a   :  { %v13590_v59 = vpop.eup %13589 }
0x3f0b   :  { %v13592_v51 = vpop.eup %13591  ;;  %v9712_v61 = vsel %vm485_vm0, %v13590_v59, 0.0 }
0x3f0c   :  { %9713 = vadd.xlane.f32.xlu0 %v9712_v61  ;;  %v9715_v41 = vsel %vm485_vm0, %v13592_v51, 0.0 }
0x3f0d   :  { %9716 = vadd.xlane.f32.xlu1 %v9715_v41 }
0x3f99   :  { %v9714_v3 = vpop.xlane.xlu0 %9713 }
0x3f9a   :  { %13593 = vrcp.f32 %v9714_v3  ;;  %v9717_v11 = vpop.xlane.xlu1 %9716 }
0x3f9b   :  { %13595 = vrcp.f32 %v9717_v11 }
0x3fa0   :  { %v12271_v33 = vpop.f32.mrb[92].mxu1 }
0x3fa1   :  { %v9966_v17 = vadd.f32 %v15851_v24, %v12271_v33  ;;  %v9960_v2 = vpop.f32.mrb[93].mxu1 }
0x3fa2   :  { %v9961_v20 = vadd.f32 %v15847_v50, %v9960_v2 }
0x3fa3   :  { %v9972_v8 = vsel %vm485_vm0, %v9966_v17, -inf }
0x3fa4   :  { %9973 = vmax.xlane.f32.xlu1 %v9972_v8  ;;  %v9969_v25 = vsel %vm485_vm0, %v9961_v20, -inf  ;;  %v13594_v50 = vpop.eup %13593 }
0x3fa5   :  { %9970 = vmax.xlane.f32.xlu0 %v9969_v25  ;;  %v9720_v24 = vmul.f32 %v13594_v50, %v13590_v59  ;;  %v13596_v13 = vpop.eup %13595  ;;  %v13672_v25 = vld [vmem:[#allocation19] ss:$0 sm:$0xff]  ;;  %v13673_v50 = vld [vmem:[#allocation20] ss:$0 sm:$0xff] }
0x3fa6   :  { %v9721_v52 = vmul.f32 %v13596_v13, %v13592_v51 }
0x3fa9   :  { %v12223_v16 = vpop.f32.mrb[98].mxu0 }
0x3faa   :  { %v9446_v9 = vpop.f32.mrb[99].mxu0 }
0x3fab   :  { %12226 = vmatprep.mubr.msk.f32.mxu0 %vm702_vm1, %v9446_v9 }
0x3fac   :  { %12227 = vmatmul.mubr.msk.f32.vlgmr.msra.gmra.mrb[100].mxu0 %vm702_vm1, %v12223_v16 }
0x3fad   :  { %12230 = vmatpush3.msra.mxu0 %v13667_v15  ;;  %12231 = vmatprep.mubr.msk.f32.mxu0 %vm702_vm1, %v15906_v37 }
0x3fae   :  { %12859 = vmatprep.subr.bf16.mxu0 %v15560_v46 }
0x3fb4   :  { %12232 = vmatmul.mubr.msk.f32.vlgmr.msra.gmra.mrb[100].mxu0 %vm702_vm1, %v15904_v35 }
0x3fb5   :  { %12861 = vmatpush3.bf16.msra.mxu0 %v15560_v46  ;;  %12253 = vmatprep.mubr.msk.f32.mxu0 %vm485_vm0, %v9720_v24 }
0x3fb6   :  { %12863 = vmatprep.subr.bf16.mxu0 %v15566_v18 }
0x3fb9   :  { %12865 = vmatpush3.bf16.msra.mxu0 %v15566_v18 }
0x3fba   :  { %12256 = vmatprep.subr.mxu0 %v13668_v60 }
0x3fbc   :  { %12254 = vmatmul.mubr.msk.f32.vlgmr.msra.gmra.mrb[102].mxu0 %vm485_vm0, %v9721_v52 }
0x3fbd   :  { %12257 = vmatpush3.msra.mxu0 %v13668_v60 }
0x3fbe   :  { %12879 = vmatprep.subr.bf16.mxu0 %v15588_v5 }
0x4031   :  { %v9974_v37 = vpop.xlane.xlu1 %9973 }
0x4032   :  { %v9976_v10 = vsub.f32 %v9966_v17, %v9974_v37  ;;  %v9971_v35 = vpop.xlane.xlu0 %9970 }
0x4033   :  { %v9975_v56 = vsub.f32 %v9961_v20, %v9971_v35  ;;  %v13671_v20 = vld [vmem:[#allocation17] ss:$0 sm:$0xff]  ;;  %v13674_v35 = vld [vmem:[#allocation22] ss:$0 sm:$0xff] }
0x4034   :  { %v9979_v46 = vmul.f32 1.442695, %v9976_v10 }
0x4035   :  { %v9977_v39 = vmul.f32 1.442695, %v9975_v56 }
0x4036   :  { %13597 = vpow2.f32 %v9979_v46 }
0x4037   :  { %13599 = vpow2.f32 %v9977_v39 }
0x4040   :  { %v13598_v30 = vpop.eup %13597 }
0x4041   :  { %v13600_v26 = vpop.eup %13599  ;;  %v9984_v18 = vsel %vm485_vm0, %v13598_v30, 0.0 }
0x4042   :  { %9985 = vadd.xlane.f32.xlu1 %v9984_v18  ;;  %v9981_v49 = vsel %vm485_vm0, %v13600_v26, 0.0 }
0x4043   :  { %9982 = vadd.xlane.f32.xlu0 %v9981_v49 }
0x408f   :  { %v12255_v14 = vpop.f32.mrb[102].mxu0 }
0x4090   :  { %v9794_v43 = vpop.f32.mrb[103].mxu0 }
0x4091   :  { %12258 = vmatprep.mubr.msk.f32.mxu0 %vm702_vm1, %v9794_v43 }
0x4092   :  { %12259 = vmatmul.mubr.msk.f32.vlgmr.msra.gmra.mrb[100].mxu0 %vm702_vm1, %v12255_v14 }
0x4093   :  { %12881 = vmatpush3.bf16.msra.mxu0 %v15588_v5 }
0x4094   :  { %12883 = vmatprep.subr.bf16.mxu0 %v15590_v38 }
0x4097   :  { %12885 = vmatpush3.bf16.msra.mxu0 %v15590_v38 }
0x4098   :  { %12283 = vmatprep.subr.mxu0 %v13669_v22 }
0x40cf   :  { %v9986_v7 = vpop.xlane.xlu1 %9985 }
0x40d0   :  { %13601 = vrcp.f32 %v9986_v7  ;;  %v9983_v54 = vpop.xlane.xlu0 %9982 }
0x40d1   :  { %13603 = vrcp.f32 %v9983_v54 }
0x40da   :  { %v13602_v21 = vpop.eup %13601 }
0x40db   :  { %v13604_v36 = vpop.eup %13603  ;;  %v9990_v31 = vmul.f32 %v13602_v21, %v13598_v30 }
0x40dc   :  { %v9989_v29 = vmul.f32 %v13604_v36, %v13600_v26 }
0x40de   :  { %12280 = vmatprep.mubr.msk.f32.mxu0 %vm485_vm0, %v9989_v29 }
0x40df   :  { %12281 = vmatmul.mubr.msk.f32.vlgmr.msra.gmra.mrb[104].mxu0 %vm485_vm0, %v9990_v31 }
0x40e0   :  { %12284 = vmatpush3.msra.mxu0 %v13669_v22 }
0x40e1   :  { %12887 = vmatprep.subr.bf16.mxu0 %v15609_v12 }
0x41b2   :  { %v12282_v5 = vpop.f32.mrb[104].mxu0 }
0x41b3   :  { %v10063_v53 = vpop.f32.mrb[105].mxu0 }
0x41b4   :  { %12285 = vmatprep.mubr.msk.f32.mxu0 %vm702_vm1, %v10063_v53  ;;  %v7635_v53 = vsel %vm485_vm0, %v15656_v62, 0.0 }
0x41b5   :  { %12286 = vmatmul.mubr.msk.f32.vlgmr.msra.gmra.mrb[100].mxu0 %vm702_vm1, %v12282_v5 }
0x41b6   :  { %12889 = vmatpush3.bf16.msra.mxu0 %v15609_v12 }
0x41b7   :  { %12891 = vmatprep.subr.bf16.mxu0 %v15614_v23 }
0x41ba   :  { %12893 = vmatpush3.bf16.msra.mxu0 %v15614_v23 }
0x4288   :  { %v12287_v38 = vpop.f32.mrb[100].mxu0 }
0x4289   :  { %v10156_v32 = vadd.f32 %v13670_v6, %v12287_v38  ;;  %v10144_v58 = vpop.f32.mrb[101].mxu0  ;;  %v7632_v38 = vsel %vm485_vm0, %v15658_v44, 0.0 }
0x428a   :  { %v10155_v55 = vadd.f32 %v13670_v6, %v10144_v58 }
0x428b   :  { %v10158_v34 = vadd.f32 %v10156_v32, %v15818_v40 }
0x428c   :  { %v10157_v48 = vadd.f32 %v10155_v55, %v15813_v27 }
0x428d   :  { %v10162_v57 = vsel %vm485_vm0, %v10158_v34, 0.0 }
0x428e   :  { %10163 = vadd.xlane.f32.xlu1 %v10162_v57  ;;  %v10159_v45 = vsel %vm485_vm0, %v10157_v48, 0.0 }
0x428f   :  { %10160 = vadd.xlane.f32.xlu0 %v10159_v45 }
0x431b   :  { %v10164_v12 = vpop.xlane.xlu1 %10163 }
0x431c   :  { %v10166_v47 = vmul.f32 0.03125, %v10164_v12  ;;  %v10161_v4 = vpop.xlane.xlu0 %10160 }
0x431d   :  { %v10165_v15 = vmul.f32 0.03125, %v10161_v4 }
0x431e   :  { %v10168_v23 = vsub.f32 %v10158_v34, %v10166_v47 }
0x431f   :  { %v10167_v42 = vsub.f32 %v10157_v48, %v10165_v15 }
0x4320   :  { %v10170_v19 = vmul.f32 %v10168_v23, %v10168_v23 }
0x4321   :  { %v10169_v0 = vmul.f32 %v10167_v42, %v10167_v42 }
0x4322   :  { %v10174_v28 = vsel %vm485_vm0, %v10170_v19, 0.0 }
0x4323   :  { %10175 = vadd.xlane.f32.xlu1 %v10174_v28  ;;  %v10171_v40 = vsel %vm485_vm0, %v10169_v0, 0.0  ;;  %v13675_v0 = vld [vmem:[#allocation23] ss:$0 sm:$0xff] }
0x4324   :  { %10172 = vadd.xlane.f32.xlu0 %v10171_v40 }
0x43b0   :  { %v10176_v27 = vpop.xlane.xlu1 %10175 }
0x43b1   :  { %v10178_v63 = vmul.f32 0.03125, %v10176_v27  ;;  %v10173_v1 = vpop.xlane.xlu0 %10172 }
0x43b2   :  { %v10177_v59 = vmul.f32 0.03125, %v10173_v1 }
0x43b3   :  { %v10180_v51 = vadd.f32 1e-05, %v10178_v63  ;;  %v13676_v63 = vld [vmem:[#allocation25] ss:$0 sm:$0xff] }
0x43b4   :  { %v10179_v61 = vadd.f32 1e-05, %v10177_v59 }
0x43b5   :  { %13605 = vrsqrt.f32 %v10180_v51 }
0x43b6   :  { %13607 = vrsqrt.f32 %v10179_v61 }
0x43bf   :  { %v13606_v41 = vpop.eup %13605 }
0x43c0   :  { %v13608_v33 = vpop.eup %13607  ;;  %v10184_v17 = vmul.f32 %v13606_v41, %v10168_v23 }
0x43c1   :  { %v10183_v2 = vmul.f32 %v13608_v33, %v10167_v42 }
0x43c2   :  { %v10186_v3 = vmul.f32 %v13671_v20, %v10184_v17 }
0x43c3   :  { %v10185_v8 = vmul.f32 %v13671_v20, %v10183_v2 }
0x43c4   :  { %v10188_v11 = vadd.f32 %v13672_v25, %v10186_v3 }
0x43c5   :  { %v10187_v16 = vadd.f32 %v13672_v25, %v10185_v8 }
0x43c7   :  { %12296 = vmatprep.mubr.msk.f32.mxu0 %vm485_vm0, %v10187_v16 }
0x43c8   :  { %12297 = vmatmul.mubr.msk.f32.vlgmr.msra.gmra.mrb[106].mxu0 %vm485_vm0, %v10188_v11 }
0x449b   :  { %v12298_v9 = vpop.f32.mrb[106].mxu0 }
0x449c   :  { %v10267_v24 = vadd.f32 %v13673_v50, %v12298_v9  ;;  %v10261_v13 = vpop.f32.mrb[107].mxu0 }
0x449d   :  { %v10262_v52 = vadd.f32 %v13673_v50, %v10261_v13 }
0x449e   :  { %v10271_v37 = vmax.f32 %v10267_v24, 0.0 }
0x449f   :  { %v10270_v60 = vmax.f32 %v10262_v52, 0.0 }
0x44a1   :  { %12315 = vmatprep.mubr.msk.f32.mxu1 %vm2359_vm3, %v10270_v60 }
0x44a2   :  { %12316 = vmatmul.mubr.msk.f32.vlgmr.msra.gmra.mrb[94].mxu1 %vm2359_vm3, %v10271_v37 }
0x4575   :  { %v12317_v10 = vpop.f32.mrb[94].mxu1 }
0x4576   :  { %v10350_v56 = vadd.f32 %v13674_v35, %v12317_v10  ;;  %v10344_v46 = vpop.f32.mrb[95].mxu1 }
0x4577   :  { %v10345_v39 = vadd.f32 %v13674_v35, %v10344_v46 }
0x4578   :  { %v10354_v30 = vadd.f32 %v10350_v56, %v10188_v11  ;;  %v10764_v56 = vld [vmem:[%s14348_s8] ss:$0 sm:$0xff] }
0x4579   :  { %v10353_v26 = vadd.f32 %v10345_v39, %v10187_v16 }
0x457a   :  { %v10358_v18 = vsel %vm485_vm0, %v10354_v30, 0.0 }
0x457b   :  { %10359 = vadd.xlane.f32.xlu1 %v10358_v18  ;;  %v10355_v49 = vsel %vm485_vm0, %v10353_v26, 0.0 }
0x457c   :  { %10356 = vadd.xlane.f32.xlu0 %v10355_v49 }
0x4608   :  { %v10360_v14 = vpop.xlane.xlu1 %10359 }
0x4609   :  { %v10362_v43 = vmul.f32 0.03125, %v10360_v14  ;;  %v10357_v22 = vpop.xlane.xlu0 %10356 }
0x460a   :  { %v10361_v7 = vmul.f32 0.03125, %v10357_v22 }
0x460b   :  { %v10364_v54 = vsub.f32 %v10354_v30, %v10362_v43  ;;  %v10765_v30 = vld [vmem:[%s14353_s5] ss:$0 sm:$0xff]  ;;  %s14117_s5 = smov [#allocation26]  }
0x460c   :  { %v10363_v21 = vsub.f32 %v10353_v26, %v10361_v7  ;;  %s10422_s8 = sshll.u32 %s14117_s5, 4  ;;  %s10423_s8 = int_to_ptr.vmem [resolvable:$true] %s10422_s8 }
0x460d   :  { %v10366_v36 = vmul.f32 %v10364_v54, %v10364_v54  ;;  %s14007_s22 = scalar_lea.vmem %s10423_s8, 512  ;;  %p14012_p9 = scmp.lt.s32.totalorder %s10423_s8, %s10423_s8 }
0x460e   :  { %v10365_v29 = vmul.f32 %v10363_v21, %v10363_v21  ;;  %p14008_p8 = scmp.ne.s32.totalorder %s10423_s8, %s14007_s22  ;;  %p14013_p10 = scmp.lt.s32.totalorder %s14007_s22, %s14007_s22 }
0x460f   :  { %v10370_v31 = vsel %vm485_vm0, %v10366_v36, 0.0 }
0x4610   :  { %10371 = vadd.xlane.f32.xlu1 %v10370_v31  ;;  %v10367_v5 = vsel %vm485_vm0, %v10365_v29, 0.0  ;;  %p14014_p11 = por %p14013_p10, %p14012_p9 }
0x4611   :  { %10368 = vadd.xlane.f32.xlu0 %v10367_v5 }
0x4612   :  { %p14015_p12 = pnand %p14014_p11, %p14008_p8 }
0x4614   :  { %7636 = vadd.xlane.f32.xlu1 %v7635_v53 }
0x4615   :  { %7633 = vadd.xlane.f32.xlu0 %v7632_v38 }
0x469d   :  { %v10372_v6 = vpop.xlane.xlu1 %10371 }
0x469e   :  { %v10374_v32 = vmul.f32 0.03125, %v10372_v6  ;;  %v10369_v58 = vpop.xlane.xlu0 %10368 }
0x469f   :  { %v10373_v55 = vmul.f32 0.03125, %v10369_v58 }
0x46a0   :  { %v10376_v34 = vadd.f32 1e-05, %v10374_v32 }
0x46a1   :  { %v10375_v48 = vadd.f32 1e-05, %v10373_v55  ;;  %v7637_v57 = vpop.xlane.xlu1 %7636 }
0x46a2   :  { %13609 = vrsqrt.f32 %v10376_v34  ;;  %v7634_v45 = vpop.xlane.xlu0 %7633  ;;  %v7639_v12 = vmul.f32 0.03125, %v7637_v57 }
0x46a3   :  { %13611 = vrsqrt.f32 %v10375_v48  ;;  %v7638_v4 = vmul.f32 0.03125, %v7634_v45 }
0x46a4   :  { %v7641_v19 = vsub.f32 %v15656_v62, %v7639_v12 }
0x46a5   :  { %v7640_v40 = vsub.f32 %v15658_v44, %v7638_v4 }
0x46a6   :  { %v7643_v61 = vmul.f32 %v7641_v19, %v7641_v19 }
0x46a7   :  { %v7642_v33 = vmul.f32 %v7640_v40, %v7640_v40 }
0x46a8   :  { %v7647_v17 = vsel %vm485_vm0, %v7643_v61, 0.0 }
0x46a9   :  { %v7644_v62 = vsel %vm485_vm0, %v7642_v33, 0.0 }
0x46ac   :  { %v13610_v47 = vpop.eup %13609 }
0x46ad   :  { %v13612_v15 = vpop.eup %13611  ;;  %v10380_v23 = vmul.f32 %v13610_v47, %v10364_v54 }
0x46ae   :  { %v10379_v42 = vmul.f32 %v13612_v15, %v10363_v21 }
0x46af   :  { %v10382_v28 = vmul.f32 %v13675_v0, %v10380_v23 }
0x46b0   :  { %v10381_v27 = vmul.f32 %v13675_v0, %v10379_v42 }
0x46b1   :  { %v10384_v1 = vadd.f32 %v13676_v63, %v10382_v28 }
0x46b2   :  { %v10383_v59 = vadd.f32 %v13676_v63, %v10381_v27 }
0x46b3   :  { %v10388_v51 = vsel %vm485_vm0, %v10384_v1, 0.0 }
0x46b4   :  { %10389 = vadd.xlane.f32.xlu1 %v10388_v51  ;;  %v10385_v41 = vsel %vm485_vm0, %v10383_v59, 0.0 }
0x46b5   :  { %10386 = vadd.xlane.f32.xlu0 %v10385_v41 }
0x46b8   :  { %7648 = vadd.xlane.f32.xlu1 %v7647_v17 }
0x46b9   :  { %7645 = vadd.xlane.f32.xlu0 %v7644_v62 }
0x4741   :  { %v10390_v2 = vpop.xlane.xlu1 %10389 }
0x4742   :  { %v10392_v44 = vmul.f32 0.03125, %v10390_v2  ;;  %v10387_v20 = vpop.xlane.xlu0 %10386 }
0x4743   :  { %v10391_v3 = vmul.f32 0.03125, %v10387_v20 }
0x4744   :  { %v10394_v8 = vsub.f32 %v10384_v1, %v10392_v44 }
0x4745   :  { %v10393_v25 = vsub.f32 %v10383_v59, %v10391_v3  ;;  %v7649_v16 = vpop.xlane.xlu1 %7648 }
0x4746   :  { %v7651_v11 = vmul.f32 0.03125, %v7649_v16  ;;  %v7646_v9 = vpop.xlane.xlu0 %7645  ;;  %v10396_v50 = vmul.f32 %v10394_v8, %v10394_v8 }
0x4747   :  { %v7650_v24 = vmul.f32 0.03125, %v7646_v9  ;;  %v10395_v13 = vmul.f32 %v10393_v25, %v10393_v25 }
0x4748   :  { %v7653_v52 = vadd.f32 1e-05, %v7651_v11  ;;  %v10400_v60 = vsel %vm485_vm0, %v10396_v50, 0.0 }
0x4749   :  { %v7652_v37 = vadd.f32 1e-05, %v7650_v24  ;;  %10401 = vadd.xlane.f32.xlu1 %v10400_v60  ;;  %v10397_v10 = vsel %vm485_vm0, %v10395_v13, 0.0 }
0x474a   :  { %13613 = vrsqrt.f32 %v7653_v52  ;;  %10398 = vadd.xlane.f32.xlu0 %v10397_v10 }
0x474b   :  { %13615 = vrsqrt.f32 %v7652_v37 }
0x4754   :  { %v13614_v35 = vpop.eup %13613 }
0x4755   :  { %v13616_v46 = vpop.eup %13615  ;;  %v7657_v39 = vmul.f32 %v13614_v35, %v7641_v19 }
0x4756   :  { %v7656_v26 = vmul.f32 %v13616_v46, %v7640_v40 }
0x4757   :  { %v7665_v18 = vmul.f32 %v10764_v56, %v7657_v39 }
0x4758   :  { %v7664_v49 = vmul.f32 %v10764_v56, %v7656_v26 }
0x4759   :  { %v7673_v14 = vadd.f32 %v10765_v30, %v7665_v18 }
0x475a   :  { %v7672_v43 = vadd.f32 %v10765_v30, %v7664_v49 }
0x475b   :  { %7675 = vst.msk [vmem:[#allocation26 + $0x8] sm:$0xff] %vm485_vm0, %v7673_v14 }
0x475c   :  { %7674 = vst.msk [vmem:[#allocation26] sm:$0xff] %vm485_vm0, %v7672_v43 }
0x47d6   :  { %v10402_v22 = vpop.xlane.xlu1 %10401 }
0x47d7   :  { %v10404_v7 = vmul.f32 0.03125, %v10402_v22  ;;  %v10399_v54 = vpop.xlane.xlu0 %10398 }
0x47d8   :  { %v10403_v21 = vmul.f32 0.03125, %v10399_v54 }
0x47d9   :  { %v10406_v36 = vadd.f32 1e-05, %v10404_v7 }
0x47da   :  { %v10405_v29 = vadd.f32 1e-05, %v10403_v21 }
0x47db   :  { %13617 = vrsqrt.f32 %v10406_v36 }
0x47dc   :  { %13619 = vrsqrt.f32 %v10405_v29 }
0x47e5   :  { %v13618_v31 = vpop.eup %13617 }
0x47e6   :  { %v13620_v5 = vpop.eup %13619  ;;  %v10410_v53 = vmul.f32 %v13618_v31, %v10394_v8 }
0x47e7   :  { %v10409_v38 = vmul.f32 %v13620_v5, %v10393_v25 }
0x47e8   :  { %v10412_v6 = vmul.f32 %v10764_v56, %v10410_v53 }
0x47e9   :  { %v10411_v32 = vmul.f32 %v10764_v56, %v10409_v38 }
0x47ea   :  { %v10414_v58 = vadd.f32 %v10765_v30, %v10412_v6 }
0x47eb   :  { %v10413_v55 = vadd.f32 %v10765_v30, %v10411_v32 }
0x47ec   :  { %10416 = vst.msk [vmem:[#allocation26 + $0x18] sm:$0xff] %vm485_vm0, %v10414_v58 }
0x47ed   :  { %10415 = vst.msk [vmem:[#allocation26 + $0x10] sm:$0xff] %vm485_vm0, %v10413_v55 }
0x47ee   :  { %14018 = shalt.err (!%p14015_p12)
}
0x47ef   :  { %s14019_s6 = scalar_lea.hbm %s14358_s29, 512 }
0x47f0   :  { %p14020_p13 = scmp.ne.s32.totalorder %s14358_s29, %s14019_s6  ;;  %p14023_p0 = scmp.lt.u32.totalorder %s14019_s6, %s14358_s29 }
0x47f2   :  { %p14025_p1 = pnand %p14023_p0, %p14020_p13 }
0x47f4   :  { %14028 = shalt.err (!%p14025_p1)
}
0x47f5   :  { %s14118_s25 = smov 128   ;;  %s14119_s28 = smov 8  }
0x47f6   :  { %10428 = dma.vmem_to_hbm [thread:$0]  %s10423_s8, 512, %s14358_s29, [#allocation4], %s14118_s25, %s14118_s25, %s14119_s28  }
0x47f7   :  { %14045 = dma.done.wait [#allocation4], 512  }
0x47f8   :  { %14046 = vsyncadd [#allocation4], 4294966784 }
0x47f9   :  { %10436 = vsyncpa [#allocation3], 1 }
0x47fa   :  { %10437 = vsyncpa [#allocation6], 1 }
0x47fb   :  { %10438 = vsyncpa [#allocation9], 1 }
0x47fc   :  { %10439 = vsyncpa [#allocation12], 1 }
0x47fd   :  { %10440 = vsyncpa [#allocation15], 1 }
0x47fe   :  { %10441 = vsyncpa [#allocation18], 1 }
0x47ff   :  { %10442 = vsyncpa [#allocation21], 1 }
0x4800   :  { %10443 = vsyncpa [#allocation24], 1 }
0x4801   :  { %10444 = vsyncpa [#allocation4], 1 }

</bundles_post_ra>
